<compile_context>
chip_gen: v7x
topology: tpu7x:2x2x1
jax: 0.10.0
libtpu: 0.0.40
codegen_flags: <defaults>
</compile_context>

<pallas_src>
import numpy as np
import jax
import jax.numpy as jnp
from jax import lax
from jax.experimental import pallas as pl
from jax.experimental.pallas import tpu as pltpu

# --- hyperparameters (hp.* in the reference; chosen deterministically here) ---
INPUT_SIZE = 3
HIDDEN_LAYERS = 4          # hp.NUM_LAYERS
SIGMA_W = 1.0              # hp.SIGMA_W
SIGMA_B = 0.0              # hp.SIGMA_B
RIDGE = 1e-3               # hp.RIDGE (moderate so the demo solve is well conditioned)

_EPS = np.float32(1e-12)
_CLIP = np.float32(1e-7)
_PI = np.float32(np.pi)
_COEF = np.float32(SIGMA_W ** 2 / (2.0 * np.pi))
_SB2 = np.float32(SIGMA_B ** 2)
_SCALE0 = np.float32(SIGMA_W ** 2 / INPUT_SIZE)
OUT_PAD = 128              # lane-dense output width (sliced back to 3 in the wrapper)


# ----------------------------- shared NTK helper -----------------------------
def _ntk_from_cos(c):
    """relu_ntk arc-cosine formula with the clamp folded in.

    Uses theta = arctan2(s, cc) with a shared s = sqrt(1 - cc^2): arccos would
    recompute that sqrt internally, so sharing it removes one full-tile sqrt
    per layer on the VALU-bound loop.  Identical range/result to arccos on
    the clamped interval.
    """
    cc = jnp.clip(c, -1.0 + _CLIP, 1.0 - _CLIP)
    s = jnp.sqrt(1.0 - cc * cc)
    theta = jnp.arctan2(s, cc)
    return _COEF * (cc * (_PI - theta) + s) + _SB2


# ----------------------------- Pallas kernel --------------------------------
def ntk_forward_kernel(xs_ref, xtT_ref, alpha_ref, invr_ref, invc_ref,
                       out_ref, acc_ref):
    k = pl.program_id(1)

    @pl.when(k == 0)
    def _():
        acc_ref[...] = jnp.zeros_like(acc_ref)

    xs = xs_ref[...]         # (tile_m, 3) row tile of test points
    xtT = xtT_ref[...]       # (3, tile_n) column tile of X_train^T

    # K0 block via three broadcast FMAs on the VPU (exact f32).  A depth-3
    # contraction would use <3% of the MXU and force an RHS relayout per step.
    K = xs[:, 0:1] * xtT[0:1, :]
    K = K + xs[:, 1:2] * xtT[1:2, :]
    K = K + xs[:, 2:3] * xtT[2:3, :]
    K = _SCALE0 * K + _SB2

    # Per-layer normalizers precomputed in the wrapper; the kernel does only
    # two broadcast multiplies + the arc-cos formula per layer.
    invr = invr_ref[...]     # (tile_m, HIDDEN_LAYERS) sublane-oriented
    invc = invc_ref[...]     # (HIDDEN_LAYERS, tile_n) lane-oriented
    for l in range(HIDDEN_LAYERS):
        K = _ntk_from_cos((invr[:, l:l + 1] * K) * invc[l:l + 1, :])

    # Accumulate the output contraction in f32 (see header: bf16 truncation of
    # K would be amplified by the large ridge-solution alpha).
    acc_ref[...] += jnp.dot(K, alpha_ref[...], preferred_element_type=jnp.float32)

    @pl.when(k == pl.num_programs(1) - 1)
    def _():
        out_ref[...] = acc_ref[...]


def ntk_pinn_forward(x, y, t, X_train, alpha, *, tile_m=None, tile_n=None):
    """Pallas-backed equivalent of NTK_PINN_NS2D.forward."""
    X_test = jnp.concatenate([x, y, t], axis=1).astype(jnp.float32)
    X_train = jnp.asarray(X_train, jnp.float32)
    alpha = jnp.asarray(alpha, jnp.float32)
    M = X_test.shape[0]
    N = X_train.shape[0]
    if M != N:
        raise ValueError("reference relu_ntk(K_star) requires N_test == N_train")

    # Analytic diagonal of the square K_star and its per-layer inverse-sqrt
    # normalizers, computed once in the wrapper (O(L*N)) instead of per tile.
    # Reference semantics require x_test_i . x_train_i > 0 (e.g. coords in
    # [0, 1]) for 1/sqrt(diag) to stay finite -- same constraint as the torch
    # module, not a new one.
    d = _SCALE0 * jnp.sum(X_test * X_train, axis=1) + _SB2          # (N,)
    inv_layers = []
    for _ in range(HIDDEN_LAYERS):
        inv = lax.rsqrt(d + _EPS)
        inv_layers.append(inv)
        d = _ntk_from_cos(d * inv * inv)                            # diag evolution
    inv_all = jnp.stack(inv_layers, axis=0)                         # (L, N)
    inv_rows = inv_all.T                                            # (M, L) sublane layout
    inv_cols = inv_all                                              # (L, N) lane layout

    Xt_T = X_train.T                                                # (3, N)
    alpha_pad = jnp.pad(alpha, ((0, 0), (0, OUT_PAD - alpha.shape[1])))  # (N, 128)

    if tile_m is None:
        # Prefer >= 2 row tiles so the "parallel" axis can shard across the two
        # v7x TensorCores; on 1-TC chips the extra grid step costs ~0.35 us.
        tile_m = next((tm for tm in (512, 256, 128, 64, 32, 16, 8)
                       if M % tm == 0 and M // tm >= 2), M)
    if tile_n is None:
        tile_n = N if N <= 1024 else next(
            (tn for tn in (1024, 512, 256, 128) if N % tn == 0), N)
    if M % tile_m or N % tile_n:
        raise ValueError("tile sizes must divide the problem sizes")

    grid = (M // tile_m, N // tile_n)

    uvp_pad = pl.pallas_call(
        ntk_forward_kernel,
        out_shape=jax.ShapeDtypeStruct((M, OUT_PAD), jnp.float32),
        grid_spec=pltpu.PrefetchScalarGridSpec(
            num_scalar_prefetch=0,
            grid=grid,
            in_specs=[
                pl.BlockSpec((tile_m, 3), lambda i, k: (i, 0)),              # X_test row tile
                pl.BlockSpec((3, tile_n), lambda i, k: (0, k)),              # X_train^T col tile
                pl.BlockSpec((tile_n, OUT_PAD), lambda i, k: (k, 0)),        # alpha (padded)
                pl.BlockSpec((tile_m, HIDDEN_LAYERS), lambda i, k: (i, 0)),  # inv_r, all layers
                pl.BlockSpec((HIDDEN_LAYERS, tile_n), lambda i, k: (0, k)),  # inv_c, all layers
            ],
            out_specs=pl.BlockSpec((tile_m, OUT_PAD), lambda i, k: (i, 0)),
            scratch_shapes=[pltpu.VMEM((tile_m, OUT_PAD), jnp.float32)],
        ),
        compiler_params=pltpu.CompilerParams(
            dimension_semantics=("parallel", "arbitrary"),
        ),
    )(X_test, Xt_T, alpha_pad, inv_rows, inv_cols)

    uvp = uvp_pad[:, :3]
    return uvp[:, 0:1], uvp[:, 1:2], uvp[:, 2:3]


# ----------------------- plain-JAX glue (fit + reference) -------------------
def _relu_ntk_ref(K, sigma_w=SIGMA_W, sigma_b=SIGMA_B):
    eps = 1e-12
    vars_ = jnp.diag(K)
    inv_sqrt = 1.0 / jnp.sqrt(vars_ + eps)
    C = K * inv_sqrt[:, None] * inv_sqrt[None, :]   # == diag(inv_sqrt) @ K @ diag(inv_sqrt)
    Cc = jnp.clip(C, -1.0 + 1e-7, 1.0 - 1e-7)
    theta = jnp.arccos(Cc)
    return sigma_w ** 2 / (2 * np.pi) * (
        Cc * (np.pi - theta) + jnp.sqrt(1.0 - Cc ** 2)
    ) + sigma_b ** 2


def ntk_kernel_ref(X1, X2):
    K = SIGMA_W ** 2 / INPUT_SIZE * jnp.dot(
        X1, X2.T, precision=lax.Precision.HIGHEST
    ) + SIGMA_B ** 2
    for _ in range(HIDDEN_LAYERS):
        K = _relu_ntk_ref(K)
    return K


def fit(X, y, ridge=RIDGE):
    # Kernel ridge regression solve (the module's fit()).
    # TODO(synk): the torch retry-with-10x-ridge / pinverse fallback is host-side
    # try/except control flow; kept as a single jnp.linalg.solve here.
    K = ntk_kernel_ref(X, X)
    K_reg = K + ridge * jnp.eye(K.shape[0], dtype=K.dtype)
    return jnp.linalg.solve(K_reg, y)


# ---------------------------------- main -------------------------------------
if __name__ == "__main__":
    key = jax.random.PRNGKey(0)
    k_xtr, k_ytr, k_x, k_y, k_t = jax.random.split(key, 5)

    N_train = 256
    N_test = 256  # must equal N_train (see layout note / reference semantics)

    # Coordinates drawn from [0, 1] (NS2D PINN domain): guarantees the
    # "diagonal" x_test_i . x_train_i of K_star stays positive, so relu_ntk's
    # 1/sqrt(diag) is finite (the reference NaNs for arbitrary signed inputs).
    X_train = jax.random.uniform(k_xtr, (N_train, 3), jnp.float32)
    y_train = 0.1 * jax.random.normal(k_ytr, (N_train, 3), jnp.float32)
    alpha = fit(X_train, y_train)

    x = jax.random.uniform(k_x, (N_test, 1), jnp.float32)
    y = jax.random.uniform(k_y, (N_test, 1), jnp.float32)
    t = jax.random.uniform(k_t, (N_test, 1), jnp.float32)

    # tile_m=128 -> 2 parallel row tiles (v7x megacore friendly);
    # tile_n=128 -> 2 accumulation steps, exercising the pl.when accumulator.
    u, v, p = ntk_pinn_forward(x, y, t, X_train, alpha, tile_m=128, tile_n=128)
    u, v, p = jax.block_until_ready((u, v, p))

    # Cross-check against a plain-JAX reference of the same forward math.
    X_test = jnp.concatenate([x, y, t], axis=1)
    uvp_ref = jnp.dot(ntk_kernel_ref(X_test, X_train), alpha,
                      precision=lax.Precision.HIGHEST)
    ref = (uvp_ref[:, 0:1], uvp_ref[:, 1:2], uvp_ref[:, 2:3])
    scale = max(1.0, float(jnp.max(jnp.abs(uvp_ref))))
    for got, want in zip((u, v, p), ref):
        assert got.shape == want.shape == (N_test, 1)
        assert bool(jnp.all(jnp.isfinite(got)))
        np.testing.assert_allclose(
            np.asarray(got), np.asarray(want), rtol=5e-2, atol=5e-2 * scale
        )

    print("KERNEL_OK")
</pallas_src>

<mosaic_0001>
module attributes {stable_mosaic.version = 11 : i64} {
  func.func @ntk_forward_kernel(%arg0: i32, %arg1: i32, %arg2: memref<128x3xf32, #tpu.memory_space<vmem>>, %arg3: memref<3x128xf32, #tpu.memory_space<vmem>>, %arg4: memref<128x128xf32, #tpu.memory_space<vmem>>, %arg5: memref<128x4xf32, #tpu.memory_space<vmem>>, %arg6: memref<4x128xf32, #tpu.memory_space<vmem>>, %arg7: memref<128x128xf32, #tpu.memory_space<vmem>>, %arg8: memref<128x128xf32, #tpu.memory_space<vmem>>) attributes {dimension_semantics = [#tpu.dimension_semantics<parallel>, #tpu.dimension_semantics<arbitrary>], iteration_bounds = array<i64: 2, 2>, scalar_prefetch = 0 : i64, scratch_operands = 1 : i64, tpu.core_type = #tpu.core_type<tc>, window_params = [{transform_indices = @transform_0, window_bounds = array<i64: 128, 3>}, {transform_indices = @transform_1, window_bounds = array<i64: 3, 128>}, {transform_indices = @transform_2, window_bounds = array<i64: 128, 128>}, {transform_indices = @transform_3, window_bounds = array<i64: 128, 4>}, {transform_indices = @transform_4, window_bounds = array<i64: 4, 128>}, {transform_indices = @transform_5, window_bounds = array<i64: 128, 128>}]} {
    %c0_i32 = arith.constant 0 : i32
    %0 = arith.cmpi eq, %arg1, %c0_i32 : i32
    %1 = arith.extui %0 : i1 to i32
    %c0_i32_0 = arith.constant 0 : i32
    %2 = arith.cmpi ne, %1, %c0_i32_0 : i32
    scf.if %2 {
      %cst_41 = arith.constant 0.000000e+00 : f32
      %128 = vector.broadcast %cst_41 : f32 to vector<128x128xf32>
      %c0_42 = arith.constant 0 : index
      %c0_43 = arith.constant 0 : index
      %129 = vector.load %arg8[%c0_42, %c0_43] : memref<128x128xf32, #tpu.memory_space<vmem>>, vector<128x128xf32>
      tpu.vector_store %arg8[%c0_42, %c0_43], %128 {strides = array<i32>} : memref<128x128xf32, #tpu.memory_space<vmem>>, vector<128x128xf32>,
    } else {
    }
    %c0 = arith.constant 0 : index
    %c0_1 = arith.constant 0 : index
    %3 = vector.load %arg2[%c0, %c0_1] : memref<128x3xf32, #tpu.memory_space<vmem>>, vector<128x3xf32>
    %c0_2 = arith.constant 0 : index
    %c0_3 = arith.constant 0 : index
    %4 = vector.load %arg3[%c0_2, %c0_3] : memref<3x128xf32, #tpu.memory_space<vmem>>, vector<3x128xf32>
    %5 = vector.extract_strided_slice %3 {offsets = [0, 0], sizes = [128, 1], strides = [1, 1]} : vector<128x3xf32> to vector<128x1xf32>
    %6 = vector.extract_strided_slice %4 {offsets = [0, 0], sizes = [1, 128], strides = [1, 1]} : vector<3x128xf32> to vector<1x128xf32>
    %7 = vector.broadcast %5 : vector<128x1xf32> to vector<128x128xf32>
    %8 = vector.broadcast %6 : vector<1x128xf32> to vector<128x128xf32>
    %9 = arith.mulf %7, %8 : vector<128x128xf32>
    %10 = vector.extract_strided_slice %3 {offsets = [0, 1], sizes = [128, 1], strides = [1, 1]} : vector<128x3xf32> to vector<128x1xf32>
    %11 = vector.extract_strided_slice %4 {offsets = [1, 0], sizes = [1, 128], strides = [1, 1]} : vector<3x128xf32> to vector<1x128xf32>
    %12 = vector.broadcast %10 : vector<128x1xf32> to vector<128x128xf32>
    %13 = vector.broadcast %11 : vector<1x128xf32> to vector<128x128xf32>
    %14 = arith.mulf %12, %13 : vector<128x128xf32>
    %15 = arith.addf %9, %14 : vector<128x128xf32>
    %16 = vector.extract_strided_slice %3 {offsets = [0, 2], sizes = [128, 1], strides = [1, 1]} : vector<128x3xf32> to vector<128x1xf32>
    %17 = vector.extract_strided_slice %4 {offsets = [2, 0], sizes = [1, 128], strides = [1, 1]} : vector<3x128xf32> to vector<1x128xf32>
    %18 = vector.broadcast %16 : vector<128x1xf32> to vector<128x128xf32>
    %19 = vector.broadcast %17 : vector<1x128xf32> to vector<128x128xf32>
    %20 = arith.mulf %18, %19 : vector<128x128xf32>
    %21 = arith.addf %15, %20 : vector<128x128xf32>
    %cst = arith.constant 0.333333343 : f32
    %22 = vector.broadcast %cst : f32 to vector<128x128xf32>
    %23 = arith.mulf %22, %21 : vector<128x128xf32>
    %cst_4 = arith.constant 0.000000e+00 : f32
    %24 = vector.broadcast %cst_4 : f32 to vector<128x128xf32>
    %25 = arith.addf %23, %24 : vector<128x128xf32>
    %c0_5 = arith.constant 0 : index
    %c0_6 = arith.constant 0 : index
    %26 = vector.load %arg5[%c0_5, %c0_6] : memref<128x4xf32, #tpu.memory_space<vmem>>, vector<128x4xf32>
    %c0_7 = arith.constant 0 : index
    %c0_8 = arith.constant 0 : index
    %27 = vector.load %arg6[%c0_7, %c0_8] : memref<4x128xf32, #tpu.memory_space<vmem>>, vector<4x128xf32>
    %28 = vector.extract_strided_slice %26 {offsets = [0, 0], sizes = [128, 1], strides = [1, 1]} : vector<128x4xf32> to vector<128x1xf32>
    %29 = vector.broadcast %28 : vector<128x1xf32> to vector<128x128xf32>
    %30 = arith.mulf %29, %25 : vector<128x128xf32>
    %31 = vector.extract_strided_slice %27 {offsets = [0, 0], sizes = [1, 128], strides = [1, 1]} : vector<4x128xf32> to vector<1x128xf32>
    %32 = vector.broadcast %31 : vector<1x128xf32> to vector<128x128xf32>
    %33 = arith.mulf %30, %32 : vector<128x128xf32>
    %cst_9 = arith.constant -0.99999988 : f32
    %cst_10 = arith.constant 0.99999988 : f32
    %34 = vector.broadcast %cst_9 : f32 to vector<128x128xf32>
    %35 = arith.maximumf %34, %33 : vector<128x128xf32>
    %36 = vector.broadcast %cst_10 : f32 to vector<128x128xf32>
    %37 = arith.minimumf %36, %35 : vector<128x128xf32>
    %38 = arith.mulf %37, %37 : vector<128x128xf32>
    %cst_11 = arith.constant 1.000000e+00 : f32
    %39 = vector.broadcast %cst_11 : f32 to vector<128x128xf32>
    %40 = arith.subf %39, %38 : vector<128x128xf32>
    %41 = math.sqrt %40 : vector<128x128xf32>
    %42 = math.atan2 %41, %37 : vector<128x128xf32>
    %cst_12 = arith.constant 3.14159274 : f32
    %43 = vector.broadcast %cst_12 : f32 to vector<128x128xf32>
    %44 = arith.subf %43, %42 : vector<128x128xf32>
    %45 = arith.mulf %37, %44 : vector<128x128xf32>
    %46 = arith.addf %45, %41 : vector<128x128xf32>
    %cst_13 = arith.constant 0.159154937 : f32
    %47 = vector.broadcast %cst_13 : f32 to vector<128x128xf32>
    %48 = arith.mulf %47, %46 : vector<128x128xf32>
    %cst_14 = arith.constant 0.000000e+00 : f32
    %49 = vector.broadcast %cst_14 : f32 to vector<128x128xf32>
    %50 = arith.addf %48, %49 : vector<128x128xf32>
    %51 = vector.extract_strided_slice %26 {offsets = [0, 1], sizes = [128, 1], strides = [1, 1]} : vector<128x4xf32> to vector<128x1xf32>
    %52 = vector.broadcast %51 : vector<128x1xf32> to vector<128x128xf32>
    %53 = arith.mulf %52, %50 : vector<128x128xf32>
    %54 = vector.extract_strided_slice %27 {offsets = [1, 0], sizes = [1, 128], strides = [1, 1]} : vector<4x128xf32> to vector<1x128xf32>
    %55 = vector.broadcast %54 : vector<1x128xf32> to vector<128x128xf32>
    %56 = arith.mulf %53, %55 : vector<128x128xf32>
    %cst_15 = arith.constant -0.99999988 : f32
    %cst_16 = arith.constant 0.99999988 : f32
    %57 = vector.broadcast %cst_15 : f32 to vector<128x128xf32>
    %58 = arith.maximumf %57, %56 : vector<128x128xf32>
    %59 = vector.broadcast %cst_16 : f32 to vector<128x128xf32>
    %60 = arith.minimumf %59, %58 : vector<128x128xf32>
    %61 = arith.mulf %60, %60 : vector<128x128xf32>
    %cst_17 = arith.constant 1.000000e+00 : f32
    %62 = vector.broadcast %cst_17 : f32 to vector<128x128xf32>
    %63 = arith.subf %62, %61 : vector<128x128xf32>
    %64 = math.sqrt %63 : vector<128x128xf32>
    %65 = math.atan2 %64, %60 : vector<128x128xf32>
    %cst_18 = arith.constant 3.14159274 : f32
    %66 = vector.broadcast %cst_18 : f32 to vector<128x128xf32>
    %67 = arith.subf %66, %65 : vector<128x128xf32>
    %68 = arith.mulf %60, %67 : vector<128x128xf32>
    %69 = arith.addf %68, %64 : vector<128x128xf32>
    %cst_19 = arith.constant 0.159154937 : f32
    %70 = vector.broadcast %cst_19 : f32 to vector<128x128xf32>
    %71 = arith.mulf %70, %69 : vector<128x128xf32>
    %cst_20 = arith.constant 0.000000e+00 : f32
    %72 = vector.broadcast %cst_20 : f32 to vector<128x128xf32>
    %73 = arith.addf %71, %72 : vector<128x128xf32>
    %74 = vector.extract_strided_slice %26 {offsets = [0, 2], sizes = [128, 1], strides = [1, 1]} : vector<128x4xf32> to vector<128x1xf32>
    %75 = vector.broadcast %74 : vector<128x1xf32> to vector<128x128xf32>
    %76 = arith.mulf %75, %73 : vector<128x128xf32>
    %77 = vector.extract_strided_slice %27 {offsets = [2, 0], sizes = [1, 128], strides = [1, 1]} : vector<4x128xf32> to vector<1x128xf32>
    %78 = vector.broadcast %77 : vector<1x128xf32> to vector<128x128xf32>
    %79 = arith.mulf %76, %78 : vector<128x128xf32>
    %cst_21 = arith.constant -0.99999988 : f32
    %cst_22 = arith.constant 0.99999988 : f32
    %80 = vector.broadcast %cst_21 : f32 to vector<128x128xf32>
    %81 = arith.maximumf %80, %79 : vector<128x128xf32>
    %82 = vector.broadcast %cst_22 : f32 to vector<128x128xf32>
    %83 = arith.minimumf %82, %81 : vector<128x128xf32>
    %84 = arith.mulf %83, %83 : vector<128x128xf32>
    %cst_23 = arith.constant 1.000000e+00 : f32
    %85 = vector.broadcast %cst_23 : f32 to vector<128x128xf32>
    %86 = arith.subf %85, %84 : vector<128x128xf32>
    %87 = math.sqrt %86 : vector<128x128xf32>
    %88 = math.atan2 %87, %83 : vector<128x128xf32>
    %cst_24 = arith.constant 3.14159274 : f32
    %89 = vector.broadcast %cst_24 : f32 to vector<128x128xf32>
    %90 = arith.subf %89, %88 : vector<128x128xf32>
    %91 = arith.mulf %83, %90 : vector<128x128xf32>
    %92 = arith.addf %91, %87 : vector<128x128xf32>
    %cst_25 = arith.constant 0.159154937 : f32
    %93 = vector.broadcast %cst_25 : f32 to vector<128x128xf32>
    %94 = arith.mulf %93, %92 : vector<128x128xf32>
    %cst_26 = arith.constant 0.000000e+00 : f32
    %95 = vector.broadcast %cst_26 : f32 to vector<128x128xf32>
    %96 = arith.addf %94, %95 : vector<128x128xf32>
    %97 = vector.extract_strided_slice %26 {offsets = [0, 3], sizes = [128, 1], strides = [1, 1]} : vector<128x4xf32> to vector<128x1xf32>
    %98 = vector.broadcast %97 : vector<128x1xf32> to vector<128x128xf32>
    %99 = arith.mulf %98, %96 : vector<128x128xf32>
    %100 = vector.extract_strided_slice %27 {offsets = [3, 0], sizes = [1, 128], strides = [1, 1]} : vector<4x128xf32> to vector<1x128xf32>
    %101 = vector.broadcast %100 : vector<1x128xf32> to vector<128x128xf32>
    %102 = arith.mulf %99, %101 : vector<128x128xf32>
    %cst_27 = arith.constant -0.99999988 : f32
    %cst_28 = arith.constant 0.99999988 : f32
    %103 = vector.broadcast %cst_27 : f32 to vector<128x128xf32>
    %104 = arith.maximumf %103, %102 : vector<128x128xf32>
    %105 = vector.broadcast %cst_28 : f32 to vector<128x128xf32>
    %106 = arith.minimumf %105, %104 : vector<128x128xf32>
    %107 = arith.mulf %106, %106 : vector<128x128xf32>
    %cst_29 = arith.constant 1.000000e+00 : f32
    %108 = vector.broadcast %cst_29 : f32 to vector<128x128xf32>
    %109 = arith.subf %108, %107 : vector<128x128xf32>
    %110 = math.sqrt %109 : vector<128x128xf32>
    %111 = math.atan2 %110, %106 : vector<128x128xf32>
    %cst_30 = arith.constant 3.14159274 : f32
    %112 = vector.broadcast %cst_30 : f32 to vector<128x128xf32>
    %113 = arith.subf %112, %111 : vector<128x128xf32>
    %114 = arith.mulf %106, %113 : vector<128x128xf32>
    %115 = arith.addf %114, %110 : vector<128x128xf32>
    %cst_31 = arith.constant 0.159154937 : f32
    %116 = vector.broadcast %cst_31 : f32 to vector<128x128xf32>
    %117 = arith.mulf %116, %115 : vector<128x128xf32>
    %cst_32 = arith.constant 0.000000e+00 : f32
    %118 = vector.broadcast %cst_32 : f32 to vector<128x128xf32>
    %119 = arith.addf %117, %118 : vector<128x128xf32>
    %c0_33 = arith.constant 0 : index
    %c0_34 = arith.constant 0 : index
    %120 = vector.load %arg8[%c0_33, %c0_34] : memref<128x128xf32, #tpu.memory_space<vmem>>, vector<128x128xf32>
    %c0_35 = arith.constant 0 : index
    %c0_36 = arith.constant 0 : index
    %121 = vector.load %arg4[%c0_35, %c0_36] : memref<128x128xf32, #tpu.memory_space<vmem>>, vector<128x128xf32>
    %cst_37 = arith.constant dense<0.000000e+00> : vector<128x128xf32>
    %122 = tpu.matmul %119, %121, %cst_37 {dimension_numbers = #tpu.dot_dimension_numbers<[1], [0], [0], [1], [0, 0, 1, 1], [], []>} : vector<128x128xf32>, vector<128x128xf32>, vector<128x128xf32> -> vector<128x128xf32>
    %123 = arith.addf %120, %122 : vector<128x128xf32>
    %c0_38 = arith.constant 0 : index
    %c0_39 = arith.constant 0 : index
    %124 = vector.load %arg8[%c0_38, %c0_39] : memref<128x128xf32, #tpu.memory_space<vmem>>, vector<128x128xf32>
    tpu.vector_store %arg8[%c0_38, %c0_39], %123 {strides = array<i32>} : memref<128x128xf32, #tpu.memory_space<vmem>>, vector<128x128xf32>,
    %c1_i32 = arith.constant 1 : i32
    %125 = arith.cmpi eq, %arg1, %c1_i32 : i32
    %126 = arith.extui %125 : i1 to i32
    %c0_i32_40 = arith.constant 0 : i32
    %127 = arith.cmpi ne, %126, %c0_i32_40 : i32
    scf.if %127 {
      %c0_41 = arith.constant 0 : index
      %c0_42 = arith.constant 0 : index
      %128 = vector.load %arg8[%c0_41, %c0_42] : memref<128x128xf32, #tpu.memory_space<vmem>>, vector<128x128xf32>
      %c0_43 = arith.constant 0 : index
      %c0_44 = arith.constant 0 : index
      %129 = vector.load %arg7[%c0_43, %c0_44] : memref<128x128xf32, #tpu.memory_space<vmem>>, vector<128x128xf32>
      tpu.vector_store %arg7[%c0_43, %c0_44], %128 {strides = array<i32>} : memref<128x128xf32, #tpu.memory_space<vmem>>, vector<128x128xf32>,
    } else {
    }
    return
  }
  func.func @transform_0(%arg0: i32, %arg1: i32) -> (i32, i32) {
    %c0_i32 = arith.constant 0 : i32
    %c0_i32_0 = arith.constant 0 : i32
    return %arg0, %c0_i32 : i32, i32
  }
  func.func @transform_1(%arg0: i32, %arg1: i32) -> (i32, i32) {
    %c0_i32 = arith.constant 0 : i32
    %c0_i32_0 = arith.constant 0 : i32
    return %c0_i32, %arg1 : i32, i32
  }
  func.func @transform_2(%arg0: i32, %arg1: i32) -> (i32, i32) {
    %c0_i32 = arith.constant 0 : i32
    %c0_i32_0 = arith.constant 0 : i32
    return %arg1, %c0_i32 : i32, i32
  }
  func.func @transform_3(%arg0: i32, %arg1: i32) -> (i32, i32) {
    %c0_i32 = arith.constant 0 : i32
    %c0_i32_0 = arith.constant 0 : i32
    return %arg0, %c0_i32 : i32, i32
  }
  func.func @transform_4(%arg0: i32, %arg1: i32) -> (i32, i32) {
    %c0_i32 = arith.constant 0 : i32
    %c0_i32_0 = arith.constant 0 : i32
    return %c0_i32, %arg1 : i32, i32
  }
  func.func @transform_5(%arg0: i32, %arg1: i32) -> (i32, i32) {
    %c0_i32 = arith.constant 0 : i32
    %c0_i32_0 = arith.constant 0 : i32
    return %arg0, %c0_i32 : i32, i32
  }
}

</mosaic_0001>

<bundles_post_ra>
// kernel: tpu_custom_call.1
= control target key start
LH: loop header
LB: loop body
LE: loop exit
PB: predicated region body
PF: predicated region fallthrough
CT: control target
= control target key end

     0   :  { %s12339_s0 = inlined_call_operand.vmem [shape: f32[256,3], index: 0, kind: input, shape index: {}]   ;;  %s12340_s1 = inlined_call_operand.vmem [shape: f32[3,256], index: 1, kind: input, shape index: {}]   ;;  %s12341_s2 = inlined_call_operand.vmem [shape: f32[256,128], index: 2, kind: input, shape index: {}]   ;;  %s12342_s3 = inlined_call_operand.vmem [shape: f32[256,4], index: 3, kind: input, shape index: {}]   ;;  %s12343_s4 = inlined_call_operand.vmem [shape: f32[4,256], index: 4, kind: input, shape index: {}]   ;;  %s12344_s5 = inlined_call_operand.hbm [shape: f32[256,128], index: 5, kind: output, shape index: {}]  }
   0x1   :  { %12681 = sst [smem:[#allocation44_spill]] %s12339_s0 }
   0x2   :  { %10 = vsyncpa [#allocation4], 0 }
   0x3   :  { %12 = vsyncpa [#allocation4 + $0x1], 0  ;;  %s6273_s18 = smov 0   ;;  %s6275_s19 = smov 0  }
   0x4   :  { %s6277_s20 = smov 0   ;;  %s6279_s21 = smov 0  }
   0x5   :  { %s6281_s22 = smov 0   ;;  %s6283_s23 = smov 0  }
   0x6   :  { %s6285_s24 = smov 0   ;;  %s6287_s25 = smov 0  }
   0x7 LB: > { %12682 = sst [smem:[#allocation6_spill]] %s6223_s23  ;;  %s5530_s26 = sadd.s32 4294967295, %s6231_s25   ;;  %s6231_s25 = sphi %s6287_s25, %s18_s25   ;;  %s6227_s24 = sphi %s6285_s24, %s13198_s24   ;;  %s6223_s23 = sphi %s6283_s23, %s13203_s23   ;;  %s6219_s22 = sphi %s6281_s22, %s13196_s22   ;;  %s6215_s21 = sphi %s6279_s21, %s13202_s21   ;;  %s6211_s20 = sphi %s6277_s20, %s13201_s20   ;;  %s6207_s19 = sphi %s6275_s19, %s13200_s19   ;;  %s6203_s18 = sphi %s6273_s18, %s13199_s18  }
   0x8   : > { %12683 = sst [smem:[#allocation7_spill]] %s6227_s24  ;;  %s5531_s27 = sadd.s32 4294967294, %s6231_s25  }
   0x9   : > { %s27_s28 = sadd.s32 1, %s6223_s23  ;;  %s30_s29 = sadd.s32 1, %s6227_s24 }
   0xa   : > { %p28_p0 = scmp.ge.s32.totalorder %s27_s28, 2  ;;  %p177_p1 = scmp.ne.s32.totalorder %s6211_s20, %s6207_s19 }
   0xb   : > { %p178_p2 = scmp.eq.s32.totalorder %s5530_s26, 3  ;;  %p183_p4 = scmp.ne.s32.totalorder %s6207_s19, %s6203_s18 }
   0xc   : > { %s13205_s28 = smov (%p28_p0, %s27_s28), 0  ;;  %s13207_s29 = smov (!%p28_p0, %s30_s29), %s6227_s24 }
   0xd   : > { %12684 = sst [smem:[#allocation8_spill]] %s13205_s28  ;;  %p6322_p3 = por %p178_p2, %p177_p1 }
   0xe   : > { %p32_p5 = scmp.ge.s32.totalorder %s13207_s29, 2  ;;  %p184_p6 = scmp.eq.s32.totalorder %s5531_s27, 3 }
   0xf   : > { %p5534_p7 = scmp.ge.s32.totalorder %s6231_s25, 1  ;;  %p243_p8 = scmp.lt.s32.totalorder %s6231_s25, 5 }
  0x10   : > { %s13209_s29 = smov (%p32_p5, %s13207_s29), 0  ;;  %p6332_p9 = por %p184_p6, %p183_p4 }
  0x11   : > { %12686 = sst [smem:[#allocation9_spill]] %s13209_s29  ;;  %p244_p10 = pnand %p5534_p7, %p243_p8 }
  0x12   : > { %s164_s7 = ssub.s32 %s6227_s24, %s13209_s29  ;;  %s167_s8 = sadd.s32 1, %s6211_s20 }
  0x13   : > { %p165_p11 = scmp.eq.s32.totalorder %s164_s7, 0  ;;  %247 = sbr.rel (%p244_p10) target bundleno = 1563 (0x61b), region = 40 }
  0x15   : > { %s6340_s9 = scalar_select %p165_p11, %s6211_s20, %s167_s8  }
  0x17   : > { %12688 = sst [smem:[#allocation10_spill]] %s6340_s9 }
  0x1a   : > { %s12346_s10 = sand.u32 1, %s6207_s19   ;;  %s5536_s11 = sshll.u32 %s6219_s22, 4 }
  0x1b   : > { %s5535_s12 = sshll.u32 %s12346_s10, 7  ;;  %p290_p12 = scmp.lt.s32.totalorder %s5536_s11, 31 }
  0x1c   : > { %p295_p13 = scmp.lt.s32.totalorder %s6215_s21, 1  ;;  %s5539_s15 = sshll.u32 %s6215_s21, 4 }
  0x1d   : > { %s13211_s11 = smov (!%p290_p12, %s5536_s11), 31  ;;  %s12689_s0 = sld [smem:[#allocation44_spill]] }
  0x1e   : > { %s296_s13 = scalar_select %p295_p13, %s6215_s21, 1 }
  0x1f   : > { %s5537_s14 = sshll.u32 %s13211_s11, 3  ;;  %p300_p0 = scmp.lt.s32.totalorder %s5539_s15, 31 }
  0x20   : > { %s5538_s27 = sshll.u32 %s296_s13, 2  ;;  %s6362_s24 = scalar_lea.vmem %s12342_s3, %s5537_s14 }
  0x21   : > { %s6357_s29 = scalar_lea.vmem %s12340_s1, %s5538_s27  ;;  %s6367_s9 = scalar_lea.vmem %s12343_s4, %s5538_s27 }
  0x22   : > { %s13213_s15 = smov (!%p300_p0, %s5539_s15), 31  ;;  %s6374_s7 = scalar_lea.vmem [#allocation3], %s5535_s12 }
  0x23   : > { %s6352_s26 = scalar_lea.vmem %s12689_s0, %s5537_s14  ;;  %s5540_s16 = sshll.u32 %s13213_s15, 3 }
  0x24   : > { %s6372_s0 = scalar_lea.vmem %s12341_s2, %s5540_s16  ;;  %p5544_p1 = scmp.ne.s32.totalorder %s6215_s21, 0 }
  0x25   : > { %v6233_v0 = vmov (!%p5544_p1), 0.0  }
  0x26   : > { %319 = sbr.rel (%p5544_p1) target bundleno = 46 (0x2e), region = 44  ;;  %320 = vst [vmem:[#allocation2] sm:$0xff] (!%p5544_p1), %v6233_v0  ;;  %321 = vst [vmem:[#allocation2 + $0x8] sm:$0xff] (!%p5544_p1), %v6233_v0 }
  0x27   : > { %322 = vst [vmem:[#allocation2 + $0x10] sm:$0xff] (!%p5544_p1), %v6233_v0  ;;  %323 = vst [vmem:[#allocation2 + $0x18] sm:$0xff] (!%p5544_p1), %v6233_v0 }
  0x28   : > { %324 = vst [vmem:[#allocation2 + $0x20] sm:$0xff] (!%p5544_p1), %v6233_v0  ;;  %325 = vst [vmem:[#allocation2 + $0x28] sm:$0xff] (!%p5544_p1), %v6233_v0 }
  0x29   : > { %326 = vst [vmem:[#allocation2 + $0x30] sm:$0xff] (!%p5544_p1), %v6233_v0  ;;  %327 = vst [vmem:[#allocation2 + $0x38] sm:$0xff] (!%p5544_p1), %v6233_v0 }
  0x2a   : > { %328 = vst [vmem:[#allocation2 + $0x40] sm:$0xff] (!%p5544_p1), %v6233_v0  ;;  %329 = vst [vmem:[#allocation2 + $0x48] sm:$0xff] (!%p5544_p1), %v6233_v0 }
  0x2b   : > { %330 = vst [vmem:[#allocation2 + $0x50] sm:$0xff] (!%p5544_p1), %v6233_v0  ;;  %331 = vst [vmem:[#allocation2 + $0x58] sm:$0xff] (!%p5544_p1), %v6233_v0 }
  0x2c   : > { %332 = vst [vmem:[#allocation2 + $0x60] sm:$0xff] (!%p5544_p1), %v6233_v0  ;;  %333 = vst [vmem:[#allocation2 + $0x68] sm:$0xff] (!%p5544_p1), %v6233_v0 }
  0x2d   : > { %334 = vst [vmem:[#allocation2 + $0x70] sm:$0xff] %v6233_v0  ;;  %335 = vst [vmem:[#allocation2 + $0x78] sm:$0xff] %v6233_v0 }
  0x2e PF: > { %v337_v1 = vld [vmem:[%s6352_s26 + $0x8] sm:$0xff]  ;;  %v336_v2 = vld [vmem:[%s6352_s26] sm:$0xff]  ;;  %v6234_v3 = vmov 1   ;;  %v346_v4 = vld [vmem:[%s6352_s26 + $0x50] sm:$0xff]  ;;  %v6235_v8 = vmov 0   ;;  %v6236_v11 = vmov 2   ;;  %v433_v59 = vlaneseq }
  0x2f   : > { %5834 = vset.pattern.permute.xlu0 %v6234_v3  ;;  %5832 = vset.pattern.permute.xlu1 %v6234_v3  ;;  %v344_v5 = vld [vmem:[%s6352_s26 + $0x40] sm:$0xff]  ;;  %v339_v6 = vld [vmem:[%s6352_s26 + $0x18] sm:$0xff]  ;;  %v345_v7 = vld [vmem:[%s6352_s26 + $0x48] sm:$0xff]  ;;  %p5609_p2 = scmp.ne.s32.totalorder %s6215_s21, 1 }
  0x30   : > { %458 = vperm.xlu0 %5834, %v337_v1   ;;  %454 = vperm.xlu1 %5832, %v336_v2   ;;  %v341_v9 = vld [vmem:[%s6352_s26 + $0x28] sm:$0xff]  ;;  %v343_v10 = vld [vmem:[%s6352_s26 + $0x38] sm:$0xff]  ;;  %v338_v12 = vld [vmem:[%s6352_s26 + $0x10] sm:$0xff]  ;;  %v6536_v62 = vshrl.u32 %v433_v59, 7 }
  0x31   : > { %v347_v13 = vld [vmem:[%s6352_s26 + $0x58] sm:$0xff]  ;;  %v348_v14 = vld [vmem:[%s6352_s26 + $0x60] sm:$0xff]  ;;  %v6407_v17 = vld [vmem:[%s6362_s24 + $0x48] sm:$0xff] }
  0x32   : > { %v6401_v15 = vld [vmem:[%s6362_s24] sm:$0xff]  ;;  %v6412_v18 = vld [vmem:[%s6352_s26 + $0x70] sm:$0xff]  ;;  %v349_v21 = vld [vmem:[%s6352_s26 + $0x68] sm:$0xff]  ;;  %12690 = vst [vmem:[#allocation11_spill] sm:$0xff] %v6536_v62 }
  0x33   : > { %v340_v16 = vld [vmem:[%s6352_s26 + $0x20] sm:$0xff]  ;;  %v6416_v19 = vld [vmem:[%s6362_s24 + $0x10] sm:$0xff]  ;;  %v6426_v22 = vld [vmem:[%s6362_s24 + $0x58] sm:$0xff] }
  0x34   : > { %494 = vperm.xlu0 %5834, %v346_v4   ;;  %486 = vperm.xlu1 %5832, %v344_v5   ;;  %v6419_v20 = vld [vmem:[%s6362_s24 + $0x40] sm:$0xff]  ;;  %v6435_v24 = vld [vmem:[%s6362_s24 + $0x8] sm:$0xff]  ;;  %v6438_v25 = vld [vmem:[%s6362_s24 + $0x30] sm:$0xff] }
  0x35   : > { %v6431_v23 = vld [vmem:[%s6362_s24 + $0x60] sm:$0xff]  ;;  %v6444_v26 = vld [vmem:[%s6362_s24 + $0x38] sm:$0xff]  ;;  %v342_v27 = vld [vmem:[%s6352_s26 + $0x30] sm:$0xff] }
  0x36   : > { %v6454_v28 = vld [vmem:[%s6362_s24 + $0x50] sm:$0xff]  ;;  %v6462_v29 = vld [vmem:[%s6362_s24 + $0x68] sm:$0xff]  ;;  %v351_v30 = vld [vmem:[%s6352_s26 + $0x78] sm:$0xff] }
  0x37   : > { %v6469_v31 = vld [vmem:[%s6362_s24 + $0x70] sm:$0xff]  ;;  %v6477_v34 = vld [vmem:[%s6362_s24 + $0x78] sm:$0xff]  ;;  %v689_v44 = vld [vmem:[%s6362_s24 + $0x20] sm:$0xff] }
  0x38   : > { %466 = vperm.xlu0 %5834, %v339_v6   ;;  %5833 = vset.pattern.permute.xlu1 %v6235_v8  ;;  %v688_v39 = vld [vmem:[%s6362_s24 + $0x18] sm:$0xff]  ;;  %v690_v47 = vld [vmem:[%s6362_s24 + $0x28] sm:$0xff] }
  0x39   : > { %400 = vperm.xlu1 %5833, %v345_v7  }
  0x3c   : > { %474 = vperm.xlu0 %5834, %v341_v9  }
  0x3d   : > { %5835 = vset.pattern.permute.xlu1 %v6234_v3 }
  0x3e   : > { %490 = vperm.xlu1 %5835, %v345_v7  }
  0x40   : > { %482 = vperm.xlu0 %5834, %v343_v10  }
  0x42   : > { %5836 = vset.pattern.permute.xlu1 %v6236_v11 }
  0x43   : > { %554 = vperm.xlu1 %5836, %v336_v2  }
  0x44   : > { %5851 = vset.pattern.permute.xlu0 %v6236_v11 }
  0x45   : > { %586 = vperm.xlu0 %5851, %v344_v5  }
  0x47   : > { %558 = vperm.xlu1 %5836, %v337_v1  }
  0x49   : > { %562 = vperm.xlu0 %5851, %v338_v12  }
  0x4b   : > { %590 = vperm.xlu1 %5836, %v345_v7  }
  0x4d   : > { %598 = vperm.xlu0 %5851, %v347_v13  }
  0x4f   : > { %5837 = vset.pattern.permute.xlu1 %v6235_v8 }
  0x50   : > { %405 = vperm.xlu1 %5837, %v346_v4  }
  0x51   : > { %574 = vperm.xlu0 %5851, %v341_v9  }
  0x54   : > { %5838 = vset.pattern.permute.xlu1 %v6234_v3 }
  0x55   : > { %582 = vperm.xlu0 %5851, %v343_v10   ;;  %462 = vperm.xlu1 %5838, %v338_v12  }
  0x59   : > { %5855 = vset.pattern.permute.xlu0 %v6235_v8  ;;  %5839 = vset.pattern.permute.xlu1 %v6235_v8 }
  0x5a   : > { %355 = vperm.xlu0 %5855, %v336_v2   ;;  %370 = vperm.xlu1 %5839, %v339_v6   ;;  %v435_v2 = vsub.s32 0, %v6536_v62 }
  0x5e   : > { %395 = vperm.xlu0 %5855, %v344_v5   ;;  %410 = vperm.xlu1 %5839, %v347_v13  }
  0x62   : > { %360 = vperm.xlu0 %5855, %v337_v1   ;;  %5840 = vset.pattern.permute.xlu1 %v6234_v3  ;;  %v12350_v1 = vsub.s32 1, %v6536_v62 }
  0x63   : > { %498 = vperm.xlu1 %5840, %v347_v13  }
  0x66   : > { %365 = vperm.xlu0 %5855, %v338_v12  }
  0x67   : > { %5841 = vset.pattern.permute.xlu1 %v6236_v11 }
  0x68   : > { %594 = vperm.xlu1 %5841, %v346_v4   ;;  %v352_v4 = vld [vmem:[%s6357_s29] sm:$0x7] }
  0x69   : > { %v6553_v7 = vrot.slane %v352_v4, %v435_v2 }
  0x6a   : > { %415 = vperm.xlu0 %5855, %v348_v14  }
  0x6c   : > { %566 = vperm.xlu1 %5841, %v339_v6   ;;  %v6551_v6 = vrot.slane %v352_v4, %v12350_v1 }
  0x6e   : > { %704 = vperm.xlu0 %5855, %v6401_v15  }
  0x70   : > { %5842 = vset.pattern.permute.xlu1 %v6235_v8 }
  0x71   : > { %375 = vperm.xlu1 %5842, %v340_v16  }
  0x72   : > { %380 = vperm.xlu0 %5855, %v341_v9  }
  0x75   : > { %5843 = vset.pattern.permute.xlu1 %v6234_v3 }
  0x76   : > { %749 = vperm.xlu0 %5855, %v6407_v17   ;;  %470 = vperm.xlu1 %5843, %v340_v16  }
  0x7a   : > { %425 = vperm.xlu0 %5855, %v6412_v18   ;;  %502 = vperm.xlu1 %5843, %v348_v14  }
  0x7e   : > { %714 = vperm.xlu0 %5855, %v6416_v19   ;;  %5844 = vset.pattern.permute.xlu1 %v6235_v8 }
  0x7f   : > { %744 = vperm.xlu1 %5844, %v6419_v20  }
  0x82   : > { %390 = vperm.xlu0 %5855, %v343_v10  }
  0x83   : > { %420 = vperm.xlu1 %5844, %v349_v21  }
  0x86   : > { %759 = vperm.xlu0 %5855, %v6426_v22  }
  0x87   : > { %5845 = vset.pattern.permute.xlu1 %v6234_v3 }
  0x88   : > { %506 = vperm.xlu1 %5845, %v349_v21  }
  0x8a   : > { %764 = vperm.xlu0 %5855, %v6431_v23  }
  0x8c   : > { %5846 = vset.pattern.permute.xlu1 %v6235_v8 }
  0x8d   : > { %709 = vperm.xlu1 %5846, %v6435_v24  }
  0x8e   : > { %734 = vperm.xlu0 %5855, %v6438_v25  }
  0x91   : > { %5847 = vset.pattern.permute.xlu1 %v6236_v11 }
  0x92   : > { %739 = vperm.xlu0 %5855, %v6444_v26   ;;  %570 = vperm.xlu1 %5847, %v340_v16  }
  0x96   : > { %602 = vperm.xlu1 %5847, %v348_v14   ;;  %5857 = vset.pattern.permute.xlu0 %v6234_v3 }
  0x97   : > { %1827 = vperm.xlu0 %5857, %v6401_v15  }
  0x9a   : > { %606 = vperm.xlu1 %5847, %v349_v21  }
  0x9b   : > { %1863 = vperm.xlu0 %5857, %v6407_v17  }
  0x9e   : > { %5848 = vset.pattern.permute.xlu1 %v6235_v8 }
  0x9f   : > { %385 = vperm.xlu1 %5848, %v342_v27   ;;  %1867 = vperm.xlu0 %5857, %v6454_v28  }
  0xa3   : > { %5849 = vset.pattern.permute.xlu1 %v6234_v3  ;;  %1871 = vperm.xlu0 %5857, %v6426_v22  }
  0xa4   : > { %478 = vperm.xlu1 %5849, %v342_v27  }
  0xa7   : > { %1875 = vperm.xlu0 %5857, %v6431_v23  }
  0xa8   : > { %510 = vperm.xlu1 %5849, %v6412_v18  }
  0xab   : > { %1879 = vperm.xlu0 %5857, %v6462_v29  }
  0xac   : > { %5850 = vset.pattern.permute.xlu1 %v6235_v8 }
  0xad   : > { %754 = vperm.xlu1 %5850, %v6454_v28  }
  0xaf   : > { %v6471_v32 = vpop.permute.xlu1 %454  ;;  %v6473_v33 = vpop.permute.xlu0 %458  ;;  %1883 = vperm.xlu0 %5857, %v6469_v31  }
  0xb0   : > { %v521_v12 = vmul.f32 %v6551_v6, %v6471_v32 }
  0xb1   : > { %430 = vperm.xlu1 %5850, %v351_v30  }
  0xb3   : > { %v6479_v35 = vpop.permute.xlu1 %486  ;;  %v6481_v36 = vpop.permute.xlu0 %494  ;;  %1887 = vperm.xlu0 %5857, %v6477_v34  }
  0xb5   : > { %5852 = vset.pattern.permute.xlu1 %v6234_v3 }
  0xb6   : > { %514 = vperm.xlu1 %5852, %v351_v30  }
  0xb7   : > { %v6485_v37 = vpop.permute.xlu0 %466  ;;  %5860 = vset.pattern.permute.xlu0 %v6236_v11 }
  0xb8   : > { %v6488_v38 = vpop.permute.xlu1 %400  ;;  %2967 = vperm.xlu0 %5860, %v6419_v20  }
  0xba   : > { %5853 = vset.pattern.permute.xlu1 %v6235_v8 }
  0xbb   : > { %719 = vperm.xlu1 %5853, %v688_v39   ;;  %v475_v40 = vpop.permute.xlu0 %474 }
  0xbc   : > { %2943 = vperm.xlu0 %5860, %v6416_v19   ;;  %v526_v13 = vmul.f32 %v6551_v6, %v475_v40 }
  0xbd   : > { %v6494_v41 = vpop.permute.xlu1 %490 }
  0xbf   : > { %5854 = vset.pattern.permute.xlu1 %v6236_v11  ;;  %v6497_v42 = vpop.permute.xlu0 %482 }
  0xc0   : > { %578 = vperm.xlu1 %5854, %v342_v27   ;;  %2947 = vperm.xlu0 %5860, %v688_v39  }
  0xc2   : > { %v555_v43 = vpop.permute.xlu1 %554 }
  0xc4   : > { %610 = vperm.xlu1 %5854, %v6412_v18   ;;  %v6501_v45 = vpop.permute.xlu0 %586  ;;  %2951 = vperm.xlu0 %5860, %v689_v44  }
  0xc6   : > { %v6503_v46 = vpop.permute.xlu1 %558 }
  0xc8   : > { %614 = vperm.xlu1 %5854, %v351_v30   ;;  %v6506_v48 = vpop.permute.xlu0 %562  ;;  %2955 = vperm.xlu0 %5860, %v690_v47  }
  0xca   : > { %v6508_v49 = vpop.permute.xlu1 %590 }
  0xcc   : > { %5856 = vset.pattern.permute.xlu1 %v6235_v8  ;;  %v6511_v50 = vpop.permute.xlu0 %598  ;;  %2959 = vperm.xlu0 %5860, %v6438_v25   ;;  %v12349_v8 = vsub.s32 2, %v6536_v62 }
  0xcd   : > { %724 = vperm.xlu1 %5856, %v689_v44  }
  0xce   : > { %v6562_v14 = vrot.slane %v352_v4, %v12349_v8  ;;  %v530_v4 = vmul.f32 %v6551_v6, %v6494_v41 }
  0xcf   : > { %v6514_v51 = vpop.permute.xlu1 %405 }
  0xd0   : > { %v575_v52 = vpop.permute.xlu0 %574  ;;  %2963 = vperm.xlu0 %5860, %v6444_v26   ;;  %v621_v27 = vmul.f32 %v6562_v14, %v555_v43 }
  0xd1   : > { %729 = vperm.xlu1 %5856, %v690_v47   ;;  %v626_v21 = vmul.f32 %v6562_v14, %v575_v52 }
  0xd4   : > { %v6517_v53 = vpop.permute.xlu1 %462  ;;  %v6519_v54 = vpop.permute.xlu0 %582 }
  0xd5   : > { %769 = vperm.xlu1 %5856, %v6462_v29  }
  0xd9   : > { %v356_v55 = vpop.permute.xlu0 %355  ;;  %774 = vperm.xlu1 %5856, %v6469_v31   ;;  %v6523_v56 = vpop.permute.xlu1 %370 }
  0xda   : > { %v437_v10 = vmul.f32 %v6553_v7, %v356_v55 }
  0xdd   : > { %v6525_v57 = vpop.permute.xlu0 %395  ;;  %779 = vperm.xlu1 %5856, %v6477_v34   ;;  %v6528_v58 = vpop.permute.xlu1 %410 }
  0xe1   : > { %v6530_v60 = vpop.permute.xlu0 %360  ;;  %5858 = vset.pattern.permute.xlu1 %v6234_v3 }
  0xe2   : > { %1859 = vperm.xlu1 %5858, %v6419_v20   ;;  %v6534_v61 = vpop.permute.xlu1 %498 }
  0xe5   : > { %v6538_v63 = vpop.permute.xlu0 %365 }
  0xe6   : > { %1831 = vperm.xlu1 %5858, %v6435_v24  }
  0xe7   : > { %v6541_v0 = vpop.permute.xlu1 %594 }
  0xe9   : > { %v416_v5 = vpop.permute.xlu0 %415 }
  0xea   : > { %1835 = vperm.xlu1 %5858, %v6416_v19   ;;  %v537_v19 = vadd.f32 %v521_v12, %v437_v10  ;;  %v449_v59 = vmul.f32 %v6553_v7, %v416_v5  ;;  %v6575_v10 = vld [vmem:[%s6367_s9] sm:$0xf] }
  0xeb   : > { %v6547_v3 = vpop.permute.xlu1 %566  ;;  %v6586_v5 = vrot.slane %v6575_v10, %v435_v2 }
  0xec   : > { %v637_v40 = vadd.f32 %v621_v27, %v537_v19 }
  0xed   : > { %v705_v9 = vpop.permute.xlu0 %704 }
  0xee   : > { %1839 = vperm.xlu1 %5858, %v688_v39   ;;  %v653_v52 = vmul.f32 0.33333334, %v637_v40 }
  0xf0   : > { %v6564_v16 = vpop.permute.xlu1 %375  ;;  %v782_v41 = vmul.f32 %v705_v9, %v653_v52 }
  0xf1   : > { %v381_v18 = vpop.permute.xlu0 %380 }
  0xf2   : > { %v442_v20 = vmul.f32 %v6553_v7, %v381_v18  ;;  %1843 = vperm.xlu1 %5858, %v689_v44  }
  0xf4   : > { %v542_v30 = vadd.f32 %v526_v13, %v442_v20  ;;  %v630_v13 = vmul.f32 %v6562_v14, %v6508_v49  ;;  %v628_v49 = vmul.f32 %v6562_v14, %v6519_v54 }
  0xf5   : > { %v750_v32 = vpop.permute.xlu0 %749  ;;  %v471_v39 = vpop.permute.xlu1 %470 }
  0xf6   : > { %1847 = vperm.xlu1 %5858, %v690_v47   ;;  %v6569_v55 = vadd.f32 %v626_v21, %v542_v30  ;;  %v446_v47 = vmul.f32 %v6553_v7, %v6488_v38  ;;  %v528_v38 = vmul.f32 %v6551_v6, %v6497_v42  ;;  %v529_v42 = vmul.f32 %v6551_v6, %v6479_v35 }
  0xf8   : > { %v546_v19 = vadd.f32 %v530_v4, %v446_v47 }
  0xf9   : > { %v6577_v12 = vpop.permute.xlu0 %425  ;;  %v503_v44 = vpop.permute.xlu1 %502 }
  0xfa   : > { %v533_v43 = vmul.f32 %v6551_v6, %v503_v44  ;;  %1851 = vperm.xlu1 %5858, %v6438_v25   ;;  %v646_v27 = vadd.f32 %v630_v13, %v546_v19  ;;  %v802_v25 = vmul.f32 %v6586_v5, %v782_v41 }
  0xfc   : > { %v6588_v18 = vadd.f32 %v533_v43, %v449_v59  ;;  %v662_v40 = vmul.f32 0.33333334, %v646_v27  ;;  %v6603_v59 = vclamps-f32 %v802_v25, 0.9999999  ;;  %v629_v43 = vmul.f32 %v6562_v14, %v6501_v45 }
  0xfd   : > { %v6590_v20 = vpop.permute.xlu0 %714 }
  0xfe   : > { %1855 = vperm.xlu1 %5858, %v6444_v26   ;;  %v745_v21 = vpop.permute.xlu1 %744  ;;  %v445_v26 = vmul.f32 %v6553_v7, %v6525_v57  ;;  %v791_v44 = vmul.f32 %v750_v32, %v662_v40  ;;  %v850_v57 = vmul.f32 %v6603_v59, %v6603_v59 }
 0x100   : > { %v811_v13 = vmul.f32 %v6586_v5, %v791_v44  ;;  %v866_v19 = vsub.f32 1.0, %v850_v57 }
 0x101   : > { %v391_v30 = vpop.permute.xlu0 %390 }
 0x102   : > { %v444_v2 = vmul.f32 %v6553_v7, %v391_v30  ;;  %v421_v9 = vpop.permute.xlu1 %420  ;;  %5859 = vset.pattern.permute.xlu1 %v6236_v11  ;;  %v6620_v25 = vclamps-f32 %v811_v13, 0.9999999  ;;  %v525_v30 = vmul.f32 %v6551_v6, %v471_v39  ;;  %5863 = vrsqrt.f32 %v866_v19 }
 0x103   : > { %2935 = vperm.xlu1 %5859, %v6401_v15   ;;  %v545_v15 = vadd.f32 %v529_v42, %v445_v26  ;;  %v450_v47 = vmul.f32 %v6553_v7, %v421_v9  ;;  %vm884_vm0 = vcmp.eq.f32.partialorder %v866_v19, inf  ;;  %vm886_vm1 = vcmp.eq.f32.partialorder %v866_v19, 0.0 }
 0x104   : > { %v544_v4 = vadd.f32 %v528_v38, %v444_v2  ;;  %v441_v38 = vmul.f32 %v6553_v7, %v6564_v16 }
 0x105   : > { %v6605_v52 = vpop.permute.xlu0 %759  ;;  %v645_v45 = vadd.f32 %v629_v43, %v545_v15  ;;  %v522_v43 = vmul.f32 %v6551_v6, %v6473_v33 }
 0x106   : > { %v644_v54 = vadd.f32 %v628_v49, %v544_v4  ;;  %v541_v26 = vadd.f32 %v525_v30, %v441_v38  ;;  %v622_v30 = vmul.f32 %v6562_v14, %v6503_v46  ;;  %v632_v38 = vmul.f32 %v6562_v14, %v6511_v50 }
 0x107   : > { %v507_v11 = vpop.permute.xlu1 %506  ;;  %2939 = vperm.xlu1 %5859, %v6435_v24   ;;  %v661_v49 = vmul.f32 0.33333334, %v645_v45 }
 0x108   : > { %v534_v32 = vmul.f32 %v6551_v6, %v507_v11  ;;  %v660_v2 = vmul.f32 0.33333334, %v644_v54 }
 0x109   : > { %v6617_v41 = vpop.permute.xlu0 %764  ;;  %v790_v4 = vmul.f32 %v745_v21, %v661_v49  ;;  %v438_v21 = vmul.f32 %v6553_v7, %v6530_v60 }
 0x10a   : > { %v550_v35 = vadd.f32 %v534_v32, %v450_v47  ;;  %v532_v47 = vmul.f32 %v6551_v6, %v6534_v61 }
 0x10b   : > { %2971 = vperm.xlu1 %5859, %v6407_v17   ;;  %v859_v17 = vmul.f32 %v6620_v25, %v6620_v25  ;;  %v810_v54 = vmul.f32 %v6586_v5, %v790_v4  ;;  %v538_v33 = vadd.f32 %v522_v43, %v438_v21 }
 0x10c   : > { %v710_v27 = vpop.permute.xlu1 %709  ;;  %v5864_v15 = vpop.eup %5863 }
 0x10d   : > { %v6622_v24 = vpop.permute.xlu0 %734  ;;  %v875_v39 = vsub.f32 1.0, %v859_v17  ;;  %v6644_v57 = vclamps-f32 %v810_v54, 0.9999999  ;;  %v883_v13 = vmul.f32 %v5864_v15, %v866_v19  ;;  %v6679_v15 = vand.u32 2147483647, %v6603_v59 }
 0x10f   : > { %2975 = vperm.xlu1 %5859, %v6454_v28   ;;  %5865 = vrsqrt.f32 %v875_v39  ;;  %v858_v60 = vmul.f32 %v6644_v57, %v6644_v57  ;;  %vm947_vm2 = vcmp.eq.f32.partialorder %v875_v39, inf  ;;  %vm949_vm3 = vcmp.eq.f32.partialorder %v875_v39, 0.0 }
 0x111   : > { %v740_v9 = vpop.permute.xlu0 %739  ;;  %v571_v40 = vpop.permute.xlu1 %570  ;;  %v6661_v49 = vsub.f32 1.0, %v858_v60 }
 0x112   : > { %v6630_v44 = vmul.f32 %v740_v9, %v660_v2  ;;  %v625_v42 = vmul.f32 %v6562_v14, %v571_v40 }
 0x113   : > { %2979 = vperm.xlu1 %5859, %v6426_v22   ;;  %5867 = vrsqrt.f32 %v6661_v49  ;;  %vm940_vm4 = vcmp.eq.f32.partialorder %v6661_v49, inf  ;;  %vm942_vm5 = vcmp.eq.f32.partialorder %v6661_v49, 0.0 }
 0x114   : > { %v6634_v28 = vadd.f32 %v625_v42, %v541_v26 }
 0x115   : > { %v6636_v16 = vpop.permute.xlu1 %602 }
 0x117   : > { %2983 = vperm.xlu1 %5859, %v6431_v23   ;;  %v448_v23 = vmul.f32 %v6553_v7, %v6528_v58  ;;  %v887_v58 = vand.u32 2147483648, %v866_v19 }
 0x119   : > { %v607_v11 = vpop.permute.xlu1 %606  ;;  %v548_v61 = vadd.f32 %v532_v47, %v448_v23  ;;  %v5866_v2 = vpop.eup %5865 }
 0x11a   : > { %v634_v22 = vmul.f32 %v6562_v14, %v607_v11  ;;  %v946_v4 = vmul.f32 %v5866_v2, %v875_v39 }
 0x11b   : > { %2987 = vperm.xlu1 %5859, %v6462_v29   ;;  %v638_v29 = vadd.f32 %v622_v30, %v538_v33  ;;  %v648_v17 = vadd.f32 %v632_v38, %v548_v61  ;;  %v950_v33 = vand.u32 2147483648, %v875_v39  ;;  %v531_v30 = vmul.f32 %v6551_v6, %v6481_v36 }
 0x11c   : > { %v6650_v32 = vadd.f32 %v634_v22, %v550_v35  ;;  %v885_v35 = vsel %vm884_vm0, %v866_v19, %v883_v13  ;;  %v948_v47 = vsel %vm947_vm2, %v875_v39, %v946_v4  ;;  %v447_v38 = vmul.f32 %v6553_v7, %v6514_v51 }
 0x11d   : > { %v6666_v50 = vsel %vm886_vm1, %v887_v58, %v885_v35  ;;  %v654_v26 = vmul.f32 0.33333334, %v638_v29  ;;  %v664_v42 = vmul.f32 0.33333334, %v648_v17  ;;  %v6687_v60 = vsel %vm949_vm3, %v950_v33, %v948_v47 }
 0x11e   : > { %v386_v45 = vpop.permute.xlu1 %385  ;;  %v6672_v21 = vand.u32 2147483647, %v6666_v50  ;;  %v6696_v29 = vand.u32 2147483647, %v6687_v60  ;;  %v631_v39 = vmul.f32 %v6562_v14, %v6541_v0  ;;  %v6703_v58 = vand.u32 2147483647, %v6620_v25 }
 0x11f   : > { %2991 = vperm.xlu1 %5859, %v6469_v31   ;;  %v443_v46 = vmul.f32 %v6553_v7, %v386_v45  ;;  %v783_v54 = vmul.f32 %v710_v27, %v654_v26  ;;  %v793_v11 = vmul.f32 %v6605_v52, %v664_v42  ;;  %v5868_v45 = vpop.eup %5867  ;;  %v547_v17 = vadd.f32 %v531_v30, %v447_v38 }
 0x120   : > { %v997_v23 = vmax.f32 %v6679_v15, %v6672_v21  ;;  %v939_v36 = vmul.f32 %v5868_v45, %v6661_v49  ;;  %v1420_v51 = vmax.f32 %v6703_v58, %v6696_v29  ;;  %v523_v42 = vmul.f32 %v6551_v6, %v6517_v53 }
 0x121   : > { %v803_v27 = vmul.f32 %v6586_v5, %v783_v54  ;;  %v647_v0 = vadd.f32 %v631_v39, %v547_v17  ;;  %v996_v53 = vmin.f32 %v6679_v15, %v6672_v21  ;;  %vm1021_vm0 = vcmp.lt.f32.partialorder %v6603_v59, 0.0 }
 0x122   : > { %5869 = vrcp.f32 %v997_v23  ;;  %vm1024_vm1 = vcmp.lt.s32.totalorder %v6603_v59, 0 }
 0x123   : > { %v479_v9 = vpop.permute.xlu1 %478  ;;  %2995 = vperm.xlu1 %5859, %v6477_v34   ;;  %v451_v34 = vmul.f32 %v6553_v7, %v6577_v12  ;;  %v813_v12 = vmul.f32 %v6586_v5, %v793_v11  ;;  %v6689_v52 = vclamps-f32 %v803_v27, 0.9999999  ;;  %5871 = vrcp.f32 %v1420_v51 }
 0x124   : > { %v527_v40 = vmul.f32 %v6551_v6, %v479_v9  ;;  %v439_v9 = vmul.f32 %v6553_v7, %v6538_v63  ;;  %v943_v63 = vand.u32 2147483648, %v6661_v49  ;;  %v623_v11 = vmul.f32 %v6562_v14, %v6506_v48 }
 0x125   : > { %v6698_v35 = vclamps-f32 %v813_v12, 0.9999999  ;;  %v851_v2 = vmul.f32 %v6689_v52, %v6689_v52  ;;  %v663_v23 = vmul.f32 0.33333334, %v647_v0 }
 0x126   : > { %v6668_v31 = vadd.f32 %v527_v40, %v443_v46  ;;  %v539_v47 = vadd.f32 %v523_v42, %v439_v9 }
 0x127   : > { %v511_v43 = vpop.permute.xlu1 %510  ;;  %v861_v46 = vmul.f32 %v6698_v35, %v6698_v35  ;;  %v867_v54 = vsub.f32 1.0, %v851_v2 }
 0x128   : > { %v535_v19 = vmul.f32 %v6551_v6, %v511_v43  ;;  %v941_v43 = vsel %vm940_vm4, %v6661_v49, %v939_v36  ;;  %v639_v38 = vadd.f32 %v623_v11, %v539_v47  ;;  %v6741_v49 = vand.u32 2147483647, %v6644_v57 }
 0x129   : > { %v6723_v27 = vsub.f32 1.0, %v861_v46  ;;  %v6730_v12 = vsel %vm942_vm5, %v943_v63, %v941_v43  ;;  %5873 = vrsqrt.f32 %v867_v54  ;;  %v1419_v46 = vmin.f32 %v6703_v58, %v6696_v29 }
 0x12a   : > { %v6681_v22 = vadd.f32 %v535_v19, %v451_v34  ;;  %v6735_v48 = vand.u32 2147483647, %v6730_v12  ;;  %vm891_vm6 = vcmp.eq.f32.partialorder %v867_v54, inf  ;;  %vm893_vm8 = vcmp.eq.f32.partialorder %v867_v54, 0.0 }
 0x12b   : > { %5875 = vrsqrt.f32 %v6723_v27  ;;  %vm961_vm7 = vcmp.eq.f32.partialorder %v6723_v27, inf  ;;  %vm963_vm9 = vcmp.eq.f32.partialorder %v6723_v27, 0.0  ;;  %vm1444_vm4 = vcmp.lt.f32.partialorder %v6620_v25, 0.0 }
 0x12c   : > { %v755_v13 = vpop.permute.xlu1 %754  ;;  %v5870_v19 = vpop.eup %5869  ;;  %v1373_v36 = vmax.f32 %v6741_v49, %v6735_v48  ;;  %vm1018_vm5 = vcmp.gt.f32.partialorder %v6672_v21, %v6679_v15 }
 0x12d   : > { %v792_v45 = vmul.f32 %v755_v13, %v663_v23  ;;  %v6732_v30 = vmul.f32 %v5870_v19, %v996_v53  ;;  %v655_v13 = vmul.f32 0.33333334, %v639_v38  ;;  %v5872_v17 = vpop.eup %5871 }
 0x12e   : > { %v6757_v42 = vmul.f32 %v5872_v17, %v1419_v46  ;;  %5877 = vrcp.f32 %v1373_v36  ;;  %v894_v46 = vand.u32 2147483648, %v867_v54 }
 0x12f   : > { %v812_v39 = vmul.f32 %v6586_v5, %v792_v45  ;;  %v6746_v2 = vmul.f32 %v6732_v30, %v6732_v30  ;;  %v784_v51 = vmul.f32 %v6590_v20, %v655_v13 }
 0x130   : > { %v431_v61 = vpop.permute.xlu1 %430  ;;  %v6766_v45 = vmul.f32 %v6757_v42, %v6757_v42 }
 0x131   : > { %v452_v26 = vmul.f32 %v6553_v7, %v431_v61  ;;  %v804_v19 = vmul.f32 %v6586_v5, %v784_v51 }
 0x133   : > { %v6769_v13 = vclamps-f32 %v804_v19, 0.9999999 }
 0x135   : > { %v515_v40 = vpop.permute.xlu1 %514 }
 0x136   : > { %v536_v4 = vmul.f32 %v6551_v6, %v515_v40  ;;  %v6753_v40 = vclamps-f32 %v812_v39, 0.9999999 }
 0x138   : > { %v552_v34 = vadd.f32 %v536_v4, %v452_v26  ;;  %12691 = vst [vmem:[#allocation12_spill] sm:$0xff] %v6753_v40  ;;  %v1001_v26 = vmul.f32 0.002785687, %v6746_v2  ;;  %v5874_v4 = vpop.eup %5873  ;;  %v860_v11 = vmul.f32 %v6753_v40, %v6753_v40 }
 0x139   : > { %v5876_v63 = vpop.eup %5875  ;;  %v890_v53 = vmul.f32 %v5874_v4, %v867_v54 }
 0x13a   : > { %v6726_v33 = vpop.permute.xlu1 %719  ;;  %v1002_v23 = vadd.f32 -0.015866, %v1001_v26  ;;  %v960_v39 = vmul.f32 %v5876_v63, %v6723_v27  ;;  %v852_v26 = vmul.f32 %v6769_v13, %v6769_v13  ;;  %v964_v63 = vand.u32 2147483648, %v6723_v27 }
 0x13b   : > { %v892_v51 = vsel %vm891_vm6, %v867_v54, %v890_v53  ;;  %v524_v54 = vmul.f32 %v6551_v6, %v6485_v37  ;;  %vm1447_vm6 = vcmp.lt.s32.totalorder %v6620_v25, 0 }
 0x13c   : > { %v1003_v17 = vmul.f32 %v1002_v23, %v6746_v2  ;;  %v6781_v4 = vsel %vm893_vm8, %v894_v46, %v892_v51  ;;  %v624_v51 = vmul.f32 %v6562_v14, %v6547_v3  ;;  %v6803_v46 = vsub.f32 1.0, %v852_v26 }
 0x13d   : > { %12692 = vst [vmem:[#allocation13_spill] sm:$0xff] %v6781_v4  ;;  %v6823_v26 = vand.u32 2147483647, %v6698_v35  ;;  %vm1026_vm8 = vcmp.eq.f32.partialorder %v6666_v50, 0.0 }
 0x13e   : > { %v1004_v19 = vadd.f32 0.04247222, %v1003_v17  ;;  %v6799_v17 = vand.u32 2147483647, %v6781_v4  ;;  %vm898_vm12 = vcmp.eq.f32.partialorder %v6803_v46, inf  ;;  %vm900_vm13 = vcmp.eq.f32.partialorder %v6803_v46, 0.0 }
 0x13f   : > { %v6738_v61 = vpop.permute.xlu1 %578  ;;  %12697 = vst [vmem:[#allocation18_spill] sm:$0xff] %v6823_v26 }
 0x140   : > { %12694 = vst [vmem:[#allocation15_spill] sm:$0xff] %v6799_v17  ;;  %v1005_v37 = vmul.f32 %v1004_v19, %v6746_v2 }
 0x143   : > { %v611_v9 = vpop.permute.xlu1 %610 }
 0x144   : > { %v635_v0 = vmul.f32 %v6562_v14, %v611_v9  ;;  %v1424_v9 = vmul.f32 0.002785687, %v6766_v45 }
 0x146   : > { %v651_v43 = vadd.f32 %v635_v0, %v6681_v22  ;;  %v6771_v22 = vsub.f32 1.0, %v860_v11  ;;  %v5878_v0 = vpop.eup %5877  ;;  %v1372_v11 = vmin.f32 %v6741_v49, %v6735_v48  ;;  %v1425_v23 = vadd.f32 -0.015866, %v1424_v9 }
 0x147   : > { %v615_v20 = vpop.permute.xlu1 %614 }
 0x148   : > { %v636_v47 = vmul.f32 %v6562_v14, %v615_v20  ;;  %5879 = vrsqrt.f32 %v6771_v22  ;;  %v667_v19 = vmul.f32 0.33333334, %v651_v43  ;;  %vm954_vm10 = vcmp.eq.f32.partialorder %v6771_v22, inf }
 0x149   : > { %5881 = vrsqrt.f32 %v6803_v46  ;;  %vm956_vm11 = vcmp.eq.f32.partialorder %v6771_v22, 0.0 }
 0x14a   : > { %v652_v38 = vadd.f32 %v636_v47, %v552_v34  ;;  %v962_v34 = vsel %vm961_vm7, %v6723_v27, %v960_v39  ;;  %v440_v47 = vmul.f32 %v6553_v7, %v6523_v56  ;;  %v6796_v39 = vmul.f32 %v5878_v0, %v1372_v11 }
 0x14b   : > { %v6794_v53 = vsel %vm963_vm9, %v964_v63, %v962_v34  ;;  %v666_v27 = vmul.f32 0.33333334, %v6650_v32  ;;  %v6808_v56 = vand.u32 2147483647, %v6689_v52  ;;  %v1426_v0 = vmul.f32 %v1425_v23, %v6766_v45 }
 0x14c   : > { %v6773_v36 = vpop.permute.xlu1 %724  ;;  %12693 = vst [vmem:[#allocation14_spill] sm:$0xff] %v6794_v53  ;;  %v6811_v7 = vand.u32 2147483647, %v6794_v53  ;;  %v540_v9 = vadd.f32 %v524_v54, %v440_v47  ;;  %v6818_v3 = vmul.f32 %v6796_v39, %v6796_v39  ;;  %v1006_v11 = vadd.f32 -0.074975304, %v1005_v37 }
 0x14d   : > { %12695 = vst [vmem:[#allocation16_spill] sm:$0xff] %v6808_v56  ;;  %v1044_v32 = vmax.f32 %v6808_v56, %v6799_v17  ;;  %v1427_v23 = vadd.f32 0.04247222, %v1426_v0  ;;  %v668_v53 = vmul.f32 0.33333334, %v652_v38  ;;  %vm1028_vm7 = vcmp.ne.f32.partialorder %v6603_v59, %v6603_v59 }
 0x14e   : > { %12696 = vst [vmem:[#allocation17_spill] sm:$0xff] %v6811_v7  ;;  %v640_v63 = vadd.f32 %v624_v51, %v540_v9  ;;  %v1514_v47 = vmax.f32 %v6823_v26, %v6811_v7  ;;  %v1377_v8 = vmul.f32 0.002785687, %v6818_v3  ;;  %v1007_v4 = vmul.f32 %v1006_v11, %v6746_v2 }
 0x14f   : > { %5883 = vrcp.f32 %v1044_v32  ;;  %v1428_v37 = vmul.f32 %v1427_v23, %v6766_v45  ;;  %vm1029_vm9 = vcmp.ne.f32.partialorder %v6666_v50, %v6666_v50 }
 0x150   : > { %v6784_v20 = vpop.permute.xlu1 %729  ;;  %v656_v1 = vmul.f32 0.33333334, %v640_v63  ;;  %5885 = vrcp.f32 %v1514_v47  ;;  %v1008_v63 = vadd.f32 0.1064488, %v1007_v4 }
 0x151   : > { %v1429_v11 = vadd.f32 -0.074975304, %v1428_v37 }
 0x152   : > { %v785_v43 = vmul.f32 %v6726_v33, %v656_v1  ;;  %v957_v33 = vand.u32 2147483648, %v6771_v22  ;;  %v1009_v4 = vmul.f32 %v1008_v63, %v6746_v2 }
 0x154   : > { %v770_v6 = vpop.permute.xlu1 %769  ;;  %v805_v38 = vmul.f32 %v6586_v5, %v785_v43  ;;  %v1043_v43 = vmin.f32 %v6808_v56, %v6799_v17 }
 0x155   : > { %v6813_v34 = vmul.f32 %v770_v6, %v666_v27  ;;  %v5880_v6 = vpop.eup %5879 }
 0x156   : > { %v953_v0 = vmul.f32 %v5880_v6, %v6771_v22  ;;  %v5882_v32 = vpop.eup %5881  ;;  %v6848_v6 = vclamps-f32 %v805_v38, 0.9999999  ;;  %v901_v38 = vand.u32 2147483648, %v6803_v46 }
 0x158   : > { %v775_v54 = vpop.permute.xlu1 %774  ;;  %v955_v47 = vsel %vm954_vm10, %v6771_v22, %v953_v0  ;;  %12701 = vst [vmem:[#allocation22_spill] sm:$0xff] %v6848_v6  ;;  %v853_v63 = vmul.f32 %v6848_v6, %v6848_v6  ;;  %vm1397_vm10 = vcmp.lt.f32.partialorder %v6644_v57, 0.0 }
 0x159   : > { %v6828_v27 = vmul.f32 %v775_v54, %v667_v19  ;;  %v1378_v19 = vadd.f32 -0.015866, %v1377_v8  ;;  %v657_v54 = vmul.f32 0.33333334, %v6634_v28  ;;  %v5884_v8 = vpop.eup %5883  ;;  %v6845_v23 = vsel %vm956_vm11, %v957_v33, %v955_v47 }
 0x15a   : > { %12700 = vst [vmem:[#allocation21_spill] sm:$0xff] %v6845_v23  ;;  %v897_v28 = vmul.f32 %v5882_v32, %v6803_v46  ;;  %v5886_v37 = vpop.eup %5885  ;;  %v6856_v22 = vand.u32 2147483647, %v6845_v23  ;;  %vm1035_vm11 = vcmp.eq.s32.totalorder %v6672_v21, inf }
 0x15b   : > { %12698 = vst [vmem:[#allocation19_spill] sm:$0xff] %v6828_v27  ;;  %v1379_v1 = vmul.f32 %v1378_v19, %v6818_v3  ;;  %v6858_v19 = vmul.f32 %v5884_v8, %v1043_v43 }
 0x15c   : > { %v780_v51 = vpop.permute.xlu1 %779  ;;  %12702 = vst [vmem:[#allocation23_spill] sm:$0xff] %v6856_v22  ;;  %v899_v32 = vsel %vm898_vm12, %v6803_v46, %v897_v28  ;;  %vm1400_vm12 = vcmp.lt.s32.totalorder %v6644_v57, 0 }
 0x15d   : > { %v6834_v9 = vmul.f32 %v780_v51, %v668_v53  ;;  %v786_v53 = vmul.f32 %v6773_v36, %v657_v54  ;;  %v1430_v51 = vmul.f32 %v1429_v11, %v6766_v45  ;;  %v1380_v0 = vadd.f32 0.04247222, %v1379_v1 }
 0x15e   : > { %v1513_v54 = vmin.f32 %v6823_v26, %v6811_v7  ;;  %v1010_v11 = vadd.f32 -0.14207031, %v1009_v4  ;;  %v6868_v1 = vand.u32 2147483647, %v6753_v40  ;;  %v6880_v43 = vmul.f32 %v6858_v19, %v6858_v19 }
 0x15f   : > { %12699 = vst [vmem:[#allocation20_spill] sm:$0xff] %v6834_v9  ;;  %v806_v36 = vmul.f32 %v6586_v5, %v786_v53  ;;  %v1431_v47 = vadd.f32 0.1064488, %v1430_v51  ;;  %v1381_v33 = vmul.f32 %v1380_v0, %v6818_v3  ;;  %v6882_v4 = vsel %vm900_vm13, %v901_v38, %v899_v32 }
 0x160   : > { %v6871_v53 = vmul.f32 %v5886_v37, %v1513_v54  ;;  %v1467_v28 = vmax.f32 %v6868_v1, %v6856_v22  ;;  %12705 = vst [vmem:[#allocation26_spill] sm:$0xff] %v6882_v4  ;;  %v6884_v51 = vsub.f32 1.0, %v853_v63  ;;  %v1011_v23 = vmul.f32 %v1010_v11, %v6746_v2 }
 0x161   : > { %v6874_v8 = vclamps-f32 %v806_v36, 0.9999999  ;;  %v1432_v37 = vmul.f32 %v1431_v47, %v6766_v45  ;;  %v1382_v0 = vadd.f32 -0.074975304, %v1381_v33  ;;  %v6889_v46 = vand.u32 2147483647, %v6882_v4 }
 0x162   : > { %12703 = vst [vmem:[#allocation24_spill] sm:$0xff] %v6871_v53  ;;  %5887 = vrcp.f32 %v1467_v28  ;;  %v1048_v54 = vmul.f32 0.002785687, %v6880_v43  ;;  %v6896_v32 = vmul.f32 %v6871_v53, %v6871_v53  ;;  %v6899_v38 = vand.u32 2147483647, %v6769_v13 }
 0x163   : > { %12704 = vst [vmem:[#allocation25_spill] sm:$0xff] %v6874_v8  ;;  %12706 = vst [vmem:[#allocation27_spill] sm:$0xff] %v6889_v46  ;;  %v854_v36 = vmul.f32 %v6874_v8, %v6874_v8  ;;  %v1012_v63 = vadd.f32 0.19993454, %v1011_v23  ;;  %v1433_v11 = vadd.f32 -0.14207031, %v1432_v37  ;;  %5889 = vrsqrt.f32 %v6884_v51 }
 0x164   : > { %v627_v47 = vmul.f32 %v6562_v14, %v6738_v61  ;;  %v1383_v33 = vmul.f32 %v1382_v0, %v6818_v3  ;;  %v1091_v28 = vmax.f32 %v6899_v38, %v6889_v46  ;;  %v1049_v9 = vadd.f32 -0.015866, %v1048_v54 }
 0x165   : > { %v6907_v4 = vsub.f32 1.0, %v854_v36  ;;  %v1518_v40 = vmul.f32 0.002785687, %v6896_v32  ;;  %v1013_v27 = vmul.f32 %v1012_v63, %v6746_v2  ;;  %v1434_v23 = vmul.f32 %v1433_v11, %v6766_v45 }
 0x166   : > { %v643_v37 = vadd.f32 %v627_v47, %v6668_v31  ;;  %v1384_v17 = vadd.f32 0.1064488, %v1383_v33  ;;  %5891 = vrcp.f32 %v1091_v28  ;;  %v1050_v61 = vmul.f32 %v1049_v9, %v6880_v43 }
 0x167   : > { %v1519_v56 = vadd.f32 -0.015866, %v1518_v40  ;;  %5893 = vrsqrt.f32 %v6907_v4  ;;  %v1014_v7 = vadd.f32 -0.33333147, %v1013_v27  ;;  %v658_v36 = vmul.f32 0.33333334, %v6569_v55 }
 0x168   : > { %v1435_v54 = vadd.f32 0.19993454, %v1434_v23  ;;  %v659_v26 = vmul.f32 0.33333334, %v643_v37  ;;  %v1385_v53 = vmul.f32 %v1384_v17, %v6818_v3  ;;  %v1466_v63 = vmin.f32 %v6868_v1, %v6856_v22 }
 0x169   : > { %v787_v31 = vmul.f32 %v6784_v20, %v658_v36  ;;  %v1051_v47 = vadd.f32 0.04247222, %v1050_v61  ;;  %v1520_v9 = vmul.f32 %v1519_v56, %v6896_v32  ;;  %v1015_v33 = vmul.f32 %v1014_v7, %v6746_v2 }
 0x16a   : > { %v1436_v27 = vmul.f32 %v1435_v54, %v6766_v45  ;;  %v788_v55 = vmul.f32 %v6622_v24, %v659_v26  ;;  %v1386_v28 = vadd.f32 -0.14207031, %v1385_v53  ;;  %vm905_vm14 = vcmp.eq.f32.partialorder %v6884_v51, inf }
 0x16b   : > { %v807_v23 = vmul.f32 %v6586_v5, %v787_v31  ;;  %v1052_v37 = vmul.f32 %v1051_v47, %v6880_v43  ;;  %v1521_v22 = vadd.f32 0.04247222, %v1520_v9  ;;  %v1016_v2 = vmul.f32 %v1015_v33, %v6732_v30 }
 0x16c   : > { %v5888_v0 = vpop.eup %5887  ;;  %v1437_v7 = vadd.f32 -0.33333147, %v1436_v27  ;;  %v808_v24 = vmul.f32 %v6586_v5, %v788_v55  ;;  %v1387_v26 = vmul.f32 %v1386_v28, %v6818_v3  ;;  %v1090_v53 = vmin.f32 %v6899_v38, %v6889_v46 }
 0x16d   : > { %v5890_v11 = vpop.eup %5889  ;;  %v6921_v40 = vmul.f32 %v5888_v0, %v1466_v63  ;;  %v6940_v36 = vclamps-f32 %v807_v23, 0.9999999  ;;  %v1053_v54 = vadd.f32 -0.074975304, %v1052_v37  ;;  %v1522_v63 = vmul.f32 %v1521_v22, %v6896_v32 }
 0x16e   : > { %v904_v17 = vmul.f32 %v5890_v11, %v6884_v51  ;;  %v908_v11 = vand.u32 2147483648, %v6884_v51  ;;  %vm907_vm15 = vcmp.eq.f32.partialorder %v6884_v51, 0.0  ;;  %v1017_v33 = vadd.f32 %v1016_v2, %v6732_v30 }
 0x16f   : > { %v6931_v56 = vmul.f32 %v6921_v40, %v6921_v40  ;;  %12707 = vst [vmem:[#allocation28_spill] sm:$0xff] %v6940_v36  ;;  %v1438_v27 = vmul.f32 %v1437_v7, %v6766_v45  ;;  %v809_v28 = vmul.f32 %v6586_v5, %v6630_v44  ;;  %v6955_v22 = vclamps-f32 %v808_v24, 0.9999999 }
 0x170   : > { %v5892_v20 = vpop.eup %5891  ;;  %v906_v0 = vsel %vm905_vm14, %v6884_v51, %v904_v17  ;;  %v1388_v17 = vadd.f32 0.19993454, %v1387_v26  ;;  %v855_v51 = vmul.f32 %v6940_v36, %v6940_v36  ;;  %v1054_v23 = vmul.f32 %v1053_v54, %v6880_v43 }
 0x171   : > { %v5894_v61 = vpop.eup %5893  ;;  %v1471_v31 = vmul.f32 0.002785687, %v6931_v56  ;;  %v6945_v47 = vmul.f32 %v5892_v20, %v1090_v53  ;;  %v6951_v55 = vsel %vm907_vm15, %v908_v11, %v906_v0  ;;  %12709 = vst [vmem:[#allocation30_spill] sm:$0xff] %v6955_v22  ;;  %v1523_v30 = vadd.f32 -0.074975304, %v1522_v63 }
 0x172   : > { %v911_v9 = vmul.f32 %v5894_v61, %v6907_v4  ;;  %12708 = vst [vmem:[#allocation29_spill] sm:$0xff] %v6951_v55  ;;  %vm912_vm2 = vcmp.eq.f32.partialorder %v6907_v4, inf  ;;  %v6968_v44 = vand.u32 2147483647, %v6951_v55  ;;  %v633_v61 = vmul.f32 %v6562_v14, %v6636_v16 }
 0x173   : > { %v1472_v45 = vadd.f32 -0.015866, %v1471_v31  ;;  %v6965_v37 = vmul.f32 %v6945_v47, %v6945_v47  ;;  %v1019_v2 = vsub.f32 1.5707964, %v1017_v33  ;;  %v1439_v7 = vmul.f32 %v1438_v27, %v6757_v42 }
 0x174   : > { %12710 = vst [vmem:[#allocation31_spill] sm:$0xff] %v6968_v44  ;;  %v913_v20 = vsel %vm912_vm2, %v6907_v4, %v911_v9  ;;  %v915_v24 = vand.u32 2147483648, %v6907_v4  ;;  %v856_v26 = vmul.f32 %v6955_v22, %v6955_v22  ;;  %v1389_v53 = vmul.f32 %v1388_v17, %v6818_v3 }
 0x175   : > { %v6979_v0 = vand.u32 2147483647, %v6848_v6  ;;  %vm914_vm3 = vcmp.eq.f32.partialorder %v6907_v4, 0.0  ;;  %v6982_v54 = vsub.f32 1.0, %v855_v51  ;;  %v1055_v63 = vadd.f32 0.1064488, %v1054_v23 }
 0x176   : > { %v1524_v14 = vmul.f32 %v1523_v30, %v6896_v32  ;;  %v6985_v16 = vsel %vm914_vm3, %v915_v24, %v913_v20  ;;  %v1473_v11 = vmul.f32 %v1472_v45, %v6931_v56  ;;  %v1095_v31 = vmul.f32 0.002785687, %v6965_v37  ;;  %vm7090_vm3 = vmor %vm1028_vm7, %vm1029_vm9 }
 0x177   : > { %12711 = vst [vmem:[#allocation32_spill] sm:$0xff] %v6979_v0  ;;  %12712 = vst [vmem:[#allocation33_spill] sm:$0xff] %v6985_v16  ;;  %v1138_v9 = vmax.f32 %v6979_v0, %v6968_v44  ;;  %v6992_v27 = vclamps-f32 %v809_v28, 0.9999999  ;;  %v649_v4 = vadd.f32 %v633_v61, %v6588_v18  ;;  %v1020_v17 = vsel %vm1018_vm5, %v1019_v2, %v1017_v33 }
 0x178   : > { %v1440_v51 = vadd.f32 %v1439_v7, %v6757_v42  ;;  %v1390_v23 = vadd.f32 -0.33333147, %v1389_v53  ;;  %v7000_v30 = vand.u32 2147483647, %v6985_v16  ;;  %v7002_v45 = vsub.f32 1.0, %v856_v26 }
 0x179   : > { %12713 = vst [vmem:[#allocation34_spill] sm:$0xff] %v6992_v27  ;;  %v1056_v20 = vmul.f32 %v1055_v63, %v6880_v43  ;;  %v1525_v28 = vadd.f32 0.1064488, %v1524_v14  ;;  %5895 = vrsqrt.f32 %v6982_v54  ;;  %v1474_v18 = vadd.f32 0.04247222, %v1473_v11 }
 0x17a   : > { %12714 = vst [vmem:[#allocation35_spill] sm:$0xff] %v7000_v30  ;;  %v1096_v61 = vadd.f32 -0.015866, %v1095_v31  ;;  %5897 = vrcp.f32 %v1138_v9  ;;  %v7007_v24 = vand.u32 2147483647, %v6874_v8  ;;  %v12716_v33 = vsub.s32 1, %v6536_v62 }
 0x17b   : > { %v12381_v2 = vmov 0.0   ;;  %v12377_v26 = vmov 0.7853982   ;;  %v665_v14 = vmul.f32 0.33333334, %v649_v4  ;;  %v1391_v62 = vmul.f32 %v1390_v23, %v6818_v3 }
 0x17c   : > { %12715 = vst [vmem:[#allocation36_spill] sm:$0xff] %v7007_v24  ;;  %v7012_v42 = vrot.slane %v6575_v10, %v12716_v33  ;;  %v1025_v7 = vsel %vm1024_vm1, 3.1415927, %v12381_v2  ;;  %v7020_v53 = vsel %vm1021_vm0, 2.3561945, %v12377_v26  ;;  %v857_v10 = vmul.f32 %v6992_v27, %v6992_v27 }
 0x17d   : > { %v7025_v63 = vsel %vm1444_vm4, 2.3561945, %v12377_v26  ;;  %v7032_v11 = vsel %vm1447_vm6, 3.1415927, %v12381_v2  ;;  %v1185_v31 = vmax.f32 %v7007_v24, %v7000_v30  ;;  %v1022_v9 = vsub.f32 3.1415927, %v1020_v17 }
 0x17e   : > { %v1442_v33 = vsub.f32 1.5707964, %v1440_v51  ;;  %v1057_v16 = vadd.f32 -0.14207031, %v1056_v20  ;;  %v1475_v26 = vmul.f32 %v1474_v18, %v6931_v56  ;;  %v1526_v4 = vmul.f32 %v1525_v28, %v6896_v32 }
 0x17f   : > { %v1097_v55 = vmul.f32 %v1096_v61, %v6965_v37  ;;  %5899 = vrsqrt.f32 %v7002_v45  ;;  %v7048_v3 = vsub.f32 1.0, %v857_v10  ;;  %v794_v23 = vmul.f32 %v6617_v41, %v665_v14 }
 0x180   : > { %5901 = vrcp.f32 %v1185_v31  ;;  %v1023_v20 = vsel %vm1021_vm0, %v1022_v9, %v1020_v17  ;;  %vm1441_vm13 = vcmp.gt.f32.partialorder %v6696_v29, %v6703_v58  ;;  %v1392_v28 = vmul.f32 %v1391_v62, %v6796_v39 }
 0x181   : > { %v1058_v18 = vmul.f32 %v1057_v16, %v6880_v43  ;;  %vm1034_vm14 = vcmp.eq.s32.totalorder %v6679_v15, inf  ;;  %v1443_v61 = vsel %vm1441_vm13, %v1442_v33, %v1440_v51  ;;  %v1476_v10 = vadd.f32 -0.074975304, %v1475_v26 }
 0x182   : > { %v1527_v41 = vadd.f32 -0.14207031, %v1526_v4  ;;  %v1098_v14 = vadd.f32 0.04247222, %v1097_v55  ;;  %vm1449_vm15 = vcmp.eq.f32.partialorder %v6687_v60, 0.0  ;;  %v12717_v31 = vmov 0.0   ;;  %vm1036_vm9 = vmand %vm1034_vm14, %vm1035_vm11 }
 0x183   : > { %v5896_v2 = vpop.eup %5895  ;;  %v7062_v8 = vsel %vm1400_vm12, 3.1415927, %v12717_v31  ;;  %v12718_v17 = vmov 0.7853982   ;;  %vm1068_vm0 = vcmp.lt.f32.partialorder %v6689_v52, 0.0  ;;  %v814_v16 = vmul.f32 %v6586_v5, %v794_v23 }
 0x184   : > { %v7067_v9 = vsel %vm1397_vm10, 2.3561945, %v12718_v17  ;;  %v5898_v62 = vpop.eup %5897  ;;  %v1027_v51 = vsel %vm1026_vm8, %v1025_v7, %v1023_v20  ;;  %vm1071_vm1 = vcmp.lt.s32.totalorder %v6689_v52, 0  ;;  %5903 = vrsqrt.f32 %v7048_v3 }
 0x185   : > { %v1445_v55 = vsub.f32 3.1415927, %v1443_v61  ;;  %v1393_v26 = vadd.f32 %v1392_v28, %v6796_v39  ;;  %v1059_v33 = vadd.f32 0.19993454, %v1058_v18  ;;  %v1137_v4 = vmin.f32 %v6979_v0, %v6968_v44 }
 0x186   : > { %vm1451_vm2 = vcmp.ne.f32.partialorder %v6620_v25, %v6620_v25  ;;  %v1477_v6 = vmul.f32 %v1476_v10, %v6931_v56  ;;  %v1528_v23 = vmul.f32 %v1527_v41, %v6896_v32  ;;  %v1099_v7 = vmul.f32 %v1098_v14, %v6965_v37 }
 0x187   : > { %v918_v20 = vmul.f32 %v5896_v2, %v6982_v54  ;;  %vm1452_vm5 = vcmp.ne.f32.partialorder %v6687_v60, %v6687_v60  ;;  %v7098_v18 = vsel %vm1071_vm1, 3.1415927, %v12717_v31  ;;  %v7100_v10 = vmul.f32 %v5898_v62, %v1137_v4 }
 0x188   : > { %v7102_v41 = vclamps-f32 %v814_v16, 0.9999999  ;;  %v1031_v14 = vsel %vm7090_vm3, nan, %v1027_v51  ;;  %vm1394_vm6 = vcmp.gt.f32.partialorder %v6735_v48, %v6741_v49  ;;  %v7111_v44 = vsel %vm1068_vm0, 2.3561945, %v12718_v17  ;;  %vm7156_vm14 = vmor %vm1451_vm2, %vm1452_vm5 }
 0x189   : > { %12721 = vst [vmem:[#allocation37_spill] sm:$0xff] %v7100_v10  ;;  %v5900_v2 = vpop.eup %5899  ;;  %v1446_v28 = vsel %vm1444_vm4, %v1445_v55, %v1443_v61  ;;  %vm1458_vm7 = vcmp.eq.s32.totalorder %v6696_v29, inf  ;;  %v1395_v62 = vsub.f32 1.5707964, %v1393_v26  ;;  %v1060_v16 = vmul.f32 %v1059_v33, %v6880_v43 }
 0x18a   : > { %vm919_vm8 = vcmp.eq.f32.partialorder %v6982_v54, inf  ;;  %v5902_v4 = vpop.eup %5901  ;;  %v1478_v51 = vadd.f32 0.1064488, %v1477_v6  ;;  %v1529_v39 = vadd.f32 0.19993454, %v1528_v23  ;;  %vm1457_vm4 = vcmp.eq.s32.totalorder %v6703_v58, inf }
 0x18b   : > { %v1100_v0 = vadd.f32 -0.074975304, %v1099_v7  ;;  %v920_v46 = vsel %vm919_vm8, %v6982_v54, %v918_v20  ;;  %v7126_v61 = vmul.f32 %v7100_v10, %v7100_v10  ;;  %v1184_v55 = vmin.f32 %v7007_v24, %v7000_v30  ;;  %v1828_v10 = vpop.permute.xlu0 %1827 }
 0x18c   : > { %v922_v6 = vand.u32 2147483648, %v6982_v54  ;;  %v925_v33 = vmul.f32 %v5900_v2, %v7002_v45  ;;  %v1037_v23 = vsel %vm1036_vm9, %v7020_v53, %v1031_v14  ;;  %v1450_v21 = vsel %vm1449_vm15, %v7032_v11, %v1446_v28 }
 0x18d   : > { %vm1541_vm11 = vcmp.lt.s32.totalorder %v6698_v35, 0  ;;  %vm921_vm12 = vcmp.eq.f32.partialorder %v6982_v54, 0.0  ;;  %v1396_v15 = vsel %vm1394_vm6, %v1395_v62, %v1393_v26  ;;  %v1061_v7 = vadd.f32 -0.33333147, %v1060_v16  ;;  %vm1459_vm6 = vmand %vm1457_vm4, %vm1458_vm7 }
 0x18e   : > { %v7141_v20 = vmul.f32 %v5902_v4, %v1184_v55  ;;  %v7143_v30 = vsel %vm921_vm12, %v922_v6, %v920_v46  ;;  %v5904_v2 = vpop.eup %5903  ;;  %v862_v53 = vmul.f32 %v7102_v41, %v7102_v41  ;;  %v1479_v14 = vmul.f32 %v1478_v51, %v6931_v56 }
 0x18f   : > { %12723 = vst [vmem:[#allocation39_spill] sm:$0xff] %v7143_v30  ;;  %v1101_v11 = vmul.f32 %v1100_v0, %v6965_v37  ;;  %vm926_vm13 = vcmp.eq.f32.partialorder %v7002_v45, inf  ;;  %v1038_v54 = vand.u32 2147483647, %v1037_v23  ;;  %v1530_v26 = vmul.f32 %v1529_v39, %v6896_v32 }
 0x190   : > { %12722 = vst [vmem:[#allocation38_spill] sm:$0xff] %v7141_v20  ;;  %v1142_v28 = vmul.f32 0.002785687, %v7126_v61  ;;  %v927_v62 = vsel %vm926_vm13, %v7002_v45, %v925_v33  ;;  %v1454_v0 = vsel %vm7156_vm14, nan, %v1450_v21  ;;  %v1398_v16 = vsub.f32 3.1415927, %v1396_v15 }
 0x191   : > { %vm1538_vm15 = vcmp.lt.f32.partialorder %v6698_v35, 0.0  ;;  %v7167_v4 = vand.u32 2147483647, %v7143_v30  ;;  %v929_v51 = vand.u32 2147483648, %v7002_v45  ;;  %vm1402_vm1 = vcmp.eq.f32.partialorder %v6730_v12, 0.0 }
 0x192   : > { %vm1405_vm2 = vcmp.ne.f32.partialorder %v6730_v12, %v6730_v12  ;;  %v1062_v39 = vmul.f32 %v1061_v7, %v6880_v43  ;;  %v7176_v55 = vmul.f32 %v7141_v20, %v7141_v20  ;;  %vm928_vm3 = vcmp.eq.f32.partialorder %v7002_v45, 0.0  ;;  %v6119_v45 = vld [vmem:[%s6362_s24] sm:$0xff] }
 0x193   : > { %v1480_v6 = vadd.f32 -0.14207031, %v1479_v14  ;;  %v1102_v33 = vadd.f32 0.1064488, %v1101_v11  ;;  %v7180_v23 = vand.u32 2147483647, %v6940_v36  ;;  %v7182_v21 = vsel %vm928_vm3, %v929_v51, %v927_v62 }
 0x194   : > { %12726 = vst [vmem:[#allocation40_spill] sm:$0xff] %v7182_v21  ;;  %v6239_v46 = vmov 3   ;;  %vm1404_vm5 = vcmp.ne.f32.partialorder %v6644_v57, %v6644_v57  ;;  %v1531_v7 = vadd.f32 -0.33333147, %v1530_v26  ;;  %v1143_v30 = vadd.f32 -0.015866, %v1142_v28 }
 0x195   : > { %5861 = vset.pattern.permute.xlu0 %v6239_v46  ;;  %5862 = vset.pattern.permute.xlu1 %v6239_v46  ;;  %v932_v24 = vmul.f32 %v5904_v2, %v7048_v3  ;;  %v6120_v14 = vld [vmem:[%s6362_s24 + $0x40] sm:$0xff]  ;;  %v7190_v11 = vsub.f32 1.0, %v862_v53  ;;  %v12727_v62 = vand.u32 2147483648, %v6666_v50  ;;  %v7201_v26 = vsel %vm1541_vm11, 3.1415927, %v12717_v31  ;;  %vm7256_vm11 = vmor %vm1404_vm5, %vm1405_vm2 }
 0x196   : > { %4043 = vperm.xlu0 %5861, %v6119_v45   ;;  %4075 = vperm.xlu1 %5862, %v6120_v14   ;;  %v1232_v2 = vmax.f32 %v7180_v23, %v7167_v4  ;;  %v1460_v53 = vsel %vm1459_vm6, %v7025_v63, %v1454_v0  ;;  %vm1411_vm8 = vcmp.eq.s32.totalorder %v6735_v48, inf  ;;  %v7209_v29 = vand.u32 2147483647, %v7182_v21  ;;  %v6123_v21 = vld [vmem:[%s6362_s24 + $0x50] sm:$0xff] }
 0x197   : > { %v1040_v51 = vor.u32 %v12727_v62, %v1038_v54  ;;  %v1189_v54 = vmul.f32 0.002785687, %v7176_v55  ;;  %vm933_vm7 = vcmp.eq.f32.partialorder %v7048_v3, inf  ;;  %v1399_v58 = vsel %vm1397_vm10, %v1398_v16, %v1396_v15  ;;  %v6121_v15 = vld [vmem:[%s6362_s24 + $0x48] sm:$0xff] }
 0x198   : > { %12728 = vst [vmem:[#allocation41_spill] sm:$0xff] %v7209_v29  ;;  %v1481_v28 = vmul.f32 %v1480_v6, %v6931_v56  ;;  %v1063_v46 = vmul.f32 %v1062_v39, %v6858_v19  ;;  %v1103_v45 = vmul.f32 %v1102_v33, %v6965_v37  ;;  %vm1410_vm9 = vcmp.eq.s32.totalorder %v6741_v49, inf  ;;  %v6122_v16 = vld [vmem:[%s6362_s24 + $0x8] sm:$0xff] }
 0x199   : > { %v1532_v63 = vmul.f32 %v1531_v7, %v6896_v32  ;;  %vm1115_vm4 = vcmp.lt.f32.partialorder %v6769_v13, 0.0  ;;  %v1144_v0 = vmul.f32 %v1143_v30, %v7126_v61  ;;  %v7222_v14 = vand.u32 2147483647, %v6955_v22  ;;  %vm1412_vm13 = vmand %vm1410_vm9, %vm1411_vm8 }
 0x19a   : > { %v934_v62 = vsel %vm933_vm7, %v7048_v3, %v932_v24  ;;  %4079 = vperm.xlu0 %5861, %v6121_v15   ;;  %4047 = vperm.xlu1 %5862, %v6122_v16   ;;  %v1746_v39 = vsub.f32 3.1415927, %v1040_v51  ;;  %v1461_v6 = vand.u32 2147483647, %v1460_v53  ;;  %5905 = vrcp.f32 %v1232_v2  ;;  %v12731_v16 = vld [vmem:[#allocation24_spill] sm:$0xff] }
 0x19b   : > { %12729 = vst [vmem:[#allocation42_spill] sm:$0xff] %v7222_v14  ;;  %v936_v32 = vand.u32 2147483648, %v7048_v3  ;;  %v815_v33 = vmul.f32 %v6586_v5, %v6813_v34  ;;  %v1190_v30 = vadd.f32 -0.015866, %v1189_v54  ;;  %v1279_v7 = vmax.f32 %v7222_v14, %v7209_v29 }
 0x19c   : > { %vm935_vm10 = vcmp.eq.f32.partialorder %v7048_v3, 0.0  ;;  %v1403_v24 = vsel %vm1402_vm1, %v7062_v8, %v1399_v58  ;;  %v1482_v51 = vadd.f32 0.19993454, %v1481_v28  ;;  %v1104_v15 = vadd.f32 -0.14207031, %v1103_v45  ;;  %v6124_v3 = vld [vmem:[%s6362_s24 + $0x10] sm:$0xff] }
 0x19d   : > { %v7236_v53 = vsel %vm935_vm10, %v936_v32, %v934_v62  ;;  %v1064_v2 = vadd.f32 %v1063_v46, %v6858_v19  ;;  %v1533_v43 = vmul.f32 %v1532_v63, %v12731_v16  ;;  %v7243_v34 = vsel %vm1538_vm15, 2.3561945, %v12718_v17  ;;  %v12735_v46 = vld [vmem:[#allocation13_spill] sm:$0xff]  ;;  %v12736_v45 = vld [vmem:[#allocation14_spill] sm:$0xff] }
 0x19e   : > { %12730 = vst [vmem:[#allocation43_spill] sm:$0xff] %v7236_v53  ;;  %v1145_v54 = vadd.f32 0.04247222, %v1144_v0  ;;  %4083 = vperm.xlu0 %5861, %v6123_v21   ;;  %4051 = vperm.xlu1 %5862, %v6124_v3   ;;  %v1762_v8 = vmul.f32 %v6603_v59, %v1746_v39  ;;  %v12732_v58 = vand.u32 2147483648, %v6687_v60  ;;  %v1407_v59 = vsel %vm7256_vm11, nan, %v1403_v24  ;;  %v12739_v32 = vld [vmem:[#allocation18_spill] sm:$0xff] }
 0x19f   : > { %v1191_v0 = vmul.f32 %v1190_v30, %v7176_v55  ;;  %5907 = vrcp.f32 %v1279_v7  ;;  %v7266_v62 = vand.u32 2147483647, %v7236_v53  ;;  %v7268_v39 = vclamps-f32 %v815_v33, 0.9999999  ;;  %v12740_v3 = vld [vmem:[#allocation17_spill] sm:$0xff]  ;;  %v6125_v63 = vld [vmem:[%s6362_s24 + $0x58] sm:$0xff] }
 0x1a0   : > { %v1463_v28 = vor.u32 %v12732_v58, %v1461_v6  ;;  %v1483_v6 = vmul.f32 %v1482_v51, %v6931_v56  ;;  %vm1535_vm12 = vcmp.gt.f32.partialorder %v12740_v3, %v12739_v32  ;;  %v1105_v58 = vmul.f32 %v1104_v15, %v6965_v37  ;;  %v6126_v33 = vld [vmem:[%s6362_s24 + $0x18] sm:$0xff]  ;;  %v12742_v15 = vld [vmem:[#allocation16_spill] sm:$0xff]  ;;  %v12743_v53 = vld [vmem:[#allocation15_spill] sm:$0xff] }
 0x1a1   : > { %12737 = vst [vmem:[#allocation24_spill] sm:$0xff] %v7266_v62  ;;  %12738 = vst [vmem:[#allocation13_spill] sm:$0xff] %v7268_v39  ;;  %5909 = vrsqrt.f32 %v7190_v11  ;;  %v1066_v19 = vsub.f32 1.5707964, %v1064_v2  ;;  %v1534_v24 = vadd.f32 %v1533_v43, %v12731_v16  ;;  %v1146_v30 = vmul.f32 %v1145_v54, %v7126_v61  ;;  %v12744_v43 = vld [vmem:[#allocation19_spill] sm:$0xff] }
 0x1a2   : > { %v7278_v7 = vand.u32 2147483647, %v6992_v27  ;;  %4087 = vperm.xlu0 %5861, %v6125_v63   ;;  %4055 = vperm.xlu1 %5862, %v6126_v33   ;;  %v1778_v51 = vadd.f32 %v1762_v8, %v6666_v50  ;;  %v1755_v21 = vsub.f32 3.1415927, %v1463_v28  ;;  %vm1065_vm14 = vcmp.gt.f32.partialorder %v12743_v53, %v12742_v15 }
 0x1a3   : > { %vm1118_vm1 = vcmp.lt.s32.totalorder %v6769_v13, 0  ;;  %v816_v16 = vmul.f32 %v6586_v5, %v12744_v43  ;;  %v1413_v54 = vsel %vm1412_vm13, %v7067_v9, %v1407_v59  ;;  %v1192_v63 = vadd.f32 0.04247222, %v1191_v0  ;;  %v6127_v59 = vld [vmem:[%s6362_s24 + $0x20] sm:$0xff] }
 0x1a4   : > { %12741 = vst [vmem:[#allocation14_spill] sm:$0xff] %v7278_v7  ;;  %v1326_v50 = vmax.f32 %v7278_v7, %v7266_v62  ;;  %v5906_v48 = vpop.eup %5905  ;;  %v863_v49 = vmul.f32 %v7268_v39, %v7268_v39  ;;  %v1484_v8 = vadd.f32 -0.33333147, %v1483_v6  ;;  %v1106_v28 = vadd.f32 0.19993454, %v1105_v58  ;;  %v6128_v0 = vld [vmem:[%s6362_s24 + $0x60] sm:$0xff] }
 0x1a5   : > { %v7300_v33 = vsel %vm1115_vm4, 2.3561945, %v12718_v17  ;;  %v1067_v27 = vsel %vm1065_vm14, %v1066_v19, %v1064_v2  ;;  %v1536_v22 = vsub.f32 1.5707964, %v1534_v24  ;;  %v1147_v43 = vadd.f32 -0.074975304, %v1146_v30 }
 0x1a6   : > { %v1231_v9 = vmin.f32 %v7180_v23, %v7167_v4  ;;  %4059 = vperm.xlu1 %5862, %v6127_v59   ;;  %4091 = vperm.xlu0 %5861, %v6128_v0   ;;  %v1794_v36 = vmul.f32 0.15915494, %v1778_v51  ;;  %v1771_v20 = vmul.f32 %v6620_v25, %v1755_v21  ;;  %v1414_v6 = vand.u32 2147483647, %v1413_v54  ;;  %v12745_v58 = vld [vmem:[#allocation12_spill] sm:$0xff] }
 0x1a7   : > { %vm1494_vm2 = vcmp.lt.s32.totalorder %v12745_v58, 0  ;;  %v7308_v39 = vclamps-f32 %v816_v16, 0.9999999  ;;  %vm1073_vm3 = vcmp.eq.f32.partialorder %v12735_v46, 0.0  ;;  %v1193_v2 = vmul.f32 %v1192_v63, %v7176_v55 }
 0x1a8   : > { %v7312_v19 = vmul.f32 %v5906_v48, %v1231_v9  ;;  %5911 = vrcp.f32 %v1326_v50  ;;  %v1485_v30 = vmul.f32 %v1484_v8, %v6931_v56  ;;  %v1069_v51 = vsub.f32 3.1415927, %v1067_v27  ;;  %v6129_v50 = vld [vmem:[%s6362_s24 + $0x28] sm:$0xff] }
 0x1a9   : > { %12746 = vst [vmem:[#allocation18_spill] sm:$0xff] %v7308_v39  ;;  %v1107_v25 = vmul.f32 %v1106_v28, %v6965_v37  ;;  %v7319_v21 = vsel %vm1118_vm1, 3.1415927, %v12717_v31  ;;  %v5908_v16 = vpop.eup %5907  ;;  %v7321_v54 = vsub.f32 1.0, %v863_v49  ;;  %vm1491_vm5 = vcmp.lt.f32.partialorder %v12745_v58, 0.0  ;;  %v6130_v48 = vld [vmem:[%s6362_s24 + $0x68] sm:$0xff] }
 0x1aa   : > { %vm1075_vm6 = vcmp.ne.f32.partialorder %v6689_v52, %v6689_v52  ;;  %v1537_v56 = vsel %vm1535_vm12, %v1536_v22, %v1534_v24  ;;  %v1148_v63 = vmul.f32 %v1147_v43, %v7126_v61  ;;  %4063 = vperm.xlu1 %5862, %v6129_v50   ;;  %4095 = vperm.xlu0 %5861, %v6130_v48   ;;  %v12747_v9 = vand.u32 2147483648, %v6730_v12 }
 0x1ab   : > { %v5910_v8 = vpop.eup %5909  ;;  %v1890_v28 = vmul.f32 %v1828_v10, %v1794_v36  ;;  %v1787_v49 = vadd.f32 %v1771_v20, %v6687_v60  ;;  %v7338_v0 = vsel %vm1494_vm2, 3.1415927, %v12717_v31  ;;  %v864_v22 = vmul.f32 %v7308_v39, %v7308_v39 }
 0x1ac   : > { %v1416_v59 = vor.u32 %v12747_v9, %v1414_v6  ;;  %vm1082_vm8 = vcmp.eq.s32.totalorder %v12743_v53, inf  ;;  %vm1543_vm7 = vcmp.eq.f32.partialorder %v12736_v45, 0.0  ;;  %v1194_v24 = vadd.f32 -0.074975304, %v1193_v2  ;;  %v6131_v9 = vld [vmem:[%s6362_s24 + $0x30] sm:$0xff] }
 0x1ad   : > { %v7346_v60 = vmul.f32 %v7312_v19, %v7312_v19  ;;  %v1278_v36 = vmin.f32 %v7222_v14, %v7209_v29  ;;  %v1486_v10 = vmul.f32 %v1485_v30, %v6921_v40  ;;  %v1070_v20 = vsel %vm1068_vm0, %v1069_v51, %v1067_v27  ;;  %v6132_v51 = vld [vmem:[%s6362_s24 + $0x70] sm:$0xff] }
 0x1ae   : > { %v1539_v43 = vsub.f32 3.1415927, %v1537_v56  ;;  %vm1546_vm9 = vcmp.ne.f32.partialorder %v12736_v45, %v12736_v45  ;;  %v1108_v6 = vadd.f32 -0.33333147, %v1107_v25  ;;  %vm1081_vm10 = vcmp.eq.s32.totalorder %v12742_v15, inf  ;;  %4067 = vperm.xlu1 %5862, %v6131_v9   ;;  %4099 = vperm.xlu0 %5861, %v6132_v51  }
 0x1af   : > { %v1149_v2 = vadd.f32 0.1064488, %v1148_v63  ;;  %v7356_v50 = vmul.f32 %v5908_v16, %v1278_v36  ;;  %v967_v48 = vmul.f32 %v5910_v8, %v7190_v11  ;;  %5913 = vrsqrt.f32 %v7321_v54  ;;  %v1864_v16 = vpop.permute.xlu0 %1863  ;;  %v12748_v8 = vld [vmem:[#allocation23_spill] sm:$0xff] }
 0x1b0   : > { %v1803_v30 = vmul.f32 0.15915494, %v1787_v49  ;;  %v1754_v29 = vsub.f32 3.1415927, %v1416_v59  ;;  %v7364_v27 = vsel %vm1491_vm5, 2.3561945, %v12718_v17  ;;  %vm1076_vm0 = vcmp.ne.f32.partialorder %v12735_v46, %v12735_v46 }
 0x1b1   : > { %vm1545_vm11 = vcmp.ne.f32.partialorder %v6698_v35, %v6698_v35  ;;  %v1910_v25 = vmul.f32 %v7012_v42, %v1890_v28  ;;  %v7372_v63 = vsub.f32 1.0, %v864_v22  ;;  %vm1488_vm12 = vcmp.gt.f32.partialorder %v12748_v8, %v6868_v1 }
 0x1b2   : > { %v1195_v49 = vmul.f32 %v1194_v24, %v7176_v55  ;;  %v1236_v59 = vmul.f32 0.002785687, %v7346_v60  ;;  %v1487_v36 = vadd.f32 %v1486_v10, %v6921_v40  ;;  %v1074_v9 = vsel %vm1073_vm3, %v7098_v18, %v1070_v20  ;;  %v5912_v22 = vpop.eup %5911  ;;  %v6133_v18 = vld [vmem:[%s6362_s24 + $0x38] sm:$0xff]  ;;  %vm1083_vm3 = vmand %vm1081_vm10, %vm1082_vm8 }
 0x1b3   : > { %v1540_v28 = vsel %vm1538_vm15, %v1539_v43, %v1537_v56  ;;  %vm1552_vm13 = vcmp.eq.s32.totalorder %v12740_v3, inf  ;;  %vm968_vm14 = vcmp.eq.f32.partialorder %v7190_v11, inf  ;;  %v1109_v51 = vmul.f32 %v1108_v6, %v6965_v37  ;;  %4071 = vperm.xlu1 %5862, %v6133_v18   ;;  %vm7401_vm15 = vmor %vm1075_vm6, %vm1076_vm0  ;;  %v12754_v37 = vld [vmem:[#allocation21_spill] sm:$0xff] }
 0x1b4   : > { %v1150_v24 = vmul.f32 %v1149_v2, %v7126_v61  ;;  %v7390_v40 = vmul.f32 %v7356_v50, %v7356_v50  ;;  %v969_v10 = vsel %vm968_vm14, %v7190_v11, %v967_v48  ;;  %v1899_v20 = vmul.f32 %v1864_v16, %v1803_v30  ;;  %v6134_v2 = vld [vmem:[%s6362_s24 + $0x78] sm:$0xff]  ;;  %vm7440_vm6 = vmor %vm1545_vm11, %vm1546_vm9 }
 0x1b5   : > { %v1770_v56 = vmul.f32 %v6644_v57, %v1754_v29  ;;  %vm1551_vm1 = vcmp.eq.s32.totalorder %v12739_v32, inf  ;;  %v1325_v43 = vmin.f32 %v7278_v7, %v7266_v62  ;;  %v971_v6 = vand.u32 2147483648, %v7190_v11  ;;  %4103 = vperm.xlu0 %5861, %v6134_v2  }
 0x1b6   : > { %v1078_v57 = vsel %vm7401_vm15, nan, %v1074_v9  ;;  %v1196_v29 = vadd.f32 0.1064488, %v1195_v49  ;;  %v1237_v48 = vadd.f32 -0.015866, %v1236_v59  ;;  %vm970_vm2 = vcmp.eq.f32.partialorder %v7190_v11, 0.0  ;;  %vm1553_vm10 = vmand %vm1551_vm1, %vm1552_vm13 }
 0x1b7   : > { %v1489_v30 = vsub.f32 1.5707964, %v1487_v36  ;;  %v1544_v16 = vsel %vm1543_vm7, %v7201_v26, %v1540_v28  ;;  %v7416_v18 = vmul.f32 %v5912_v22, %v1325_v43  ;;  %v7418_v14 = vsel %vm970_vm2, %v971_v6, %v969_v10  ;;  %v12753_v59 = vld [vmem:[#allocation20_spill] sm:$0xff] }
 0x1b8   : > { %12751 = vst [vmem:[#allocation17_spill] sm:$0xff] %v7418_v14  ;;  %v1110_v62 = vmul.f32 %v1109_v51, %v6945_v47  ;;  %v1151_v7 = vadd.f32 -0.14207031, %v1150_v24  ;;  %v1283_v2 = vmul.f32 0.002785687, %v7390_v40  ;;  %5915 = vrsqrt.f32 %v7372_v63  ;;  %v12758_v24 = vld [vmem:[#allocation27_spill] sm:$0xff] }
 0x1b9   : > { %v7423_v49 = vclamps-f32 %v1910_v25, 0.9999999  ;;  %v817_v11 = vmul.f32 %v6586_v5, %v12753_v59  ;;  %v1786_v9 = vadd.f32 %v1770_v56, %v6730_v12  ;;  %v5914_v28 = vpop.eup %5913  ;;  %v1084_v22 = vsel %vm1083_vm3, %v7111_v44, %v1078_v57 }
 0x1ba   : > { %v1197_v12 = vmul.f32 %v1196_v29, %v7176_v55  ;;  %v1238_v53 = vmul.f32 %v1237_v48, %v7346_v60  ;;  %v7447_v15 = vand.u32 2147483647, %v7418_v14  ;;  %v1919_v25 = vmul.f32 %v7012_v42, %v1899_v20 }
 0x1bb   : > { %12752 = vst [vmem:[#allocation16_spill] sm:$0xff] %v7423_v49  ;;  %v1490_v44 = vsel %vm1488_vm12, %v1489_v30, %v1487_v36  ;;  %v1548_v51 = vsel %vm7440_vm6, nan, %v1544_v16  ;;  %vm1112_vm8 = vcmp.gt.f32.partialorder %v12758_v24, %v6899_v38  ;;  %v7459_v10 = vmul.f32 %v7416_v18, %v7416_v18  ;;  %v1860_v16 = vpop.permute.xlu1 %1859 }
 0x1bc   : > { %12757 = vst [vmem:[#allocation15_spill] sm:$0xff] %v7447_v15  ;;  %v1111_v56 = vadd.f32 %v1110_v62, %v6945_v47  ;;  %v1152_v43 = vmul.f32 %v1151_v7, %v7126_v61  ;;  %v1284_v6 = vadd.f32 -0.015866, %v1283_v2  ;;  %v7464_v20 = vand.u32 2147483647, %v7102_v41 }
 0x1bd   : > { %v7466_v57 = vclamps-f32 %v817_v11, 0.9999999  ;;  %v1802_v36 = vmul.f32 0.15915494, %v1786_v9  ;;  %v1085_v29 = vand.u32 2147483647, %v1084_v22  ;;  %v974_v48 = vmul.f32 %v5914_v28, %v7321_v54 }
 0x1be   : > { %12759 = vst [vmem:[#allocation19_spill] sm:$0xff] %v7464_v20  ;;  %v1958_v30 = vmul.f32 %v7423_v49, %v7423_v49  ;;  %vm1496_vm7 = vcmp.eq.f32.partialorder %v12754_v37, 0.0  ;;  %vm1499_vm9 = vcmp.ne.f32.partialorder %v12754_v37, %v12754_v37  ;;  %v1198_v47 = vadd.f32 -0.14207031, %v1197_v12 }
 0x1bf   : > { %12760 = vst [vmem:[#allocation12_spill] sm:$0xff] %v7466_v57  ;;  %v1239_v62 = vadd.f32 0.04247222, %v1238_v53  ;;  %v1561_v7 = vmax.f32 %v7464_v20, %v7447_v15  ;;  %v7480_v2 = vclamps-f32 %v1919_v25, 0.9999999  ;;  %v1554_v11 = vsel %vm1553_vm10, %v7243_v34, %v1548_v51 }
 0x1c0   : > { %v1492_v59 = vsub.f32 3.1415927, %v1490_v44  ;;  %v1330_v9 = vmul.f32 0.002785687, %v7459_v10  ;;  %vm1498_vm0 = vcmp.ne.f32.partialorder %v12745_v58, %v12745_v58  ;;  %v1113_v28 = vsub.f32 1.5707964, %v1111_v56 }
 0x1c1   : > { %v1153_v3 = vadd.f32 0.19993454, %v1152_v43  ;;  %v1285_v32 = vmul.f32 %v1284_v6, %v7390_v40  ;;  %vm975_vm11 = vcmp.eq.f32.partialorder %v7321_v54, inf  ;;  %v865_v22 = vmul.f32 %v7466_v57, %v7466_v57  ;;  %vm7537_vm3 = vmor %vm1498_vm0, %vm1499_vm9 }
 0x1c2   : > { %v1898_v5 = vmul.f32 %v1860_v16, %v1802_v36  ;;  %v12761_v12 = vand.u32 2147483648, %v12735_v46  ;;  %v976_v34 = vsel %vm975_vm11, %v7321_v54, %v974_v48  ;;  %v5916_v25 = vpop.eup %5915  ;;  %vm1505_vm12 = vcmp.eq.s32.totalorder %v12748_v8, inf  ;;  %v12773_v8 = vld [vmem:[#allocation37_spill] sm:$0xff] }
 0x1c3   : > { %v1199_v51 = vmul.f32 %v1198_v47, %v7176_v55  ;;  %v1240_v43 = vmul.f32 %v1239_v62, %v7346_v60  ;;  %5917 = vrcp.f32 %v1561_v7  ;;  %v978_v6 = vand.u32 2147483648, %v7321_v54 }
 0x1c4   : > { %v1087_v53 = vor.u32 %v12761_v12, %v1085_v29  ;;  %v1493_v26 = vsel %vm1491_vm5, %v1492_v59, %v1490_v44  ;;  %v1555_v14 = vand.u32 2147483647, %v1554_v11  ;;  %v1331_v36 = vadd.f32 -0.015866, %v1330_v9  ;;  %v12763_v59 = vld [vmem:[#allocation26_spill] sm:$0xff] }
 0x1c5   : > { %vm977_vm13 = vcmp.eq.f32.partialorder %v7321_v54, 0.0  ;;  %vm1504_vm14 = vcmp.eq.s32.totalorder %v6868_v1, inf  ;;  %v1114_v29 = vsel %vm1112_vm8, %v1113_v28, %v1111_v56  ;;  %v1154_v48 = vmul.f32 %v1153_v3, %v7126_v61 }
 0x1c6   : > { %v1286_v16 = vadd.f32 0.04247222, %v1285_v32  ;;  %v7505_v47 = vsel %vm977_vm13, %v978_v6, %v976_v34  ;;  %v7507_v62 = vsub.f32 1.0, %v1958_v30  ;;  %v7509_v7 = vsub.f32 1.0, %v865_v22 }
 0x1c7   : > { %12762 = vst [vmem:[#allocation23_spill] sm:$0xff] %v7505_v47  ;;  %v1747_v44 = vsub.f32 3.1415927, %v1087_v53  ;;  %vm1120_vm5 = vcmp.eq.f32.partialorder %v12763_v59, 0.0  ;;  %v981_v54 = vmul.f32 %v5916_v25, %v7372_v63  ;;  %v1967_v11 = vmul.f32 %v7480_v2, %v7480_v2 }
 0x1c8   : > { %v1918_v9 = vmul.f32 %v7012_v42, %v1898_v5  ;;  %vm1123_vm15 = vcmp.ne.f32.partialorder %v12763_v59, %v12763_v59  ;;  %v1200_v56 = vadd.f32 0.19993454, %v1199_v51  ;;  %v1241_v28 = vadd.f32 -0.074975304, %v1240_v43 }
 0x1c9   : > { %v1497_v30 = vsel %vm1496_vm7, %v7338_v0, %v1493_v26  ;;  %v1116_v3 = vsub.f32 3.1415927, %v1114_v29  ;;  %v1332_v32 = vmul.f32 %v1331_v36, %v7459_v10  ;;  %v7523_v22 = vand.u32 2147483647, %v7505_v47  ;;  %v12768_v26 = vld [vmem:[#allocation13_spill] sm:$0xff] }
 0x1ca   : > { %v12765_v12 = vand.u32 2147483648, %v12736_v45  ;;  %vm1122_vm1 = vcmp.ne.f32.partialorder %v6769_v13, %v6769_v13  ;;  %v1155_v5 = vadd.f32 -0.33333147, %v1154_v48  ;;  %v1287_v34 = vmul.f32 %v1286_v16, %v7390_v40 }
 0x1cb   : > { %12764 = vst [vmem:[#allocation20_spill] sm:$0xff] %v7523_v22  ;;  %vm982_vm2 = vcmp.eq.f32.partialorder %v7372_v63, inf  ;;  %v7543_v25 = vand.u32 2147483647, %v12768_v26  ;;  %5919 = vrsqrt.f32 %v7509_v7  ;;  %v1501_v43 = vsel %vm7537_vm3, nan, %v1497_v30  ;;  %vm7595_vm10 = vmor %vm1122_vm1, %vm1123_vm15 }
 0x1cc   : > { %v1557_v53 = vor.u32 %v12765_v12, %v1555_v14  ;;  %v1763_v14 = vmul.f32 %v6689_v52, %v1747_v44  ;;  %v983_v51 = vsel %vm982_vm2, %v7372_v63, %v981_v54  ;;  %vm1129_vm6 = vcmp.eq.s32.totalorder %v12758_v24, inf }
 0x1cd   : > { %12769 = vst [vmem:[#allocation21_spill] sm:$0xff] %v7543_v25  ;;  %v1201_v6 = vmul.f32 %v1200_v56, %v7176_v55  ;;  %v1242_v36 = vmul.f32 %v1241_v28, %v7346_v60  ;;  %v985_v48 = vand.u32 2147483648, %v7372_v63  ;;  %v1117_v52 = vsel %vm1115_vm4, %v1116_v3, %v1114_v29  ;;  %v5918_v54 = vpop.eup %5917  ;;  %vm1506_vm4 = vmand %vm1504_vm14, %vm1505_vm12 }
 0x1ce   : > { %v1333_v16 = vadd.f32 0.04247222, %v1332_v32  ;;  %v1608_v44 = vmax.f32 %v7543_v25, %v7523_v22  ;;  %vm984_vm8 = vcmp.eq.f32.partialorder %v7372_v63, 0.0  ;;  %v1757_v12 = vsub.f32 3.1415927, %v1557_v53 }
 0x1cf   : > { %vm1128_vm7 = vcmp.eq.s32.totalorder %v6899_v38, inf  ;;  %v1156_v30 = vmul.f32 %v1155_v5, %v7126_v61  ;;  %v1288_v56 = vadd.f32 -0.074975304, %v1287_v34  ;;  %v7560_v0 = vsel %vm984_vm8, %v985_v48, %v983_v51  ;;  %v12774_v34 = vld [vmem:[#allocation22_spill] sm:$0xff] }
 0x1d0   : > { %12770 = vst [vmem:[#allocation27_spill] sm:$0xff] %v7560_v0  ;;  %v7562_v28 = vsub.f32 1.0, %v1967_v11  ;;  %v7564_v47 = vclamps-f32 %v1918_v9, 0.9999999  ;;  %v1779_v63 = vadd.f32 %v1763_v14, %v12735_v46  ;;  %v1560_v29 = vmin.f32 %v7464_v20, %v7447_v15  ;;  %vm1130_vm11 = vmand %vm1128_vm7, %vm1129_vm6 }
 0x1d1   : > { %v1507_v3 = vsel %vm1506_vm4, %v7364_v27, %v1501_v43  ;;  %v1121_v61 = vsel %vm1120_vm5, %v7319_v21, %v1117_v52  ;;  %v1202_v11 = vadd.f32 -0.33333147, %v1201_v6  ;;  %v1243_v32 = vadd.f32 0.1064488, %v1242_v36 }
 0x1d2   : > { %12771 = vst [vmem:[#allocation26_spill] sm:$0xff] %v7564_v47  ;;  %v1334_v9 = vmul.f32 %v1333_v16, %v7459_v10  ;;  %v7578_v53 = vmul.f32 %v5918_v54, %v1560_v29  ;;  %5921 = vrcp.f32 %v1608_v44  ;;  %v7581_v1 = vand.u32 2147483647, %v7560_v0 }
 0x1d3   : > { %v1773_v46 = vmul.f32 %v6698_v35, %v1757_v12  ;;  %v1157_v5 = vmul.f32 %v1156_v30, %v12773_v8  ;;  %vm1165_vm9 = vcmp.lt.s32.totalorder %v12774_v34, 0  ;;  %v1289_v27 = vmul.f32 %v1288_v56, %v7390_v40  ;;  %v7614_v30 = vpop.permute.xlu0 %1867  ;;  %v1832_v56 = vpop.permute.xlu1 %1831 }
 0x1d4   : > { %12772 = vst [vmem:[#allocation13_spill] sm:$0xff] %v7581_v1  ;;  %v1966_v21 = vmul.f32 %v7564_v47, %v7564_v47  ;;  %v1508_v14 = vand.u32 2147483647, %v1507_v3  ;;  %v1795_v51 = vmul.f32 0.15915494, %v1779_v63  ;;  %v1125_v6 = vsel %vm7595_vm10, nan, %v1121_v61 }
 0x1d5   : > { %v7600_v35 = vand.u32 2147483647, %v7308_v39  ;;  %v1133_v36 = vand.u32 2147483648, %v12763_v59  ;;  %vm1162_vm0 = vcmp.lt.f32.partialorder %v12774_v34, 0.0  ;;  %v1244_v48 = vmul.f32 %v1243_v32, %v7346_v60  ;;  %v5920_v52 = vpop.eup %5919 }
 0x1d6   : > { %v1203_v16 = vmul.f32 %v1202_v11, %v7176_v55  ;;  %v1335_v44 = vadd.f32 -0.074975304, %v1334_v9  ;;  %v7610_v54 = vmul.f32 %v7578_v53, %v7578_v53  ;;  %v1789_v63 = vadd.f32 %v1773_v46, %v12736_v45 }
 0x1d7   : > { %12777 = vst [vmem:[#allocation37_spill] sm:$0xff] %v7600_v35  ;;  %v1655_v12 = vmax.f32 %v7600_v35, %v7581_v1  ;;  %v1158_v29 = vadd.f32 %v1157_v5, %v12773_v8  ;;  %v7621_v3 = vsel %vm1165_vm9, 3.1415927, %v12717_v31  ;;  %v1290_v55 = vadd.f32 0.1064488, %v1289_v27  ;;  %v12779_v8 = vld [vmem:[#allocation32_spill] sm:$0xff] }
 0x1d8   : > { %v7623_v61 = vsub.f32 1.0, %v1966_v21  ;;  %v12778_v11 = vand.u32 2147483648, %v12754_v37  ;;  %v1891_v9 = vmul.f32 %v1832_v56, %v1795_v51  ;;  %v7634_v45 = vsel %vm1162_vm0, 2.3561945, %v12718_v17  ;;  %v12780_v5 = vld [vmem:[#allocation31_spill] sm:$0xff] }
 0x1d9   : > { %v1131_v46 = vsel %vm1130_vm11, %v7300_v33, %v1125_v6  ;;  %vm1159_vm12 = vcmp.gt.f32.partialorder %v12780_v5, %v12779_v8  ;;  %v1245_v27 = vadd.f32 -0.14207031, %v1244_v48  ;;  %v988_v21 = vmul.f32 %v5920_v52, %v7509_v7  ;;  %v1872_v52 = vpop.permute.xlu0 %1871 }
 0x1da   : > { %v1510_v32 = vor.u32 %v12778_v11, %v1508_v14  ;;  %v12781_v14 = vld [vmem:[#allocation38_spill] sm:$0xff]  ;;  %v1336_v24 = vmul.f32 %v1335_v44, %v7459_v10  ;;  %v1565_v38 = vmul.f32 0.002785687, %v7610_v54  ;;  %5923 = vrcp.f32 %v1655_v12  ;;  %v12782_v11 = vld [vmem:[#allocation25_spill] sm:$0xff] }
 0x1db   : > { %v1204_v51 = vmul.f32 %v1203_v16, %v12781_v14  ;;  %v1805_v43 = vmul.f32 0.15915494, %v1789_v63  ;;  %v1160_v56 = vsub.f32 1.5707964, %v1158_v29  ;;  %vm1212_vm13 = vcmp.lt.s32.totalorder %v12782_v11, 0 }
 0x1dc   : > { %v1291_v0 = vmul.f32 %v1290_v55, %v7390_v40  ;;  %v5922_v33 = vpop.eup %5921  ;;  %v1756_v6 = vsub.f32 3.1415927, %v1510_v32  ;;  %v1911_v39 = vmul.f32 %v7012_v42, %v1891_v9  ;;  %v1132_v48 = vand.u32 2147483647, %v1131_v46 }
 0x1dd   : > { %vm989_vm14 = vcmp.eq.f32.partialorder %v7509_v7, inf  ;;  %vm1209_vm5 = vcmp.lt.f32.partialorder %v12782_v11, 0.0  ;;  %v1246_v16 = vmul.f32 %v1245_v27, %v7346_v60  ;;  %v1607_v44 = vmin.f32 %v7543_v25, %v7523_v22 }
 0x1de   : > { %v990_v12 = vsel %vm989_vm14, %v7509_v7, %v988_v21  ;;  %5925 = vrsqrt.f32 %v7507_v62  ;;  %v1205_v63 = vadd.f32 %v1204_v51, %v12781_v14  ;;  %v1337_v55 = vadd.f32 0.1064488, %v1336_v24  ;;  %v12786_v51 = vld [vmem:[#allocation29_spill] sm:$0xff] }
 0x1df   : > { %v1566_v32 = vadd.f32 -0.015866, %v1565_v38  ;;  %v992_v9 = vand.u32 2147483648, %v7509_v7  ;;  %v1161_v46 = vsel %vm1159_vm12, %v1160_v56, %v1158_v29  ;;  %v1292_v15 = vadd.f32 -0.14207031, %v1291_v0 }
 0x1e0   : > { %v7658_v20 = vmul.f32 %v5922_v33, %v1607_v44  ;;  %vm991_vm15 = vcmp.eq.f32.partialorder %v7509_v7, 0.0  ;;  %v1772_v27 = vmul.f32 %v12745_v58, %v1756_v6  ;;  %v1901_v21 = vmul.f32 %v1872_v52, %v1805_v43  ;;  %v12789_v44 = vld [vmem:[#allocation35_spill] sm:$0xff] }
 0x1e1   : > { %v1134_v22 = vor.u32 %v1133_v36, %v1132_v48  ;;  %v7662_v25 = vsel %vm991_vm15, %v992_v9, %v990_v12  ;;  %v7664_v14 = vclamps-f32 %v1911_v39, 0.9999999  ;;  %vm1167_vm1 = vcmp.eq.f32.partialorder %v12786_v51, 0.0 }
 0x1e2   : > { %12783 = vst [vmem:[#allocation22_spill] sm:$0xff] %v7658_v20  ;;  %12784 = vst [vmem:[#allocation32_spill] sm:$0xff] %v7662_v25  ;;  %vm1170_vm2 = vcmp.ne.f32.partialorder %v12786_v51, %v12786_v51  ;;  %v1247_v0 = vadd.f32 0.19993454, %v1246_v16  ;;  %v1163_v24 = vsub.f32 3.1415927, %v1161_v46  ;;  %v1338_v7 = vmul.f32 %v1337_v55, %v7459_v10 }
 0x1e3   : > { %12785 = vst [vmem:[#allocation31_spill] sm:$0xff] %v7664_v14  ;;  %v1207_v38 = vsub.f32 1.5707964, %v1205_v63  ;;  %v1567_v58 = vmul.f32 %v1566_v32, %v7610_v54  ;;  %vm1169_vm3 = vcmp.ne.f32.partialorder %v12774_v34, %v12774_v34  ;;  %v7677_v39 = vsel %vm1212_vm13, 3.1415927, %v12717_v31  ;;  %v12788_v16 = vld [vmem:[#allocation36_spill] sm:$0xff] }
 0x1e4   : > { %v1293_v36 = vmul.f32 %v1292_v15, %v7390_v40  ;;  %v7682_v43 = vmul.f32 %v7658_v20, %v7658_v20  ;;  %v7685_v56 = vand.u32 2147483647, %v7662_v25  ;;  %v5924_v33 = vpop.eup %5923  ;;  %v1788_v6 = vadd.f32 %v1772_v27, %v12754_v37  ;;  %vm7745_vm11 = vmor %vm1169_vm3, %vm1170_vm2 }
 0x1e5   : > { %v1921_v48 = vmul.f32 %v7012_v42, %v1901_v21  ;;  %v1748_v52 = vsub.f32 3.1415927, %v1134_v22  ;;  %vm1206_vm6 = vcmp.gt.f32.partialorder %v12789_v44, %v12788_v16  ;;  %v1959_v12 = vmul.f32 %v7664_v14, %v7664_v14 }
 0x1e6   : > { %12787 = vst [vmem:[#allocation38_spill] sm:$0xff] %v7685_v56  ;;  %v1248_v15 = vmul.f32 %v1247_v0, %v7346_v60  ;;  %v1654_v55 = vmin.f32 %v7600_v35, %v7581_v1  ;;  %v7697_v32 = vand.u32 2147483647, %v7466_v57  ;;  %v1164_v37 = vsel %vm1162_vm0, %v1163_v24, %v1161_v46 }
 0x1e7   : > { %vm1176_vm8 = vcmp.eq.s32.totalorder %v12780_v5, inf  ;;  %v1208_v22 = vsel %vm1206_vm6, %v1207_v38, %v1205_v63  ;;  %v1339_v9 = vadd.f32 -0.14207031, %v1338_v7  ;;  %v1568_v27 = vadd.f32 0.04247222, %v1567_v58  ;;  %v12792_v38 = vld [vmem:[#allocation33_spill] sm:$0xff] }
 0x1e8   : > { %12790 = vst [vmem:[#allocation25_spill] sm:$0xff] %v7697_v32  ;;  %v5926_v21 = vpop.eup %5925  ;;  %v1294_v29 = vadd.f32 0.19993454, %v1293_v36  ;;  %v1612_v25 = vmul.f32 0.002785687, %v7682_v43  ;;  %v7703_v20 = vmul.f32 %v5924_v33, %v1654_v55  ;;  %v1702_v0 = vmax.f32 %v7697_v32, %v7685_v56  ;;  %v12793_v58 = vld [vmem:[#allocation28_spill] sm:$0xff] }
 0x1e9   : > { %v1804_v1 = vmul.f32 0.15915494, %v1788_v6  ;;  %v7707_v57 = vclamps-f32 %v1921_v48, 0.9999999  ;;  %v1764_v35 = vmul.f32 %v6769_v13, %v1748_v52  ;;  %vm1175_vm7 = vcmp.eq.s32.totalorder %v12779_v8, inf }
 0x1ea   : > { %v7714_v63 = vsel %vm1209_vm5, 2.3561945, %v12718_v17  ;;  %v7716_v46 = vsub.f32 1.0, %v1959_v12  ;;  %v1210_v24 = vsub.f32 3.1415927, %v1208_v22  ;;  %vm1214_vm4 = vcmp.eq.f32.partialorder %v12792_v38, 0.0 }
 0x1eb   : > { %12791 = vst [vmem:[#allocation29_spill] sm:$0xff] %v7707_v57  ;;  %vm1217_vm9 = vcmp.ne.f32.partialorder %v12792_v38, %v12792_v38  ;;  %v1249_v7 = vadd.f32 -0.33333147, %v1248_v15  ;;  %vm1256_vm10 = vcmp.lt.f32.partialorder %v12793_v58, 0.0  ;;  %v1168_v13 = vsel %vm1167_vm1, %v7621_v3, %v1164_v37  ;;  %vm1177_vm1 = vmand %vm1175_vm7, %vm1176_vm8 }
 0x1ec   : > { %v1340_v36 = vmul.f32 %v1339_v9, %v7459_v10  ;;  %v1569_v33 = vmul.f32 %v1568_v27, %v7610_v54  ;;  %v1991_v6 = vmul.f32 %v5926_v21, %v7507_v62  ;;  %vm1216_vm0 = vcmp.ne.f32.partialorder %v12782_v11, %v12782_v11 }
 0x1ed   : > { %v1295_v48 = vmul.f32 %v1294_v29, %v7390_v40  ;;  %v1613_v52 = vadd.f32 -0.015866, %v1612_v25  ;;  %v7733_v12 = vmul.f32 %v7703_v20, %v7703_v20  ;;  %5927 = vrcp.f32 %v1702_v0  ;;  %vm7800_vm2 = vmor %vm1216_vm0, %vm1217_vm9 }
 0x1ee   : > { %v1900_v15 = vmul.f32 %v7614_v30, %v1804_v1  ;;  %v1969_v3 = vmul.f32 %v7707_v57, %v7707_v57  ;;  %v1780_v55 = vadd.f32 %v1764_v35, %v12763_v59  ;;  %vm1259_vm12 = vcmp.lt.s32.totalorder %v12793_v58, 0 }
 0x1ef   : > { %v1172_v1 = vsel %vm7745_vm11, nan, %v1168_v13  ;;  %v1211_v30 = vsel %vm1209_vm5, %v1210_v24, %v1208_v22  ;;  %vm1223_vm13 = vcmp.eq.s32.totalorder %v12789_v44, inf  ;;  %v1250_v59 = vmul.f32 %v1249_v7, %v7346_v60 }
 0x1f0   : > { %vm1992_vm14 = vcmp.eq.f32.partialorder %v7507_v62, inf  ;;  %v1341_v35 = vadd.f32 0.19993454, %v1340_v36  ;;  %v1570_v29 = vadd.f32 -0.074975304, %v1569_v33  ;;  %5929 = vrsqrt.f32 %v7716_v46 }
 0x1f1   : > { %v1993_v37 = vsel %vm1992_vm14, %v7507_v62, %v1991_v6  ;;  %vm1222_vm15 = vcmp.eq.s32.totalorder %v12788_v16, inf  ;;  %v1296_v9 = vadd.f32 -0.33333147, %v1295_v48  ;;  %v1614_v27 = vmul.f32 %v1613_v52, %v7682_v43  ;;  %v1836_v6 = vpop.permute.xlu1 %1835  ;;  %v12805_v16 = vld [vmem:[#allocation39_spill] sm:$0xff] }
 0x1f2   : > { %v1659_v21 = vmul.f32 0.002785687, %v7733_v12  ;;  %v1995_v22 = vand.u32 2147483648, %v7507_v62  ;;  %v1920_v0 = vmul.f32 %v7012_v42, %v1900_v15  ;;  %v7768_v24 = vsel %vm1259_vm12, 3.1415927, %v12717_v31  ;;  %vm1224_vm8 = vmand %vm1222_vm15, %vm1223_vm13 }
 0x1f3   : > { %vm1994_vm5 = vcmp.eq.f32.partialorder %v7507_v62, 0.0  ;;  %v7771_v7 = vsub.f32 1.0, %v1969_v3  ;;  %v1251_v13 = vmul.f32 %v1250_v59, %v7312_v19  ;;  %v7781_v36 = vsel %vm1256_vm10, 2.3561945, %v12718_v17 }
 0x1f4   : > { %v7783_v33 = vsel %vm1994_vm5, %v1995_v22, %v1993_v37  ;;  %v1178_v48 = vsel %vm1177_vm1, %v7634_v45, %v1172_v1  ;;  %v1215_v62 = vsel %vm1214_vm4, %v7677_v39, %v1211_v30  ;;  %v1342_v5 = vmul.f32 %v1341_v35, %v7459_v10  ;;  %v12800_v39 = vld [vmem:[#allocation30_spill] sm:$0xff] }
 0x1f5   : > { %12796 = vst [vmem:[#allocation36_spill] sm:$0xff] %v7783_v33  ;;  %v1571_v8 = vmul.f32 %v1570_v29, %v7610_v54  ;;  %v1796_v52 = vmul.f32 0.15915494, %v1780_v55  ;;  %v1297_v15 = vmul.f32 %v1296_v9, %v7390_v40  ;;  %v1615_v3 = vadd.f32 0.04247222, %v1614_v27 }
 0x1f6   : > { %v1660_v25 = vadd.f32 -0.015866, %v1659_v21  ;;  %v7792_v59 = vclamps-f32 %v1920_v0, 0.9999999  ;;  %vm1303_vm3 = vcmp.lt.f32.partialorder %v12800_v39, 0.0  ;;  %vm1306_vm6 = vcmp.lt.s32.totalorder %v12800_v39, 0 }
 0x1f7   : > { %v7807_v40 = vand.u32 2147483647, %v7783_v33  ;;  %v5928_v55 = vpop.eup %5927  ;;  %v1892_v1 = vmul.f32 %v1836_v6, %v1796_v52  ;;  %v1179_v30 = vand.u32 2147483647, %v1178_v48  ;;  %v1219_v35 = vsel %vm7800_vm2, nan, %v1215_v62 }
 0x1f8   : > { %12797 = vst [vmem:[#allocation35_spill] sm:$0xff] %v7792_v59  ;;  %v1252_v29 = vadd.f32 %v1251_v13, %v7312_v19  ;;  %v1343_v37 = vadd.f32 -0.33333147, %v1342_v5  ;;  %v1572_v9 = vadd.f32 0.1064488, %v1571_v8  ;;  %v1701_v27 = vmin.f32 %v7697_v32, %v7685_v56  ;;  %v12813_v32 = vld [vmem:[#allocation14_spill] sm:$0xff] }
 0x1f9   : > { %12801 = vst [vmem:[#allocation33_spill] sm:$0xff] %v7807_v40  ;;  %v7815_v21 = vand.u32 2147483647, %v7423_v49  ;;  %v1298_v22 = vmul.f32 %v1297_v15, %v7356_v50  ;;  %v7819_v0 = vsel %vm1306_vm6, 3.1415927, %v12717_v31  ;;  %v1616_v6 = vmul.f32 %v1615_v3, %v7682_v43 }
 0x1fa   : > { %v1661_v48 = vmul.f32 %v1660_v25, %v7733_v12  ;;  %v5930_v62 = vpop.eup %5929  ;;  %v1968_v19 = vmul.f32 %v7792_v59, %v7792_v59  ;;  %v7832_v13 = vsel %vm1303_vm3, 2.3561945, %v12718_v17  ;;  %v7834_v5 = vmul.f32 %v5928_v55, %v1701_v27 }
 0x1fb   : > { %12802 = vst [vmem:[#allocation28_spill] sm:$0xff] %v7815_v21  ;;  %v2105_v8 = vmax.f32 %v7815_v21, %v7807_v40  ;;  %v1912_v52 = vmul.f32 %v7012_v42, %v1892_v1  ;;  %v12804_v15 = vand.u32 2147483648, %v12786_v51  ;;  %v1225_v44 = vsel %vm1224_vm8, %v7714_v63, %v1219_v35 }
 0x1fc   : > { %12803 = vst [vmem:[#allocation30_spill] sm:$0xff] %v7834_v5  ;;  %v1254_v25 = vsub.f32 1.5707964, %v1252_v29  ;;  %vm1253_vm7 = vcmp.gt.f32.partialorder %v7167_v4, %v7180_v23  ;;  %v1344_v60 = vmul.f32 %v1343_v37, %v7459_v10  ;;  %v1573_v55 = vmul.f32 %v1572_v9, %v7610_v54 }
 0x1fd   : > { %v1181_v3 = vor.u32 %v12804_v15, %v1179_v30  ;;  %v1299_v27 = vadd.f32 %v1298_v22, %v7356_v50  ;;  %v1617_v33 = vadd.f32 -0.074975304, %v1616_v6  ;;  %v1662_v49 = vadd.f32 0.04247222, %v1661_v48  ;;  %v12806_v30 = vld [vmem:[#allocation40_spill] sm:$0xff] }
 0x1fe   : > { %v1998_v1 = vmul.f32 %v5930_v62, %v7716_v46  ;;  %v1226_v56 = vand.u32 2147483647, %v1225_v44  ;;  %v7852_v63 = vmul.f32 %v7834_v5, %v7834_v5  ;;  %5931 = vrcp.f32 %v2105_v8  ;;  %v1840_v5 = vpop.permute.xlu1 %1839 }
 0x1ff   : > { %v7854_v35 = vsub.f32 1.0, %v1968_v19  ;;  %v7856_v45 = vclamps-f32 %v1912_v52, 0.9999999  ;;  %v1749_v10 = vsub.f32 3.1415927, %v1181_v3  ;;  %v1255_v37 = vsel %vm1253_vm7, %v1254_v25, %v1252_v29  ;;  %v12809_v52 = vld [vmem:[#allocation42_spill] sm:$0xff] }
 0x200   : > { %v1345_v50 = vmul.f32 %v1344_v60, %v7416_v18  ;;  %v1574_v9 = vadd.f32 -0.14207031, %v1573_v55  ;;  %vm1999_vm4 = vcmp.eq.f32.partialorder %v7716_v46, inf  ;;  %5933 = vrsqrt.f32 %v7562_v28  ;;  %v12810_v3 = vld [vmem:[#allocation41_spill] sm:$0xff] }
 0x201   : > { %12807 = vst [vmem:[#allocation39_spill] sm:$0xff] %v7856_v45  ;;  %v1301_v22 = vsub.f32 1.5707964, %v1299_v27  ;;  %v1618_v6 = vmul.f32 %v1617_v33, %v7682_v43  ;;  %v1663_v48 = vmul.f32 %v1662_v49, %v7733_v12  ;;  %v2000_v62 = vsel %vm1999_vm4, %v7716_v46, %v1998_v1  ;;  %v12811_v49 = vld [vmem:[#allocation34_spill] sm:$0xff] }
 0x202   : > { %v12808_v19 = vand.u32 2147483648, %v12792_v38  ;;  %vm1300_vm9 = vcmp.gt.f32.partialorder %v12810_v3, %v12809_v52  ;;  %v1706_v60 = vmul.f32 0.002785687, %v7852_v63  ;;  %v2002_v29 = vand.u32 2147483648, %v7716_v46 }
 0x203   : > { %v1960_v44 = vmul.f32 %v7856_v45, %v7856_v45  ;;  %v1765_v25 = vmul.f32 %v12774_v34, %v1749_v10  ;;  %vm1261_vm0 = vcmp.eq.f32.partialorder %v12805_v16, 0.0  ;;  %vm1264_vm11 = vcmp.ne.f32.partialorder %v12805_v16, %v12805_v16  ;;  %v12814_v45 = vld [vmem:[#allocation24_spill] sm:$0xff] }
 0x204   : > { %v1228_v8 = vor.u32 %v12808_v19, %v1226_v56  ;;  %vm1353_vm12 = vcmp.lt.s32.totalorder %v12811_v49, 0  ;;  %vm2001_vm13 = vcmp.eq.f32.partialorder %v7716_v46, 0.0  ;;  %v1257_v56 = vsub.f32 3.1415927, %v1255_v37 }
 0x205   : > { %v1346_v33 = vadd.f32 %v1345_v50, %v7416_v18  ;;  %v1575_v55 = vmul.f32 %v1574_v9, %v7610_v54  ;;  %v7880_v1 = vsel %vm2001_vm13, %v2002_v29, %v2000_v62  ;;  %vm1263_vm14 = vcmp.ne.f32.partialorder %v12793_v58, %v12793_v58 }
 0x206   : > { %12812 = vst [vmem:[#allocation40_spill] sm:$0xff] %v7880_v1  ;;  %v1302_v34 = vsel %vm1300_vm9, %v1301_v22, %v1299_v27  ;;  %v1619_v10 = vadd.f32 0.1064488, %v1618_v6  ;;  %v1664_v19 = vadd.f32 -0.074975304, %v1663_v48  ;;  %5935 = vrsqrt.f32 %v7623_v61 }
 0x207   : > { %v1750_v15 = vsub.f32 3.1415927, %v1228_v8  ;;  %vm1347_vm15 = vcmp.gt.f32.partialorder %v12814_v45, %v12813_v32  ;;  %vm1350_vm5 = vcmp.lt.f32.partialorder %v12811_v49, 0.0  ;;  %v1707_v46 = vadd.f32 -0.015866, %v1706_v60 }
 0x208   : > { %v7888_v18 = vsub.f32 1.0, %v1960_v44  ;;  %v1781_v50 = vadd.f32 %v1765_v25, %v12786_v51  ;;  %vm1270_vm1 = vcmp.eq.s32.totalorder %v7167_v4, inf  ;;  %vm1308_vm2 = vcmp.eq.f32.partialorder %v12806_v30, 0.0  ;;  %v5932_v22 = vpop.eup %5931 }
 0x209   : > { %v7896_v27 = vsel %vm1353_vm12, 3.1415927, %v12717_v31  ;;  %v7899_v9 = vand.u32 2147483647, %v7880_v1  ;;  %v1258_v6 = vsel %vm1256_vm10, %v1257_v56, %v1255_v37  ;;  %v1304_v48 = vsub.f32 3.1415927, %v1302_v34 }
 0x20a   : > { %vm1311_vm6 = vcmp.ne.f32.partialorder %v12806_v30, %v12806_v30  ;;  %v1348_v51 = vsub.f32 1.5707964, %v1346_v33  ;;  %v1576_v62 = vadd.f32 0.19993454, %v1575_v55  ;;  %vm1269_vm8 = vcmp.eq.s32.totalorder %v7180_v23, inf  ;;  %v5934_v25 = vpop.eup %5933 }
 0x20b   : > { %v1620_v8 = vmul.f32 %v1619_v10, %v7682_v43  ;;  %v1665_v60 = vmul.f32 %v1664_v19, %v7733_v12  ;;  %v2104_v29 = vmin.f32 %v7815_v21, %v7807_v40  ;;  %v7911_v44 = vand.u32 2147483647, %v7664_v14  ;;  %v12815_v40 = vld [vmem:[#allocation43_spill] sm:$0xff] }
 0x20c   : > { %v1766_v37 = vmul.f32 %v12782_v11, %v1750_v15  ;;  %vm1310_vm10 = vcmp.ne.f32.partialorder %v12800_v39, %v12800_v39  ;;  %v7919_v56 = vsel %vm1350_vm5, 2.3561945, %v12718_v17  ;;  %vm1585_vm7 = vcmp.lt.f32.partialorder %v7102_v41, 0.0 }
 0x20d   : > { %v1708_v55 = vmul.f32 %v1707_v46, %v7852_v63  ;;  %v1797_v10 = vmul.f32 0.15915494, %v1781_v50  ;;  %vm1317_vm4 = vcmp.eq.s32.totalorder %v12810_v3, inf  ;;  %vm1588_vm9 = vcmp.lt.s32.totalorder %v7102_v41, 0 }
 0x20e   : > { %v7925_v19 = vmul.f32 %v5932_v22, %v2104_v29  ;;  %v2152_v11 = vmax.f32 %v7911_v44, %v7899_v9  ;;  %v1262_v15 = vsel %vm1261_vm0, %v7768_v24, %v1258_v6  ;;  %v1349_v1 = vsel %vm1347_vm15, %v1348_v51, %v1346_v33  ;;  %vm7948_vm0 = vmor %vm1263_vm14, %vm1264_vm11 }
 0x20f   : > { %v1577_v50 = vmul.f32 %v1576_v62, %v7610_v54  ;;  %v1305_v21 = vsel %vm1303_vm3, %v1304_v48, %v1302_v34  ;;  %vm1316_vm12 = vcmp.eq.s32.totalorder %v12809_v52, inf  ;;  %v1621_v22 = vadd.f32 -0.14207031, %v1620_v8  ;;  %vm1271_vm14 = vmand %vm1269_vm8, %vm1270_vm1 }
 0x210   : > { %v1666_v29 = vadd.f32 0.1064488, %v1665_v60  ;;  %v2054_v14 = vmul.f32 %v5934_v25, %v7562_v28  ;;  %v1782_v24 = vadd.f32 %v1766_v37, %v12792_v38  ;;  %v7955_v34 = vsel %vm1588_vm9, 3.1415927, %v12717_v31  ;;  %v5936_v48 = vpop.eup %5935 }
 0x211   : > { %v7960_v6 = vsel %vm1585_vm7, 2.3561945, %v12718_v17  ;;  %v1709_v38 = vadd.f32 0.04247222, %v1708_v55  ;;  %v1893_v51 = vmul.f32 %v1840_v5, %v1797_v10  ;;  %v1266_v62 = vsel %vm7948_vm0, nan, %v1262_v15 }
 0x212   : > { %vm1355_vm3 = vcmp.eq.f32.partialorder %v12815_v40, 0.0  ;;  %v7967_v8 = vmul.f32 %v7925_v19, %v7925_v19  ;;  %5937 = vrcp.f32 %v2152_v11  ;;  %v1309_v60 = vsel %vm1308_vm2, %v7819_v0, %v1305_v21  ;;  %vm7994_vm2 = vmor %vm1310_vm10, %vm1311_vm6 }
 0x213   : > { %v1351_v25 = vsub.f32 3.1415927, %v1349_v1  ;;  %vm1358_vm11 = vcmp.ne.f32.partialorder %v12815_v40, %v12815_v40  ;;  %v1578_v37 = vadd.f32 -0.33333147, %v1577_v50  ;;  %vm2055_vm13 = vcmp.eq.f32.partialorder %v7562_v28, inf }
 0x214   : > { %v1622_v5 = vmul.f32 %v1621_v22, %v7682_v43  ;;  %v1667_v55 = vmul.f32 %v1666_v29, %v7733_v12  ;;  %v2056_v10 = vsel %vm2055_vm13, %v7562_v28, %v2054_v14  ;;  %5939 = vrsqrt.f32 %v7854_v35  ;;  %vm1318_vm13 = vmand %vm1316_vm12, %vm1317_vm4 }
 0x215   : > { %v1798_v11 = vmul.f32 0.15915494, %v1782_v24  ;;  %vm1357_vm15 = vcmp.ne.f32.partialorder %v12811_v49, %v12811_v49  ;;  %v1710_v21 = vmul.f32 %v1709_v38, %v7852_v63  ;;  %v2058_v0 = vand.u32 2147483648, %v7562_v28  ;;  %v1844_v24 = vpop.permute.xlu1 %1843 }
 0x216   : > { %v2047_v15 = vmul.f32 %v5936_v48, %v7623_v61  ;;  %vm1364_vm1 = vcmp.eq.s32.totalorder %v12814_v45, inf  ;;  %vm1632_vm8 = vcmp.lt.f32.partialorder %v12768_v26, 0.0  ;;  %vm1635_vm9 = vcmp.lt.s32.totalorder %v12768_v26, 0  ;;  %vm8056_vm4 = vmor %vm1357_vm15, %vm1358_vm11 }
 0x217   : > { %v2109_v23 = vmul.f32 0.002785687, %v7967_v8  ;;  %vm2057_vm0 = vcmp.eq.f32.partialorder %v7562_v28, 0.0  ;;  %v1272_v14 = vsel %vm1271_vm14, %v7781_v36, %v1266_v62  ;;  %v1313_v50 = vsel %vm7994_vm2, nan, %v1309_v60 }
 0x218   : > { %v1579_v22 = vmul.f32 %v1578_v37, %v7610_v54  ;;  %v8007_v29 = vsel %vm2057_vm0, %v2058_v0, %v2056_v10  ;;  %v1352_v33 = vsel %vm1350_vm5, %v1351_v25, %v1349_v1  ;;  %vm1363_vm6 = vcmp.eq.s32.totalorder %v12813_v32, inf }
 0x219   : > { %v1623_v38 = vadd.f32 0.19993454, %v1622_v5  ;;  %v1668_v48 = vadd.f32 -0.14207031, %v1667_v55  ;;  %vm2048_vm10 = vcmp.eq.f32.partialorder %v7623_v61, inf  ;;  %v1913_v28 = vmul.f32 %v7012_v42, %v1893_v51  ;;  %vm1365_vm12 = vmand %vm1363_vm6, %vm1364_vm1 }
 0x21a   : > { %v1894_v36 = vmul.f32 %v1844_v24, %v1798_v11  ;;  %v1711_v54 = vadd.f32 -0.074975304, %v1710_v21  ;;  %v2049_v62 = vsel %vm2048_vm10, %v7623_v61, %v2047_v15  ;;  %v1319_v60 = vsel %vm1318_vm13, %v7832_v13, %v1313_v50 }
 0x21b   : > { %v2110_v1 = vadd.f32 -0.015866, %v2109_v23  ;;  %v8021_v25 = vand.u32 2147483647, %v8007_v29  ;;  %v2051_v37 = vand.u32 2147483648, %v7623_v61  ;;  %v1356_v51 = vsel %vm1355_vm3, %v7896_v27, %v1352_v33 }
 0x21c   : > { %v1273_v5 = vand.u32 2147483647, %v1272_v14  ;;  %v1580_v3 = vmul.f32 %v1579_v22, %v7578_v53  ;;  %vm2050_vm5 = vcmp.eq.f32.partialorder %v7623_v61, 0.0  ;;  %v5938_v52 = vpop.eup %5937  ;;  %v1624_v55 = vmul.f32 %v1623_v38, %v7682_v43 }
 0x21d   : > { %12820 = vst [vmem:[#allocation42_spill] sm:$0xff] %v8021_v25  ;;  %v1669_v13 = vmul.f32 %v1668_v48, %v7733_v12  ;;  %v8032_v10 = vand.u32 2147483647, %v7480_v2  ;;  %v8034_v11 = vsel %vm2050_vm5, %v2051_v37, %v2049_v62  ;;  %v1320_v21 = vand.u32 2147483647, %v1319_v60 }
 0x21e   : > { %12821 = vst [vmem:[#allocation41_spill] sm:$0xff] %v8034_v11  ;;  %v8039_v0 = vsel %vm1635_vm9, 3.1415927, %v12717_v31  ;;  %v8044_v61 = vsel %vm1632_vm8, 2.3561945, %v12718_v17  ;;  %v2151_v27 = vmin.f32 %v7911_v44, %v7899_v9  ;;  %v5940_v15 = vpop.eup %5939  ;;  %v1712_v14 = vmul.f32 %v1711_v54, %v7852_v63 }
 0x21f   : > { %v8048_v4 = vclamps-f32 %v1913_v28, 0.9999999  ;;  %v2111_v50 = vmul.f32 %v2110_v1, %v7967_v8  ;;  %v2528_v22 = vmax.f32 %v8032_v10, %v8021_v25  ;;  %v1360_v24 = vsel %vm8056_vm4, nan, %v1356_v51 }
 0x220   : > { %v1581_v33 = vadd.f32 %v1580_v3, %v7578_v53  ;;  %v8067_v38 = vmul.f32 %v5938_v52, %v2151_v27  ;;  %v8070_v48 = vand.u32 2147483647, %v8034_v11  ;;  %v1914_v28 = vmul.f32 %v7012_v42, %v1894_v36  ;;  %v12829_v52 = vld [vmem:[#allocation19_spill] sm:$0xff]  ;;  %v12835_v11 = vld [vmem:[#allocation17_spill] sm:$0xff] }
 0x221   : > { %12822 = vst [vmem:[#allocation34_spill] sm:$0xff] %v8048_v4  ;;  %v12826_v62 = vand.u32 2147483648, %v12805_v16  ;;  %v1625_v60 = vadd.f32 -0.33333147, %v1624_v55  ;;  %v1670_v1 = vadd.f32 0.19993454, %v1669_v13  ;;  %v2061_v51 = vmul.f32 %v5940_v15, %v7854_v35 }
 0x222   : > { %12825 = vst [vmem:[#allocation14_spill] sm:$0xff] %v8070_v48  ;;  %v12827_v37 = vand.u32 2147483648, %v12806_v30  ;;  %v8082_v53 = vand.u32 2147483647, %v7564_v47  ;;  %5941 = vrsqrt.f32 %v7771_v7  ;;  %v1366_v36 = vsel %vm1365_vm12, %v7919_v56, %v1360_v24  ;;  %v12830_v55 = vld [vmem:[#allocation15_spill] sm:$0xff]  ;;  %v1848_v47 = vpop.permute.xlu1 %1847 }
 0x223   : > { %v1275_v54 = vor.u32 %v12826_v62, %v1273_v5  ;;  %v1713_v5 = vadd.f32 0.1064488, %v1712_v14  ;;  %v2112_v3 = vadd.f32 0.04247222, %v2111_v50  ;;  %5943 = vrcp.f32 %v2528_v22 }
 0x224   : > { %v1322_v46 = vor.u32 %v12827_v37, %v1320_v21  ;;  %12828 = vst [vmem:[#allocation24_spill] sm:$0xff] %v8082_v53  ;;  %vm1582_vm3 = vcmp.gt.f32.partialorder %v12830_v55, %v12829_v52  ;;  %v1583_v13 = vsub.f32 1.5707964, %v1581_v33  ;;  %v8091_v32 = vmul.f32 %v8067_v38, %v8067_v38 }
 0x225   : > { %v2481_v45 = vmax.f32 %v8082_v53, %v8070_v48  ;;  %v1751_v21 = vsub.f32 3.1415927, %v1275_v54  ;;  %v1626_v27 = vmul.f32 %v1625_v60, %v7682_v43  ;;  %v1671_v15 = vmul.f32 %v1670_v1, %v7733_v12  ;;  %v12832_v1 = vld [vmem:[#allocation22_spill] sm:$0xff] }
 0x226   : > { %vm2062_vm11 = vcmp.eq.f32.partialorder %v7854_v35, inf  ;;  %v1961_v56 = vmul.f32 %v8048_v4, %v8048_v4  ;;  %v1752_v23 = vsub.f32 3.1415927, %v1322_v46  ;;  %v1367_v14 = vand.u32 2147483647, %v1366_v36 }
 0x227   : > { %v2063_v50 = vsel %vm2062_vm11, %v7854_v35, %v2061_v51  ;;  %v8101_v22 = vclamps-f32 %v1914_v28, 0.9999999  ;;  %v1714_v24 = vmul.f32 %v1713_v5, %v7852_v63  ;;  %v2113_v62 = vmul.f32 %v2112_v3, %v7967_v8 }
 0x228   : > { %v2065_v54 = vand.u32 2147483648, %v7854_v35  ;;  %v1584_v43 = vsel %vm1582_vm3, %v1583_v13, %v1581_v33  ;;  %v2156_v60 = vmul.f32 0.002785687, %v8091_v32  ;;  %5945 = vrcp.f32 %v2481_v45 }
 0x229   : > { %12831 = vst [vmem:[#allocation43_spill] sm:$0xff] %v8101_v22  ;;  %vm2064_vm14 = vcmp.eq.f32.partialorder %v7854_v35, 0.0  ;;  %v1767_v46 = vmul.f32 %v12793_v58, %v1751_v21  ;;  %v1627_v28 = vmul.f32 %v1626_v27, %v12832_v1  ;;  %v1672_v37 = vadd.f32 -0.33333147, %v1671_v15  ;;  %v12836_v27 = vld [vmem:[#allocation21_spill] sm:$0xff]  ;;  %v12837_v15 = vld [vmem:[#allocation20_spill] sm:$0xff] }
 0x22a   : > { %v8113_v51 = vsel %vm2064_vm14, %v2065_v54, %v2063_v50  ;;  %v1768_v36 = vmul.f32 %v12800_v39, %v1752_v23  ;;  %v12834_v5 = vand.u32 2147483648, %v12815_v40  ;;  %vm1590_vm15 = vcmp.eq.f32.partialorder %v12835_v11, 0.0  ;;  %v12838_v39 = vld [vmem:[#allocation23_spill] sm:$0xff] }
 0x22b   : > { %12833 = vst [vmem:[#allocation19_spill] sm:$0xff] %v8113_v51  ;;  %v1586_v13 = vsub.f32 3.1415927, %v1584_v43  ;;  %vm1593_vm2 = vcmp.ne.f32.partialorder %v12835_v11, %v12835_v11  ;;  %v1715_v35 = vadd.f32 -0.14207031, %v1714_v24  ;;  %v8122_v21 = vsub.f32 1.0, %v1961_v56 }
 0x22c   : > { %v1369_v3 = vor.u32 %v12834_v5, %v1367_v14  ;;  %v2114_v58 = vadd.f32 -0.074975304, %v2113_v62  ;;  %v5942_v45 = vpop.eup %5941  ;;  %vm1629_vm1 = vcmp.gt.f32.partialorder %v12837_v15, %v12836_v27  ;;  %v2157_v50 = vadd.f32 -0.015866, %v2156_v60 }
 0x22d   : > { %v8128_v14 = vand.u32 2147483647, %v8113_v51  ;;  %v5944_v54 = vpop.eup %5943  ;;  %v1962_v5 = vmul.f32 %v8101_v22, %v8101_v22  ;;  %v1783_v33 = vadd.f32 %v1767_v46, %v12805_v16  ;;  %vm1592_vm9 = vcmp.ne.f32.partialorder %v7102_v41, %v7102_v41  ;;  %v12841_v46 = vld [vmem:[#allocation18_spill] sm:$0xff] }
 0x22e   : > { %v1628_v56 = vadd.f32 %v1627_v28, %v12832_v1  ;;  %v1673_v24 = vmul.f32 %v1672_v37, %v7733_v12  ;;  %v1784_v62 = vadd.f32 %v1768_v36, %v12806_v30  ;;  %v1753_v23 = vsub.f32 3.1415927, %v1369_v3  ;;  %vm8186_vm4 = vmor %vm1592_vm9, %vm1593_vm2 }
 0x22f   : > { %12839 = vst [vmem:[#allocation15_spill] sm:$0xff] %v8128_v14  ;;  %v2527_v60 = vmin.f32 %v8032_v10, %v8021_v25  ;;  %v8141_v51 = vand.u32 2147483647, %v7792_v59  ;;  %v1587_v16 = vsel %vm1585_vm7, %v1586_v13, %v1584_v43  ;;  %vm1599_vm0 = vcmp.eq.s32.totalorder %v12830_v55, inf }
 0x230   : > { %vm1679_vm6 = vcmp.lt.f32.partialorder %v12841_v46, 0.0  ;;  %v1716_v1 = vmul.f32 %v1715_v35, %v7852_v63  ;;  %v2115_v12 = vmul.f32 %v2114_v58, %v7967_v8  ;;  %v2068_v30 = vmul.f32 %v5942_v45, %v7771_v7 }
 0x231   : > { %12840 = vst [vmem:[#allocation22_spill] sm:$0xff] %v8141_v51  ;;  %vm1682_vm10 = vcmp.lt.s32.totalorder %v12841_v46, 0  ;;  %v2158_v28 = vmul.f32 %v2157_v50, %v8091_v32  ;;  %v8152_v37 = vmul.f32 %v5944_v54, %v2527_v60  ;;  %v2575_v36 = vmax.f32 %v8141_v51, %v8128_v14 }
 0x232   : > { %v8156_v43 = vsub.f32 1.0, %v1962_v5  ;;  %v1799_v3 = vmul.f32 0.15915494, %v1783_v33  ;;  %vm1598_vm7 = vcmp.eq.s32.totalorder %v12829_v52, inf  ;;  %v1630_v13 = vsub.f32 1.5707964, %v1628_v56  ;;  %v5946_v58 = vpop.eup %5945 }
 0x233   : > { %v1674_v35 = vmul.f32 %v1673_v24, %v7703_v20  ;;  %v1800_v59 = vmul.f32 0.15915494, %v1784_v62  ;;  %v1769_v45 = vmul.f32 %v12811_v49, %v1753_v23  ;;  %v1591_v50 = vsel %vm1590_vm15, %v7955_v34, %v1587_v16  ;;  %v1852_v23 = vpop.permute.xlu1 %1851  ;;  %vm1600_vm15 = vmand %vm1598_vm7, %vm1599_vm0 }
 0x234   : > { %vm2069_vm13 = vcmp.eq.f32.partialorder %v7771_v7, inf  ;;  %v1717_v54 = vadd.f32 0.19993454, %v1716_v1  ;;  %v2116_v60 = vadd.f32 0.1064488, %v2115_v12  ;;  %v2480_v33 = vmin.f32 %v8082_v53, %v8070_v48 }
 0x235   : > { %v2070_v5 = vsel %vm2069_vm13, %v7771_v7, %v2068_v30  ;;  %v2159_v25 = vadd.f32 0.04247222, %v2158_v28  ;;  %v8170_v24 = vmul.f32 %v8152_v37, %v8152_v37  ;;  %5947 = vrcp.f32 %v2575_v36 }
 0x236   : > { %v2072_v49 = vand.u32 2147483648, %v7771_v7  ;;  %v1631_v34 = vsel %vm1629_vm1, %v1630_v13, %v1628_v56  ;;  %v1675_v62 = vadd.f32 %v1674_v35, %v7703_v20  ;;  %v8177_v16 = vmul.f32 %v5946_v58, %v2480_v33  ;;  %v12849_v33 = vld [vmem:[#allocation27_spill] sm:$0xff] }
 0x237   : > { %vm2071_vm5 = vcmp.eq.f32.partialorder %v7771_v7, 0.0  ;;  %v1895_v1 = vmul.f32 %v1848_v47, %v1799_v3  ;;  %v1896_v12 = vmul.f32 %v1852_v23, %v1800_v59  ;;  %vm1637_vm12 = vcmp.eq.f32.partialorder %v12838_v39, 0.0  ;;  %v12846_v7 = vld [vmem:[#allocation37_spill] sm:$0xff]  ;;  %v1856_v23 = vpop.permute.xlu1 %1855 }
 0x238   : > { %12842 = vst [vmem:[#allocation17_spill] sm:$0xff] %v8177_v16  ;;  %v8191_v56 = vsel %vm2071_vm5, %v2072_v49, %v2070_v5  ;;  %5949 = vrsqrt.f32 %v7888_v18  ;;  %v1785_v20 = vadd.f32 %v1769_v45, %v12815_v40  ;;  %v1595_v47 = vsel %vm8186_vm4, nan, %v1591_v50  ;;  %v12847_v59 = vld [vmem:[#allocation13_spill] sm:$0xff] }
 0x239   : > { %12845 = vst [vmem:[#allocation21_spill] sm:$0xff] %v8191_v56  ;;  %vm1640_vm3 = vcmp.ne.f32.partialorder %v12838_v39, %v12838_v39  ;;  %vm1676_vm11 = vcmp.gt.f32.partialorder %v12847_v59, %v12846_v7  ;;  %v1718_v28 = vmul.f32 %v1717_v54, %v7852_v63  ;;  %v1633_v36 = vsub.f32 3.1415927, %v1631_v34 }
 0x23a   : > { %v2117_v3 = vmul.f32 %v2116_v60, %v7967_v8  ;;  %v2160_v13 = vmul.f32 %v2159_v25, %v8091_v32  ;;  %v2532_v35 = vmul.f32 0.002785687, %v8170_v24  ;;  %vm1639_vm14 = vcmp.ne.f32.partialorder %v12768_v26, %v12768_v26 }
 0x23b   : > { %v1677_v40 = vsub.f32 1.5707964, %v1675_v62  ;;  %v8210_v58 = vsel %vm1682_vm10, 3.1415927, %v12717_v31  ;;  %v8214_v45 = vmul.f32 %v8177_v16, %v8177_v16  ;;  %v8217_v50 = vand.u32 2147483647, %v8191_v56  ;;  %vm8277_vm7 = vmor %vm1639_vm14, %vm1640_vm3 }
 0x23c   : > { %v1915_v25 = vmul.f32 %v7012_v42, %v1895_v1  ;;  %v1916_v54 = vmul.f32 %v7012_v42, %v1896_v12  ;;  %v8228_v60 = vsel %vm1679_vm6, 2.3561945, %v12718_v17  ;;  %v1801_v49 = vmul.f32 0.15915494, %v1785_v20  ;;  %v12851_v20 = vld [vmem:[#allocation12_spill] sm:$0xff] }
 0x23d   : > { %12848 = vst [vmem:[#allocation20_spill] sm:$0xff] %v8217_v50  ;;  %v1601_v30 = vsel %vm1600_vm15, %v7960_v6, %v1595_v47  ;;  %v1719_v56 = vadd.f32 -0.33333147, %v1718_v28  ;;  %v8233_v1 = vand.u32 2147483647, %v7707_v57  ;;  %v1634_v55 = vsel %vm1632_vm8, %v1633_v36, %v1631_v34 }
 0x23e   : > { %vm1646_vm2 = vcmp.eq.s32.totalorder %v12837_v15, inf  ;;  %v2118_v52 = vadd.f32 -0.14207031, %v2117_v3  ;;  %v2161_v12 = vadd.f32 -0.074975304, %v2160_v13  ;;  %v1678_v5 = vsel %vm1676_vm11, %v1677_v40, %v1675_v62 }
 0x23f   : > { %12850 = vst [vmem:[#allocation23_spill] sm:$0xff] %v8233_v1  ;;  %v2533_v48 = vadd.f32 -0.015866, %v2532_v35  ;;  %vm1729_vm1 = vcmp.lt.s32.totalorder %v12851_v20, 0  ;;  %v2485_v6 = vmul.f32 0.002785687, %v8214_v45  ;;  %v2622_v47 = vmax.f32 %v8233_v1, %v8217_v50  ;;  %v5948_v28 = vpop.eup %5947 }
 0x240   : > { %v8245_v57 = vclamps-f32 %v1915_v25, 0.9999999  ;;  %v8247_v34 = vclamps-f32 %v1916_v54, 0.9999999  ;;  %v1897_v36 = vmul.f32 %v1856_v23, %v1801_v49  ;;  %v1602_v3 = vand.u32 2147483647, %v1601_v30 }
 0x241   : > { %vm1645_vm8 = vcmp.eq.s32.totalorder %v12836_v27, inf  ;;  %v1638_v62 = vsel %vm1637_vm12, %v8039_v0, %v1634_v55  ;;  %vm1684_vm9 = vcmp.eq.f32.partialorder %v12849_v33, 0.0  ;;  %vm1687_vm0 = vcmp.ne.f32.partialorder %v12849_v33, %v12849_v33 }
 0x242   : > { %12852 = vst [vmem:[#allocation18_spill] sm:$0xff] %v8245_v57  ;;  %12853 = vst [vmem:[#allocation37_spill] sm:$0xff] %v8247_v34  ;;  %v1720_v13 = vmul.f32 %v1719_v56, %v7852_v63  ;;  %v2574_v35 = vmin.f32 %v8141_v51, %v8128_v14  ;;  %5951 = vrsqrt.f32 %v8122_v21  ;;  %v5950_v40 = vpop.eup %5949  ;;  %v1680_v25 = vsub.f32 3.1415927, %v1678_v5 }
 0x243   : > { %v2119_v54 = vmul.f32 %v2118_v52, %v7967_v8  ;;  %v2162_v49 = vmul.f32 %v2161_v12, %v8091_v32  ;;  %v2534_v0 = vmul.f32 %v2533_v48, %v8170_v24  ;;  %vm1686_vm10 = vcmp.ne.f32.partialorder %v12841_v46, %v12841_v46  ;;  %vm1647_vm3 = vmand %vm1645_vm8, %vm1646_vm2 }
 0x244   : > { %v2486_v23 = vadd.f32 -0.015866, %v2485_v6  ;;  %v8265_v30 = vmul.f32 %v5948_v28, %v2574_v35  ;;  %5953 = vrcp.f32 %v2622_v47  ;;  %v2005_v63 = vmul.f32 %v5950_v40, %v7888_v18  ;;  %v12858_v6 = vld [vmem:[#allocation30_spill] sm:$0xff]  ;;  %vm8343_vm11 = vmor %vm1686_vm10, %vm1687_vm0 }
 0x245   : > { %v1917_v56 = vmul.f32 %v7012_v42, %v1897_v36  ;;  %v12855_v55 = vand.u32 2147483648, %v12835_v11  ;;  %vm2006_vm13 = vcmp.eq.f32.partialorder %v7888_v18, inf  ;;  %v2009_v52 = vand.u32 2147483648, %v7888_v18 }
 0x246   : > { %12854 = vst [vmem:[#allocation13_spill] sm:$0xff] %v8265_v30  ;;  %v1642_v12 = vsel %vm8277_vm7, nan, %v1638_v62  ;;  %vm1693_vm5 = vcmp.eq.s32.totalorder %v12847_v59, inf  ;;  %v1721_v47 = vmul.f32 %v1720_v13, %v12858_v6  ;;  %v2007_v28 = vsel %vm2006_vm13, %v7888_v18, %v2005_v63 }
 0x247   : > { %v1604_v14 = vor.u32 %v12855_v55, %v1602_v3  ;;  %vm2008_vm4 = vcmp.eq.f32.partialorder %v7888_v18, 0.0  ;;  %v1681_v36 = vsel %vm1679_vm6, %v1680_v25, %v1678_v5  ;;  %v2163_v3 = vadd.f32 0.1064488, %v2162_v49 }
 0x248   : > { %v2535_v35 = vadd.f32 0.04247222, %v2534_v0  ;;  %v8291_v40 = vsel %vm2008_vm4, %v2009_v52, %v2007_v28  ;;  %vm1692_vm12 = vcmp.eq.s32.totalorder %v12846_v7, inf  ;;  %v2120_v55 = vadd.f32 0.19993454, %v2119_v54 }
 0x249   : > { %12859 = vst [vmem:[#allocation27_spill] sm:$0xff] %v8291_v40  ;;  %v2487_v62 = vmul.f32 %v2486_v23, %v8214_v45  ;;  %v8297_v48 = vmul.f32 %v8265_v30, %v8265_v30  ;;  %v8300_v13 = vand.u32 2147483647, %v8291_v40  ;;  %v1963_v18 = vmul.f32 %v8245_v57, %v8245_v57  ;;  %v12862_v23 = vld [vmem:[#allocation39_spill] sm:$0xff]  ;;  %vm1694_vm14 = vmand %vm1692_vm12, %vm1693_vm5 }
 0x24a   : > { %v8304_v5 = vclamps-f32 %v1917_v56, 0.9999999  ;;  %v1758_v25 = vsub.f32 3.1415927, %v1604_v14  ;;  %vm1726_vm6 = vcmp.lt.f32.partialorder %v12851_v20, 0.0  ;;  %v1964_v54 = vmul.f32 %v8247_v34, %v8247_v34 }
 0x24b   : > { %12860 = vst [vmem:[#allocation12_spill] sm:$0xff] %v8300_v13  ;;  %v1722_v49 = vadd.f32 %v1721_v47, %v12858_v6  ;;  %v8317_v0 = vsel %vm1729_vm1, 3.1415927, %v12717_v31  ;;  %v8320_v63 = vand.u32 2147483647, %v12862_v23  ;;  %v1648_v14 = vsel %vm1647_vm3, %v8044_v61, %v1642_v12 }
 0x24c   : > { %12861 = vst [vmem:[#allocation30_spill] sm:$0xff] %v8304_v5  ;;  %v1685_v56 = vsel %vm1684_vm9, %v8210_v58, %v1681_v36  ;;  %v2164_v15 = vmul.f32 %v2163_v3, %v8091_v32  ;;  %v2536_v27 = vmul.f32 %v2535_v35, %v8170_v24  ;;  %v5952_v52 = vpop.eup %5951  ;;  %v2121_v6 = vmul.f32 %v2120_v55, %v7967_v8 }
 0x24d   : > { %v2488_v47 = vadd.f32 0.04247222, %v2487_v62  ;;  %v2579_v28 = vmul.f32 0.002785687, %v8297_v48  ;;  %v2199_v40 = vmax.f32 %v8320_v63, %v8300_v13  ;;  %v8332_v23 = vsub.f32 1.0, %v1963_v18 }
 0x24e   : > { %v1965_v61 = vmul.f32 %v8304_v5, %v8304_v5  ;;  %v1774_v58 = vmul.f32 %v7102_v41, %v1758_v25  ;;  %v8350_v36 = vsel %vm1726_vm6, 2.3561945, %v12718_v17  ;;  %v5954_v3 = vpop.eup %5953  ;;  %v8352_v35 = vsub.f32 1.0, %v1964_v54 }
 0x24f   : > { %v1649_v55 = vand.u32 2147483647, %v1648_v14  ;;  %v1689_v41 = vsel %vm8343_vm11, nan, %v1685_v56  ;;  %v1724_v62 = vsub.f32 1.5707964, %v1722_v49  ;;  %v2621_v51 = vmin.f32 %v8233_v1, %v8217_v50  ;;  %v12865_v14 = vld [vmem:[#allocation25_spill] sm:$0xff] }
 0x250   : > { %v2165_v18 = vadd.f32 -0.14207031, %v2164_v15  ;;  %v2537_v25 = vadd.f32 -0.074975304, %v2536_v27  ;;  %v2012_v5 = vmul.f32 %v5952_v52, %v8122_v21  ;;  %v2122_v34 = vadd.f32 -0.33333147, %v2121_v6 }
 0x251   : > { %v2489_v30 = vmul.f32 %v2488_v47, %v8214_v45  ;;  %v2580_v53 = vadd.f32 -0.015866, %v2579_v28  ;;  %5955 = vrcp.f32 %v2199_v40  ;;  %v8360_v16 = vsub.f32 1.0, %v1965_v61  ;;  %v12866_v56 = vld [vmem:[#allocation38_spill] sm:$0xff]  ;;  %v12868_v40 = vld [vmem:[#allocation16_spill] sm:$0xff]  ;;  %v12875_v50 = vld [vmem:[#allocation33_spill] sm:$0xff] }
 0x252   : > { %v1790_v54 = vadd.f32 %v1774_v58, %v12835_v11  ;;  %vm1723_vm15 = vcmp.gt.f32.partialorder %v12866_v56, %v12865_v14  ;;  %v8369_v15 = vmul.f32 %v5954_v3, %v2621_v51  ;;  %v12867_v27 = vand.u32 2147483648, %v12838_v39  ;;  %v12869_v28 = vld [vmem:[#allocation32_spill] sm:$0xff] }
 0x253   : > { %v1695_v6 = vsel %vm1694_vm14, %v8228_v60, %v1689_v41  ;;  %vm2132_vm2 = vcmp.lt.s32.totalorder %v12868_v40, 0  ;;  %vm2013_vm1 = vcmp.eq.f32.partialorder %v8122_v21, inf  ;;  %v1725_v11 = vsel %vm1723_vm15, %v1724_v62, %v1722_v49 }
 0x254   : > { %v1651_v52 = vor.u32 %v12867_v27, %v1649_v55  ;;  %v2166_v59 = vmul.f32 %v2165_v18, %v8091_v32  ;;  %v2538_v7 = vmul.f32 %v2537_v25, %v8170_v24  ;;  %v2014_v47 = vsel %vm2013_vm1, %v8122_v21, %v2012_v5  ;;  %v12871_v27 = vld [vmem:[#allocation31_spill] sm:$0xff] }
 0x255   : > { %vm1731_vm8 = vcmp.eq.f32.partialorder %v12869_v28, 0.0  ;;  %v2123_v51 = vmul.f32 %v2122_v34, %v7967_v8  ;;  %v2490_v61 = vadd.f32 -0.074975304, %v2489_v30  ;;  %v2581_v58 = vmul.f32 %v2580_v53, %v8297_v48  ;;  %v1876_v53 = vpop.permute.xlu0 %1875 }
 0x256   : > { %v2016_v60 = vand.u32 2147483648, %v8122_v21  ;;  %v1806_v12 = vmul.f32 0.15915494, %v1790_v54  ;;  %vm2129_vm9 = vcmp.lt.f32.partialorder %v12868_v40, 0.0  ;;  %v8386_v49 = vmul.f32 %v8369_v15, %v8369_v15 }
 0x257   : > { %vm2015_vm0 = vcmp.eq.f32.partialorder %v8122_v21, 0.0  ;;  %v1759_v3 = vsub.f32 3.1415927, %v1651_v52  ;;  %v1696_v5 = vand.u32 2147483647, %v1695_v6  ;;  %vm1733_vm10 = vcmp.ne.f32.partialorder %v12851_v20, %v12851_v20 }
 0x258   : > { %v1727_v55 = vsub.f32 3.1415927, %v1725_v11  ;;  %v8391_v8 = vsel %vm2015_vm0, %v2016_v60, %v2014_v47  ;;  %vm1734_vm7 = vcmp.ne.f32.partialorder %v12869_v28, %v12869_v28  ;;  %vm1740_vm13 = vcmp.eq.s32.totalorder %v12866_v56, inf }
 0x259   : > { %12870 = vst [vmem:[#allocation25_spill] sm:$0xff] %v8391_v8  ;;  %v8399_v34 = vsel %vm2132_vm2, 3.1415927, %v12717_v31  ;;  %v2167_v21 = vadd.f32 0.19993454, %v2166_v59  ;;  %v2124_v41 = vmul.f32 %v2123_v51, %v7925_v19  ;;  %v2491_v18 = vmul.f32 %v2490_v61, %v8214_v45 }
 0x25a   : > { %v2539_v30 = vadd.f32 0.1064488, %v2538_v7  ;;  %v8405_v62 = vsel %vm2129_vm9, 2.3561945, %v12718_v17  ;;  %v2582_v25 = vadd.f32 0.04247222, %v2581_v58  ;;  %v1902_v7 = vmul.f32 %v1876_v53, %v1806_v12 }
 0x25b   : > { %vm1739_vm5 = vcmp.eq.s32.totalorder %v12865_v14, inf  ;;  %vm2179_vm4 = vcmp.lt.s32.totalorder %v12871_v27, 0  ;;  %v2626_v52 = vmul.f32 0.002785687, %v8386_v49  ;;  %v8413_v6 = vand.u32 2147483647, %v8391_v8  ;;  %v5956_v59 = vpop.eup %5955 }
 0x25c   : > { %v1775_v47 = vmul.f32 %v12768_v26, %v1759_v3  ;;  %v12873_v51 = vand.u32 2147483648, %v12849_v33  ;;  %v1728_v61 = vsel %vm1726_vm6, %v1727_v55, %v1725_v11  ;;  %v12874_v58 = vld [vmem:[#allocation28_spill] sm:$0xff]  ;;  %v2168_v54 = vmul.f32 %v2167_v21, %v8091_v32  ;;  %vm8452_vm6 = vmor %vm1733_vm10, %vm1734_vm7 }
 0x25d   : > { %12872 = vst [vmem:[#allocation38_spill] sm:$0xff] %v8413_v6  ;;  %vm2126_vm12 = vcmp.gt.f32.partialorder %v12875_v50, %v12874_v58  ;;  %v2540_v1 = vmul.f32 %v2539_v30, %v8170_v24  ;;  %v2198_v8 = vmin.f32 %v8320_v63, %v8300_v13  ;;  %v8427_v12 = vand.u32 2147483647, %v8048_v4  ;;  %v12876_v4 = vld [vmem:[#allocation36_spill] sm:$0xff]  ;;  %vm1741_vm14 = vmand %vm1739_vm5, %vm1740_vm13 }
 0x25e   : > { %v1698_v60 = vor.u32 %v12873_v51, %v1696_v5  ;;  %v2125_v26 = vadd.f32 %v2124_v41, %v7925_v19  ;;  %v2492_v3 = vadd.f32 0.1064488, %v2491_v18  ;;  %v2583_v5 = vmul.f32 %v2582_v25, %v8297_v48 }
 0x25f   : > { %5957 = vrsqrt.f32 %v8156_v43  ;;  %v1732_v11 = vsel %vm1731_vm8, %v8317_v0, %v1728_v61  ;;  %v2627_v55 = vadd.f32 -0.015866, %v2626_v52  ;;  %v8435_v53 = vmul.f32 %v5956_v59, %v2198_v8 }
 0x260   : > { %v2246_v21 = vmax.f32 %v8427_v12, %v8413_v6  ;;  %v1791_v30 = vadd.f32 %v1775_v47, %v12838_v39  ;;  %v1760_v51 = vsub.f32 3.1415927, %v1698_v60  ;;  %v8444_v41 = vsel %vm2179_vm4, 3.1415927, %v12717_v31 }
 0x261   : > { %v2169_v8 = vadd.f32 -0.33333147, %v2168_v54  ;;  %vm2176_vm3 = vcmp.lt.f32.partialorder %v12871_v27, 0.0  ;;  %v2541_v39 = vadd.f32 -0.14207031, %v2540_v1  ;;  %vm2555_vm11 = vcmp.lt.s32.totalorder %v7480_v2, 0 }
 0x262   : > { %v1736_v18 = vsel %vm8452_vm6, nan, %v1732_v11  ;;  %v2127_v25 = vsub.f32 1.5707964, %v2125_v26  ;;  %v2493_v52 = vmul.f32 %v2492_v3, %v8214_v45  ;;  %v2584_v59 = vadd.f32 -0.074975304, %v2583_v5 }
 0x263   : > { %v1922_v47 = vmul.f32 %v7012_v42, %v1902_v7  ;;  %v2628_v60 = vmul.f32 %v2627_v55, %v8386_v49  ;;  %v8465_v61 = vmul.f32 %v8435_v53, %v8435_v53  ;;  %5959 = vrcp.f32 %v2246_v21 }
 0x264   : > { %v1807_v1 = vmul.f32 0.15915494, %v1791_v30  ;;  %v1776_v54 = vmul.f32 %v12841_v46, %v1760_v51  ;;  %v8475_v7 = vsel %vm2176_vm3, 2.3561945, %v12718_v17  ;;  %vm2552_vm15 = vcmp.lt.f32.partialorder %v7480_v2, 0.0  ;;  %v12880_v30 = vld [vmem:[#allocation11_spill] sm:$0xff] }
 0x265   : > { %v1742_v3 = vsel %vm1741_vm14, %v8350_v36, %v1736_v18  ;;  %v2170_v5 = vmul.f32 %v2169_v8, %v8091_v32  ;;  %v2542_v11 = vmul.f32 %v2541_v39, %v8170_v24  ;;  %v8484_v46 = vsel %vm2555_vm11, 3.1415927, %v12717_v31  ;;  %v1880_v36 = vpop.permute.xlu0 %1879  ;;  %v6135_v32 = vld [vmem:[%s6367_s9] sm:$0xf] }
 0x266   : > { %v2128_v14 = vsel %vm2126_vm12, %v2127_v25, %v2125_v26  ;;  %v2494_v56 = vadd.f32 -0.14207031, %v2493_v52  ;;  %v2585_v55 = vmul.f32 %v2584_v59, %v8297_v48  ;;  %5961 = vrsqrt.f32 %v8332_v23 }
 0x267   : > { %v8491_v21 = vclamps-f32 %v1922_v47, 0.9999999  ;;  %v12881_v51 = vsub.s32 2, %v12880_v30  ;;  %v2629_v8 = vadd.f32 0.04247222, %v2628_v60  ;;  %v1903_v19 = vmul.f32 %v1880_v36, %v1807_v1 }
 0x268   : > { %v2203_v39 = vmul.f32 0.002785687, %v8465_v61  ;;  %v1792_v26 = vadd.f32 %v1776_v54, %v12849_v33  ;;  %v1743_v25 = vand.u32 2147483647, %v1742_v3  ;;  %vm2134_vm2 = vcmp.eq.f32.partialorder %v12876_v4, 0.0 }
 0x269   : > { %12879 = vst [vmem:[#allocation16_spill] sm:$0xff] %v8491_v21  ;;  %v8496_v0 = vrot.slane %v6135_v32, %v12881_v51  ;;  %v5958_v18 = vpop.eup %5957  ;;  %vm2137_vm1 = vcmp.ne.f32.partialorder %v12876_v4, %v12876_v4  ;;  %v8506_v52 = vsel %vm2552_vm15, 2.3561945, %v12718_v17  ;;  %v2130_v59 = vsub.f32 3.1415927, %v2128_v14 }
 0x26a   : > { %v2171_v47 = vmul.f32 %v2170_v5, %v8067_v38  ;;  %v2543_v60 = vadd.f32 0.19993454, %v2542_v11  ;;  %v2019_v32 = vmul.f32 %v5958_v18, %v8156_v43  ;;  %vm2136_vm8 = vcmp.ne.f32.partialorder %v12868_v40, %v12868_v40 }
 0x26b   : > { %v2495_v33 = vmul.f32 %v2494_v56, %v8214_v45  ;;  %v2586_v1 = vadd.f32 0.1064488, %v2585_v55  ;;  %vm2020_vm0 = vcmp.eq.f32.partialorder %v8156_v43, inf  ;;  %v2023_v54 = vand.u32 2147483648, %v8156_v43  ;;  %vm8563_vm5 = vmor %vm2136_vm8, %vm2137_vm1 }
 0x26c   : > { %v2630_v3 = vmul.f32 %v2629_v8, %v8386_v49  ;;  %v2204_v36 = vadd.f32 -0.015866, %v2203_v39  ;;  %v2021_v51 = vsel %vm2020_vm0, %v8156_v43, %v2019_v32  ;;  %vm2022_vm10 = vcmp.eq.f32.partialorder %v8156_v43, 0.0 }
 0x26d   : > { %v1923_v5 = vmul.f32 %v7012_v42, %v1903_v19  ;;  %v1808_v11 = vmul.f32 0.15915494, %v1792_v26  ;;  %v12882_v18 = vand.u32 2147483648, %v12869_v28  ;;  %v8523_v56 = vsel %vm2022_vm10, %v2023_v54, %v2021_v51  ;;  %v5960_v55 = vpop.eup %5959 }
 0x26e   : > { %12883 = vst [vmem:[#allocation32_spill] sm:$0xff] %v8523_v56  ;;  %vm2143_vm7 = vcmp.eq.s32.totalorder %v12875_v50, inf  ;;  %v2172_v13 = vadd.f32 %v2171_v47, %v8067_v38  ;;  %v2544_v8 = vmul.f32 %v2543_v60, %v8170_v24  ;;  %v8529_v39 = vand.u32 2147483647, %v8101_v22  ;;  %v1884_v47 = vpop.permute.xlu0 %1883 }
 0x26f   : > { %v8521_v30 = vor.u32 %v12882_v18, %v1743_v25  ;;  %v8532_v43 = vand.u32 2147483647, %v8523_v56  ;;  %v2131_v19 = vsel %vm2129_vm9, %v2130_v59, %v2128_v14  ;;  %v2496_v26 = vadd.f32 0.19993454, %v2495_v33 }
 0x270   : > { %12884 = vst [vmem:[#allocation31_spill] sm:$0xff] %v8529_v39  ;;  %v2587_v25 = vmul.f32 %v2586_v1, %v8297_v48  ;;  %v2245_v32 = vmin.f32 %v8427_v12, %v8413_v6  ;;  %v1970_v38 = vmul.f32 %v8491_v21, %v8491_v21  ;;  %vm2142_vm13 = vcmp.eq.s32.totalorder %v12874_v58, inf  ;;  %v5962_v18 = vpop.eup %5961 }
 0x271   : > { %12885 = vst [vmem:[#allocation28_spill] sm:$0xff] %v8532_v43  ;;  %v2631_v60 = vadd.f32 -0.074975304, %v2630_v3  ;;  %v2205_v54 = vmul.f32 %v2204_v36, %v8465_v61  ;;  %v2293_v51 = vmax.f32 %v8529_v39, %v8532_v43  ;;  %v8545_v14 = vclamps-f32 %v1923_v5, 0.9999999  ;;  %vm2144_vm14 = vmand %vm2142_vm13, %vm2143_vm7 }
 0x272   : > { %v1904_v59 = vmul.f32 %v1884_v47, %v1808_v11  ;;  %vm2173_vm9 = vcmp.gt.f32.partialorder %v7899_v9, %v7911_v44  ;;  %v8549_v33 = vmul.f32 %v5960_v55, %v2245_v32  ;;  %v2135_v1 = vsel %vm2134_vm2, %v8399_v34, %v2131_v19 }
 0x273   : > { %v2174_v56 = vsub.f32 1.5707964, %v2172_v13  ;;  %v2545_v3 = vadd.f32 -0.33333147, %v2544_v8  ;;  %5963 = vrcp.f32 %v2293_v51  ;;  %v1761_v36 = vsub.f32 3.1415927, %v8521_v30 }
 0x274   : > { %v2497_v22 = vmul.f32 %v2496_v26, %v8214_v45  ;;  %v2588_v6 = vadd.f32 -0.14207031, %v2587_v25  ;;  %v2026_v5 = vmul.f32 %v5962_v18, %v8332_v23  ;;  %v2632_v34 = vmul.f32 %v2631_v60, %v8386_v49  ;;  %v12889_v60 = vld [vmem:[#allocation40_spill] sm:$0xff] }
 0x275   : > { %v2206_v55 = vadd.f32 0.04247222, %v2205_v54  ;;  %vm2027_vm4 = vcmp.eq.f32.partialorder %v8332_v23, inf  ;;  %v2030_v30 = vand.u32 2147483648, %v8332_v23  ;;  %v2139_v8 = vsel %vm8563_vm5, nan, %v2135_v1 }
 0x276   : > { %v8574_v19 = vmul.f32 %v8549_v33, %v8549_v33  ;;  %v2028_v26 = vsel %vm2027_vm4, %v8332_v23, %v2026_v5  ;;  %vm2029_vm12 = vcmp.eq.f32.partialorder %v8332_v23, 0.0  ;;  %v2175_v25 = vsel %vm2173_vm9, %v2174_v56, %v2172_v13 }
 0x277   : > { %v2546_v32 = vmul.f32 %v2545_v3, %v8170_v24  ;;  %v8582_v47 = vsel %vm2029_vm12, %v2030_v30, %v2028_v26  ;;  %5965 = vrsqrt.f32 %v8352_v35  ;;  %vm2181_vm6 = vcmp.eq.f32.partialorder %v12889_v60, 0.0 }
 0x278   : > { %12888 = vst [vmem:[#allocation33_spill] sm:$0xff] %v8582_v47  ;;  %v2498_v54 = vadd.f32 -0.33333147, %v2497_v22  ;;  %v2589_v51 = vmul.f32 %v2588_v6, %v8297_v48  ;;  %v8588_v18 = vand.u32 2147483647, %v8245_v57  ;;  %v8593_v1 = vsub.f32 1.0, %v1970_v38 }
 0x279   : > { %v8591_v23 = vand.u32 2147483647, %v8582_v47  ;;  %vm2184_vm11 = vcmp.ne.f32.partialorder %v12889_v60, %v12889_v60  ;;  %v2633_v24 = vadd.f32 0.1064488, %v2632_v34  ;;  %v2207_v13 = vmul.f32 %v2206_v55, %v8465_v61 }
 0x27a   : > { %12890 = vst [vmem:[#allocation36_spill] sm:$0xff] %v8588_v18  ;;  %v1971_v56 = vmul.f32 %v8545_v14, %v8545_v14  ;;  %v2177_v22 = vsub.f32 3.1415927, %v2175_v25  ;;  %vm2183_vm2 = vcmp.ne.f32.partialorder %v12871_v27, %v12871_v27  ;;  %v2250_v6 = vmul.f32 0.002785687, %v8574_v19 }
 0x27b   : > { %12891 = vst [vmem:[#allocation40_spill] sm:$0xff] %v8591_v23  ;;  %v2340_v38 = vmax.f32 %v8588_v18, %v8591_v23  ;;  %v1924_v3 = vmul.f32 %v7012_v42, %v1904_v59  ;;  %v2145_v5 = vsel %vm2144_vm14, %v8405_v62, %v2139_v8  ;;  %vm2190_vm1 = vcmp.eq.s32.totalorder %v7899_v9, inf }
 0x27c   : > { %v2547_v58 = vmul.f32 %v2546_v32, %v8152_v37  ;;  %v1777_v11 = vmul.f32 %v12851_v20, %v1761_v36  ;;  %v2499_v34 = vmul.f32 %v2498_v54, %v8214_v45  ;;  %v2590_v55 = vadd.f32 0.19993454, %v2589_v51  ;;  %v12892_v45 = vld [vmem:[#allocation42_spill] sm:$0xff] }
 0x27d   : > { %5967 = vrcp.f32 %v2340_v38  ;;  %v5964_v30 = vpop.eup %5963  ;;  %vm2189_vm8 = vcmp.eq.s32.totalorder %v7911_v44, inf  ;;  %v2634_v59 = vmul.f32 %v2633_v24, %v8386_v49  ;;  %v2208_v62 = vadd.f32 -0.074975304, %v2207_v13  ;;  %v12894_v38 = vld [vmem:[#allocation26_spill] sm:$0xff] }
 0x27e   : > { %v2292_v8 = vmin.f32 %v8529_v39, %v8532_v43  ;;  %v8621_v50 = vsub.f32 1.0, %v1971_v56  ;;  %v2146_v32 = vand.u32 2147483647, %v2145_v5  ;;  %v2178_v20 = vsel %vm2176_vm3, %v2177_v22, %v2175_v25  ;;  %v12895_v56 = vld [vmem:[#allocation17_spill] sm:$0xff]  ;;  %vm8657_vm3 = vmor %vm2183_vm2, %vm2184_vm11 }
 0x27f   : > { %vm2549_vm0 = vcmp.gt.f32.partialorder %v12892_v45, %v8032_v10  ;;  %v2251_v36 = vadd.f32 -0.015866, %v2250_v6  ;;  %v8627_v54 = vclamps-f32 %v1924_v3, 0.9999999  ;;  %v2548_v51 = vadd.f32 %v2547_v58, %v8152_v37  ;;  %vm2191_vm9 = vmand %vm2189_vm8, %vm2190_vm1 }
 0x280   : > { %vm2508_vm10 = vcmp.lt.s32.totalorder %v12894_v38, 0  ;;  %v8631_v24 = vmul.f32 %v5964_v30, %v2292_v8  ;;  %v1793_v13 = vadd.f32 %v1777_v11, %v12869_v28  ;;  %v2500_v26 = vmul.f32 %v2499_v34, %v12895_v56 }
 0x281   : > { %12893 = vst [vmem:[#allocation42_spill] sm:$0xff] %v8627_v54  ;;  %vm2505_vm7 = vcmp.lt.f32.partialorder %v12894_v38, 0.0  ;;  %v2591_v25 = vmul.f32 %v2590_v55, %v8297_v48  ;;  %v5966_v22 = vpop.eup %5965  ;;  %v2182_v6 = vsel %vm2181_vm6, %v8444_v41, %v2178_v20  ;;  %v2635_v3 = vadd.f32 -0.14207031, %v2634_v59 }
 0x282   : > { %v2209_v37 = vmul.f32 %v2208_v62, %v8465_v61  ;;  %5969 = vrsqrt.f32 %v8360_v16  ;;  %v12896_v5 = vand.u32 2147483648, %v12876_v4  ;;  %v8645_v28 = vsel %vm2508_vm10, 3.1415927, %v12717_v31 }
 0x283   : > { %v2252_v11 = vmul.f32 %v2251_v36, %v8574_v19  ;;  %v2033_v34 = vmul.f32 %v5966_v22, %v8352_v35  ;;  %v1972_v55 = vmul.f32 %v8627_v54, %v8627_v54  ;;  %v2550_v30 = vsub.f32 1.5707964, %v2548_v51 }
 0x284   : > { %v2148_v58 = vor.u32 %v12896_v5, %v2146_v32  ;;  %v8664_v59 = vsel %vm2505_vm7, 2.3561945, %v12718_v17  ;;  %v8668_v62 = vmul.f32 %v8631_v24, %v8631_v24  ;;  %v2186_v8 = vsel %vm8657_vm3, nan, %v2182_v6 }
 0x285   : > { %v2501_v32 = vadd.f32 %v2500_v26, %v12895_v56  ;;  %v2592_v20 = vadd.f32 -0.33333147, %v2591_v25  ;;  %vm2034_vm13 = vcmp.eq.f32.partialorder %v8352_v35, inf  ;;  %v1809_v36 = vmul.f32 0.15915494, %v1793_v13 }
 0x286   : > { %v2636_v22 = vmul.f32 %v2635_v3, %v8386_v49  ;;  %v2210_v5 = vadd.f32 0.1064488, %v2209_v37  ;;  %v2035_v47 = vsel %vm2034_vm13, %v8352_v35, %v2033_v34  ;;  %v2854_v39 = vsub.f32 3.1415927, %v2148_v58  ;;  %v12901_v34 = vld [vmem:[#allocation24_spill] sm:$0xff] }
 0x287   : > { %v5968_v43 = vpop.eup %5967  ;;  %v2253_v41 = vadd.f32 0.04247222, %v2252_v11  ;;  %v2339_v26 = vmin.f32 %v8588_v18, %v8591_v23  ;;  %v2037_v56 = vand.u32 2147483648, %v8352_v35  ;;  %v2192_v13 = vsel %vm2191_vm9, %v8475_v7, %v2186_v8  ;;  %v1888_v11 = vpop.permute.xlu0 %1887  ;;  %v12902_v7 = vld [vmem:[#allocation14_spill] sm:$0xff]  ;;  %v12903_v18 = vld [vmem:[#allocation35_spill] sm:$0xff] }
 0x288   : > { %v2551_v25 = vsel %vm2549_vm0, %v2550_v30, %v2548_v51  ;;  %v2297_v6 = vmul.f32 0.002785687, %v8668_v62  ;;  %vm2036_vm5 = vcmp.eq.f32.partialorder %v8352_v35, 0.0  ;;  %v2503_v9 = vsub.f32 1.5707964, %v2501_v32 }
 0x289   : > { %v2593_v44 = vmul.f32 %v2592_v20, %v8297_v48  ;;  %v8690_v3 = vmul.f32 %v5968_v43, %v2339_v26  ;;  %v8692_v37 = vsel %vm2036_vm5, %v2037_v56, %v2035_v47  ;;  %v8694_v58 = vsub.f32 1.0, %v1972_v55 }
 0x28a   : > { %12900 = vst [vmem:[#allocation17_spill] sm:$0xff] %v8692_v37  ;;  %vm2502_vm4 = vcmp.gt.f32.partialorder %v12902_v7, %v12901_v34  ;;  %v2637_v8 = vadd.f32 0.19993454, %v2636_v22  ;;  %v2211_v51 = vmul.f32 %v2210_v5, %v8465_v61  ;;  %v1905_v30 = vmul.f32 %v1888_v11, %v1809_v36  ;;  %v12904_v36 = vld [vmem:[#allocation13_spill] sm:$0xff] }
 0x28b   : > { %12899 = vst [vmem:[#allocation26_spill] sm:$0xff] %v8690_v3  ;;  %v2193_v23 = vand.u32 2147483647, %v2192_v13  ;;  %vm2602_vm12 = vcmp.lt.s32.totalorder %v12903_v18, 0  ;;  %v2254_v35 = vmul.f32 %v2253_v41, %v8574_v19  ;;  %v2870_v43 = vmul.f32 %v12868_v40, %v2854_v39  ;;  %v12905_v40 = vld [vmem:[#allocation41_spill] sm:$0xff] }
 0x28c   : > { %v5970_v48 = vpop.eup %5969  ;;  %v2553_v47 = vsub.f32 3.1415927, %v2551_v25  ;;  %v2298_v20 = vadd.f32 -0.015866, %v2297_v6  ;;  %v8703_v55 = vand.u32 2147483647, %v8692_v37  ;;  %vm2560_vm11 = vcmp.ne.f32.partialorder %v8007_v29, %v8007_v29 }
 0x28d   : > { %vm2557_vm6 = vcmp.eq.f32.partialorder %v8007_v29, 0.0  ;;  %v2504_v22 = vsel %vm2502_vm4, %v2503_v9, %v2501_v32  ;;  %v2594_v5 = vmul.f32 %v2593_v44, %v12904_v36  ;;  %v8711_v26 = vmul.f32 %v8690_v3, %v8690_v3  ;;  %v12906_v13 = vld [vmem:[#allocation37_spill] sm:$0xff] }
 0x28e   : > { %v2040_v41 = vmul.f32 %v5970_v48, %v8360_v16  ;;  %vm2510_vm14 = vcmp.eq.f32.partialorder %v12905_v40, 0.0  ;;  %vm2513_vm2 = vcmp.ne.f32.partialorder %v12905_v40, %v12905_v40  ;;  %v2638_v39 = vmul.f32 %v2637_v8, %v8386_v49 }
 0x28f   : > { %v2212_v56 = vadd.f32 -0.14207031, %v2211_v51  ;;  %v8719_v6 = vand.u32 2147483647, %v12906_v13  ;;  %vm2041_vm1 = vcmp.eq.f32.partialorder %v8360_v16, inf  ;;  %vm2559_vm8 = vcmp.ne.f32.partialorder %v7480_v2, %v7480_v2 }
 0x290   : > { %v2255_v32 = vadd.f32 -0.074975304, %v2254_v35  ;;  %v2042_v9 = vsel %vm2041_vm1, %v8360_v16, %v2040_v41  ;;  %v2044_v44 = vand.u32 2147483648, %v8360_v16  ;;  %5971 = vrsqrt.f32 %v8593_v1 }
 0x291   : > { %v2506_v11 = vsub.f32 3.1415927, %v2504_v22  ;;  %vm2512_vm0 = vcmp.ne.f32.partialorder %v12894_v38, %v12894_v38  ;;  %v2299_v8 = vmul.f32 %v2298_v20, %v8668_v62  ;;  %v2387_v51 = vmax.f32 %v8719_v6, %v8703_v55 }
 0x292   : > { %vm2043_vm10 = vcmp.eq.f32.partialorder %v8360_v16, 0.0  ;;  %v2886_v48 = vadd.f32 %v2870_v43, %v12876_v4  ;;  %v12907_v35 = vand.u32 2147483648, %v12889_v60  ;;  %v2344_v37 = vmul.f32 0.002785687, %v8711_v26 }
 0x293   : > { %v8737_v13 = vsel %vm2043_vm10, %v2044_v44, %v2042_v9  ;;  %vm2566_vm3 = vcmp.eq.s32.totalorder %v12892_v45, inf  ;;  %v2595_v20 = vadd.f32 %v2594_v5, %v12904_v36  ;;  %vm2599_vm13 = vcmp.lt.f32.partialorder %v12903_v18, 0.0 }
 0x294   : > { %v2195_v41 = vor.u32 %v12907_v35, %v2193_v23  ;;  %12908 = vst [vmem:[#allocation24_spill] sm:$0xff] %v8737_v13  ;;  %v8746_v16 = vsel %vm2602_vm12, 3.1415927, %v12717_v31  ;;  %v2554_v4 = vsel %vm2552_vm15, %v2553_v47, %v2551_v25  ;;  %vm2519_vm9 = vcmp.eq.s32.totalorder %v12902_v7, inf  ;;  %vm8801_vm12 = vmor %vm2512_vm0, %vm2513_vm2 }
 0x295   : > { %v2639_v23 = vadd.f32 -0.33333147, %v2638_v39  ;;  %v2213_v43 = vmul.f32 %v2212_v56, %v8465_v61  ;;  %v2256_v9 = vmul.f32 %v2255_v32, %v8574_v19  ;;  %vm2565_vm5 = vcmp.eq.s32.totalorder %v8032_v10, inf  ;;  %v2936_v56 = vpop.permute.xlu1 %2935 }
 0x296   : > { %v2507_v36 = vsel %vm2505_vm7, %v2506_v11, %v2504_v22  ;;  %v2300_v5 = vadd.f32 0.04247222, %v2299_v8  ;;  %5973 = vrcp.f32 %v2387_v51  ;;  %v8757_v44 = vand.u32 2147483647, %v8737_v13  ;;  %v12910_v11 = vld [vmem:[#allocation30_spill] sm:$0xff]  ;;  %vm8782_vm7 = vmor %vm2559_vm8, %vm2560_vm11 }
 0x297   : > { %v1925_v35 = vmul.f32 %v7012_v42, %v1905_v30  ;;  %v2902_v25 = vmul.f32 0.15915494, %v2886_v48  ;;  %v2855_v47 = vsub.f32 3.1415927, %v2195_v41  ;;  %vm2518_vm15 = vcmp.eq.s32.totalorder %v12901_v34, inf  ;;  %v12914_v48 = vld [vmem:[#allocation22_spill] sm:$0xff]  ;;  %vm2567_vm2 = vmand %vm2565_vm5, %vm2566_vm3 }
 0x298   : > { %12909 = vst [vmem:[#allocation14_spill] sm:$0xff] %v8757_v44  ;;  %v2345_v39 = vadd.f32 -0.015866, %v2344_v37  ;;  %v2558_v32 = vsel %vm2557_vm6, %v8484_v46, %v2554_v4  ;;  %v2597_v57 = vsub.f32 1.5707964, %v2595_v20  ;;  %v2511_v42 = vsel %vm2510_vm14, %v8645_v28, %v2507_v36  ;;  %v12915_v41 = vld [vmem:[#allocation15_spill] sm:$0xff]  ;;  %vm2520_vm10 = vmand %vm2518_vm15, %vm2519_vm9 }
 0x299   : > { %v8767_v22 = vsel %vm2599_vm13, 2.3561945, %v12718_v17  ;;  %v8770_v8 = vand.u32 2147483647, %v12910_v11  ;;  %v2640_v37 = vmul.f32 %v2639_v23, %v8386_v49  ;;  %v2214_v30 = vadd.f32 0.19993454, %v2213_v43 }
 0x29a   : > { %v2257_v51 = vadd.f32 0.1064488, %v2256_v9  ;;  %vm2596_vm4 = vcmp.gt.f32.partialorder %v12915_v41, %v12914_v48  ;;  %v12916_v4 = vld [vmem:[#allocation19_spill] sm:$0xff]  ;;  %v2301_v28 = vmul.f32 %v2300_v5, %v8668_v62  ;;  %v5972_v23 = vpop.eup %5971  ;;  %v8792_v43 = vclamps-f32 %v1925_v35, 0.9999999 }
 0x29b   : > { %12911 = vst [vmem:[#allocation35_spill] sm:$0xff] %v8770_v8  ;;  %v2434_v49 = vmax.f32 %v8770_v8, %v8757_v44  ;;  %v2998_v9 = vmul.f32 %v2936_v56, %v2902_v25  ;;  %v2871_v36 = vmul.f32 %v12871_v27, %v2855_v47  ;;  %v2346_v5 = vmul.f32 %v2345_v39, %v8711_v26 }
 0x29c   : > { %v2562_v13 = vsel %vm8782_vm7, nan, %v2558_v32  ;;  %v2515_v35 = vsel %vm8801_vm12, nan, %v2511_v42  ;;  %v2598_v25 = vsel %vm2596_vm4, %v2597_v57, %v2595_v20  ;;  %v2075_v27 = vmul.f32 %v5972_v23, %v8593_v1  ;;  %v12919_v20 = vld [vmem:[#allocation29_spill] sm:$0xff] }
 0x29d   : > { %v2641_v47 = vmul.f32 %v2640_v37, %v8369_v15  ;;  %v2215_v56 = vmul.f32 %v2214_v30, %v8465_v61  ;;  %v2258_v3 = vmul.f32 %v2257_v51, %v8574_v19  ;;  %vm2076_vm6 = vcmp.eq.f32.partialorder %v8593_v1, inf }
 0x29e   : > { %vm2604_vm11 = vcmp.eq.f32.partialorder %v12916_v4, 0.0  ;;  %vm2607_vm14 = vcmp.ne.f32.partialorder %v12916_v4, %v12916_v4  ;;  %v2302_v39 = vadd.f32 -0.074975304, %v2301_v28  ;;  %5975 = vrcp.f32 %v2434_v49 }
 0x29f   : > { %v2077_v32 = vsel %vm2076_vm6, %v8593_v1, %v2075_v27  ;;  %v2079_v57 = vand.u32 2147483648, %v8593_v1  ;;  %vm2646_vm1 = vcmp.lt.f32.partialorder %v12919_v20, 0.0  ;;  %vm2649_vm8 = vcmp.lt.s32.totalorder %v12919_v20, 0 }
 0x2a0   : > { %v2347_v11 = vadd.f32 0.04247222, %v2346_v5  ;;  %vm2078_vm0 = vcmp.eq.f32.partialorder %v8593_v1, 0.0  ;;  %v5974_v42 = vpop.eup %5973  ;;  %v3018_v37 = vmul.f32 %v8496_v0, %v2998_v9  ;;  %v2887_v30 = vadd.f32 %v2871_v36, %v12889_v60  ;;  %v12923_v5 = vld [vmem:[#allocation20_spill] sm:$0xff] }
 0x2a1   : > { %v2600_v45 = vsub.f32 3.1415927, %v2598_v25  ;;  %vm2606_vm3 = vcmp.ne.f32.partialorder %v12903_v18, %v12903_v18  ;;  %v8835_v10 = vsel %vm2078_vm0, %v2079_v57, %v2077_v32  ;;  %v2568_v51 = vsel %vm2567_vm2, %v8506_v52, %v2562_v13 }
 0x2a2   : > { %12920 = vst [vmem:[#allocation13_spill] sm:$0xff] %v8835_v10  ;;  %v2521_v1 = vsel %vm2520_vm10, %v8664_v59, %v2515_v35  ;;  %vm2613_vm5 = vcmp.eq.s32.totalorder %v12915_v41, inf  ;;  %v2216_v46 = vadd.f32 -0.33333147, %v2215_v56  ;;  %v2386_v60 = vmin.f32 %v8719_v6, %v8703_v55 }
 0x2a3   : > { %v1973_v34 = vmul.f32 %v8792_v43, %v8792_v43  ;;  %v2642_v7 = vadd.f32 %v2641_v47, %v8369_v15  ;;  %v2259_v28 = vadd.f32 -0.14207031, %v2258_v3  ;;  %v2303_v49 = vmul.f32 %v2302_v39, %v8668_v62  ;;  %v12922_v3 = vld [vmem:[#allocation23_spill] sm:$0xff] }
 0x2a4   : > { %vm2612_vm9 = vcmp.eq.s32.totalorder %v12914_v48, inf  ;;  %v8850_v52 = vsel %vm2649_vm8, 3.1415927, %v12717_v31  ;;  %v2348_v59 = vmul.f32 %v2347_v11, %v8711_v26  ;;  %v8853_v13 = vmul.f32 %v5974_v42, %v2386_v60 }
 0x2a5   : > { %v8856_v23 = vand.u32 2147483647, %v8835_v10  ;;  %v2569_v9 = vand.u32 2147483647, %v2568_v51  ;;  %v2522_v36 = vand.u32 2147483647, %v2521_v1  ;;  %v2601_v15 = vsel %vm2599_vm13, %v2600_v45, %v2598_v25  ;;  %v2940_v45 = vpop.permute.xlu1 %2939  ;;  %vm8898_vm13 = vmor %vm2606_vm3, %vm2607_vm14 }
 0x2a6   : > { %vm2643_vm15 = vcmp.gt.f32.partialorder %v12923_v5, %v12922_v3  ;;  %v8862_v35 = vclamps-f32 %v3018_v37, 0.9999999  ;;  %v2903_v27 = vmul.f32 0.15915494, %v2887_v30  ;;  %v2217_v47 = vmul.f32 %v2216_v46, %v8465_v61  ;;  %vm2614_vm7 = vmand %vm2612_vm9, %vm2613_vm5 }
 0x2a7   : > { %12921 = vst [vmem:[#allocation41_spill] sm:$0xff] %v8856_v23  ;;  %v8866_v56 = vand.u32 2147483647, %v8491_v21  ;;  %v8868_v39 = vsub.f32 1.0, %v1973_v34  ;;  %v2644_v32 = vsub.f32 1.5707964, %v2642_v7  ;;  %v2260_v57 = vmul.f32 %v2259_v28, %v8574_v19 }
 0x2a8   : > { %v2304_v11 = vadd.f32 0.1064488, %v2303_v49  ;;  %v2605_v25 = vsel %vm2604_vm11, %v8746_v16, %v2601_v15  ;;  %v2349_v42 = vadd.f32 -0.074975304, %v2348_v59  ;;  %v8876_v37 = vmul.f32 %v8853_v13, %v8853_v13  ;;  %v5976_v30 = vpop.eup %5975 }
 0x2a9   : > { %v2669_v61 = vmax.f32 %v8866_v56, %v8856_v23  ;;  %v12924_v51 = vand.u32 2147483648, %v8007_v29  ;;  %v12925_v46 = vand.u32 2147483648, %v12905_v40  ;;  %v8887_v16 = vsel %vm2646_vm1, 2.3561945, %v12718_v17 }
 0x2aa   : > { %5977 = vrsqrt.f32 %v8621_v50  ;;  %v3066_v34 = vmul.f32 %v8862_v35, %v8862_v35  ;;  %v2999_v28 = vmul.f32 %v2940_v45, %v2903_v27  ;;  %v2218_v59 = vmul.f32 %v2217_v47, %v8435_v53 }
 0x2ab   : > { %v2571_v1 = vor.u32 %v12924_v51, %v2569_v9  ;;  %v2524_v60 = vor.u32 %v12925_v46, %v2522_v36  ;;  %v2433_v9 = vmin.f32 %v8770_v8, %v8757_v44  ;;  %v2609_v36 = vsel %vm8898_vm13, nan, %v2605_v25  ;;  %v12928_v25 = vld [vmem:[#allocation21_spill] sm:$0xff] }
 0x2ac   : > { %v2645_v15 = vsel %vm2643_vm15, %v2644_v32, %v2642_v7  ;;  %v2261_v27 = vadd.f32 0.19993454, %v2260_v57  ;;  %v2305_v45 = vmul.f32 %v2304_v11, %v8668_v62  ;;  %v2350_v51 = vmul.f32 %v2349_v42, %v8711_v26  ;;  %v12929_v32 = vld [vmem:[#allocation39_spill] sm:$0xff] }
 0x2ad   : > { %v2391_v46 = vmul.f32 0.002785687, %v8876_v37  ;;  %v8913_v10 = vmul.f32 %v5976_v30, %v2433_v9  ;;  %5979 = vrcp.f32 %v2669_v61  ;;  %v2863_v47 = vsub.f32 3.1415927, %v2571_v1 }
 0x2ae   : > { %v2862_v21 = vsub.f32 3.1415927, %v2524_v60  ;;  %vm2651_vm4 = vcmp.eq.f32.partialorder %v12928_v25, 0.0  ;;  %vm2654_vm12 = vcmp.ne.f32.partialorder %v12928_v25, %v12928_v25  ;;  %vm2226_vm6 = vcmp.lt.s32.totalorder %v12929_v32, 0 }
 0x2af   : > { %v3019_v57 = vmul.f32 %v8496_v0, %v2999_v28  ;;  %v2615_v11 = vsel %vm2614_vm7, %v8767_v22, %v2609_v36  ;;  %v2219_v42 = vadd.f32 %v2218_v59, %v8435_v53  ;;  %vm2223_vm11 = vcmp.lt.f32.partialorder %v12929_v32, 0.0  ;;  %v12931_v36 = vld [vmem:[#allocation12_spill] sm:$0xff] }
 0x2b0   : > { %v8928_v41 = vsub.f32 1.0, %v3066_v34  ;;  %v2647_v48 = vsub.f32 3.1415927, %v2645_v15  ;;  %vm2653_vm14 = vcmp.ne.f32.partialorder %v12919_v20, %v12919_v20  ;;  %v2262_v61 = vmul.f32 %v2261_v27, %v8574_v19 }
 0x2b1   : > { %v2306_v30 = vadd.f32 -0.14207031, %v2305_v45  ;;  %vm2660_vm2 = vcmp.eq.s32.totalorder %v12923_v5, inf  ;;  %v8935_v1 = vsel %vm2226_vm6, 3.1415927, %v12717_v31  ;;  %v8939_v53 = vmul.f32 %v8913_v10, %v8913_v10  ;;  %v12932_v45 = vld [vmem:[#allocation27_spill] sm:$0xff]  ;;  %vm8985_vm3 = vmor %vm2653_vm14, %vm2654_vm12 }
 0x2b2   : > { %v2351_v60 = vadd.f32 0.1064488, %v2350_v51  ;;  %v2392_v22 = vadd.f32 -0.015866, %v2391_v46  ;;  %v2879_v34 = vmul.f32 %v7480_v2, %v2863_v47  ;;  %v2878_v28 = vmul.f32 %v12894_v38, %v2862_v21 }
 0x2b3   : > { %v2616_v49 = vand.u32 2147483647, %v2615_v11  ;;  %v8946_v59 = vsel %vm2223_vm11, 2.3561945, %v12718_v17  ;;  %v8948_v9 = vclamps-f32 %v3019_v57, 0.9999999  ;;  %vm2220_vm0 = vcmp.gt.f32.partialorder %v12931_v36, %v8320_v63 }
 0x2b4   : > { %vm2659_vm8 = vcmp.eq.s32.totalorder %v12922_v3, inf  ;;  %v2221_v27 = vsub.f32 1.5707964, %v2219_v42  ;;  %v5978_v46 = vpop.eup %5977  ;;  %v2648_v2 = vsel %vm2646_vm1, %v2647_v48, %v2645_v15  ;;  %v2263_v21 = vadd.f32 -0.33333147, %v2262_v61 }
 0x2b5   : > { %12930 = vst [vmem:[#allocation22_spill] sm:$0xff] %v8948_v9  ;;  %v2307_v38 = vmul.f32 %v2306_v30, %v8668_v62  ;;  %5981 = vrsqrt.f32 %v8694_v58  ;;  %v2352_v47 = vmul.f32 %v2351_v60, %v8711_v26  ;;  %v2393_v57 = vmul.f32 %v2392_v22, %v8876_v37  ;;  %vm2661_vm9 = vmand %vm2659_vm8, %vm2660_vm2 }
 0x2b6   : > { %v2438_v11 = vmul.f32 0.002785687, %v8939_v53  ;;  %v2082_v7 = vmul.f32 %v5978_v46, %v8621_v50  ;;  %v2895_v44 = vadd.f32 %v2879_v34, %v8007_v29  ;;  %v2894_v51 = vadd.f32 %v2878_v28, %v12905_v40 }
 0x2b7   : > { %v12933_v8 = vand.u32 2147483648, %v12916_v4  ;;  %vm2083_vm1 = vcmp.eq.f32.partialorder %v8621_v50, inf  ;;  %v5980_v48 = vpop.eup %5979  ;;  %v2652_v61 = vsel %vm2651_vm4, %v8850_v52, %v2648_v2  ;;  %v2222_v30 = vsel %vm2220_vm0, %v2221_v27, %v2219_v42 }
 0x2b8   : > { %v2084_v60 = vsel %vm2083_vm1, %v8621_v50, %v2082_v7  ;;  %v2086_v29 = vand.u32 2147483648, %v8621_v50  ;;  %v2264_v40 = vmul.f32 %v2263_v21, %v8574_v19  ;;  %v2308_v22 = vadd.f32 0.19993454, %v2307_v38  ;;  %v2972_v38 = vpop.permute.xlu1 %2971 }
 0x2b9   : > { %v2618_v15 = vor.u32 %v12933_v8, %v2616_v49  ;;  %v2668_v8 = vmin.f32 %v8866_v56, %v8856_v23  ;;  %vm2085_vm10 = vcmp.eq.f32.partialorder %v8621_v50, 0.0  ;;  %v2353_v7 = vadd.f32 -0.14207031, %v2352_v47  ;;  %v2968_v47 = vpop.permute.xlu0 %2967  ;;  %v12968_v23 = vld [vmem:[#allocation33_spill] sm:$0xff] }
 0x2ba   : > { %v2394_v42 = vadd.f32 0.04247222, %v2393_v57  ;;  %v2439_v34 = vadd.f32 -0.015866, %v2438_v11  ;;  %v8989_v19 = vsel %vm2085_vm10, %v2086_v29, %v2084_v60  ;;  %v3067_v28 = vmul.f32 %v8948_v9, %v8948_v9  ;;  %v12940_v29 = vld [vmem:[#allocation34_spill] sm:$0xff] }
 0x2bb   : > { %12936 = vst [vmem:[#allocation15_spill] sm:$0xff] %v8989_v19  ;;  %v2911_v49 = vmul.f32 0.15915494, %v2895_v44  ;;  %v2656_v50 = vsel %vm8985_vm3, nan, %v2652_v61  ;;  %v8995_v27 = vmul.f32 %v5980_v48, %v2668_v8  ;;  %v2910_v46 = vmul.f32 0.15915494, %v2894_v51 }
 0x2bc   : > { %v2864_v2 = vsub.f32 3.1415927, %v2618_v15  ;;  %vm2228_vm5 = vcmp.eq.f32.partialorder %v12932_v45, 0.0  ;;  %v8999_v21 = vand.u32 2147483647, %v8989_v19  ;;  %vm2231_vm15 = vcmp.ne.f32.partialorder %v12932_v45, %v12932_v45 }
 0x2bd   : > { %v2224_v44 = vsub.f32 3.1415927, %v2222_v30  ;;  %v2265_v57 = vmul.f32 %v2264_v40, %v8549_v33  ;;  %v2309_v51 = vmul.f32 %v2308_v22, %v8668_v62  ;;  %v9010_v11 = vand.u32 2147483647, %v8545_v14 }
 0x2be   : > { %12937 = vst [vmem:[#allocation19_spill] sm:$0xff] %v8999_v21  ;;  %v2662_v15 = vsel %vm2661_vm9, %v8887_v16, %v2656_v50  ;;  %v2354_v48 = vmul.f32 %v2353_v7, %v8711_v26  ;;  %v2395_v5 = vmul.f32 %v2394_v42, %v8876_v37  ;;  %v2440_v3 = vmul.f32 %v2439_v34, %v8939_v53 }
 0x2bf   : > { %12938 = vst [vmem:[#allocation29_spill] sm:$0xff] %v9010_v11  ;;  %v5982_v61 = vpop.eup %5981  ;;  %v9016_v60 = vsub.f32 1.0, %v3067_v28  ;;  %vm2230_vm13 = vcmp.ne.f32.partialorder %v12929_v32, %v12929_v32  ;;  %vm2270_vm7 = vcmp.lt.f32.partialorder %v12940_v29, 0.0  ;;  %v9023_v40 = vmul.f32 %v8995_v27, %v8995_v27 }
 0x2c0   : > { %v2716_v16 = vmax.f32 %v9010_v11, %v8999_v21  ;;  %v3007_v22 = vmul.f32 %v2972_v38, %v2911_v49  ;;  %v3006_v8 = vmul.f32 %v2968_v47, %v2910_v46  ;;  %v2880_v52 = vmul.f32 %v12903_v18, %v2864_v2  ;;  %vm9068_vm2 = vmor %vm2230_vm13, %vm2231_vm15 }
 0x2c1   : > { %12939 = vst [vmem:[#allocation23_spill] sm:$0xff] %v9016_v60  ;;  %vm2273_vm4 = vcmp.lt.s32.totalorder %v12940_v29, 0  ;;  %v2663_v7 = vand.u32 2147483647, %v2662_v15  ;;  %v2225_v42 = vsel %vm2223_vm11, %v2224_v44, %v2222_v30  ;;  %vm2237_vm12 = vcmp.eq.s32.totalorder %v12931_v36, inf }
 0x2c2   : > { %v2266_v34 = vadd.f32 %v2265_v57, %v8549_v33  ;;  %v2310_v28 = vadd.f32 -0.33333147, %v2309_v51  ;;  %v2355_v50 = vadd.f32 0.19993454, %v2354_v48  ;;  %v2396_v9 = vadd.f32 -0.074975304, %v2395_v5 }
 0x2c3   : > { %v2441_v19 = vadd.f32 0.04247222, %v2440_v3  ;;  %v2089_v60 = vmul.f32 %v5982_v61, %v8694_v58  ;;  %vm2236_vm6 = vcmp.eq.s32.totalorder %v8320_v63, inf  ;;  %v2673_v18 = vmul.f32 0.002785687, %v9023_v40 }
 0x2c4   : > { %5983 = vrcp.f32 %v2716_v16  ;;  %vm2090_vm14 = vcmp.eq.f32.partialorder %v8694_v58, inf  ;;  %v2093_v49 = vand.u32 2147483648, %v8694_v58  ;;  %v3027_v30 = vmul.f32 %v8496_v0, %v3007_v22  ;;  %vm2238_vm10 = vmand %vm2236_vm6, %vm2237_vm12 }
 0x2c5   : > { %v2896_v46 = vadd.f32 %v2880_v52, %v12916_v4  ;;  %v2091_v33 = vsel %vm2090_vm14, %v8694_v58, %v2089_v60  ;;  %vm2092_vm11 = vcmp.eq.f32.partialorder %v8694_v58, 0.0  ;;  %v12941_v2 = vand.u32 2147483648, %v12928_v25 }
 0x2c6   : > { %v2229_v47 = vsel %vm2228_vm5, %v8935_v1, %v2225_v42  ;;  %v2268_v44 = vsub.f32 1.5707964, %v2266_v34  ;;  %v9047_v57 = vsel %vm2092_vm11, %v2093_v49, %v2091_v33  ;;  %v2311_v51 = vmul.f32 %v2310_v28, %v8668_v62  ;;  %v2976_v49 = vpop.permute.xlu1 %2975 }
 0x2c7   : > { %v2665_v38 = vor.u32 %v12941_v2, %v2663_v7  ;;  %12942 = vst [vmem:[#allocation20_spill] sm:$0xff] %v9047_v57  ;;  %v2356_v15 = vmul.f32 %v2355_v50, %v8711_v26  ;;  %v2397_v4 = vmul.f32 %v2396_v9, %v8876_v37  ;;  %v9053_v48 = vand.u32 2147483647, %v9047_v57  ;;  %v12948_v9 = vld [vmem:[#allocation38_spill] sm:$0xff] }
 0x2c8   : > { %v3026_v58 = vmul.f32 %v8496_v0, %v3006_v8  ;;  %v2442_v5 = vmul.f32 %v2441_v19, %v8939_v53  ;;  %v2674_v3 = vadd.f32 -0.015866, %v2673_v18  ;;  %v9058_v61 = vand.u32 2147483647, %v8627_v54 }
 0x2c9   : > { %12943 = vst [vmem:[#allocation21_spill] sm:$0xff] %v9053_v48  ;;  %v9060_v1 = vclamps-f32 %v3027_v30, 0.9999999  ;;  %v2912_v60 = vmul.f32 0.15915494, %v2896_v46  ;;  %vm2267_vm8 = vcmp.gt.f32.partialorder %v12948_v9, %v8427_v12  ;;  %v2233_v22 = vsel %vm9068_vm2, nan, %v2229_v47 }
 0x2ca   : > { %12944 = vst [vmem:[#allocation39_spill] sm:$0xff] %v9058_v61  ;;  %v2274_v19 = vsel %vm2273_vm4, 3.1415927, %v12717_v31  ;;  %v2865_v16 = vsub.f32 3.1415927, %v2665_v38  ;;  %v2763_v52 = vmax.f32 %v9058_v61, %v9053_v48  ;;  %v2269_v7 = vsel %vm2267_vm8, %v2268_v44, %v2266_v34  ;;  %v12949_v30 = vld [vmem:[#allocation25_spill] sm:$0xff] }
 0x2cb   : > { %12945 = vst [vmem:[#allocation12_spill] sm:$0xff] %v9060_v1  ;;  %v9082_v8 = vsel %vm2270_vm7, 2.3561945, %v12718_v17  ;;  %v2312_v42 = vmul.f32 %v2311_v51, %v8631_v24  ;;  %v2357_v28 = vadd.f32 -0.33333147, %v2356_v15  ;;  %vm2275_vm0 = vcmp.eq.f32.partialorder %v12949_v30, 0.0 }
 0x2cc   : > { %v2398_v50 = vadd.f32 0.1064488, %v2397_v4  ;;  %v9087_v18 = vclamps-f32 %v3026_v58, 0.9999999  ;;  %vm2278_vm1 = vcmp.ne.f32.partialorder %v12949_v30, %v12949_v30  ;;  %v2443_v46 = vadd.f32 -0.074975304, %v2442_v5 }
 0x2cd   : > { %v2675_v33 = vmul.f32 %v2674_v3, %v9023_v40  ;;  %5985 = vrcp.f32 %v2763_v52  ;;  %v3075_v2 = vmul.f32 %v9060_v1, %v9060_v1  ;;  %v3008_v34 = vmul.f32 %v2976_v49, %v2912_v60  ;;  %v12950_v38 = vld [vmem:[#allocation43_spill] sm:$0xff] }
 0x2ce   : > { %vm2317_vm3 = vcmp.lt.f32.partialorder %v12950_v38, 0.0  ;;  %vm2320_vm5 = vcmp.lt.s32.totalorder %v12950_v38, 0  ;;  %v5984_v47 = vpop.eup %5983  ;;  %v2881_v44 = vmul.f32 %v12919_v20, %v2865_v16  ;;  %v2239_v51 = vsel %vm2238_vm10, %v8946_v59, %v2233_v22 }
 0x2cf   : > { %v2271_v15 = vsub.f32 3.1415927, %v2269_v7  ;;  %vm2277_vm9 = vcmp.ne.f32.partialorder %v12940_v29, %v12940_v29  ;;  %5987 = vrsqrt.f32 %v8868_v39  ;;  %vm2284_vm15 = vcmp.eq.s32.totalorder %v12948_v9, inf }
 0x2d0   : > { %v2313_v63 = vadd.f32 %v2312_v42, %v8631_v24  ;;  %v2358_v36 = vmul.f32 %v2357_v28, %v8711_v26  ;;  %v2399_v4 = vmul.f32 %v2398_v50, %v8876_v37  ;;  %v2715_v58 = vmin.f32 %v9010_v11, %v8999_v21  ;;  %v12952_v50 = vld [vmem:[#allocation26_spill] sm:$0xff]  ;;  %vm9164_vm6 = vmor %vm2277_vm9, %vm2278_vm1  ;;  %v12963_v11 = vld [vmem:[#allocation40_spill] sm:$0xff] }
 0x2d1   : > { %v3074_v20 = vmul.f32 %v9087_v18, %v9087_v18  ;;  %v2444_v5 = vmul.f32 %v2443_v46, %v8939_v53  ;;  %v2676_v3 = vadd.f32 0.04247222, %v2675_v33  ;;  %v9116_v60 = vsub.f32 1.0, %v3075_v2  ;;  %v12953_v46 = vld [vmem:[#allocation18_spill] sm:$0xff] }
 0x2d2   : > { %v3028_v62 = vmul.f32 %v8496_v0, %v3008_v34  ;;  %vm2283_vm13 = vcmp.eq.s32.totalorder %v8427_v12, inf  ;;  %v9123_v24 = vsel %vm2320_vm5, 3.1415927, %v12717_v31  ;;  %v9125_v26 = vmul.f32 %v5984_v47, %v2715_v58 }
 0x2d3   : > { %v2897_v16 = vadd.f32 %v2881_v44, %v12928_v25  ;;  %v2240_v22 = vand.u32 2147483647, %v2239_v51  ;;  %v2272_v52 = vsel %vm2270_vm7, %v2271_v15, %v2269_v7  ;;  %v9133_v42 = vsel %vm2317_vm3, 2.3561945, %v12718_v17  ;;  %vm2285_vm14 = vmand %vm2283_vm13, %vm2284_vm15 }
 0x2d4   : > { %12951 = vst [vmem:[#allocation27_spill] sm:$0xff] %v9125_v26  ;;  %v2315_v28 = vsub.f32 1.5707964, %v2313_v63  ;;  %v2359_v49 = vmul.f32 %v2358_v36, %v12952_v50  ;;  %vm2367_vm4 = vcmp.lt.s32.totalorder %v12953_v46, 0  ;;  %v2400_v33 = vadd.f32 -0.14207031, %v2399_v4 }
 0x2d5   : > { %v9137_v2 = vsub.f32 1.0, %v3074_v20  ;;  %vm2364_vm12 = vcmp.lt.f32.partialorder %v12953_v46, 0.0  ;;  %v2445_v25 = vadd.f32 0.1064488, %v2444_v5  ;;  %v2677_v34 = vmul.f32 %v2676_v3, %v9023_v40  ;;  %v12956_v20 = vld [vmem:[#allocation31_spill] sm:$0xff]  ;;  %v12957_v5 = vld [vmem:[#allocation28_spill] sm:$0xff] }
 0x2d6   : > { %v9141_v47 = vclamps-f32 %v3028_v62, 0.9999999  ;;  %v2276_v7 = vsel %vm2275_vm0, %v2274_v19, %v2272_v52  ;;  %v9147_v44 = vmul.f32 %v9125_v26, %v9125_v26  ;;  %v2762_v51 = vmin.f32 %v9058_v61, %v9053_v48  ;;  %v2980_v62 = vpop.permute.xlu1 %2979 }
 0x2d7   : > { %v5986_v15 = vpop.eup %5985  ;;  %v2913_v36 = vmul.f32 0.15915494, %v2897_v16  ;;  %v12955_v4 = vand.u32 2147483648, %v12932_v45  ;;  %vm2314_vm7 = vcmp.gt.f32.partialorder %v12957_v5, %v12956_v20  ;;  %v9156_v3 = vsel %vm2367_vm4, 3.1415927, %v12717_v31 }
 0x2d8   : > { %12954 = vst [vmem:[#allocation34_spill] sm:$0xff] %v9141_v47  ;;  %v2316_v16 = vsel %vm2314_vm7, %v2315_v28, %v2313_v63  ;;  %v2401_v52 = vmul.f32 %v2400_v33, %v8876_v37  ;;  %v2280_v57 = vsel %vm9164_vm6, nan, %v2276_v7  ;;  %v2446_v48 = vmul.f32 %v2445_v25, %v8939_v53 }
 0x2d9   : > { %v2242_v58 = vor.u32 %v12955_v4, %v2240_v22  ;;  %v2360_v22 = vadd.f32 %v2359_v49, %v12952_v50  ;;  %v9170_v4 = vmul.f32 %v5986_v15, %v2762_v51  ;;  %v5988_v59 = vpop.eup %5987  ;;  %v2678_v61 = vadd.f32 -0.074975304, %v2677_v34  ;;  %v12961_v34 = vld [vmem:[#allocation32_spill] sm:$0xff] }
 0x2da   : > { %5989 = vrsqrt.f32 %v8928_v41  ;;  %v3076_v21 = vmul.f32 %v9141_v47, %v9141_v47  ;;  %v9181_v63 = vsel %vm2364_vm12, 2.3561945, %v12718_v17  ;;  %v2720_v28 = vmul.f32 0.002785687, %v9147_v44 }
 0x2db   : > { %12960 = vst [vmem:[#allocation38_spill] sm:$0xff] %v9170_v4  ;;  %v9186_v50 = vmul.f32 %v9170_v4, %v9170_v4  ;;  %v3009_v49 = vmul.f32 %v2980_v62, %v2913_v36  ;;  %v2856_v33 = vsub.f32 3.1415927, %v2242_v58  ;;  %v2318_v25 = vsub.f32 3.1415927, %v2316_v16  ;;  %v12965_v62 = vld [vmem:[#allocation37_spill] sm:$0xff] }
 0x2dc   : > { %vm2322_vm11 = vcmp.eq.f32.partialorder %v12961_v34, 0.0  ;;  %vm2325_vm2 = vcmp.ne.f32.partialorder %v12961_v34, %v12961_v34  ;;  %v2096_v7 = vmul.f32 %v5988_v59, %v8868_v39  ;;  %v2286_v51 = vsel %vm2285_vm14, %v9082_v8, %v2280_v57 }
 0x2dd   : > { %v2362_v15 = vsub.f32 1.5707964, %v2360_v22  ;;  %v2402_v19 = vadd.f32 0.19993454, %v2401_v52  ;;  %vm2097_vm8 = vcmp.eq.f32.partialorder %v8868_v39, inf  ;;  %vm2324_vm0 = vcmp.ne.f32.partialorder %v12950_v38, %v12950_v38  ;;  %v12962_v52 = vld [vmem:[#allocation36_spill] sm:$0xff] }
 0x2de   : > { %v2447_v9 = vadd.f32 -0.14207031, %v2446_v48  ;;  %v2679_v12 = vmul.f32 %v2678_v61, %v9023_v40  ;;  %v2098_v36 = vsel %vm2097_vm8, %v8868_v39, %v2096_v7  ;;  %v2100_v58 = vand.u32 2147483648, %v8868_v39  ;;  %vm9255_vm7 = vmor %vm2324_vm0, %vm2325_vm2 }
 0x2df   : > { %v2721_v4 = vadd.f32 -0.015866, %v2720_v28  ;;  %v2767_v59 = vmul.f32 0.002785687, %v9186_v50  ;;  %vm2099_vm1 = vcmp.eq.f32.partialorder %v8868_v39, 0.0  ;;  %v9206_v57 = vsub.f32 1.0, %v3076_v21 }
 0x2e0   : > { %v2287_v8 = vand.u32 2147483647, %v2286_v51  ;;  %vm2361_vm10 = vcmp.gt.f32.partialorder %v12963_v11, %v12962_v52  ;;  %v9210_v48 = vsel %vm2099_vm1, %v2100_v58, %v2098_v36  ;;  %v3029_v61 = vmul.f32 %v8496_v0, %v3009_v49 }
 0x2e1   : > { %12964 = vst [vmem:[#allocation25_spill] sm:$0xff] %v9210_v48  ;;  %vm2331_vm5 = vcmp.eq.s32.totalorder %v12957_v5, inf  ;;  %v2403_v7 = vmul.f32 %v2402_v19, %v8876_v37  ;;  %vm2414_vm9 = vcmp.lt.s32.totalorder %v12965_v62, 0  ;;  %v9217_v28 = vand.u32 2147483647, %v9210_v48 }
 0x2e2   : > { %v2319_v39 = vsel %vm2317_vm3, %v2318_v25, %v2316_v16  ;;  %v2448_v21 = vmul.f32 %v2447_v9, %v8939_v53  ;;  %v2680_v51 = vadd.f32 0.1064488, %v2679_v12  ;;  %v9223_v36 = vand.u32 2147483647, %v8792_v43 }
 0x2e3   : > { %12966 = vst [vmem:[#allocation43_spill] sm:$0xff] %v9217_v28  ;;  %v2872_v49 = vmul.f32 %v12929_v32, %v2856_v33  ;;  %vm2330_vm15 = vcmp.eq.s32.totalorder %v12956_v20, inf  ;;  %v2363_v58 = vsel %vm2361_vm10, %v2362_v15, %v2360_v22  ;;  %v2722_v19 = vmul.f32 %v2721_v4, %v9147_v44 }
 0x2e4   : > { %v2768_v47 = vadd.f32 -0.015866, %v2767_v59  ;;  %v5990_v54 = vpop.eup %5989  ;;  %v12967_v48 = vand.u32 2147483648, %v12949_v30  ;;  %vm2411_vm3 = vcmp.lt.f32.partialorder %v12965_v62, 0.0  ;;  %v2810_v25 = vmax.f32 %v9223_v36, %v9217_v28 }
 0x2e5   : > { %v9234_v9 = vclamps-f32 %v3029_v61, 0.9999999  ;;  %v2323_v32 = vsel %vm2322_vm11, %v9123_v24, %v2319_v39  ;;  %vm2369_vm13 = vcmp.eq.f32.partialorder %v12968_v23, 0.0  ;;  %v2404_v22 = vadd.f32 -0.33333147, %v2403_v7 }
 0x2e6   : > { %v2289_v26 = vor.u32 %v12967_v48, %v2287_v8  ;;  %v9243_v4 = vsel %vm2414_vm9, 3.1415927, %v12717_v31  ;;  %v2365_v33 = vsub.f32 3.1415927, %v2363_v58  ;;  %vm2372_vm4 = vcmp.ne.f32.partialorder %v12968_v23, %v12968_v23 }
 0x2e7   : > { %v2449_v15 = vadd.f32 0.19993454, %v2448_v21  ;;  %v2681_v12 = vmul.f32 %v2680_v51, %v9023_v40  ;;  %5991 = vrcp.f32 %v2810_v25  ;;  %v2888_v59 = vadd.f32 %v2872_v49, %v12932_v45 }
 0x2e8   : > { %v2723_v8 = vadd.f32 0.04247222, %v2722_v19  ;;  %v2769_v48 = vmul.f32 %v2768_v47, %v9186_v50  ;;  %v3099_v61 = vmul.f32 %v5990_v54, %v8928_v41  ;;  %v2857_v7 = vsub.f32 3.1415927, %v2289_v26 }
 0x2e9   : > { %v2327_v39 = vsel %vm9255_vm7, nan, %v2323_v32  ;;  %vm2371_vm6 = vcmp.ne.f32.partialorder %v12953_v46, %v12953_v46  ;;  %vm3100_vm14 = vcmp.eq.f32.partialorder %v8928_v41, inf  ;;  %v3103_v45 = vand.u32 2147483648, %v8928_v41 }
 0x2ea   : > { %vm2378_vm11 = vcmp.eq.s32.totalorder %v12963_v11, inf  ;;  %v2405_v21 = vmul.f32 %v2404_v22, %v8876_v37  ;;  %v3101_v51 = vsel %vm3100_vm14, %v8928_v41, %v3099_v61  ;;  %vm3102_vm2 = vcmp.eq.f32.partialorder %v8928_v41, 0.0  ;;  %vm9320_vm10 = vmor %vm2371_vm6, %vm2372_vm4 }
 0x2eb   : > { %5993 = vrsqrt.f32 %v9116_v60  ;;  %v2366_v54 = vsel %vm2364_vm12, %v2365_v33, %v2363_v58  ;;  %v2450_v26 = vmul.f32 %v2449_v15, %v8939_v53  ;;  %v2682_v47 = vadd.f32 -0.14207031, %v2681_v12  ;;  %vm2332_vm12 = vmand %vm2330_vm15, %vm2331_vm5  ;;  %v12972_v33 = vld [vmem:[#allocation30_spill] sm:$0xff] }
 0x2ec   : > { %v9275_v49 = vsel %vm3102_vm2, %v3103_v45, %v3101_v51  ;;  %vm2377_vm8 = vcmp.eq.s32.totalorder %v12962_v52, inf  ;;  %v2724_v19 = vmul.f32 %v2723_v8, %v9147_v44  ;;  %v2770_v25 = vadd.f32 0.04247222, %v2769_v48  ;;  %v2944_v45 = vpop.permute.xlu0 %2943  ;;  %v12973_v51 = vld [vmem:[#allocation17_spill] sm:$0xff] }
 0x2ed   : > { %12971 = vst [vmem:[#allocation26_spill] sm:$0xff] %v9275_v49  ;;  %v9280_v37 = vand.u32 2147483647, %v8862_v35  ;;  %v9283_v41 = vand.u32 2147483647, %v9275_v49  ;;  %v3077_v32 = vmul.f32 %v9234_v9, %v9234_v9  ;;  %v2873_v58 = vmul.f32 %v12940_v29, %v2857_v7  ;;  %vm2379_vm9 = vmand %vm2377_vm8, %vm2378_vm11 }
 0x2ee   : > { %v9295_v22 = vsel %vm2411_vm3, 2.3561945, %v12718_v17  ;;  %vm2458_vm0 = vcmp.lt.f32.partialorder %v12972_v33, 0.0  ;;  %v2333_v15 = vsel %vm2332_vm12, %v9133_v42, %v2327_v39  ;;  %v2406_v12 = vmul.f32 %v2405_v21, %v8853_v13 }
 0x2ef   : > { %vm2461_vm1 = vcmp.lt.s32.totalorder %v12972_v33, 0  ;;  %v3213_v29 = vmax.f32 %v9280_v37, %v9283_v41  ;;  %v2904_v5 = vmul.f32 0.15915494, %v2888_v59  ;;  %v2370_v20 = vsel %vm2369_vm13, %v9156_v3, %v2366_v54 }
 0x2f0   : > { %v2451_v24 = vadd.f32 -0.33333147, %v2450_v26  ;;  %v2683_v8 = vmul.f32 %v2682_v47, %v9023_v40  ;;  %v2725_v48 = vadd.f32 -0.074975304, %v2724_v19  ;;  %v2771_v61 = vmul.f32 %v2770_v25, %v9186_v50  ;;  %v12976_v25 = vld [vmem:[#allocation24_spill] sm:$0xff] }
 0x2f1   : > { %v2809_v42 = vmin.f32 %v9223_v36, %v9217_v28  ;;  %5995 = vrcp.f32 %v3213_v29  ;;  %v5992_v7 = vpop.eup %5991  ;;  %v9310_v39 = vsub.f32 1.0, %v3077_v32  ;;  %v2889_v59 = vadd.f32 %v2873_v58, %v12949_v30 }
 0x2f2   : > { %v2334_v21 = vand.u32 2147483647, %v2333_v15  ;;  %v2407_v54 = vadd.f32 %v2406_v12, %v8853_v13  ;;  %vm2408_vm5 = vcmp.gt.f32.partialorder %v8703_v55, %v8719_v6  ;;  %v9330_v30 = vsel %vm2461_vm1, 3.1415927, %v12717_v31 }
 0x2f3   : > { %v9335_v26 = vsel %vm2458_vm0, 2.3561945, %v12718_v17  ;;  %v9337_v47 = vmul.f32 %v5992_v7, %v2809_v42  ;;  %v2374_v19 = vsel %vm9320_vm10, nan, %v2370_v20  ;;  %v2452_v13 = vmul.f32 %v2451_v24, %v8939_v53 }
 0x2f4   : > { %v2684_v58 = vadd.f32 0.19993454, %v2683_v8  ;;  %v3000_v12 = vmul.f32 %v2944_v45, %v2904_v5  ;;  %v2726_v29 = vmul.f32 %v2725_v48, %v9147_v44  ;;  %v2772_v16 = vadd.f32 -0.074975304, %v2771_v61  ;;  %v2948_v61 = vpop.permute.xlu0 %2947 }
 0x2f5   : > { %v5994_v15 = vpop.eup %5993  ;;  %5997 = vrsqrt.f32 %v9137_v2  ;;  %v2905_v49 = vmul.f32 0.15915494, %v2889_v59  ;;  %v12977_v28 = vand.u32 2147483648, %v12961_v34  ;;  %v9353_v53 = vmul.f32 %v9337_v47, %v9337_v47 }
 0x2f6   : > { %v3162_v5 = vmul.f32 %v5994_v15, %v9116_v60  ;;  %v2380_v20 = vsel %vm2379_vm9, %v9181_v63, %v2374_v19  ;;  %v2409_v24 = vsub.f32 1.5707964, %v2407_v54  ;;  %vm3163_vm15 = vcmp.eq.f32.partialorder %v9116_v60, inf  ;;  %v12980_v15 = vld [vmem:[#allocation35_spill] sm:$0xff] }
 0x2f7   : > { %v2336_v42 = vor.u32 %v12977_v28, %v2334_v21  ;;  %v3166_v8 = vand.u32 2147483648, %v9116_v60  ;;  %v2453_v28 = vmul.f32 %v2452_v13, %v8913_v10  ;;  %v2685_v11 = vmul.f32 %v2684_v58, %v9023_v40 }
 0x2f8   : > { %v3164_v52 = vsel %vm3163_vm15, %v9116_v60, %v3162_v5  ;;  %vm3165_vm13 = vcmp.eq.f32.partialorder %v9116_v60, 0.0  ;;  %v3020_v48 = vmul.f32 %v8496_v0, %v3000_v12  ;;  %v2727_v7 = vadd.f32 0.1064488, %v2726_v29  ;;  %v12981_v12 = vld [vmem:[#allocation14_spill] sm:$0xff] }
 0x2f9   : > { %v2773_v45 = vmul.f32 %v2772_v16, %v9186_v50  ;;  %v9365_v63 = vsel %vm3165_vm13, %v3166_v8, %v3164_v52  ;;  %v3001_v59 = vmul.f32 %v2948_v61, %v2905_v49  ;;  %v2814_v21 = vmul.f32 0.002785687, %v9353_v53 }
 0x2fa   : > { %12978 = vst [vmem:[#allocation18_spill] sm:$0xff] %v9365_v63  ;;  %v3212_v3 = vmin.f32 %v9280_v37, %v9283_v41  ;;  %v9371_v19 = vand.u32 2147483647, %v9365_v63  ;;  %v2858_v58 = vsub.f32 3.1415927, %v2336_v42  ;;  %vm2455_vm4 = vcmp.gt.f32.partialorder %v12981_v12, %v12980_v15  ;;  %v12983_v42 = vld [vmem:[#allocation16_spill] sm:$0xff] }
 0x2fb   : > { %v5996_v13 = vpop.eup %5995  ;;  %v2381_v60 = vand.u32 2147483647, %v2380_v20  ;;  %v9376_v29 = vand.u32 2147483647, %v9060_v1  ;;  %v2410_v16 = vsel %vm2408_vm5, %v2409_v24, %v2407_v54  ;;  %v2454_v49 = vadd.f32 %v2453_v28, %v8913_v10 }
 0x2fc   : > { %12979 = vst [vmem:[#allocation31_spill] sm:$0xff] %v9371_v19  ;;  %v2686_v5 = vadd.f32 -0.33333147, %v2685_v11  ;;  %v9382_v8 = vmul.f32 %v5996_v13, %v3212_v3  ;;  %vm2416_vm7 = vcmp.eq.f32.partialorder %v12973_v51, 0.0  ;;  %vm2419_vm6 = vcmp.ne.f32.partialorder %v12973_v51, %v12973_v51 }
 0x2fd   : > { %12982 = vst [vmem:[#allocation28_spill] sm:$0xff] %v9376_v29  ;;  %vm2696_vm14 = vcmp.lt.s32.totalorder %v12983_v42, 0  ;;  %v2728_v20 = vmul.f32 %v2727_v7, %v9147_v44  ;;  %v2774_v52 = vadd.f32 0.1064488, %v2773_v45  ;;  %v3636_v61 = vmax.f32 %v9376_v29, %v9371_v19 }
 0x2fe   : > { %v9391_v32 = vclamps-f32 %v3020_v48, 0.9999999  ;;  %v3021_v10 = vmul.f32 %v8496_v0, %v3001_v59  ;;  %v2815_v54 = vadd.f32 -0.015866, %v2814_v21  ;;  %v9396_v24 = vmul.f32 %v9382_v8, %v9382_v8 }
 0x2ff   : > { %v5998_v28 = vpop.eup %5997  ;;  %v2874_v11 = vmul.f32 %v12950_v38, %v2858_v58  ;;  %v12984_v3 = vand.u32 2147483648, %v12968_v23  ;;  %v2412_v7 = vsub.f32 3.1415927, %v2410_v16  ;;  %vm2418_vm11 = vcmp.ne.f32.partialorder %v12965_v62, %v12965_v62 }
 0x300   : > { %5999 = vrcp.f32 %v3636_v61  ;;  %vm2425_vm2 = vcmp.eq.s32.totalorder %v8703_v55, inf  ;;  %v2456_v48 = vsub.f32 1.5707964, %v2454_v49  ;;  %v2687_v45 = vmul.f32 %v2686_v5, %v9023_v40  ;;  %vm9458_vm15 = vmor %vm2418_vm11, %vm2419_vm6  ;;  %v12991_v55 = vld [vmem:[#allocation13_spill] sm:$0xff] }
 0x301   : > { %v2383_v13 = vor.u32 %v12984_v3, %v2381_v60  ;;  %v3217_v59 = vmul.f32 0.002785687, %v9396_v24  ;;  %v3155_v21 = vmul.f32 %v5998_v28, %v9137_v2  ;;  %v2729_v63 = vadd.f32 -0.14207031, %v2728_v20 }
 0x302   : > { %v2775_v38 = vmul.f32 %v2774_v52, %v9186_v50  ;;  %vm3156_vm8 = vcmp.eq.f32.partialorder %v9137_v2, inf  ;;  %v3159_v58 = vand.u32 2147483648, %v9137_v2  ;;  %vm2424_vm12 = vcmp.eq.s32.totalorder %v8719_v6, inf }
 0x303   : > { %v2816_v60 = vmul.f32 %v2815_v54, %v9353_v53  ;;  %v3218_v61 = vadd.f32 -0.015866, %v3217_v59  ;;  %v3157_v3 = vsel %vm3156_vm8, %v9137_v2, %v3155_v21  ;;  %vm3158_vm1 = vcmp.eq.f32.partialorder %v9137_v2, 0.0 }
 0x304   : > { %v2890_v40 = vadd.f32 %v2874_v11, %v12961_v34  ;;  %v2859_v5 = vsub.f32 3.1415927, %v2383_v13  ;;  %v2413_v20 = vsel %vm2411_vm3, %v2412_v7, %v2410_v16  ;;  %v9417_v52 = vsel %vm3158_vm1, %v3159_v58, %v3157_v3 }
 0x305   : > { %12985 = vst [vmem:[#allocation32_spill] sm:$0xff] %v9417_v52  ;;  %v2457_v28 = vsel %vm2455_vm4, %v2456_v48, %v2454_v49  ;;  %v3219_v1 = vmul.f32 %v3218_v61, %v9396_v24  ;;  %v9424_v54 = vand.u32 2147483647, %v9087_v18  ;;  %v9427_v59 = vand.u32 2147483647, %v9417_v52 }
 0x306   : > { %v3068_v2 = vmul.f32 %v9391_v32, %v9391_v32  ;;  %vm2463_vm10 = vcmp.eq.f32.partialorder %v12976_v25, 0.0  ;;  %vm2466_vm3 = vcmp.ne.f32.partialorder %v12976_v25, %v12976_v25  ;;  %v2688_v34 = vmul.f32 %v2687_v45, %v8995_v27 }
 0x307   : > { %12986 = vst [vmem:[#allocation36_spill] sm:$0xff] %v9424_v54  ;;  %12987 = vst [vmem:[#allocation40_spill] sm:$0xff] %v9427_v59  ;;  %vm2693_vm5 = vcmp.lt.f32.partialorder %v12983_v42, 0.0  ;;  %v2730_v16 = vmul.f32 %v2729_v63, %v9147_v44  ;;  %v2417_v49 = vsel %vm2416_vm7, %v9243_v4, %v2413_v20  ;;  %v2776_v11 = vadd.f32 -0.14207031, %v2775_v38 }
 0x308   : > { %v2817_v13 = vadd.f32 0.04247222, %v2816_v60  ;;  %v3589_v7 = vmax.f32 %v9424_v54, %v9427_v59  ;;  %v2875_v48 = vmul.f32 %v12953_v46, %v2859_v5  ;;  %v2459_v21 = vsub.f32 3.1415927, %v2457_v28  ;;  %vm2426_vm7 = vmand %vm2424_vm12, %vm2425_vm2 }
 0x309   : > { %vm2465_vm9 = vcmp.ne.f32.partialorder %v12972_v33, %v12972_v33  ;;  %v9448_v45 = vsel %vm2696_vm14, 3.1415927, %v12717_v31  ;;  %v3220_v63 = vadd.f32 0.04247222, %v3219_v1  ;;  %v9450_v58 = vclamps-f32 %v3021_v10, 0.9999999 }
 0x30a   : > { %v2906_v4 = vmul.f32 0.15915494, %v2890_v40  ;;  %vm2472_vm13 = vcmp.eq.s32.totalorder %v12981_v12, inf  ;;  %v3635_v38 = vmin.f32 %v9376_v29, %v9371_v19  ;;  %6001 = vrcp.f32 %v3589_v7  ;;  %v6000_v1 = vpop.eup %5999  ;;  %vm9513_vm14 = vmor %vm2465_vm9, %vm2466_vm3  ;;  %v12995_v19 = vld [vmem:[#allocation23_spill] sm:$0xff] }
 0x30b   : > { %12988 = vst [vmem:[#allocation37_spill] sm:$0xff] %v9450_v58  ;;  %v2421_v10 = vsel %vm9458_vm15, nan, %v2417_v49  ;;  %v2689_v60 = vadd.f32 %v2688_v34, %v8995_v27  ;;  %v2731_v61 = vadd.f32 0.19993454, %v2730_v16  ;;  %6003 = vrsqrt.f32 %v9206_v57  ;;  %v2952_v49 = vpop.permute.xlu0 %2951 }
 0x30c   : > { %v9469_v3 = vsub.f32 1.0, %v3068_v2  ;;  %vm2471_vm4 = vcmp.eq.s32.totalorder %v12980_v15, inf  ;;  %v2777_v40 = vmul.f32 %v2776_v11, %v9186_v50  ;;  %v2818_v5 = vmul.f32 %v2817_v13, %v9353_v53 }
 0x30d   : > { %v9474_v20 = vmul.f32 %v6000_v1, %v3635_v38  ;;  %v2891_v7 = vadd.f32 %v2875_v48, %v12968_v23  ;;  %v2460_v27 = vsel %vm2458_vm0, %v2459_v21, %v2457_v28  ;;  %v9486_v2 = vsel %vm2693_vm5, 2.3561945, %v12718_v17  ;;  %vm2473_vm2 = vmand %vm2471_vm4, %vm2472_vm13 }
 0x30e   : > { %v3221_v34 = vmul.f32 %v3220_v63, %v9396_v24  ;;  %v3069_v16 = vmul.f32 %v9450_v58, %v9450_v58  ;;  %v2427_v23 = vsel %vm2426_vm7, %v9295_v22, %v2421_v10  ;;  %v3002_v28 = vmul.f32 %v2952_v49, %v2906_v4  ;;  %v12992_v10 = vld [vmem:[#allocation41_spill] sm:$0xff] }
 0x30f   : > { %v9495_v6 = vmul.f32 %v9474_v20, %v9474_v20  ;;  %v2691_v13 = vsub.f32 1.5707964, %v2689_v60  ;;  %v2732_v48 = vmul.f32 %v2731_v61, %v9147_v44  ;;  %vm2743_vm0 = vcmp.lt.s32.totalorder %v8545_v14, 0 }
 0x310   : > { %v2464_v21 = vsel %vm2463_vm10, %v9330_v30, %v2460_v27  ;;  %v2778_v63 = vadd.f32 0.19993454, %v2777_v40  ;;  %v2819_v46 = vadd.f32 -0.074975304, %v2818_v5  ;;  %v2907_v38 = vmul.f32 0.15915494, %v2891_v7 }
 0x311   : > { %v3640_v22 = vmul.f32 0.002785687, %v9495_v6  ;;  %v2428_v1 = vand.u32 2147483647, %v2427_v23  ;;  %vm2690_vm6 = vcmp.gt.f32.partialorder %v12992_v10, %v8866_v56  ;;  %v3222_v11 = vadd.f32 -0.074975304, %v3221_v34  ;;  %v2956_v23 = vpop.permute.xlu0 %2955 }
 0x312   : > { %v9505_v4 = vsub.f32 1.0, %v3069_v16  ;;  %vm2740_vm11 = vcmp.lt.f32.partialorder %v8545_v14, 0.0  ;;  %v9519_v61 = vsel %vm2743_vm0, 3.1415927, %v12717_v31  ;;  %v2468_v5 = vsel %vm9513_vm14, nan, %v2464_v21 }
 0x313   : > { %v3641_v40 = vadd.f32 -0.015866, %v3640_v22  ;;  %v2692_v7 = vsel %vm2690_vm6, %v2691_v13, %v2689_v60  ;;  %v2733_v27 = vadd.f32 -0.33333147, %v2732_v48  ;;  %v3588_v34 = vmin.f32 %v9424_v54, %v9427_v59  ;;  %v13005_v59 = vld [vmem:[#allocation19_spill] sm:$0xff] }
 0x314   : > { %v6002_v16 = vpop.eup %6001  ;;  %v3022_v49 = vmul.f32 %v8496_v0, %v3002_v28  ;;  %v2779_v58 = vmul.f32 %v2778_v63, %v9186_v50  ;;  %v2820_v52 = vmul.f32 %v2819_v46, %v9353_v53  ;;  %6005 = vrsqrt.f32 %v12995_v19 }
 0x315   : > { %v6004_v29 = vpop.eup %6003  ;;  %v3003_v22 = vmul.f32 %v2956_v23, %v2907_v38  ;;  %v12996_v30 = vand.u32 2147483648, %v12973_v51  ;;  %vm2698_vm8 = vcmp.eq.f32.partialorder %v12991_v55, 0.0  ;;  %v3223_v60 = vmul.f32 %v3222_v11, %v9396_v24 }
 0x316   : > { %v9537_v28 = vmul.f32 %v6002_v16, %v3588_v34  ;;  %v2474_v13 = vsel %vm2473_vm2, %v9335_v26, %v2468_v5  ;;  %v2694_v48 = vsub.f32 3.1415927, %v2692_v7  ;;  %v3642_v63 = vmul.f32 %v3641_v40, %v9495_v6  ;;  %v12999_v16 = vld [vmem:[#allocation27_spill] sm:$0xff] }
 0x317   : > { %v2430_v21 = vor.u32 %v12996_v30, %v2428_v1  ;;  %v3169_v46 = vmul.f32 %v6004_v29, %v9206_v57  ;;  %vm2700_vm12 = vcmp.ne.f32.partialorder %v12983_v42, %v12983_v42  ;;  %v2734_v12 = vmul.f32 %v2733_v27, %v9147_v44  ;;  %v13000_v30 = vld [vmem:[#allocation42_spill] sm:$0xff] }
 0x318   : > { %v9547_v15 = vmul.f32 %v9537_v28, %v9537_v28  ;;  %vm3170_vm1 = vcmp.eq.f32.partialorder %v9206_v57, inf  ;;  %v3173_v11 = vand.u32 2147483648, %v9206_v57  ;;  %vm2707_vm10 = vcmp.eq.s32.totalorder %v12992_v10, inf  ;;  %v13013_v10 = vld [vmem:[#allocation22_spill] sm:$0xff] }
 0x319   : > { %v2780_v26 = vadd.f32 -0.33333147, %v2779_v58  ;;  %v2821_v38 = vadd.f32 0.1064488, %v2820_v52  ;;  %v3171_v1 = vsel %vm3170_vm1, %v9206_v57, %v3169_v46  ;;  %vm3172_vm3 = vcmp.eq.f32.partialorder %v9206_v57, 0.0 }
 0x31a   : > { %v9557_v44 = vsel %vm2740_vm11, 2.3561945, %v12718_v17  ;;  %v3224_v29 = vadd.f32 0.1064488, %v3223_v60  ;;  %v3593_v40 = vmul.f32 0.002785687, %v9547_v15  ;;  %v9560_v5 = vsel %vm3172_vm3, %v3173_v11, %v3171_v1 }
 0x31b   : > { %12997 = vst [vmem:[#allocation33_spill] sm:$0xff] %v9560_v5  ;;  %v2860_v27 = vsub.f32 3.1415927, %v2430_v21  ;;  %vm2701_vm9 = vcmp.ne.f32.partialorder %v12991_v55, %v12991_v55  ;;  %vm2706_vm15 = vcmp.eq.s32.totalorder %v8866_v56, inf  ;;  %v3643_v52 = vadd.f32 0.04247222, %v3642_v63 }
 0x31c   : > { %v9566_v58 = vand.u32 2147483647, %v9560_v5  ;;  %v2475_v57 = vand.u32 2147483647, %v2474_v13  ;;  %v2695_v34 = vsel %vm2693_vm5, %v2694_v48, %v2692_v7  ;;  %v2735_v23 = vmul.f32 %v2734_v12, %v12999_v16  ;;  %v13001_v60 = vld [vmem:[#allocation34_spill] sm:$0xff]  ;;  %vm9605_vm7 = vmor %vm2700_vm12, %vm2701_vm9 }
 0x31d   : > { %vm2787_vm13 = vcmp.lt.f32.partialorder %v13000_v30, 0.0  ;;  %v9573_v46 = vand.u32 2147483647, %v13001_v60  ;;  %v9575_v21 = vclamps-f32 %v3022_v49, 0.9999999  ;;  %v3023_v11 = vmul.f32 %v8496_v0, %v3003_v22  ;;  %v13004_v22 = vld [vmem:[#allocation29_spill] sm:$0xff]  ;;  %vm2708_vm6 = vmand %vm2706_vm15, %vm2707_vm10 }
 0x31e   : > { %12998 = vst [vmem:[#allocation30_spill] sm:$0xff] %v9566_v58  ;;  %v2781_v63 = vmul.f32 %v2780_v26, %v9186_v50  ;;  %v2822_v1 = vmul.f32 %v2821_v38, %v9353_v53  ;;  %vm2790_vm4 = vcmp.lt.s32.totalorder %v13000_v30, 0  ;;  %v3225_v13 = vmul.f32 %v3224_v29, %v9396_v24  ;;  %v6006_v12 = vpop.eup %6005 }
 0x31f   : > { %13002 = vst [vmem:[#allocation17_spill] sm:$0xff] %v9573_v46  ;;  %13003 = vst [vmem:[#allocation24_spill] sm:$0xff] %v9575_v21  ;;  %v3594_v7 = vadd.f32 -0.015866, %v3593_v40  ;;  %v3683_v48 = vmax.f32 %v9573_v46, %v9566_v58  ;;  %v2876_v5 = vmul.f32 %v12965_v62, %v2860_v27  ;;  %v2699_v49 = vsel %vm2698_vm8, %v9448_v45, %v2695_v34  ;;  %v13007_v40 = vld [vmem:[#allocation15_spill] sm:$0xff] }
 0x320   : > { %vm2737_vm5 = vcmp.gt.f32.partialorder %v13005_v59, %v13004_v22  ;;  %v3644_v50 = vmul.f32 %v3643_v52, %v9495_v6  ;;  %v13006_v26 = vand.u32 2147483648, %v12976_v25  ;;  %v2736_v29 = vadd.f32 %v2735_v23, %v12999_v16  ;;  %v13011_v52 = vld [vmem:[#allocation38_spill] sm:$0xff] }
 0x321   : > { %6007 = vrcp.f32 %v3683_v48  ;;  %v3070_v62 = vmul.f32 %v9575_v21, %v9575_v21  ;;  %v9597_v27 = vclamps-f32 %v3023_v11, 0.9999999  ;;  %v2823_v34 = vadd.f32 -0.14207031, %v2822_v1 }
 0x322   : > { %v2477_v38 = vor.u32 %v13006_v26, %v2475_v57  ;;  %v2782_v57 = vmul.f32 %v2781_v63, %v13011_v52  ;;  %v2703_v16 = vsel %vm9605_vm7, nan, %v2699_v49  ;;  %v3226_v23 = vadd.f32 -0.14207031, %v3225_v13 }
 0x323   : > { %13008 = vst [vmem:[#allocation35_spill] sm:$0xff] %v9597_v27  ;;  %v3595_v11 = vmul.f32 %v3594_v7, %v9547_v15  ;;  %v3106_v48 = vmul.f32 %v6006_v12, %v12995_v19  ;;  %v2892_v26 = vadd.f32 %v2876_v5, %v12973_v51  ;;  %v3645_v54 = vadd.f32 -0.074975304, %v3644_v50 }
 0x324   : > { %vm3107_vm0 = vcmp.eq.f32.partialorder %v12995_v19, inf  ;;  %v3110_v21 = vand.u32 2147483648, %v12995_v19  ;;  %v2861_v60 = vsub.f32 3.1415927, %v2477_v38  ;;  %v2738_v63 = vsub.f32 1.5707964, %v2736_v29 }
 0x325   : > { %v3108_v1 = vsel %vm3107_vm0, %v12995_v19, %v3106_v48  ;;  %vm3109_vm14 = vcmp.eq.f32.partialorder %v12995_v19, 0.0  ;;  %v2709_v13 = vsel %vm2708_vm6, %v9486_v2, %v2703_v16  ;;  %v2783_v51 = vadd.f32 %v2782_v57, %v13011_v52 }
 0x326   : > { %v2824_v5 = vmul.f32 %v2823_v34, %v9353_v53  ;;  %v9626_v7 = vsel %vm3109_vm14, %v3110_v21, %v3108_v1  ;;  %v3227_v12 = vmul.f32 %v3226_v23, %v9396_v24  ;;  %v3596_v49 = vadd.f32 0.04247222, %v3595_v11  ;;  %v13017_v1 = vld [vmem:[#allocation21_spill] sm:$0xff] }
 0x327   : > { %13012 = vst [vmem:[#allocation14_spill] sm:$0xff] %v9626_v7  ;;  %v9630_v50 = vand.u32 2147483647, %v13013_v10  ;;  %v9633_v56 = vand.u32 2147483647, %v9626_v7  ;;  %v3646_v21 = vmul.f32 %v3645_v54, %v9495_v6  ;;  %v2877_v45 = vmul.f32 %v12972_v33, %v2861_v60 }
 0x328   : > { %v2908_v38 = vmul.f32 0.15915494, %v2892_v26  ;;  %v9638_v19 = vsel %vm2790_vm4, 3.1415927, %v12717_v31  ;;  %v9643_v2 = vsel %vm2787_vm13, 2.3561945, %v12718_v17  ;;  %v2739_v57 = vsel %vm2737_vm5, %v2738_v63, %v2736_v29  ;;  %v2960_v29 = vpop.permute.xlu0 %2959 }
 0x329   : > { %13014 = vst [vmem:[#allocation16_spill] sm:$0xff] %v9630_v50  ;;  %13015 = vst [vmem:[#allocation13_spill] sm:$0xff] %v9633_v56  ;;  %v2710_v52 = vand.u32 2147483647, %v2709_v13  ;;  %v3260_v34 = vmax.f32 %v9630_v50, %v9633_v56  ;;  %v9652_v16 = vsub.f32 1.0, %v3070_v62  ;;  %v3071_v23 = vmul.f32 %v9597_v27, %v9597_v27  ;;  %v13016_v62 = vld [vmem:[#allocation39_spill] sm:$0xff] }
 0x32a   : > { %vm2745_vm2 = vcmp.eq.f32.partialorder %v13007_v40, 0.0  ;;  %v2785_v11 = vsub.f32 1.5707964, %v2783_v51  ;;  %v3682_v54 = vmin.f32 %v9573_v46, %v9566_v58  ;;  %v2825_v60 = vadd.f32 0.19993454, %v2824_v5 }
 0x32b   : > { %v6008_v33 = vpop.eup %6007  ;;  %v3228_v48 = vadd.f32 0.19993454, %v3227_v12  ;;  %v3597_v26 = vmul.f32 %v3596_v49, %v9547_v15  ;;  %6009 = vrcp.f32 %v3260_v34  ;;  %v2741_v63 = vsub.f32 3.1415927, %v2739_v57  ;;  %v13020_v34 = vld [vmem:[#allocation20_spill] sm:$0xff] }
 0x32c   : > { %vm2747_vm8 = vcmp.ne.f32.partialorder %v8545_v14, %v8545_v14  ;;  %vm2784_vm12 = vcmp.gt.f32.partialorder %v13017_v1, %v13016_v62  ;;  %v3647_v13 = vadd.f32 0.1064488, %v3646_v21  ;;  %v9664_v7 = vmul.f32 %v6008_v33, %v3682_v54  ;;  %v2964_v58 = vpop.permute.xlu0 %2963 }
 0x32d   : > { %v3004_v27 = vmul.f32 %v2960_v29, %v2908_v38  ;;  %v2893_v10 = vadd.f32 %v2877_v45, %v12976_v25  ;;  %v13018_v5 = vand.u32 2147483648, %v12991_v55  ;;  %vm2754_vm1 = vcmp.eq.s32.totalorder %v13005_v59, inf }
 0x32e   : > { %6011 = vrsqrt.f32 %v9310_v39  ;;  %v9671_v49 = vsub.f32 1.0, %v3071_v23  ;;  %vm2837_vm10 = vcmp.lt.s32.totalorder %v8792_v43, 0  ;;  %v9677_v21 = vmul.f32 %v9664_v7, %v9664_v7 }
 0x32f   : > { %v2712_v12 = vor.u32 %v13018_v5, %v2710_v52  ;;  %vm2753_vm3 = vcmp.eq.s32.totalorder %v13004_v22, inf  ;;  %v2786_v25 = vsel %vm2784_vm12, %v2785_v11, %v2783_v51  ;;  %v2826_v38 = vmul.f32 %v2825_v60, %v9353_v53  ;;  %v13021_v11 = vld [vmem:[#allocation11_spill] sm:$0xff] }
 0x330   : > { %13019 = vst [vmem:[#allocation41_spill] sm:$0xff] %v9671_v49  ;;  %v3229_v45 = vmul.f32 %v3228_v48, %v9396_v24  ;;  %v3598_v52 = vadd.f32 -0.074975304, %v3597_v26  ;;  %v2742_v23 = vsel %vm2740_vm11, %v2741_v63, %v2739_v57  ;;  %vm2792_vm9 = vcmp.eq.f32.partialorder %v13020_v34, 0.0  ;;  %vm2755_vm6 = vmand %vm2753_vm3, %vm2754_vm1 }
 0x331   : > { %vm2834_vm15 = vcmp.lt.f32.partialorder %v8792_v43, 0.0  ;;  %v3648_v54 = vmul.f32 %v3647_v13, %v9495_v6  ;;  %v3687_v33 = vmul.f32 0.002785687, %v9677_v21  ;;  %v3024_v29 = vmul.f32 %v8496_v0, %v3004_v27 }
 0x332   : > { %v2909_v5 = vmul.f32 0.15915494, %v2893_v10  ;;  %v2866_v51 = vsub.f32 3.1415927, %v2712_v12  ;;  %v4124_v60 = vsub.s32 3, %v13021_v11  ;;  %vm2748_vm4 = vcmp.ne.f32.partialorder %v13007_v40, %v13007_v40 }
 0x333   : > { %v2788_v48 = vsub.f32 3.1415927, %v2786_v25  ;;  %v9695_v57 = vsel %vm2837_vm10, 3.1415927, %v12717_v31  ;;  %v3688_v26 = vadd.f32 -0.015866, %v3687_v33  ;;  %v2746_v27 = vsel %vm2745_vm2, %v9519_v61, %v2742_v23  ;;  %vm9720_vm5 = vmor %vm2747_vm8, %vm2748_vm4 }
 0x334   : > { %vm2795_vm11 = vcmp.ne.f32.partialorder %v13020_v34, %v13020_v34  ;;  %v2827_v10 = vadd.f32 -0.33333147, %v2826_v38  ;;  %v3230_v63 = vadd.f32 -0.33333147, %v3229_v45  ;;  %v3599_v13 = vmul.f32 %v3598_v52, %v9547_v15  ;;  %v6136_v52 = vld [vmem:[%s6367_s9] sm:$0xf] }
 0x335   : > { %v9706_v12 = vsel %vm2834_vm15, 2.3561945, %v12718_v17  ;;  %v3649_v11 = vadd.f32 -0.14207031, %v3648_v54  ;;  %v3689_v33 = vmul.f32 %v3688_v26, %v9677_v21  ;;  %v3259_v46 = vmin.f32 %v9630_v50, %v9633_v56  ;;  %v6010_v49 = vpop.eup %6009 }
 0x336   : > { %v9711_v61 = vclamps-f32 %v3024_v29, 0.9999999  ;;  %v3005_v23 = vmul.f32 %v2964_v58, %v2909_v5  ;;  %v2882_v38 = vmul.f32 %v12983_v42, %v2866_v51  ;;  %vm2794_vm7 = vcmp.ne.f32.partialorder %v13000_v30, %v13000_v30 }
 0x337   : > { %v9727_v54 = vrot.slane %v6136_v52, %v4124_v60  ;;  %v2750_v58 = vsel %vm9720_vm5, nan, %v2746_v27  ;;  %v2789_v42 = vsel %vm2787_vm13, %v2788_v48, %v2786_v25  ;;  %v3690_v29 = vadd.f32 0.04247222, %v3689_v33  ;;  %vm9782_vm12 = vmor %vm2794_vm7, %vm2795_vm11 }
 0x338   : > { %v9733_v5 = vmul.f32 %v6010_v49, %v3259_v46  ;;  %v6012_v51 = vpop.eup %6011  ;;  %vm2801_vm0 = vcmp.eq.s32.totalorder %v13017_v1, inf  ;;  %v2828_v26 = vmul.f32 %v2827_v10, %v9353_v53  ;;  %v3231_v56 = vmul.f32 %v3230_v63, %v9396_v24 }
 0x339   : > { %v3600_v50 = vadd.f32 0.1064488, %v3599_v13  ;;  %6013 = vrsqrt.f32 %v9469_v3  ;;  %v3650_v25 = vmul.f32 %v3649_v11, %v9495_v6  ;;  %v3691_v46 = vmul.f32 %v3690_v29, %v9677_v21 }
 0x33a   : > { %v9747_v49 = vmul.f32 %v9733_v5, %v9733_v5  ;;  %v3176_v53 = vmul.f32 %v6012_v51, %v9310_v39  ;;  %v3025_v24 = vmul.f32 %v8496_v0, %v3005_v23  ;;  %v2898_v60 = vadd.f32 %v2882_v38, %v12991_v55 }
 0x33b   : > { %v2756_v48 = vsel %vm2755_vm6, %v9557_v44, %v2750_v58  ;;  %v2793_v59 = vsel %vm2792_vm9, %v9638_v19, %v2789_v42  ;;  %vm2800_vm13 = vcmp.eq.s32.totalorder %v13016_v62, inf  ;;  %v3692_v22 = vadd.f32 -0.074975304, %v3691_v46 }
 0x33c   : > { %v3264_v27 = vmul.f32 0.002785687, %v9747_v49  ;;  %vm3177_vm14 = vcmp.eq.f32.partialorder %v9310_v39, inf  ;;  %v3180_v10 = vand.u32 2147483648, %v9310_v39  ;;  %v2829_v63 = vmul.f32 %v2828_v26, %v9337_v47  ;;  %vm2802_vm10 = vmand %vm2800_vm13, %vm2801_vm0 }
 0x33d   : > { %v3601_v13 = vmul.f32 %v3600_v50, %v9547_v15  ;;  %v3178_v55 = vsel %vm3177_vm14, %v9310_v39, %v3176_v53  ;;  %vm3179_vm2 = vcmp.eq.f32.partialorder %v9310_v39, 0.0  ;;  %v3232_v44 = vmul.f32 %v3231_v56, %v9382_v8 }
 0x33e   : > { %v3651_v19 = vadd.f32 0.19993454, %v3650_v25  ;;  %v3265_v11 = vadd.f32 -0.015866, %v3264_v27  ;;  %v9765_v33 = vsel %vm3179_vm2, %v3180_v10, %v3178_v55  ;;  %v3072_v23 = vmul.f32 %v9711_v61, %v9711_v61  ;;  %v2984_v25 = vpop.permute.xlu1 %2983  ;;  %v13028_v10 = vld [vmem:[#allocation43_spill] sm:$0xff] }
 0x33f   : > { %vm3240_vm8 = vcmp.lt.s32.totalorder %v8862_v35, 0  ;;  %v3693_v38 = vmul.f32 %v3692_v22, %v9677_v21  ;;  %v9772_v45 = vand.u32 2147483647, %v9765_v33  ;;  %v9774_v50 = vclamps-f32 %v3025_v24, 0.9999999 }
 0x340   : > { %v2757_v52 = vand.u32 2147483647, %v2756_v48  ;;  %v3266_v56 = vmul.f32 %v3265_v11, %v9747_v49  ;;  %v9788_v58 = vand.u32 2147483647, %v9234_v9  ;;  %v2914_v42 = vmul.f32 0.15915494, %v2898_v60 }
 0x341   : > { %13024 = vst [vmem:[#allocation23_spill] sm:$0xff] %v9774_v50  ;;  %v2797_v29 = vsel %vm9782_vm12, nan, %v2793_v59  ;;  %v2830_v51 = vadd.f32 %v2829_v63, %v9337_v47  ;;  %v3602_v26 = vadd.f32 -0.14207031, %v3601_v13  ;;  %v3233_v46 = vadd.f32 %v3232_v44, %v9382_v8 }
 0x342   : > { %v3652_v53 = vmul.f32 %v3651_v19, %v9495_v6  ;;  %v3267_v24 = vadd.f32 0.04247222, %v3266_v56  ;;  %v3730_v48 = vmax.f32 %v9788_v58, %v9772_v45  ;;  %v9797_v27 = vsub.f32 1.0, %v3072_v23 }
 0x343   : > { %v6014_v22 = vpop.eup %6013  ;;  %vm3237_vm1 = vcmp.lt.f32.partialorder %v8862_v35, 0.0  ;;  %v9803_v60 = vsel %vm3240_vm8, 3.1415927, %v12717_v31  ;;  %v3694_v47 = vadd.f32 0.1064488, %v3693_v38  ;;  %v13027_v59 = vand.u32 2147483648, %v13007_v40 }
 0x344   : > { %vm2831_vm3 = vcmp.gt.f32.partialorder %v13028_v10, %v9223_v36  ;;  %v3268_v63 = vmul.f32 %v3267_v24, %v9747_v49  ;;  %6015 = vrcp.f32 %v3730_v48  ;;  %v3073_v13 = vmul.f32 %v9774_v50, %v9774_v50 }
 0x345   : > { %v2759_v8 = vor.u32 %v13027_v59, %v2757_v52  ;;  %v3010_v55 = vmul.f32 %v2984_v25, %v2914_v42  ;;  %v2803_v44 = vsel %vm2802_vm10, %v9643_v2, %v2797_v29  ;;  %v3603_v19 = vmul.f32 %v3602_v26, %v9547_v15  ;;  %v13029_v29 = vld [vmem:[#allocation25_spill] sm:$0xff] }
 0x346   : > { %v2832_v11 = vsub.f32 1.5707964, %v2830_v51  ;;  %v3235_v23 = vsub.f32 1.5707964, %v3233_v46  ;;  %v3653_v1 = vadd.f32 -0.33333147, %v3652_v53  ;;  %v3113_v62 = vmul.f32 %v6014_v22, %v9469_v3 }
 0x347   : > { %v3695_v38 = vmul.f32 %v3694_v47, %v9677_v21  ;;  %v3269_v52 = vadd.f32 -0.074975304, %v3268_v63  ;;  %vm3114_vm9 = vcmp.eq.f32.partialorder %v9469_v3, inf  ;;  %v3117_v39 = vand.u32 2147483648, %v9469_v3 }
 0x348   : > { %v2867_v56 = vsub.f32 3.1415927, %v2759_v8  ;;  %v2804_v24 = vand.u32 2147483647, %v2803_v44  ;;  %v3115_v42 = vsel %vm3114_vm9, %v9469_v3, %v3113_v62  ;;  %vm3116_vm4 = vcmp.eq.f32.partialorder %v9469_v3, 0.0 }
 0x349   : > { %v3030_v2 = vmul.f32 %v8496_v0, %v3010_v55  ;;  %v3604_v25 = vadd.f32 0.19993454, %v3603_v19  ;;  %v9826_v53 = vsel %vm3116_vm4, %v3117_v39, %v3115_v42  ;;  %v2833_v48 = vsel %vm2831_vm3, %v2832_v11, %v2830_v51  ;;  %v13035_v39 = vld [vmem:[#allocation12_spill] sm:$0xff] }
 0x34a   : > { %13030 = vst [vmem:[#allocation27_spill] sm:$0xff] %v9826_v53  ;;  %vm3234_vm11 = vcmp.gt.f32.partialorder %v9283_v41, %v9280_v37  ;;  %v3654_v22 = vmul.f32 %v3653_v1, %v9495_v6  ;;  %v9835_v47 = vand.u32 2147483647, %v9826_v53  ;;  %v3696_v59 = vadd.f32 -0.14207031, %v3695_v38 }
 0x34b   : > { %v3236_v3 = vsel %vm3234_vm11, %v3235_v23, %v3233_v46  ;;  %v3270_v8 = vmul.f32 %v3269_v52, %v9747_v49  ;;  %v9839_v63 = vand.u32 2147483647, %v9391_v32  ;;  %v9841_v55 = vsub.f32 1.0, %v3073_v13  ;;  %v13034_v46 = vld [vmem:[#allocation26_spill] sm:$0xff] }
 0x34c   : > { %13031 = vst [vmem:[#allocation42_spill] sm:$0xff] %v9835_v47  ;;  %v2883_v44 = vmul.f32 %v8545_v14, %v2867_v56  ;;  %v13032_v51 = vand.u32 2147483648, %v13020_v34  ;;  %v9849_v6 = vsel %vm3237_vm1, 2.3561945, %v12718_v17  ;;  %v9851_v11 = vclamps-f32 %v3030_v2, 0.9999999 }
 0x34d   : > { %vm2839_vm5 = vcmp.eq.f32.partialorder %v13029_v29, 0.0  ;;  %vm2842_vm7 = vcmp.ne.f32.partialorder %v13029_v29, %v13029_v29  ;;  %vm3242_vm0 = vcmp.eq.f32.partialorder %v13034_v46, 0.0  ;;  %v3605_v13 = vmul.f32 %v3604_v25, %v9547_v15 }
 0x34e   : > { %v2806_v19 = vor.u32 %v13032_v51, %v2804_v24  ;;  %13033 = vst [vmem:[#allocation29_spill] sm:$0xff] %v9851_v11  ;;  %v3729_v14 = vmin.f32 %v9788_v58, %v9772_v45  ;;  %v3307_v23 = vmax.f32 %v9839_v63, %v9835_v47  ;;  %v6016_v1 = vpop.eup %6015  ;;  %v2835_v62 = vsub.f32 3.1415927, %v2833_v48 }
 0x34f   : > { %v3238_v38 = vsub.f32 3.1415927, %v3236_v3  ;;  %vm3245_vm6 = vcmp.ne.f32.partialorder %v13034_v46, %v13034_v46  ;;  %v3655_v52 = vmul.f32 %v3654_v22, %v9474_v20  ;;  %vm3663_vm13 = vcmp.lt.s32.totalorder %v13035_v39, 0  ;;  %v13037_v22 = vld [vmem:[#allocation18_spill] sm:$0xff] }
 0x350   : > { %vm2841_vm14 = vcmp.ne.f32.partialorder %v8792_v43, %v8792_v43  ;;  %v3697_v56 = vmul.f32 %v3696_v59, %v9677_v21  ;;  %v3271_v24 = vadd.f32 0.1064488, %v3270_v8  ;;  %v9869_v42 = vmul.f32 %v6016_v1, %v3729_v14 }
 0x351   : > { %6017 = vrcp.f32 %v3307_v23  ;;  %v2899_v2 = vadd.f32 %v2883_v44, %v13007_v40  ;;  %v2868_v25 = vsub.f32 3.1415927, %v2806_v19  ;;  %vm2848_vm2 = vcmp.eq.s32.totalorder %v13028_v10, inf  ;;  %vm9928_vm11 = vmor %vm2841_vm14, %vm2842_vm7 }
 0x352   : > { %vm3244_vm8 = vcmp.ne.f32.partialorder %v8862_v35, %v8862_v35  ;;  %vm3660_vm12 = vcmp.lt.f32.partialorder %v13035_v39, 0.0  ;;  %v3078_v51 = vmul.f32 %v9851_v11, %v9851_v11  ;;  %v3606_v59 = vadd.f32 -0.33333147, %v3605_v13 }
 0x353   : > { %v9881_v8 = vmul.f32 %v9869_v42, %v9869_v42  ;;  %6019 = vrsqrt.f32 %v9505_v4  ;;  %v2836_v40 = vsel %vm2834_vm15, %v2835_v62, %v2833_v48  ;;  %vm2847_vm10 = vcmp.eq.s32.totalorder %v9223_v36, inf }
 0x354   : > { %v3239_v44 = vsel %vm3237_vm1, %v3238_v38, %v3236_v3  ;;  %vm3251_vm3 = vcmp.eq.s32.totalorder %v9283_v41, inf  ;;  %v9893_v19 = vsel %vm3663_vm13, 3.1415927, %v12717_v31  ;;  %vm3250_vm9 = vcmp.eq.s32.totalorder %v9280_v37, inf  ;;  %vm2849_vm7 = vmand %vm2847_vm10, %vm2848_vm2 }
 0x355   : > { %v3656_v13 = vadd.f32 %v3655_v52, %v9474_v20  ;;  %v3698_v14 = vadd.f32 0.19993454, %v3697_v56  ;;  %v3272_v23 = vmul.f32 %v3271_v24, %v9747_v49  ;;  %v3734_v48 = vmul.f32 0.002785687, %v9881_v8  ;;  %v13038_v24 = vld [vmem:[#allocation28_spill] sm:$0xff] }
 0x356   : > { %v2915_v1 = vmul.f32 0.15915494, %v2899_v2  ;;  %v2884_v62 = vmul.f32 %v13000_v30, %v2868_v25  ;;  %v9903_v3 = vsel %vm3660_vm12, 2.3561945, %v12718_v17  ;;  %vm3613_vm15 = vcmp.lt.f32.partialorder %v9087_v18, 0.0  ;;  %v13039_v2 = vld [vmem:[#allocation31_spill] sm:$0xff]  ;;  %v2988_v25 = vpop.permute.xlu1 %2987 }
 0x357   : > { %v9906_v38 = vsub.f32 1.0, %v3078_v51  ;;  %v3607_v20 = vmul.f32 %v3606_v59, %v9547_v15  ;;  %v3735_v52 = vadd.f32 -0.015866, %v3734_v48  ;;  %v2840_v56 = vsel %vm2839_vm5, %v9695_v57, %v2836_v40  ;;  %vm9943_vm5 = vmor %vm3244_vm8, %vm3245_vm6 }
 0x358   : > { %v3243_v30 = vsel %vm3242_vm0, %v9803_v60, %v3239_v44  ;;  %vm3657_vm1 = vcmp.gt.f32.partialorder %v13039_v2, %v13038_v24  ;;  %vm3616_vm4 = vcmp.lt.s32.totalorder %v9087_v18, 0  ;;  %v3658_v51 = vsub.f32 1.5707964, %v3656_v13  ;;  %vm3252_vm0 = vmand %vm3250_vm9, %vm3251_vm3 }
 0x359   : > { %13036 = vst [vmem:[#allocation19_spill] sm:$0xff] %v9906_v38  ;;  %v3699_v26 = vmul.f32 %v3698_v14, %v9677_v21  ;;  %v3273_v11 = vadd.f32 -0.14207031, %v3272_v23  ;;  %v3736_v15 = vmul.f32 %v3735_v52, %v9881_v8  ;;  %v3011_v59 = vmul.f32 %v2988_v25, %v2915_v1  ;;  %v13048_v38 = vld [vmem:[#allocation40_spill] sm:$0xff] }
 0x35a   : > { %v2900_v48 = vadd.f32 %v2884_v62, %v13020_v34  ;;  %v3306_v60 = vmin.f32 %v9839_v63, %v9835_v47  ;;  %6021 = vrsqrt.f32 %v9652_v16  ;;  %v2844_v44 = vsel %vm9928_vm11, nan, %v2840_v56  ;;  %v13044_v56 = vld [vmem:[#allocation32_spill] sm:$0xff]  ;;  %v2992_v41 = vpop.permute.xlu1 %2991 }
 0x35b   : > { %v6018_v40 = vpop.eup %6017  ;;  %v3608_v14 = vmul.f32 %v3607_v20, %v9537_v28  ;;  %v9949_v23 = vsel %vm3616_vm4, 3.1415927, %v12717_v31  ;;  %v3737_v1 = vadd.f32 0.04247222, %v3736_v15  ;;  %v3247_v62 = vsel %vm9943_vm5, nan, %v3243_v30 }
 0x35c   : > { %v9956_v52 = vsel %vm3613_vm15, 2.3561945, %v12718_v17  ;;  %v9959_v57 = vmul.f32 %v6018_v40, %v3306_v60  ;;  %v3659_v20 = vsel %vm3657_vm1, %v3658_v51, %v3656_v13  ;;  %v3700_v30 = vadd.f32 -0.33333147, %v3699_v26 }
 0x35d   : > { %v6020_v53 = vpop.eup %6019  ;;  %v3274_v15 = vmul.f32 %v3273_v11, %v9747_v49  ;;  %v3738_v34 = vmul.f32 %v3737_v1, %v9881_v8  ;;  %v3031_v50 = vmul.f32 %v8496_v0, %v3011_v59  ;;  %v2916_v25 = vmul.f32 0.15915494, %v2900_v48  ;;  %v13045_v48 = vld [vmem:[#allocation34_spill] sm:$0xff] }
 0x35e   : > { %v2850_v60 = vsel %vm2849_vm7, %v9706_v12, %v2844_v44  ;;  %vm3665_vm6 = vcmp.eq.f32.partialorder %v13037_v22, 0.0  ;;  %v9979_v36 = vmul.f32 %v9959_v57, %v9959_v57  ;;  %v3253_v10 = vsel %vm3252_vm0, %v9849_v6, %v3247_v62 }
 0x35f   : > { %v3609_v26 = vadd.f32 %v3608_v14, %v9537_v28  ;;  %v3739_v11 = vadd.f32 -0.074975304, %v3738_v34  ;;  %v3120_v13 = vmul.f32 %v6020_v53, %v9505_v4  ;;  %v3661_v51 = vsub.f32 3.1415927, %v3659_v20  ;;  %v13047_v34 = vld [vmem:[#allocation36_spill] sm:$0xff] }
 0x360   : > { %v3311_v12 = vmul.f32 0.002785687, %v9979_v36  ;;  %vm3121_vm13 = vcmp.eq.f32.partialorder %v9505_v4, inf  ;;  %v3124_v37 = vand.u32 2147483648, %v9505_v4  ;;  %vm3668_vm14 = vcmp.ne.f32.partialorder %v13037_v22, %v13037_v22 }
 0x361   : > { %v3701_v59 = vmul.f32 %v3700_v30, %v9677_v21  ;;  %vm3710_vm2 = vcmp.lt.s32.totalorder %v13045_v48, 0  ;;  %v3275_v6 = vadd.f32 0.19993454, %v3274_v15  ;;  %v3122_v28 = vsel %vm3121_vm13, %v9505_v4, %v3120_v13 }
 0x362   : > { %vm3123_vm8 = vcmp.eq.f32.partialorder %v9505_v4, 0.0  ;;  %v3012_v53 = vmul.f32 %v2992_v41, %v2916_v25  ;;  %v3740_v40 = vmul.f32 %v3739_v11, %v9881_v8  ;;  %v3312_v44 = vadd.f32 -0.015866, %v3311_v12  ;;  %v13049_v25 = vld [vmem:[#allocation37_spill] sm:$0xff] }
 0x363   : > { %v9994_v14 = vsel %vm3123_vm8, %v3124_v37, %v3122_v28  ;;  %v2851_v1 = vand.u32 2147483647, %v2850_v60  ;;  %v3254_v62 = vand.u32 2147483647, %v3253_v10  ;;  %vm3610_vm10 = vcmp.gt.f32.partialorder %v13048_v38, %v13047_v34 }
 0x364   : > { %13046 = vst [vmem:[#allocation15_spill] sm:$0xff] %v9994_v14  ;;  %v3611_v47 = vsub.f32 1.5707964, %v3609_v26  ;;  %v6022_v21 = vpop.eup %6021  ;;  %v3662_v30 = vsel %vm3660_vm12, %v3661_v51, %v3659_v20  ;;  %vm3674_vm3 = vcmp.eq.s32.totalorder %v13039_v2, inf  ;;  %vm3707_vm9 = vcmp.lt.f32.partialorder %v13045_v48, 0.0 }
 0x365   : > { %v3313_v4 = vmul.f32 %v3312_v44, %v9979_v36  ;;  %v10004_v15 = vand.u32 2147483647, %v13049_v25  ;;  %v10007_v60 = vand.u32 2147483647, %v9994_v14  ;;  %v10009_v10 = vclamps-f32 %v3031_v50, 0.9999999 }
 0x366   : > { %v3702_v11 = vmul.f32 %v3701_v59, %v9664_v7  ;;  %v3276_v13 = vmul.f32 %v3275_v6, %v9747_v49  ;;  %v3127_v20 = vmul.f32 %v6022_v21, %v9652_v16  ;;  %v3032_v51 = vmul.f32 %v8496_v0, %v3012_v53 }
 0x367   : > { %13050 = vst [vmem:[#allocation38_spill] sm:$0xff] %v10009_v10  ;;  %vm3673_vm12 = vcmp.eq.s32.totalorder %v13038_v24, inf  ;;  %v3741_v12 = vadd.f32 0.1064488, %v3740_v40  ;;  %v3314_v37 = vadd.f32 0.04247222, %v3313_v4  ;;  %v3354_v41 = vmax.f32 %v10004_v15, %v10007_v60 }
 0x368   : > { %v13051_v28 = vand.u32 2147483648, %v13029_v29  ;;  %v13052_v50 = vand.u32 2147483648, %v13034_v46  ;;  %v3666_v59 = vsel %vm3665_vm6, %v9893_v19, %v3662_v30  ;;  %v3612_v6 = vsel %vm3610_vm10, %v3611_v47, %v3609_v26  ;;  %v13054_v47 = vld [vmem:[#allocation41_spill] sm:$0xff]  ;;  %vm3675_vm13 = vmand %vm3673_vm12, %vm3674_vm3 }
 0x369   : > { %v3315_v53 = vmul.f32 %v3314_v37, %v9979_v36  ;;  %6023 = vrcp.f32 %v3354_v41  ;;  %vm3128_vm1 = vcmp.eq.f32.partialorder %v9652_v16, inf  ;;  %v3131_v40 = vand.u32 2147483648, %v9652_v16 }
 0x36a   : > { %v2853_v44 = vor.u32 %v13051_v28, %v2851_v1  ;;  %v3256_v14 = vor.u32 %v13052_v50, %v3254_v62  ;;  %v3703_v1 = vadd.f32 %v3702_v11, %v9664_v7  ;;  %v3277_v21 = vadd.f32 -0.33333147, %v3276_v13 }
 0x36b   : > { %v3129_v62 = vsel %vm3128_vm1, %v9652_v16, %v3127_v20  ;;  %vm3130_vm4 = vcmp.eq.f32.partialorder %v9652_v16, 0.0  ;;  %v3742_v19 = vmul.f32 %v3741_v12, %v9881_v8  ;;  %v3316_v30 = vadd.f32 -0.074975304, %v3315_v53 }
 0x36c   : > { %v10035_v4 = vsel %vm3130_vm4, %v3131_v40, %v3129_v62  ;;  %6025 = vrsqrt.f32 %v13054_v47  ;;  %v10038_v26 = vclamps-f32 %v3032_v51, 0.9999999  ;;  %v2869_v37 = vsub.f32 3.1415927, %v2853_v44  ;;  %v13059_v51 = vld [vmem:[#allocation24_spill] sm:$0xff] }
 0x36d   : > { %13053 = vst [vmem:[#allocation39_spill] sm:$0xff] %v10035_v4  ;;  %vm3667_vm11 = vcmp.ne.f32.partialorder %v13035_v39, %v13035_v39  ;;  %vm3618_vm5 = vcmp.eq.f32.partialorder %v13044_v56, 0.0  ;;  %v10044_v7 = vand.u32 2147483647, %v10035_v4  ;;  %v3962_v11 = vsub.f32 3.1415927, %v3256_v14 }
 0x36e   : > { %13055 = vst [vmem:[#allocation21_spill] sm:$0xff] %v10038_v26  ;;  %vm10049_vm7 = vmor %vm3667_vm11, %vm3668_vm14  ;;  %vm3621_vm0 = vcmp.ne.f32.partialorder %v13044_v56, %v13044_v56  ;;  %v10058_v13 = vsel %vm3710_vm2, 3.1415927, %v12717_v31  ;;  %v3317_v20 = vmul.f32 %v3316_v30, %v9979_v36  ;;  %v10062_v12 = vand.u32 2147483647, %v13059_v51 }
 0x36f   : > { %13056 = vst [vmem:[#allocation20_spill] sm:$0xff] %v10044_v7  ;;  %v3670_v14 = vsel %vm10049_vm7, nan, %v3666_v59  ;;  %v3614_v41 = vsub.f32 3.1415927, %v3612_v6  ;;  %v3705_v28 = vsub.f32 1.5707964, %v3703_v1  ;;  %v3278_v44 = vmul.f32 %v3277_v21, %v9747_v49 }
 0x370   : > { %v3079_v50 = vmul.f32 %v10009_v10, %v10009_v10  ;;  %vm3620_vm6 = vcmp.ne.f32.partialorder %v9087_v18, %v9087_v18  ;;  %v3743_v53 = vadd.f32 -0.14207031, %v3742_v19  ;;  %v3318_v40 = vadd.f32 0.1064488, %v3317_v20  ;;  %v13060_v49 = vld [vmem:[#allocation17_spill] sm:$0xff]  ;;  %v13061_v21 = vld [vmem:[#allocation30_spill] sm:$0xff] }
 0x371   : > { %v3401_v62 = vmax.f32 %v10062_v12, %v10044_v7  ;;  %v3080_v30 = vmul.f32 %v10038_v26, %v10038_v26  ;;  %v2885_v59 = vmul.f32 %v8792_v43, %v2869_v37  ;;  %vm3704_vm14 = vcmp.gt.f32.partialorder %v13061_v21, %v13060_v49  ;;  %vm10133_vm11 = vmor %vm3620_vm6, %vm3621_vm0 }
 0x372   : > { %v10085_v19 = vsel %vm3707_vm9, 2.3561945, %v12718_v17  ;;  %v3978_v16 = vmul.f32 %v8862_v35, %v3962_v11  ;;  %v3676_v20 = vsel %vm3675_vm13, %v9903_v3, %v3670_v14  ;;  %v3319_v26 = vmul.f32 %v3318_v40, %v9979_v36  ;;  %v13062_v35 = vld [vmem:[#allocation22_spill] sm:$0xff] }
 0x373   : > { %6027 = vrcp.f32 %v3401_v62  ;;  %v3615_v43 = vsel %vm3613_vm15, %v3614_v41, %v3612_v6  ;;  %vm3627_vm2 = vcmp.eq.s32.totalorder %v13048_v38, inf  ;;  %v3706_v24 = vsel %vm3704_vm14, %v3705_v28, %v3703_v1  ;;  %v6024_v10 = vpop.eup %6023  ;;  %v13064_v1 = vld [vmem:[#allocation33_spill] sm:$0xff] }
 0x374   : > { %v3279_v2 = vmul.f32 %v3278_v44, %v9733_v5  ;;  %v3353_v37 = vmin.f32 %v10004_v15, %v10007_v60  ;;  %v10096_v4 = vsub.f32 1.0, %v3079_v50  ;;  %vm3287_vm8 = vcmp.lt.s32.totalorder %v13062_v35, 0 }
 0x375   : > { %v3744_v3 = vmul.f32 %v3743_v53, %v9881_v8  ;;  %v3320_v11 = vadd.f32 -0.14207031, %v3319_v26  ;;  %v10100_v14 = vsub.f32 1.0, %v3080_v30  ;;  %v2901_v6 = vadd.f32 %v2885_v59, %v13029_v29 }
 0x376   : > { %vm3626_vm15 = vcmp.eq.s32.totalorder %v13047_v34, inf  ;;  %v10105_v28 = vmul.f32 %v6024_v10, %v3353_v37  ;;  %v6026_v44 = vpop.eup %6025  ;;  %v3994_v40 = vadd.f32 %v3978_v16, %v13034_v46  ;;  %v3677_v50 = vand.u32 2147483647, %v3676_v20 }
 0x377   : > { %13063 = vst [vmem:[#allocation11_spill] sm:$0xff] %v10100_v14  ;;  %v3619_v62 = vsel %vm3618_vm5, %v9949_v23, %v3615_v43  ;;  %v3708_v53 = vsub.f32 3.1415927, %v3706_v24  ;;  %vm3712_vm10 = vcmp.eq.f32.partialorder %v13064_v1, 0.0  ;;  %vm3715_vm3 = vcmp.ne.f32.partialorder %v13064_v1, %v13064_v1  ;;  %vm3628_vm0 = vmand %vm3626_vm15, %vm3627_vm2 }
 0x378   : > { %vm3284_vm12 = vcmp.lt.f32.partialorder %v13062_v35, 0.0  ;;  %v3280_v29 = vadd.f32 %v3279_v2, %v9733_v5  ;;  %v10118_v10 = vmul.f32 %v10105_v28, %v10105_v28  ;;  %v3134_v46 = vmul.f32 %v6026_v44, %v13054_v47  ;;  %v13069_v5 = vld [vmem:[#allocation35_spill] sm:$0xff] }
 0x379   : > { %vm3135_vm1 = vcmp.eq.f32.partialorder %v13054_v47, inf  ;;  %vm3714_vm4 = vcmp.ne.f32.partialorder %v13045_v48, %v13045_v48  ;;  %v3745_v23 = vadd.f32 0.19993454, %v3744_v3  ;;  %v3321_v26 = vmul.f32 %v3320_v11, %v9979_v36 }
 0x37a   : > { %v3138_v30 = vand.u32 2147483648, %v13054_v47  ;;  %6029 = vrsqrt.f32 %v9797_v27  ;;  %v2917_v59 = vmul.f32 0.15915494, %v2901_v6  ;;  %v3358_v16 = vmul.f32 0.002785687, %v10118_v10  ;;  %v4044_v6 = vpop.permute.xlu0 %4043  ;;  %vm10191_vm13 = vmor %vm3714_vm4, %vm3715_vm3 }
 0x37b   : > { %v3136_v20 = vsel %vm3135_vm1, %v13054_v47, %v3134_v46  ;;  %vm3137_vm5 = vcmp.eq.f32.partialorder %v13054_v47, 0.0  ;;  %v4010_v43 = vmul.f32 0.15915494, %v3994_v40  ;;  %v13067_v2 = vand.u32 2147483648, %v13037_v22 }
 0x37c   : > { %v3623_v3 = vsel %vm10133_vm11, nan, %v3619_v62  ;;  %v10144_v11 = vsel %vm3137_vm5, %v3138_v30, %v3136_v20  ;;  %v3709_v44 = vsel %vm3707_vm9, %v3708_v53, %v3706_v24  ;;  %vm3721_vm7 = vcmp.eq.s32.totalorder %v13061_v21, inf }
 0x37d   : > { %v3679_v37 = vor.u32 %v13067_v2, %v3677_v50  ;;  %13068 = vst [vmem:[#allocation43_spill] sm:$0xff] %v10144_v11  ;;  %v3359_v41 = vadd.f32 -0.015866, %v3358_v16  ;;  %v3400_v46 = vmin.f32 %v10062_v12, %v10044_v7  ;;  %v10152_v47 = vand.u32 2147483647, %v10144_v11  ;;  %v6028_v40 = vpop.eup %6027  ;;  %v2996_v50 = vpop.permute.xlu1 %2995 }
 0x37e   : > { %v3282_v2 = vsub.f32 1.5707964, %v3280_v29  ;;  %v3746_v62 = vmul.f32 %v3745_v23, %v9881_v8  ;;  %v3322_v30 = vadd.f32 0.19993454, %v3321_v26  ;;  %v10156_v20 = vand.u32 2147483647, %v13069_v5 }
 0x37f   : > { %v3013_v14 = vmul.f32 %v2996_v50, %v2917_v59  ;;  %vm3720_vm9 = vcmp.eq.s32.totalorder %v13060_v49, inf  ;;  %v10162_v24 = vsel %vm3287_vm8, 3.1415927, %v12717_v31  ;;  %v3360_v53 = vmul.f32 %v3359_v41, %v10118_v10  ;;  %v13070_v23 = vld [vmem:[#allocation16_spill] sm:$0xff]  ;;  %v13071_v26 = vld [vmem:[#allocation13_spill] sm:$0xff] }
 0x380   : > { %v10165_v16 = vmul.f32 %v6028_v40, %v3400_v46  ;;  %v4106_v11 = vmul.f32 %v4044_v6, %v4010_v43  ;;  %v3971_v7 = vsub.f32 3.1415927, %v3679_v37  ;;  %vm3281_vm6 = vcmp.gt.f32.partialorder %v13071_v26, %v13070_v23  ;;  %vm3722_vm11 = vmand %vm3720_vm9, %vm3721_vm7 }
 0x381   : > { %v3448_v59 = vmax.f32 %v10156_v20, %v10152_v47  ;;  %v3629_v50 = vsel %vm3628_vm0, %v9956_v52, %v3623_v3  ;;  %v3713_v41 = vsel %vm3712_vm10, %v10058_v13, %v3709_v44  ;;  %v3361_v46 = vadd.f32 0.04247222, %v3360_v53 }
 0x382   : > { %v10181_v43 = vmul.f32 %v10165_v16, %v10165_v16  ;;  %v3283_v38 = vsel %vm3281_vm6, %v3282_v2, %v3280_v29  ;;  %v3747_v34 = vadd.f32 -0.33333147, %v3746_v62  ;;  %v3323_v37 = vmul.f32 %v3322_v30, %v9979_v36  ;;  %v13074_v62 = vld [vmem:[#allocation14_spill] sm:$0xff] }
 0x383   : > { %6031 = vrcp.f32 %v3448_v59  ;;  %v3033_v6 = vmul.f32 %v8496_v0, %v3013_v14  ;;  %v10198_v13 = vsel %vm3284_vm12, 2.3561945, %v12718_v17  ;;  %v3362_v29 = vmul.f32 %v3361_v46, %v10118_v10 }
 0x384   : > { %v3405_v3 = vmul.f32 0.002785687, %v10181_v43  ;;  %v6030_v0 = vpop.eup %6029  ;;  %v4126_v14 = vmul.f32 %v9727_v54, %v4106_v11  ;;  %v3987_v44 = vmul.f32 %v13035_v39, %v3971_v7  ;;  %v3630_v40 = vand.u32 2147483647, %v3629_v50 }
 0x385   : > { %v3717_v2 = vsel %vm10191_vm13, nan, %v3713_v41  ;;  %vm3289_vm14 = vcmp.eq.f32.partialorder %v13074_v62, 0.0  ;;  %vm3292_vm2 = vcmp.ne.f32.partialorder %v13074_v62, %v13074_v62  ;;  %vm3757_vm8 = vcmp.lt.s32.totalorder %v9234_v9, 0 }
 0x386   : > { %v3285_v30 = vsub.f32 3.1415927, %v3283_v38  ;;  %vm3754_vm15 = vcmp.lt.f32.partialorder %v9234_v9, 0.0  ;;  %v3363_v53 = vadd.f32 -0.074975304, %v3362_v29  ;;  %v3141_v11 = vmul.f32 %v6030_v0, %v9797_v27 }
 0x387   : > { %v3406_v59 = vadd.f32 -0.015866, %v3405_v3  ;;  %vm3291_vm10 = vcmp.ne.f32.partialorder %v13062_v35, %v13062_v35  ;;  %v3748_v39 = vmul.f32 %v3747_v34, %v9881_v8  ;;  %v3324_v7 = vadd.f32 -0.33333147, %v3323_v37 }
 0x388   : > { %vm3142_vm3 = vcmp.eq.f32.partialorder %v9797_v27, inf  ;;  %v3145_v50 = vand.u32 2147483648, %v9797_v27  ;;  %vm3298_vm1 = vcmp.eq.s32.totalorder %v13071_v26, inf  ;;  %v3364_v41 = vmul.f32 %v3363_v53, %v10118_v10 }
 0x389   : > { %v3407_v46 = vmul.f32 %v3406_v59, %v10181_v43  ;;  %v3143_v52 = vsel %vm3142_vm3, %v9797_v27, %v3141_v11  ;;  %vm3144_vm4 = vcmp.eq.f32.partialorder %v9797_v27, 0.0  ;;  %v10222_v29 = vclamps-f32 %v3033_v6, 0.9999999  ;;  %v4080_v11 = vpop.permute.xlu0 %4079 }
 0x38a   : > { %v4003_v3 = vadd.f32 %v3987_v44, %v13037_v22  ;;  %v13076_v8 = vand.u32 2147483648, %v13044_v56  ;;  %v10231_v37 = vsel %vm3144_vm4, %v3145_v50, %v3143_v52  ;;  %v10233_v0 = vclamps-f32 %v4126_v14, 0.9999999 }
 0x38b   : > { %13075 = vst [vmem:[#allocation25_spill] sm:$0xff] %v10222_v29  ;;  %13077 = vst [vmem:[#allocation26_spill] sm:$0xff] %v10231_v37  ;;  %v3723_v53 = vsel %vm3722_vm11, %v10085_v19, %v3717_v2  ;;  %v3286_v27 = vsel %vm3284_vm12, %v3285_v30, %v3283_v38  ;;  %vm3297_vm5 = vcmp.eq.s32.totalorder %v13070_v23, inf  ;;  %v3408_v22 = vadd.f32 0.04247222, %v3407_v46 }
 0x38c   : > { %v3632_v34 = vor.u32 %v13076_v8, %v3630_v40  ;;  %13078 = vst [vmem:[#allocation12_spill] sm:$0xff] %v10233_v0  ;;  %v3749_v6 = vmul.f32 %v3748_v39, %v9869_v42  ;;  %v3325_v44 = vmul.f32 %v3324_v7, %v9979_v36  ;;  %v10242_v21 = vand.u32 2147483647, %v9711_v61  ;;  %vm10270_vm12 = vmor %vm3291_vm10, %vm3292_vm2 }
 0x38d   : > { %v10245_v49 = vand.u32 2147483647, %v10231_v37  ;;  %v3365_v14 = vadd.f32 0.1064488, %v3364_v41  ;;  %v3409_v40 = vmul.f32 %v3408_v22, %v10181_v43  ;;  %v3447_v19 = vmin.f32 %v10156_v20, %v10152_v47  ;;  %v6032_v38 = vpop.eup %6031  ;;  %vm3299_vm7 = vmand %vm3297_vm5, %vm3298_vm1 }
 0x38e   : > { %6033 = vrsqrt.f32 %v9841_v55  ;;  %v3081_v2 = vmul.f32 %v10222_v29, %v10222_v29  ;;  %v4019_v30 = vmul.f32 0.15915494, %v4003_v3  ;;  %v3970_v36 = vsub.f32 3.1415927, %v3632_v34 }
 0x38f   : > { %13079 = vst [vmem:[#allocation18_spill] sm:$0xff] %v10245_v49  ;;  %v3495_v59 = vmax.f32 %v10242_v21, %v10245_v49  ;;  %v3724_v39 = vand.u32 2147483647, %v3723_v53  ;;  %v3290_v7 = vsel %vm3289_vm14, %v10162_v24, %v3286_v27  ;;  %v3410_v50 = vadd.f32 -0.074975304, %v3409_v40 }
 0x390   : > { %v10258_v41 = vmul.f32 %v6032_v38, %v3447_v19  ;;  %v4174_v46 = vmul.f32 %v10233_v0, %v10233_v0  ;;  %v3750_v52 = vadd.f32 %v3749_v6, %v9869_v42  ;;  %v3326_v3 = vmul.f32 %v3325_v44, %v9959_v57 }
 0x391   : > { %6035 = vrcp.f32 %v3495_v59  ;;  %v3302_v24 = vand.u32 2147483648, %v13074_v62  ;;  %v10278_v34 = vsel %vm3757_vm8, 3.1415927, %v12717_v31  ;;  %v3366_v42 = vmul.f32 %v3365_v14, %v10118_v10 }
 0x392   : > { %v10283_v53 = vmul.f32 %v10258_v41, %v10258_v41  ;;  %v4115_v27 = vmul.f32 %v4080_v11, %v4019_v30  ;;  %v3294_v22 = vsel %vm10270_vm12, nan, %v3290_v7  ;;  %v10290_v6 = vsel %vm3754_vm15, 2.3561945, %v12718_v17 }
 0x393   : > { %v3411_v44 = vmul.f32 %v3410_v50, %v10181_v43  ;;  %v10293_v40 = vsub.f32 1.0, %v3081_v2  ;;  %v3986_v19 = vmul.f32 %v9087_v18, %v3970_v36  ;;  %v13083_v14 = vand.u32 2147483648, %v13064_v1 }
 0x394   : > { %v3452_v59 = vmul.f32 0.002785687, %v10283_v53  ;;  %v10299_v30 = vsub.f32 1.0, %v4174_v46  ;;  %vm3751_vm9 = vcmp.gt.f32.partialorder %v9772_v45, %v9788_v58  ;;  %v3752_v11 = vsub.f32 1.5707964, %v3750_v52 }
 0x395   : > { %13082 = vst [vmem:[#allocation28_spill] sm:$0xff] %v10293_v40  ;;  %v3726_v38 = vor.u32 %v13083_v14, %v3724_v39  ;;  %v3327_v2 = vadd.f32 %v3326_v3, %v9959_v57  ;;  %v3300_v18 = vsel %vm3299_vm7, %v10198_v13, %v3294_v22  ;;  %v3367_v39 = vadd.f32 -0.14207031, %v3366_v42  ;;  %v13085_v14 = vld [vmem:[#allocation42_spill] sm:$0xff] }
 0x396   : > { %13084 = vst [vmem:[#allocation31_spill] sm:$0xff] %v10299_v30  ;;  %v3453_v7 = vadd.f32 -0.015866, %v3452_v59  ;;  %v4135_v50 = vmul.f32 %v9727_v54, %v4115_v27  ;;  %vm3331_vm0 = vcmp.lt.f32.partialorder %v9391_v32, 0.0  ;;  %vm3334_vm6 = vcmp.lt.s32.totalorder %v9391_v32, 0 }
 0x397   : > { %v3412_v23 = vadd.f32 0.1064488, %v3411_v44  ;;  %v4002_v46 = vadd.f32 %v3986_v19, %v13044_v56  ;;  %v3972_v8 = vsub.f32 3.1415927, %v3726_v38  ;;  %vm3328_vm13 = vcmp.gt.f32.partialorder %v13085_v14, %v9839_v63 }
 0x398   : > { %v6034_v26 = vpop.eup %6033  ;;  %v3454_v57 = vmul.f32 %v3453_v7, %v10283_v53  ;;  %v3301_v13 = vand.u32 2147483647, %v3300_v18  ;;  %v3753_v3 = vsel %vm3751_vm9, %v3752_v11, %v3750_v52  ;;  %v3329_v42 = vsub.f32 1.5707964, %v3327_v2  ;;  %v13086_v11 = vld [vmem:[#allocation19_spill] sm:$0xff] }
 0x399   : > { %v3148_v27 = vmul.f32 %v6034_v26, %v9841_v55  ;;  %vm3759_vm14 = vcmp.eq.f32.partialorder %v9765_v33, 0.0  ;;  %vm3762_vm2 = vcmp.ne.f32.partialorder %v9765_v33, %v9765_v33  ;;  %v3368_v56 = vmul.f32 %v3367_v39, %v10118_v10 }
 0x39a   : > { %v3455_v22 = vadd.f32 0.04247222, %v3454_v57  ;;  %v3494_v44 = vmin.f32 %v10242_v21, %v10245_v49  ;;  %vm3149_vm8 = vcmp.eq.f32.partialorder %v9841_v55, inf  ;;  %v3413_v38 = vmul.f32 %v3412_v23, %v10181_v43 }
 0x39b   : > { %v6036_v19 = vpop.eup %6035  ;;  %v3150_v52 = vsel %vm3149_vm8, %v9841_v55, %v3148_v27  ;;  %v3152_v59 = vand.u32 2147483648, %v9841_v55  ;;  %6037 = vrsqrt.f32 %v13086_v11  ;;  %v3988_v18 = vmul.f32 %v13045_v48, %v3972_v8 }
 0x39c   : > { %v3755_v7 = vsub.f32 3.1415927, %v3753_v3  ;;  %vm3761_vm10 = vcmp.ne.f32.partialorder %v9234_v9, %v9234_v9  ;;  %v3456_v39 = vmul.f32 %v3455_v22, %v10283_v53  ;;  %vm3151_vm3 = vcmp.eq.f32.partialorder %v9841_v55, 0.0 }
 0x39d   : > { %v10337_v26 = vclamps-f32 %v4135_v50, 0.9999999  ;;  %v3303_v57 = vor.u32 %v3302_v24, %v3301_v13  ;;  %v10339_v23 = vmul.f32 %v6036_v19, %v3494_v44  ;;  %v10341_v27 = vsel %vm3151_vm3, %v3152_v59, %v3150_v52  ;;  %v13089_v50 = vld [vmem:[#allocation23_spill] sm:$0xff]  ;;  %v4076_v52 = vpop.permute.xlu1 %4075  ;;  %vm10399_vm12 = vmor %vm3761_vm10, %vm3762_vm2 }
 0x39e   : > { %13088 = vst [vmem:[#allocation34_spill] sm:$0xff] %v10341_v27  ;;  %vm3768_vm1 = vcmp.eq.s32.totalorder %v9772_v45, inf  ;;  %v3330_v48 = vsel %vm3328_vm13, %v3329_v42, %v3327_v2  ;;  %v3335_v8 = vsel %vm3334_vm6, 3.1415927, %v12717_v31  ;;  %v3369_v22 = vadd.f32 0.19993454, %v3368_v56 }
 0x39f   : > { %13087 = vst [vmem:[#allocation32_spill] sm:$0xff] %v10337_v26  ;;  %v3457_v36 = vadd.f32 -0.074975304, %v3456_v39  ;;  %v3414_v55 = vadd.f32 -0.14207031, %v3413_v38  ;;  %v10352_v24 = vmul.f32 %v10339_v23, %v10339_v23  ;;  %v4004_v2 = vadd.f32 %v3988_v18, %v13064_v1  ;;  %v13090_v39 = vld [vmem:[#allocation27_spill] sm:$0xff] }
 0x3a0   : > { %v10355_v13 = vand.u32 2147483647, %v13089_v50  ;;  %v10358_v44 = vand.u32 2147483647, %v10341_v27  ;;  %v4018_v19 = vmul.f32 0.15915494, %v4002_v46  ;;  %v3756_v42 = vsel %vm3754_vm15, %v3755_v7, %v3753_v3 }
 0x3a1   : > { %vm3767_vm4 = vcmp.eq.s32.totalorder %v9788_v58, inf  ;;  %v3458_v56 = vmul.f32 %v3457_v36, %v10283_v53  ;;  %v4183_v38 = vmul.f32 %v10337_v26, %v10337_v26  ;;  %v3963_v59 = vsub.f32 3.1415927, %v3303_v57 }
 0x3a2   : > { %vm3336_vm11 = vcmp.eq.f32.partialorder %v13090_v39, 0.0  ;;  %v3499_v0 = vmul.f32 0.002785687, %v10352_v24  ;;  %v3542_v46 = vmax.f32 %v10355_v13, %v10358_v44  ;;  %v3332_v1 = vsub.f32 3.1415927, %v3330_v48 }
 0x3a3   : > { %vm3339_vm15 = vcmp.ne.f32.partialorder %v13090_v39, %v13090_v39  ;;  %v10376_v36 = vsel %vm3331_vm0, 2.3561945, %v12718_v17  ;;  %v3370_v3 = vmul.f32 %v3369_v22, %v10118_v10  ;;  %v3459_v18 = vadd.f32 0.1064488, %v3458_v56 }
 0x3a4   : > { %v3760_v7 = vsel %vm3759_vm14, %v10278_v34, %v3756_v42  ;;  %v3415_v57 = vmul.f32 %v3414_v55, %v10181_v43  ;;  %v3500_v29 = vadd.f32 -0.015866, %v3499_v0  ;;  %6039 = vrcp.f32 %v3542_v46  ;;  %v4084_v42 = vpop.permute.xlu0 %4083 }
 0x3a5   : > { %v4114_v30 = vmul.f32 %v4076_v52, %v4018_v19  ;;  %v4020_v27 = vmul.f32 0.15915494, %v4004_v2  ;;  %vm3338_vm5 = vcmp.ne.f32.partialorder %v9391_v32, %v9391_v32  ;;  %v3460_v37 = vmul.f32 %v3459_v18, %v10283_v53  ;;  %v6038_v49 = vpop.eup %6037 }
 0x3a6   : > { %v10387_v22 = vsub.f32 1.0, %v4183_v38  ;;  %v10390_v56 = vand.u32 2147483647, %v10337_v26  ;;  %v3979_v34 = vmul.f32 %v13062_v35, %v3963_v59  ;;  %v3501_v55 = vmul.f32 %v3500_v29, %v10352_v24  ;;  %vm10449_vm8 = vmor %vm3338_vm5, %vm3339_vm15 }
 0x3a7   : > { %v3764_v19 = vsel %vm10399_vm12, nan, %v3760_v7  ;;  %v3333_v2 = vsel %vm3331_vm0, %v3332_v1, %v3330_v48  ;;  %vm3345_vm7 = vcmp.eq.s32.totalorder %v13085_v14, inf  ;;  %v3371_v35 = vadd.f32 -0.33333147, %v3370_v3  ;;  %vm3769_vm0 = vmand %vm3767_vm4, %vm3768_vm1 }
 0x3a8   : > { %13091 = vst [vmem:[#allocation36_spill] sm:$0xff] %v10390_v56  ;;  %vm3381_vm9 = vcmp.lt.s32.totalorder %v13049_v25, 0  ;;  %v3416_v38 = vadd.f32 0.19993454, %v3415_v57  ;;  %v3461_v52 = vadd.f32 -0.14207031, %v3460_v37  ;;  %v3183_v46 = vmul.f32 %v6038_v49, %v13086_v11  ;;  %v4088_v56 = vpop.permute.xlu0 %4087 }
 0x3a9   : > { %v3502_v59 = vadd.f32 0.04247222, %v3501_v55  ;;  %v4134_v18 = vmul.f32 %v9727_v54, %v4114_v30  ;;  %v4116_v29 = vmul.f32 %v4084_v42, %v4020_v27  ;;  %vm3344_vm6 = vcmp.eq.s32.totalorder %v9839_v63, inf }
 0x3aa   : > { %vm3184_vm13 = vcmp.eq.f32.partialorder %v13086_v11, inf  ;;  %v3187_v48 = vand.u32 2147483648, %v13086_v11  ;;  %v3995_v1 = vadd.f32 %v3979_v34, %v13074_v62  ;;  %vm3186_vm14 = vcmp.eq.f32.partialorder %v13086_v11, 0.0  ;;  %vm3346_vm10 = vmand %vm3344_vm6, %vm3345_vm7 }
 0x3ab   : > { %v3503_v37 = vmul.f32 %v3502_v59, %v10352_v24  ;;  %v3185_v49 = vsel %vm3184_vm13, %v13086_v11, %v3183_v46  ;;  %v3770_v30 = vsel %vm3769_vm0, %v10290_v6, %v3764_v19  ;;  %v3337_v27 = vsel %vm3336_vm11, %v3335_v8, %v3333_v2  ;;  %v13095_v11 = vld [vmem:[#allocation29_spill] sm:$0xff] }
 0x3ac   : > { %v3372_v3 = vmul.f32 %v3371_v35, %v10118_v10  ;;  %v10427_v7 = vsel %vm3186_vm14, %v3187_v48, %v3185_v49  ;;  %v3417_v45 = vmul.f32 %v3416_v38, %v10181_v43  ;;  %v3462_v58 = vmul.f32 %v3461_v52, %v10283_v53 }
 0x3ad   : > { %v3504_v62 = vadd.f32 -0.074975304, %v3503_v37  ;;  %v10432_v57 = vand.u32 2147483647, %v10427_v7  ;;  %v10434_v34 = vclamps-f32 %v4134_v18, 0.9999999  ;;  %v3541_v6 = vmin.f32 %v10355_v13, %v10358_v44  ;;  %v4048_v37 = vpop.permute.xlu1 %4047 }
 0x3ae   : > { %vm3378_vm2 = vcmp.lt.f32.partialorder %v13049_v25, 0.0  ;;  %v10440_v8 = vand.u32 2147483647, %v13095_v11  ;;  %v6040_v10 = vpop.eup %6039  ;;  %v4136_v0 = vmul.f32 %v9727_v54, %v4116_v29  ;;  %v4011_v55 = vmul.f32 0.15915494, %v3995_v1 }
 0x3af   : > { %13094 = vst [vmem:[#allocation40_spill] sm:$0xff] %v10434_v34  ;;  %v10456_v2 = vsel %vm3381_vm9, 3.1415927, %v12717_v31  ;;  %v3505_v35 = vmul.f32 %v3504_v62, %v10352_v24  ;;  %v3771_v42 = vand.u32 2147483647, %v3770_v30  ;;  %v3341_v38 = vsel %vm10449_vm8, nan, %v3337_v27 }
 0x3b0   : > { %v10461_v52 = vmul.f32 %v6040_v10, %v3541_v6  ;;  %v3777_v59 = vmax.f32 %v10440_v8, %v10432_v57  ;;  %v3373_v46 = vmul.f32 %v3372_v3, %v10105_v28  ;;  %v3418_v18 = vadd.f32 -0.33333147, %v3417_v45 }
 0x3b1   : > { %v3463_v29 = vadd.f32 0.19993454, %v3462_v58  ;;  %v3506_v48 = vadd.f32 0.1064488, %v3505_v35  ;;  %v4182_v1 = vmul.f32 %v10434_v34, %v10434_v34  ;;  %v10471_v49 = vsel %vm3378_vm2, 2.3561945, %v12718_v17 }
 0x3b2   : > { %v10475_v30 = vmul.f32 %v10461_v52, %v10461_v52  ;;  %6041 = vrcp.f32 %v3777_v59  ;;  %v4107_v27 = vmul.f32 %v4048_v37, %v4011_v55  ;;  %vm3425_vm3 = vcmp.lt.f32.partialorder %v13059_v51, 0.0 }
 0x3b3   : > { %vm3428_vm1 = vcmp.lt.s32.totalorder %v13059_v51, 0  ;;  %v3507_v3 = vmul.f32 %v3506_v48, %v10352_v24  ;;  %v10484_v45 = vclamps-f32 %v4136_v0, 0.9999999  ;;  %v13099_v58 = vand.u32 2147483648, %v9765_v33 }
 0x3b4   : > { %v3347_v6 = vsel %vm3346_vm10, %v10376_v36, %v3341_v38  ;;  %v3546_v10 = vmul.f32 0.002785687, %v10475_v30  ;;  %v3374_v14 = vadd.f32 %v3373_v46, %v10105_v28  ;;  %v3419_v63 = vmul.f32 %v3418_v18, %v10181_v43  ;;  %v13100_v18 = vld [vmem:[#allocation15_spill] sm:$0xff] }
 0x3b5   : > { %13098 = vst [vmem:[#allocation37_spill] sm:$0xff] %v10484_v45  ;;  %v3773_v62 = vor.u32 %v13099_v58, %v3771_v42  ;;  %v3464_v55 = vmul.f32 %v3463_v29, %v10283_v53  ;;  %v3508_v19 = vadd.f32 -0.14207031, %v3507_v3  ;;  %v10493_v35 = vsub.f32 1.0, %v4182_v1 }
 0x3b6   : > { %v10496_v59 = vsel %vm3428_vm1, 3.1415927, %v12717_v31  ;;  %v3547_v0 = vadd.f32 -0.015866, %v3546_v10  ;;  %6043 = vrsqrt.f32 %v10096_v4  ;;  %v4127_v42 = vmul.f32 %v9727_v54, %v4107_v27 }
 0x3b7   : > { %v3348_v36 = vand.u32 2147483647, %v3347_v6  ;;  %v10503_v28 = vsel %vm3425_vm3, 2.3561945, %v12718_v17  ;;  %v3509_v43 = vmul.f32 %v3508_v19, %v10352_v24  ;;  %v4184_v38 = vmul.f32 %v10484_v45, %v10484_v45  ;;  %v13102_v6 = vld [vmem:[#allocation39_spill] sm:$0xff] }
 0x3b8   : > { %v3973_v46 = vsub.f32 3.1415927, %v3773_v62  ;;  %v3548_v48 = vmul.f32 %v3547_v0, %v10475_v30  ;;  %v3376_v1 = vsub.f32 1.5707964, %v3374_v14  ;;  %v3420_v37 = vmul.f32 %v3419_v63, %v10165_v16 }
 0x3b9   : > { %v3465_v27 = vadd.f32 -0.33333147, %v3464_v55  ;;  %v3510_v3 = vadd.f32 0.19993454, %v3509_v43  ;;  %v10512_v58 = vand.u32 2147483647, %v10484_v45  ;;  %vm3375_vm4 = vcmp.gt.f32.partialorder %v10007_v60, %v10004_v15 }
 0x3ba   : > { %v3549_v19 = vadd.f32 0.04247222, %v3548_v48  ;;  %v10517_v40 = vclamps-f32 %v4127_v42, 0.9999999  ;;  %v13104_v62 = vand.u32 2147483648, %v13090_v39  ;;  %vm3472_vm11 = vcmp.lt.f32.partialorder %v13069_v5, 0.0 }
 0x3bb   : > { %13101 = vst [vmem:[#allocation41_spill] sm:$0xff] %v10512_v58  ;;  %vm3475_vm15 = vcmp.lt.s32.totalorder %v13069_v5, 0  ;;  %v10523_v55 = vsub.f32 1.0, %v4184_v38  ;;  %v3989_v0 = vmul.f32 %v9234_v9, %v3973_v46  ;;  %v3776_v10 = vmin.f32 %v10440_v8, %v10432_v57  ;;  %v13106_v45 = vld [vmem:[#allocation20_spill] sm:$0xff] }
 0x3bc   : > { %13103 = vst [vmem:[#allocation24_spill] sm:$0xff] %v10517_v40  ;;  %v3350_v29 = vor.u32 %v13104_v62, %v3348_v36  ;;  %v6042_v63 = vpop.eup %6041  ;;  %v3550_v43 = vmul.f32 %v3549_v19, %v10475_v30  ;;  %v3377_v48 = vsel %vm3375_vm4, %v3376_v1, %v3374_v14  ;;  %v3421_v42 = vadd.f32 %v3420_v37, %v10165_v16  ;;  %v13108_v1 = vld [vmem:[#allocation11_spill] sm:$0xff] }
 0x3bd   : > { %13105 = vst [vmem:[#allocation17_spill] sm:$0xff] %v10523_v55  ;;  %vm3422_vm5 = vcmp.gt.f32.partialorder %v13106_v45, %v10062_v12  ;;  %v3466_v36 = vmul.f32 %v3465_v27, %v10283_v53  ;;  %v3511_v62 = vmul.f32 %v3510_v3, %v10352_v24  ;;  %v10535_v38 = vsel %vm3475_vm15, 3.1415927, %v12717_v31 }
 0x3be   : > { %v10540_v9 = vsel %vm3472_vm11, 2.3561945, %v12718_v17  ;;  %v3551_v46 = vadd.f32 -0.074975304, %v3550_v43  ;;  %v10542_v19 = vmul.f32 %v6042_v63, %v3776_v10  ;;  %v4175_v16 = vmul.f32 %v10517_v40, %v10517_v40 }
 0x3bf   : > { %v10547_v14 = vand.u32 2147483647, %v10517_v40  ;;  %v3964_v53 = vsub.f32 3.1415927, %v3350_v29  ;;  %vm3383_vm12 = vcmp.eq.f32.partialorder %v13100_v18, 0.0  ;;  %vm3386_vm7 = vcmp.ne.f32.partialorder %v13100_v18, %v13100_v18 }
 0x3c0   : > { %6045 = vrsqrt.f32 %v13108_v1  ;;  %v6044_v37 = vpop.eup %6043  ;;  %v4005_v27 = vadd.f32 %v3989_v0, %v9765_v33  ;;  %v3379_v3 = vsub.f32 3.1415927, %v3377_v48  ;;  %v3552_v10 = vmul.f32 %v3551_v46, %v10475_v30 }
 0x3c1   : > { %13107 = vst [vmem:[#allocation30_spill] sm:$0xff] %v10547_v14  ;;  %v10557_v63 = vmul.f32 %v10542_v19, %v10542_v19  ;;  %vm3385_vm9 = vcmp.ne.f32.partialorder %v13049_v25, %v13049_v25  ;;  %v3423_v29 = vsub.f32 1.5707964, %v3421_v42  ;;  %v3467_v43 = vmul.f32 %v3466_v36, %v10258_v41 }
 0x3c2   : > { %v3512_v40 = vadd.f32 -0.33333147, %v3511_v62  ;;  %v3190_v58 = vmul.f32 %v6044_v37, %v10096_v4  ;;  %vm3392_vm6 = vcmp.eq.s32.totalorder %v10007_v60, inf  ;;  %v3553_v55 = vadd.f32 0.1064488, %v3552_v10  ;;  %vm10613_vm15 = vmor %vm3385_vm9, %vm3386_vm7 }
 0x3c3   : > { %v3781_v33 = vmul.f32 0.002785687, %v10557_v63  ;;  %vm3191_vm13 = vcmp.eq.f32.partialorder %v10096_v4, inf  ;;  %v3194_v0 = vand.u32 2147483648, %v10096_v4  ;;  %v10567_v46 = vsub.f32 1.0, %v4175_v16 }
 0x3c4   : > { %v3980_v26 = vmul.f32 %v9391_v32, %v3964_v53  ;;  %v3192_v14 = vsel %vm3191_vm13, %v10096_v4, %v3190_v58  ;;  %vm3193_vm0 = vcmp.eq.f32.partialorder %v10096_v4, 0.0  ;;  %v4021_v36 = vmul.f32 0.15915494, %v4005_v27 }
 0x3c5   : > { %13109 = vst [vmem:[#allocation22_spill] sm:$0xff] %v10567_v46  ;;  %vm3391_vm14 = vcmp.eq.s32.totalorder %v10004_v15, inf  ;;  %v3554_v62 = vmul.f32 %v3553_v55, %v10475_v30  ;;  %v3782_v37 = vadd.f32 -0.015866, %v3781_v33  ;;  %v10574_v10 = vsel %vm3193_vm0, %v3194_v0, %v3192_v14  ;;  %v13110_v46 = vld [vmem:[#allocation38_spill] sm:$0xff] }
 0x3c6   : > { %v3380_v34 = vsel %vm3378_vm2, %v3379_v3, %v3377_v48  ;;  %v3513_v16 = vmul.f32 %v3512_v40, %v10352_v24  ;;  %v10580_v32 = vand.u32 2147483647, %v13110_v46  ;;  %v10583_v58 = vand.u32 2147483647, %v10574_v10  ;;  %v13111_v3 = vld [vmem:[#allocation43_spill] sm:$0xff]  ;;  %vm3393_vm13 = vmand %vm3391_vm14, %vm3392_vm6 }
 0x3c7   : > { %v3424_v4 = vsel %vm3422_vm5, %v3423_v29, %v3421_v42  ;;  %v3468_v55 = vadd.f32 %v3467_v43, %v10258_v41  ;;  %v3555_v14 = vadd.f32 -0.14207031, %v3554_v62  ;;  %v3783_v53 = vmul.f32 %v3782_v37, %v10557_v63  ;;  %v5169_v29 = vld [vmem:[%s6372_s0 + $0x18] sm:$0xff] }
 0x3c8   : > { %v3996_v27 = vadd.f32 %v3980_v26, %v13090_v39  ;;  %vm3430_vm2 = vcmp.eq.f32.partialorder %v13102_v6, 0.0  ;;  %vm3433_vm8 = vcmp.ne.f32.partialorder %v13102_v6, %v13102_v6  ;;  %vm3469_vm10 = vcmp.gt.f32.partialorder %v10152_v47, %v10156_v20 }
 0x3c9   : > { %vm3522_vm1 = vcmp.lt.s32.totalorder %v9711_v61, 0  ;;  %v3824_v40 = vmax.f32 %v10580_v32, %v10583_v58  ;;  %v4117_v24 = vmul.f32 %v4088_v56, %v4021_v36  ;;  %v3384_v41 = vsel %vm3383_vm12, %v10456_v2, %v3380_v34 }
 0x3ca   : > { %v3556_v26 = vmul.f32 %v3555_v14, %v10475_v30  ;;  %v3784_v39 = vadd.f32 0.04247222, %v3783_v53  ;;  %v6046_v48 = vpop.eup %6045  ;;  %v3426_v42 = vsub.f32 3.1415927, %v3424_v4  ;;  %vm3432_vm4 = vcmp.ne.f32.partialorder %v13059_v51, %v13059_v51  ;;  %v4052_v14 = vpop.permute.xlu1 %4051 }
 0x3cb   : > { %v3514_v43 = vmul.f32 %v3513_v16, %v10339_v23  ;;  %6047 = vrcp.f32 %v3824_v40  ;;  %vm3439_vm5 = vcmp.eq.s32.totalorder %v13106_v45, inf  ;;  %v3470_v34 = vsub.f32 1.5707964, %v3468_v55 }
 0x3cc   : > { %vm3519_vm12 = vcmp.lt.f32.partialorder %v9711_v61, 0.0  ;;  %v10622_v2 = vsel %vm3522_vm1, 3.1415927, %v12717_v31  ;;  %v3785_v33 = vmul.f32 %v3784_v39, %v10557_v63  ;;  %v4012_v0 = vmul.f32 0.15915494, %v3996_v27 }
 0x3cd   : > { %v3388_v36 = vsel %vm10613_vm15, nan, %v3384_v41  ;;  %v3557_v62 = vadd.f32 0.19993454, %v3556_v26  ;;  %v3197_v37 = vmul.f32 %v6046_v48, %v13108_v1  ;;  %v4137_v16 = vmul.f32 %v9727_v54, %v4117_v24  ;;  %v13115_v48 = vld [vmem:[#allocation21_spill] sm:$0xff] }
 0x3ce   : > { %vm3438_vm7 = vcmp.eq.s32.totalorder %v10062_v12, inf  ;;  %v3786_v53 = vadd.f32 -0.074975304, %v3785_v33  ;;  %vm3198_vm9 = vcmp.eq.f32.partialorder %v13108_v1, inf  ;;  %v3201_v40 = vand.u32 2147483648, %v13108_v1 }
 0x3cf   : > { %v3427_v27 = vsel %vm3425_vm3, %v3426_v42, %v3424_v4  ;;  %v3515_v41 = vadd.f32 %v3514_v43, %v10339_v23  ;;  %v3199_v24 = vsel %vm3198_vm9, %v13108_v1, %v3197_v37  ;;  %vm3200_vm0 = vcmp.eq.f32.partialorder %v13108_v1, 0.0  ;;  %vm3440_vm9 = vmand %vm3438_vm7, %vm3439_vm5 }
 0x3d0   : > { %v3394_v26 = vsel %vm3393_vm13, %v10471_v49, %v3388_v36  ;;  %v3471_v39 = vsel %vm3469_vm10, %v3470_v34, %v3468_v55  ;;  %vm3480_vm1 = vcmp.ne.f32.partialorder %v13111_v3, %v13111_v3  ;;  %v3787_v15 = vmul.f32 %v3786_v53, %v10557_v63  ;;  %vm10674_vm10 = vmor %vm3432_vm4, %vm3433_vm8  ;;  %v13119_v36 = vld [vmem:[#allocation18_spill] sm:$0xff] }
 0x3d1   : > { %v10648_v60 = vsel %vm3200_vm0, %v3201_v40, %v3199_v24  ;;  %v4108_v4 = vmul.f32 %v4052_v14, %v4012_v0  ;;  %vm3477_vm3 = vcmp.eq.f32.partialorder %v13111_v3, 0.0  ;;  %v3558_v23 = vmul.f32 %v3557_v62, %v10475_v30 }
 0x3d2   : > { %13114 = vst [vmem:[#allocation33_spill] sm:$0xff] %v10648_v60  ;;  %v10653_v1 = vand.u32 2147483647, %v13115_v48  ;;  %v10656_v49 = vand.u32 2147483647, %v10648_v60  ;;  %v3431_v55 = vsel %vm3430_vm2, %v10496_v59, %v3427_v27  ;;  %vm3479_vm6 = vcmp.ne.f32.partialorder %v13069_v5, %v13069_v5 }
 0x3d3   : > { %v10658_v42 = vclamps-f32 %v4137_v16, 0.9999999  ;;  %vm3566_vm14 = vcmp.lt.f32.partialorder %v13089_v50, 0.0  ;;  %v3788_v43 = vadd.f32 0.1064488, %v3787_v15  ;;  %vm3486_vm2 = vcmp.eq.s32.totalorder %v10152_v47, inf }
 0x3d4   : > { %v3395_v56 = vand.u32 2147483647, %v3394_v26  ;;  %v3473_v34 = vsub.f32 3.1415927, %v3471_v39  ;;  %v3517_v33 = vsub.f32 1.5707964, %v3515_v41  ;;  %v3871_v0 = vmax.f32 %v10653_v1, %v10656_v49 }
 0x3d5   : > { %13116 = vst [vmem:[#allocation35_spill] sm:$0xff] %v10658_v42  ;;  %vm3516_vm15 = vcmp.gt.f32.partialorder %v13119_v36, %v10242_v21  ;;  %v10684_v62 = vsel %vm3519_vm12, 2.3561945, %v12718_v17  ;;  %v3789_v37 = vmul.f32 %v3788_v43, %v10557_v63  ;;  %v3823_v16 = vmin.f32 %v10580_v32, %v10583_v58  ;;  %v6048_v14 = vpop.eup %6047 }
 0x3d6   : > { %v4128_v53 = vmul.f32 %v9727_v54, %v4108_v4  ;;  %v3435_v40 = vsel %vm10674_vm10, nan, %v3431_v55  ;;  %v3559_v27 = vadd.f32 -0.33333147, %v3558_v23  ;;  %6049 = vrcp.f32 %v3871_v0 }
 0x3d7   : > { %vm3485_vm8 = vcmp.eq.s32.totalorder %v10156_v20, inf  ;;  %vm3569_vm4 = vcmp.lt.s32.totalorder %v13089_v50, 0  ;;  %v10697_v24 = vsel %vm3566_vm14, 2.3561945, %v12718_v17  ;;  %v3790_v26 = vadd.f32 -0.14207031, %v3789_v37 }
 0x3d8   : > { %v10699_v15 = vmul.f32 %v6048_v14, %v3823_v16  ;;  %v4185_v4 = vmul.f32 %v10658_v42, %v10658_v42  ;;  %v13120_v43 = vand.u32 2147483648, %v13100_v18  ;;  %v3474_v23 = vsel %vm3472_vm11, %v3473_v34, %v3471_v39  ;;  %v13122_v16 = vld [vmem:[#allocation26_spill] sm:$0xff]  ;;  %v13124_v34 = vld [vmem:[#allocation28_spill] sm:$0xff]  ;;  %vm10743_vm11 = vmor %vm3479_vm6, %vm3480_vm1 }
 0x3d9   : > { %v3518_v0 = vsel %vm3516_vm15, %v3517_v33, %v3515_v41  ;;  %v10715_v59 = vand.u32 2147483647, %v10658_v42  ;;  %v3441_v37 = vsel %vm3440_vm9, %v10503_v28, %v3435_v40  ;;  %vm3524_vm13 = vcmp.eq.f32.partialorder %v13122_v16, 0.0  ;;  %vm3487_vm1 = vmand %vm3485_vm8, %vm3486_vm2 }
 0x3da   : > { %v3397_v55 = vor.u32 %v13120_v43, %v3395_v56  ;;  %v3791_v45 = vmul.f32 %v3790_v26, %v10557_v63  ;;  %v10722_v12 = vmul.f32 %v10699_v15, %v10699_v15  ;;  %v10724_v56 = vclamps-f32 %v4128_v53, 0.9999999  ;;  %v5166_v26 = vld [vmem:[%s6372_s0] sm:$0xff] }
 0x3db   : > { %13121 = vst [vmem:[#allocation16_spill] sm:$0xff] %v10715_v59  ;;  %v3560_v39 = vmul.f32 %v3559_v27, %v10475_v30  ;;  %v10730_v41 = vsel %vm3569_vm4, 3.1415927, %v12717_v31  ;;  %6051 = vrsqrt.f32 %v13124_v34  ;;  %v3478_v28 = vsel %vm3477_vm3, %v10535_v38, %v3474_v23 }
 0x3dc   : > { %13123 = vst [vmem:[#allocation13_spill] sm:$0xff] %v10724_v56  ;;  %v3520_v33 = vsub.f32 3.1415927, %v3518_v0  ;;  %v3792_v14 = vadd.f32 0.19993454, %v3791_v45  ;;  %vm3526_vm5 = vcmp.ne.f32.partialorder %v9711_v61, %v9711_v61  ;;  %v10751_v43 = vsub.f32 1.0, %v4185_v4 }
 0x3dd   : > { %v3828_v53 = vmul.f32 0.002785687, %v10722_v12  ;;  %v3965_v40 = vsub.f32 3.1415927, %v3397_v55  ;;  %v3442_v30 = vand.u32 2147483647, %v3441_v37  ;;  %vm3527_vm7 = vcmp.ne.f32.partialorder %v13122_v16, %v13122_v16 }
 0x3de   : > { %13127 = vst [vmem:[#allocation14_spill] sm:$0xff] %v10751_v43  ;;  %v3793_v55 = vmul.f32 %v3792_v14, %v10557_v63  ;;  %v5167_v37 = vld [vmem:[%s6372_s0 + $0x8] sm:$0xff]  ;;  %v5168_v45 = vld [vmem:[%s6372_s0 + $0x10] sm:$0xff]  ;;  %v4176_v42 = vmul.f32 %v10724_v56, %v10724_v56  ;;  %v10762_v59 = vand.u32 2147483647, %v10724_v56  ;;  %v3482_v38 = vsel %vm10743_vm11, nan, %v3478_v28  ;;  %vm10810_vm6 = vmor %vm3526_vm5, %vm3527_vm7 }
 0x3df   : > { %v3829_v23 = vadd.f32 -0.015866, %v3828_v53  ;;  %vm3533_vm0 = vcmp.eq.s32.totalorder %v13119_v36, inf  ;;  %v3561_v4 = vmul.f32 %v3560_v39, %v10461_v52  ;;  %v3521_v14 = vsel %vm3519_vm12, %v3520_v33, %v3518_v0 }
 0x3e0   : > { %13128 = vst [vmem:[#allocation42_spill] sm:$0xff] %v10762_v59  ;;  %v3794_v53 = vadd.f32 -0.33333147, %v3793_v55  ;;  %v3870_v60 = vmin.f32 %v10653_v1, %v10656_v49  ;;  %v6050_v56 = vpop.eup %6049  ;;  %v3981_v59 = vmul.f32 %v13049_v25, %v3965_v40  ;;  %v13129_v28 = vand.u32 2147483648, %v13102_v6 }
 0x3e1   : > { %v3830_v43 = vmul.f32 %v3829_v23, %v10722_v12  ;;  %vm3532_vm12 = vcmp.eq.s32.totalorder %v10242_v21, inf  ;;  %v5704_v0 = vpack.c.bf16 %v5167_v37, %v5166_v26  ;;  %v5708_v39 = vpack.c.bf16 %v5169_v29, %v5168_v45  ;;  %v5171_v23 = vld [vmem:[%s6372_s0 + $0x28] sm:$0xff]  ;;  %v13130_v26 = vld [vmem:[#allocation34_spill] sm:$0xff] }
 0x3e2   : > { %v3444_v27 = vor.u32 %v13129_v28, %v3442_v30  ;;  %v3488_v33 = vsel %vm3487_vm1, %v10540_v9, %v3482_v38  ;;  %vm3563_vm3 = vcmp.gt.f32.partialorder %v10358_v44, %v10355_v13  ;;  %v3795_v55 = vmul.f32 %v3794_v53, %v10557_v63  ;;  %v5170_v30 = vld [vmem:[%s6372_s0 + $0x20] sm:$0xff]  ;;  %v5173_v28 = vld [vmem:[%s6372_s0 + $0x38] sm:$0xff]  ;;  %vm3534_vm8 = vmand %vm3532_vm12, %vm3533_vm0 }
 0x3e3   : > { %v3831_v25 = vadd.f32 0.04247222, %v3830_v43  ;;  %v10785_v40 = vmul.f32 %v6050_v56, %v3870_v60  ;;  %v10789_v47 = vsub.f32 1.0, %v4176_v42  ;;  %v3525_v20 = vsel %vm3524_vm13, %v10622_v2, %v3521_v14  ;;  %5736 = vmatprep.subr.bf16.mxu1 %v5704_v0  ;;  %5705 = vmatprep.subr.bf16.mxu0 %v5704_v0  ;;  %v13131_v42 = vld [vmem:[#allocation31_spill] sm:$0xff] }
 0x3e4   : > { %v3562_v29 = vadd.f32 %v3561_v4, %v10461_v52  ;;  %v3796_v63 = vmul.f32 %v3795_v55, %v10542_v19  ;;  %5744 = vmatpush3.bf16.msra.mxu1 %v5704_v0  ;;  %5707 = vmatpush3.bf16.msra.mxu0 %v5704_v0  ;;  %6053 = vrsqrt.f32 %v13131_v42  ;;  %v3997_v52 = vadd.f32 %v3981_v59, %v13100_v18  ;;  %v5172_v4 = vld [vmem:[%s6372_s0 + $0x30] sm:$0xff] }
 0x3e5   : > { %v3832_v60 = vmul.f32 %v3831_v25, %v10722_v12  ;;  %v10800_v56 = vmul.f32 %v10785_v40, %v10785_v40  ;;  %v6052_v2 = vpop.eup %6051  ;;  %v3966_v38 = vsub.f32 3.1415927, %v3444_v27  ;;  %v3489_v43 = vand.u32 2147483647, %v3488_v33  ;;  %5737 = vmatprep.subr.bf16.mxu1 %v5708_v39  ;;  %5709 = vmatprep.subr.bf16.mxu0 %v5708_v39 }
 0x3e6   : > { %v5712_v45 = vpack.c.bf16 %v5171_v23, %v5170_v30  ;;  %v3529_v14 = vsel %vm10810_vm6, nan, %v3525_v20  ;;  %v3204_v53 = vmul.f32 %v6052_v2, %v13124_v34  ;;  %v3564_v27 = vsub.f32 1.5707964, %v3562_v29 }
 0x3e7   : > { %v3833_v18 = vadd.f32 -0.074975304, %v3832_v60  ;;  %v3875_v59 = vmul.f32 0.002785687, %v10800_v56  ;;  %vm3205_vm10 = vcmp.eq.f32.partialorder %v13124_v34, inf  ;;  %vm3207_vm2 = vcmp.eq.f32.partialorder %v13124_v34, 0.0 }
 0x3e8   : > { %v3208_v0 = vand.u32 2147483648, %v13124_v34  ;;  %v3797_v33 = vadd.f32 %v3796_v63, %v10542_v19  ;;  %v3206_v30 = vsel %vm3205_vm10, %v13124_v34, %v3204_v53  ;;  %5745 = vmatpush3.bf16.msra.mxu1 %v5708_v39  ;;  %5711 = vmatpush3.bf16.msra.mxu0 %v5708_v39  ;;  %v3982_v23 = vmul.f32 %v13059_v51, %v3966_v38  ;;  %v13134_v34 = vld [vmem:[#allocation25_spill] sm:$0xff] }
 0x3e9   : > { %v3834_v55 = vmul.f32 %v3833_v18, %v10722_v12  ;;  %v3876_v25 = vadd.f32 -0.015866, %v3875_v59  ;;  %vm3804_vm15 = vcmp.lt.s32.totalorder %v13095_v11, 0  ;;  %5738 = vmatprep.subr.bf16.mxu1 %v5712_v45  ;;  %v5716_v60 = vpack.c.bf16 %v5173_v28, %v5172_v4  ;;  %5713 = vmatprep.subr.bf16.mxu0 %v5712_v45 }
 0x3ea   : > { %v10828_v20 = vsel %vm3207_vm2, %v3208_v0, %v3206_v30  ;;  %v10836_v2 = vand.u32 2147483647, %v13134_v34  ;;  %v13135_v39 = vand.u32 2147483648, %v13111_v3  ;;  %v3535_v37 = vsel %vm3534_vm8, %v10684_v62, %v3529_v14  ;;  %v4056_v0 = vpop.permute.xlu1 %4055 }
 0x3eb   : > { %v3835_v19 = vadd.f32 0.1064488, %v3834_v55  ;;  %v3877_v63 = vmul.f32 %v3876_v25, %v10800_v56  ;;  %v10839_v51 = vand.u32 2147483647, %v10828_v20  ;;  %v3565_v36 = vsel %vm3563_vm3, %v3564_v27, %v3562_v29 }
 0x3ec   : > { %v3491_v38 = vor.u32 %v13135_v39, %v3489_v43  ;;  %vm3801_vm4 = vcmp.lt.f32.partialorder %v13095_v11, 0.0  ;;  %vm3571_vm9 = vcmp.eq.f32.partialorder %v13130_v26, 0.0  ;;  %vm3574_vm13 = vcmp.ne.f32.partialorder %v13130_v26, %v13130_v26  ;;  %5746 = vmatpush3.bf16.msra.mxu1 %v5712_v45  ;;  %5715 = vmatpush3.bf16.msra.mxu0 %v5712_v45 }
 0x3ed   : > { %v3799_v21 = vsub.f32 1.5707964, %v3797_v33  ;;  %v3836_v4 = vmul.f32 %v3835_v19, %v10722_v12  ;;  %v3878_v18 = vadd.f32 0.04247222, %v3877_v63  ;;  %v3918_v43 = vmax.f32 %v10836_v2, %v10839_v51  ;;  %5739 = vmatprep.subr.bf16.mxu1 %v5716_v60  ;;  %5717 = vmatprep.subr.bf16.mxu0 %v5716_v60 }
 0x3ee   : > { %v4013_v62 = vmul.f32 0.15915494, %v3997_v52  ;;  %v3998_v14 = vadd.f32 %v3982_v23, %v13102_v6  ;;  %vm3798_vm11 = vcmp.gt.f32.partialorder %v10432_v57, %v10440_v8  ;;  %v10860_v29 = vsel %vm3804_vm15, 3.1415927, %v12717_v31  ;;  %v6054_v59 = vpop.eup %6053 }
 0x3ef   : > { %v3567_v53 = vsub.f32 3.1415927, %v3565_v36  ;;  %vm3573_vm5 = vcmp.ne.f32.partialorder %v13089_v50, %v13089_v50  ;;  %v3837_v28 = vadd.f32 -0.14207031, %v3836_v4  ;;  %v3879_v52 = vmul.f32 %v3878_v18, %v10800_v56 }
 0x3f0   : > { %6055 = vrcp.f32 %v3918_v43  ;;  %v3967_v6 = vsub.f32 3.1415927, %v3491_v38  ;;  %v3536_v45 = vand.u32 2147483647, %v3535_v37  ;;  %vm3580_vm7 = vcmp.eq.s32.totalorder %v10358_v44, inf  ;;  %5747 = vmatpush3.bf16.msra.mxu1 %v5716_v60  ;;  %5719 = vmatpush3.bf16.msra.mxu0 %v5716_v60  ;;  %vm10922_vm15 = vmor %vm3573_vm5, %vm3574_vm13 }
 0x3f1   : > { %v4207_v27 = vmul.f32 %v6054_v59, %v13131_v42  ;;  %vm4208_vm0 = vcmp.eq.f32.partialorder %v13131_v42, inf  ;;  %v3800_v55 = vsel %vm3798_vm11, %v3799_v21, %v3797_v33  ;;  %v3838_v25 = vmul.f32 %v3837_v28, %v10722_v12  ;;  %v13137_v59 = vld [vmem:[#allocation12_spill] sm:$0xff] }
 0x3f2   : > { %v3880_v30 = vadd.f32 -0.074975304, %v3879_v52  ;;  %v4211_v23 = vand.u32 2147483648, %v13131_v42  ;;  %v4109_v19 = vmul.f32 %v4056_v0, %v4013_v62  ;;  %vm3579_vm1 = vcmp.eq.s32.totalorder %v10355_v13, inf  ;;  %v5174_v52 = vld [vmem:[%s6372_s0 + $0x40] sm:$0xff] }
 0x3f3   : > { %vm3806_vm12 = vcmp.eq.f32.partialorder %v10427_v7, 0.0  ;;  %vm3809_vm3 = vcmp.ne.f32.partialorder %v10427_v7, %v10427_v7  ;;  %v4209_v63 = vsel %vm4208_vm0, %v13131_v42, %v4207_v27  ;;  %vm4210_vm6 = vcmp.eq.f32.partialorder %v13131_v42, 0.0  ;;  %vm3581_vm8 = vmand %vm3579_vm1, %vm3580_vm7 }
 0x3f4   : > { %v3568_v33 = vsel %vm3566_vm14, %v3567_v53, %v3565_v36  ;;  %v3839_v39 = vadd.f32 0.19993454, %v3838_v25  ;;  %v3881_v38 = vmul.f32 %v3880_v30, %v10800_v56  ;;  %v10882_v60 = vsel %vm4210_vm6, %v4211_v23, %v4209_v63  ;;  %v5175_v25 = vld [vmem:[%s6372_s0 + $0x48] sm:$0xff]  ;;  %v5176_v30 = vld [vmem:[%s6372_s0 + $0x50] sm:$0xff]  ;;  %v5177_v23 = vld [vmem:[%s6372_s0 + $0x58] sm:$0xff] }
 0x3f5   : > { %v4014_v37 = vmul.f32 0.15915494, %v3998_v14  ;;  %v3983_v21 = vmul.f32 %v13069_v5, %v3967_v6  ;;  %v3802_v4 = vsub.f32 3.1415927, %v3800_v55  ;;  %vm3808_vm10 = vcmp.ne.f32.partialorder %v13095_v11, %v13095_v11 }
 0x3f6   : > { %v10888_v18 = vand.u32 2147483647, %v10882_v60  ;;  %v13136_v42 = vand.u32 2147483648, %v13122_v16  ;;  %v3840_v43 = vmul.f32 %v3839_v39, %v10722_v12  ;;  %v3882_v62 = vadd.f32 0.1064488, %v3881_v38 }
 0x3f7   : > { %v10894_v14 = vand.u32 2147483647, %v13137_v59  ;;  %v3572_v5 = vsel %vm3571_vm9, %v10730_v41, %v3568_v33  ;;  %v10902_v53 = vsel %vm3801_vm4, 2.3561945, %v12718_v17  ;;  %vm3815_vm14 = vcmp.eq.s32.totalorder %v10432_v57, inf  ;;  %vm10962_vm9 = vmor %vm3808_vm10, %vm3809_vm3 }
 0x3f8   : > { %v3538_v36 = vor.u32 %v13136_v42, %v3536_v45  ;;  %v4129_v6 = vmul.f32 %v9727_v54, %v4109_v19  ;;  %v4060_v45 = vpop.permute.xlu1 %4059  ;;  %vm3814_vm2 = vcmp.eq.s32.totalorder %v10440_v8, inf  ;;  %v3841_v27 = vadd.f32 -0.33333147, %v3840_v43 }
 0x3f9   : > { %v3883_v0 = vmul.f32 %v3882_v62, %v10800_v56  ;;  %v4321_v41 = vmax.f32 %v10894_v14, %v10888_v18  ;;  %v4110_v63 = vmul.f32 %v4060_v45, %v4014_v37  ;;  %v3999_v33 = vadd.f32 %v3983_v21, %v13111_v3  ;;  %vm3816_vm11 = vmand %vm3814_vm2, %vm3815_vm14 }
 0x3fa   : > { %v3803_v39 = vsel %vm3801_vm4, %v3802_v4, %v3800_v55  ;;  %v3917_v38 = vmin.f32 %v10836_v2, %v10839_v51  ;;  %v6056_v37 = vpop.eup %6055  ;;  %v3968_v3 = vsub.f32 3.1415927, %v3538_v36  ;;  %v3576_v21 = vsel %vm10922_vm15, nan, %v3572_v5  ;;  %v5179_v36 = vld [vmem:[%s6372_s0 + $0x68] sm:$0xff] }
 0x3fb   : > { %v3884_v42 = vadd.f32 -0.14207031, %v3883_v0  ;;  %6057 = vrcp.f32 %v4321_v41  ;;  %v3842_v43 = vmul.f32 %v3841_v27, %v10722_v12  ;;  %v5720_v45 = vpack.c.bf16 %v5175_v25, %v5174_v52  ;;  %v5178_v12 = vld [vmem:[%s6372_s0 + $0x60] sm:$0xff] }
 0x3fc   : > { %v10933_v62 = vmul.f32 %v6056_v37, %v3917_v38  ;;  %v5724_v28 = vpack.c.bf16 %v5177_v23, %v5176_v30  ;;  %v10935_v9 = vclamps-f32 %v4129_v6, 0.9999999  ;;  %v3807_v55 = vsel %vm3806_vm12, %v10860_v29, %v3803_v39  ;;  %v4064_v38 = vpop.permute.xlu1 %4063 }
 0x3fd   : > { %vm3851_vm4 = vcmp.lt.s32.totalorder %v13110_v46, 0  ;;  %v3885_v4 = vmul.f32 %v3884_v42, %v10800_v56  ;;  %v4130_v5 = vmul.f32 %v9727_v54, %v4110_v63  ;;  %v3582_v52 = vsel %vm3581_vm8, %v10697_v24, %v3576_v21  ;;  %5740 = vmatprep.subr.bf16.mxu1 %v5720_v45  ;;  %5721 = vmatprep.subr.bf16.mxu0 %v5720_v45  ;;  %v5180_v63 = vld [vmem:[%s6372_s0 + $0x70] sm:$0xff] }
 0x3fe   : > { %13140 = vst [vmem:[#allocation19_spill] sm:$0xff] %v10935_v9  ;;  %v10952_v44 = vmul.f32 %v10933_v62, %v10933_v62  ;;  %6059 = vrsqrt.f32 %v10493_v35  ;;  %v4015_v13 = vmul.f32 0.15915494, %v3999_v33  ;;  %v3984_v29 = vmul.f32 %v9711_v61, %v3968_v3  ;;  %5748 = vmatpush3.bf16.msra.mxu1 %v5720_v45  ;;  %5723 = vmatpush3.bf16.msra.mxu0 %v5720_v45  ;;  %v5181_v33 = vld [vmem:[%s6372_s0 + $0x78] sm:$0xff] }
 0x3ff   : > { %vm3848_vm13 = vcmp.lt.f32.partialorder %v13110_v46, 0.0  ;;  %v3886_v6 = vadd.f32 0.19993454, %v3885_v4  ;;  %v3811_v27 = vsel %vm10962_vm9, nan, %v3807_v55  ;;  %v3843_v61 = vmul.f32 %v3842_v43, %v10699_v15  ;;  %5741 = vmatprep.subr.bf16.mxu1 %v5724_v28  ;;  %5725 = vmatprep.subr.bf16.mxu0 %v5724_v28 }
 0x400   : > { %v3922_v0 = vmul.f32 0.002785687, %v10952_v44  ;;  %v5728_v41 = vpack.c.bf16 %v5179_v36, %v5178_v12  ;;  %v3583_v25 = vand.u32 2147483647, %v3582_v52  ;;  %v10974_v30 = vsel %vm3851_vm4, 3.1415927, %v12717_v31 }
 0x401   : > { %v3887_v23 = vmul.f32 %v3886_v6, %v10800_v56  ;;  %v4177_v19 = vmul.f32 %v10935_v9, %v10935_v9  ;;  %v10981_v39 = vclamps-f32 %v4130_v5, 0.9999999  ;;  %v10990_v37 = vsel %vm3848_vm13, 2.3561945, %v12718_v17 }
 0x402   : > { %v3923_v3 = vadd.f32 -0.015866, %v3922_v0  ;;  %v4111_v21 = vmul.f32 %v4064_v38, %v4015_v13  ;;  %v4000_v42 = vadd.f32 %v3984_v29, %v13122_v16  ;;  %v3817_v43 = vsel %vm3816_vm11, %v10902_v53, %v3811_v27  ;;  %5749 = vmatpush3.bf16.msra.mxu1 %v5724_v28  ;;  %5727 = vmatpush3.bf16.msra.mxu0 %v5724_v28 }
 0x403   : > { %13143 = vst [vmem:[#allocation23_spill] sm:$0xff] %v10981_v39  ;;  %v3888_v45 = vadd.f32 -0.33333147, %v3887_v23  ;;  %v10995_v55 = vand.u32 2147483647, %v10935_v9  ;;  %v3844_v57 = vadd.f32 %v3843_v61, %v10699_v15  ;;  %5742 = vmatprep.subr.bf16.mxu1 %v5728_v41  ;;  %v5732_v4 = vpack.c.bf16 %v5181_v33, %v5180_v63  ;;  %5729 = vmatprep.subr.bf16.mxu0 %v5728_v41 }
 0x404   : > { %v3924_v8 = vmul.f32 %v3923_v3, %v10952_v44  ;;  %v13144_v36 = vand.u32 2147483648, %v13130_v26  ;;  %v4320_v53 = vmin.f32 %v10894_v14, %v10888_v18  ;;  %6061 = vrsqrt.f32 %v10387_v22 }
 0x405   : > { %v6058_v12 = vpop.eup %6057  ;;  %v3889_v16 = vmul.f32 %v3888_v45, %v10800_v56  ;;  %v11005_v28 = vsub.f32 1.0, %v4177_v19  ;;  %v4178_v15 = vmul.f32 %v10981_v39, %v10981_v39  ;;  %v3818_v52 = vand.u32 2147483647, %v3817_v43 }
 0x406   : > { %v3585_v5 = vor.u32 %v13144_v36, %v3583_v25  ;;  %v3925_v13 = vadd.f32 0.04247222, %v3924_v8  ;;  %v11010_v29 = vand.u32 2147483647, %v10981_v39  ;;  %v4016_v24 = vmul.f32 0.15915494, %v4000_v42  ;;  %5750 = vmatpush3.bf16.msra.mxu1 %v5728_v41  ;;  %5731 = vmatpush3.bf16.msra.mxu0 %v5728_v41  ;;  %v4068_v41 = vpop.permute.xlu1 %4067 }
 0x407   : > { %vm3845_vm5 = vcmp.gt.f32.partialorder %v10583_v58, %v10580_v32  ;;  %v11014_v56 = vmul.f32 %v6058_v12, %v4320_v53  ;;  %v4131_v27 = vmul.f32 %v9727_v54, %v4111_v21  ;;  %v3846_v61 = vsub.f32 1.5707964, %v3844_v57  ;;  %5743 = vmatprep.subr.bf16.mxu1 %v5732_v4  ;;  %5733 = vmatprep.subr.bf16.mxu0 %v5732_v4 }
 0x408   : > { %13145 = vst [vmem:[#allocation27_spill] sm:$0xff] %v11010_v29  ;;  %v6060_v6 = vpop.eup %6059  ;;  %vm3898_vm7 = vcmp.lt.s32.totalorder %v13115_v48, 0  ;;  %v3926_v0 = vmul.f32 %v3925_v13, %v10952_v44  ;;  %v3969_v25 = vsub.f32 3.1415927, %v3585_v5  ;;  %v3890_v23 = vmul.f32 %v3889_v16, %v10785_v40  ;;  %v13147_v5 = vld [vmem:[#allocation40_spill] sm:$0xff] }
 0x409   : > { %v11022_v63 = vmul.f32 %v11014_v56, %v11014_v56  ;;  %v4263_v33 = vmul.f32 %v6060_v6, %v10493_v35  ;;  %v13146_v19 = vand.u32 2147483648, %v10427_v7  ;;  %vm4264_vm0 = vcmp.eq.f32.partialorder %v10493_v35, inf }
 0x40a   : > { %v3927_v3 = vadd.f32 -0.074975304, %v3926_v0  ;;  %v4267_v21 = vand.u32 2147483648, %v10493_v35  ;;  %v4112_v42 = vmul.f32 %v4068_v41, %v4016_v24  ;;  %5751 = vmatpush3.bf16.msra.mxu1 %v5732_v4  ;;  %vm4266_vm1 = vcmp.eq.f32.partialorder %v10493_v35, 0.0  ;;  %5735 = vmatpush3.bf16.msra.mxu0 %v5732_v4  ;;  %v13148_v24 = vld [vmem:[#allocation22_spill] sm:$0xff] }
 0x40b   : > { %v3820_v38 = vor.u32 %v13146_v19, %v3818_v52  ;;  %v4325_v43 = vmul.f32 0.002785687, %v11022_v63  ;;  %v4265_v45 = vsel %vm4264_vm0, %v10493_v35, %v4263_v33  ;;  %v3847_v8 = vsel %vm3845_vm5, %v3846_v61, %v3844_v57 }
 0x40c   : > { %v3928_v12 = vmul.f32 %v3927_v3, %v10952_v44  ;;  %v11036_v36 = vsel %vm4266_vm1, %v4267_v21, %v4265_v45  ;;  %v11039_v16 = vand.u32 2147483647, %v13147_v5  ;;  %v3891_v53 = vadd.f32 %v3890_v23, %v10785_v40 }
 0x40d   : > { %v4326_v52 = vadd.f32 -0.015866, %v4325_v43  ;;  %v11043_v13 = vand.u32 2147483647, %v11036_v36  ;;  %6063 = vrsqrt.f32 %v13148_v24  ;;  %v11046_v35 = vsub.f32 1.0, %v4178_v15 }
 0x40e   : > { %v3985_v4 = vmul.f32 %v13089_v50, %v3969_v25  ;;  %v3974_v57 = vsub.f32 3.1415927, %v3820_v38  ;;  %v3929_v6 = vadd.f32 0.1064488, %v3928_v12  ;;  %v6062_v61 = vpop.eup %6061  ;;  %v11049_v0 = vclamps-f32 %v4131_v27, 0.9999999 }
 0x40f   : > { %vm3853_vm12 = vcmp.eq.f32.partialorder %v10574_v10, 0.0  ;;  %vm3856_vm3 = vcmp.ne.f32.partialorder %v10574_v10, %v10574_v10  ;;  %v4327_v23 = vmul.f32 %v4326_v52, %v11022_v63  ;;  %v4697_v15 = vmax.f32 %v11039_v16, %v11043_v13 }
 0x410   : > { %13149 = vst [vmem:[#allocation29_spill] sm:$0xff] %v11049_v0  ;;  %v3849_v33 = vsub.f32 3.1415927, %v3847_v8  ;;  %vm3895_vm6 = vcmp.lt.f32.partialorder %v13115_v48, 0.0  ;;  %v11062_v50 = vsel %vm3898_vm7, 3.1415927, %v12717_v31  ;;  %v3930_v27 = vmul.f32 %v3929_v6, %v10952_v44 }
 0x411   : > { %v4132_v25 = vmul.f32 %v9727_v54, %v4112_v42  ;;  %vm3855_vm10 = vcmp.ne.f32.partialorder %v13110_v46, %v13110_v46  ;;  %v3893_v41 = vsub.f32 1.5707964, %v3891_v53  ;;  %v4328_v19 = vadd.f32 0.04247222, %v4327_v23 }
 0x412   : > { %6065 = vrcp.f32 %v4697_v15  ;;  %v4001_v38 = vadd.f32 %v3985_v4, %v13130_v26  ;;  %v3990_v3 = vmul.f32 %v13095_v11, %v3974_v57  ;;  %v3931_v21 = vadd.f32 -0.14207031, %v3930_v27  ;;  %vm11123_vm7 = vmor %vm3855_vm10, %vm3856_vm3 }
 0x413   : > { %v4270_v43 = vmul.f32 %v6062_v61, %v10387_v22  ;;  %v4179_v45 = vmul.f32 %v11049_v0, %v11049_v0  ;;  %vm3862_vm14 = vcmp.eq.s32.totalorder %v10583_v58, inf  ;;  %v4329_v42 = vmul.f32 %v4328_v19, %v11022_v63 }
 0x414   : > { %vm4271_vm2 = vcmp.eq.f32.partialorder %v10387_v22, inf  ;;  %v4274_v12 = vand.u32 2147483648, %v10387_v22  ;;  %v3850_v52 = vsel %vm3848_vm13, %v3849_v33, %v3847_v8  ;;  %vm3892_vm15 = vcmp.gt.f32.partialorder %v10656_v49, %v10653_v1 }
 0x415   : > { %v4272_v11 = vsel %vm4271_vm2, %v10387_v22, %v4270_v43  ;;  %vm4273_vm8 = vcmp.eq.f32.partialorder %v10387_v22, 0.0  ;;  %vm3861_vm4 = vcmp.eq.s32.totalorder %v10580_v32, inf  ;;  %v3894_v26 = vsel %vm3892_vm15, %v3893_v41, %v3891_v53  ;;  %v4072_v53 = vpop.permute.xlu1 %4071  ;;  %v13153_v41 = vld [vmem:[#allocation33_spill] sm:$0xff] }
 0x416   : > { %v3932_v4 = vmul.f32 %v3931_v21, %v10952_v44  ;;  %v4330_v57 = vadd.f32 -0.074975304, %v4329_v42  ;;  %v11085_v6 = vsel %vm4273_vm8, %v4274_v12, %v4272_v11  ;;  %v11087_v61 = vclamps-f32 %v4132_v25, 0.9999999 }
 0x417   : > { %v4017_v23 = vmul.f32 0.15915494, %v4001_v38  ;;  %v4006_v8 = vadd.f32 %v3990_v3, %v10427_v7  ;;  %v11091_v15 = vand.u32 2147483647, %v11085_v6  ;;  %v6064_v33 = vpop.eup %6063  ;;  %v11093_v27 = vsub.f32 1.0, %v4179_v45  ;;  %v13154_v45 = vld [vmem:[#allocation36_spill] sm:$0xff] }
 0x418   : > { %13150 = vst [vmem:[#allocation15_spill] sm:$0xff] %v11087_v61  ;;  %v11096_v22 = vand.u32 2147483647, %v11049_v0  ;;  %vm3900_vm9 = vcmp.eq.f32.partialorder %v13153_v41, 0.0  ;;  %v11102_v25 = vsel %vm3895_vm6, 2.3561945, %v12718_v17  ;;  %v4331_v19 = vmul.f32 %v4330_v57, %v11022_v63 }
 0x419   : > { %13151 = vst [vmem:[#allocation39_spill] sm:$0xff] %v11093_v27  ;;  %v3854_v7 = vsel %vm3853_vm12, %v10974_v30, %v3850_v52  ;;  %v3896_v38 = vsub.f32 3.1415927, %v3894_v26  ;;  %vm3903_vm13 = vcmp.ne.f32.partialorder %v13153_v41, %v13153_v41  ;;  %vm3942_vm11 = vcmp.lt.f32.partialorder %v13134_v34, 0.0 }
 0x41a   : > { %13152 = vst [vmem:[#allocation20_spill] sm:$0xff] %v11096_v22  ;;  %v3933_v21 = vadd.f32 0.19993454, %v3932_v4  ;;  %vm3945_vm5 = vcmp.lt.s32.totalorder %v13134_v34, 0  ;;  %v4332_v43 = vadd.f32 0.1064488, %v4331_v19  ;;  %v4744_v42 = vmax.f32 %v13154_v45, %v11091_v15  ;;  %v4092_v19 = vpop.permute.xlu0 %4091 }
 0x41b   : > { %v4180_v12 = vmul.f32 %v11087_v61, %v11087_v61  ;;  %v4113_v11 = vmul.f32 %v4072_v53, %v4017_v23  ;;  %v4022_v30 = vmul.f32 0.15915494, %v4006_v8  ;;  %vm3902_vm0 = vcmp.ne.f32.partialorder %v13115_v48, %v13115_v48 }
 0x41c   : > { %v4214_v4 = vmul.f32 %v6064_v33, %v13148_v24  ;;  %v6066_v57 = vpop.eup %6065  ;;  %v3858_v23 = vsel %vm11123_vm7, nan, %v3854_v7  ;;  %vm3909_vm1 = vcmp.eq.s32.totalorder %v10656_v49, inf  ;;  %v4333_v8 = vmul.f32 %v4332_v43, %v11022_v63  ;;  %vm11193_vm15 = vmor %vm3902_vm0, %vm3903_vm13 }
 0x41d   : > { %v4696_v53 = vmin.f32 %v11039_v16, %v11043_v13  ;;  %6067 = vrcp.f32 %v4744_v42  ;;  %v3897_v3 = vsel %vm3895_vm6, %v3896_v38, %v3894_v26  ;;  %vm4215_vm12 = vcmp.eq.f32.partialorder %v13148_v24, inf  ;;  %vm3863_vm6 = vmand %vm3861_vm4, %vm3862_vm14 }
 0x41e   : > { %vm4217_vm3 = vcmp.eq.f32.partialorder %v13148_v24, 0.0  ;;  %v4218_v33 = vand.u32 2147483648, %v13148_v24  ;;  %vm3908_vm10 = vcmp.eq.s32.totalorder %v10653_v1, inf  ;;  %v3934_v7 = vmul.f32 %v3933_v21, %v10952_v44 }
 0x41f   : > { %v4334_v52 = vadd.f32 -0.14207031, %v4333_v8  ;;  %v11143_v40 = vmul.f32 %v6066_v57, %v4696_v53  ;;  %v4216_v43 = vsel %vm4215_vm12, %v13148_v24, %v4214_v4  ;;  %v4118_v0 = vmul.f32 %v4092_v19, %v4022_v30  ;;  %v13159_v53 = vld [vmem:[#allocation30_spill] sm:$0xff]  ;;  %vm3910_vm8 = vmand %vm3908_vm10, %vm3909_vm1 }
 0x420   : > { %v11153_v26 = vsel %vm3945_vm5, 3.1415927, %v12717_v31  ;;  %v11158_v38 = vsel %vm3942_vm11, 2.3561945, %v12718_v17  ;;  %v11160_v21 = vsel %vm4217_vm3, %v4218_v33, %v4216_v43  ;;  %v3864_v24 = vsel %vm3863_vm6, %v10990_v37, %v3858_v23 }
 0x421   : > { %v4335_v42 = vmul.f32 %v4334_v52, %v11022_v63  ;;  %v11166_v32 = vmul.f32 %v11143_v40, %v11143_v40  ;;  %v11169_v58 = vand.u32 2147483647, %v11160_v21  ;;  %v11171_v30 = vsub.f32 1.0, %v4180_v12 }
 0x422   : > { %v11174_v4 = vand.u32 2147483647, %v11087_v61  ;;  %v4133_v57 = vmul.f32 %v9727_v54, %v4113_v11  ;;  %v3901_v37 = vsel %vm3900_vm9, %v11062_v50, %v3897_v3  ;;  %v3935_v19 = vadd.f32 -0.33333147, %v3934_v7 }
 0x423   : > { %13157 = vst [vmem:[#allocation11_spill] sm:$0xff] %v11171_v30  ;;  %v4336_v23 = vadd.f32 0.19993454, %v4335_v42  ;;  %v4701_v8 = vmul.f32 0.002785687, %v11166_v32  ;;  %v4368_v33 = vmax.f32 %v13159_v53, %v11169_v58  ;;  %vm4345_vm14 = vcmp.lt.f32.partialorder %v13137_v59, 0.0 }
 0x424   : > { %13158 = vst [vmem:[#allocation38_spill] sm:$0xff] %v11174_v4  ;;  %v3865_v52 = vand.u32 2147483647, %v3864_v24  ;;  %vm4348_vm2 = vcmp.lt.s32.totalorder %v13137_v59, 0  ;;  %v4138_v11 = vmul.f32 %v9727_v54, %v4118_v0  ;;  %v11198_v43 = vclamps-f32 %v4133_v57, 0.9999999 }
 0x425   : > { %v4337_v3 = vmul.f32 %v4336_v23, %v11022_v63  ;;  %v4702_v7 = vadd.f32 -0.015866, %v4701_v8  ;;  %6069 = vrcp.f32 %v4368_v33  ;;  %v3905_v24 = vsel %vm11193_vm15, nan, %v3901_v37 }
 0x426   : > { %13162 = vst [vmem:[#allocation43_spill] sm:$0xff] %v11198_v43  ;;  %v4743_v0 = vmin.f32 %v13154_v45, %v11091_v15  ;;  %6071 = vrsqrt.f32 %v10789_v47  ;;  %v3936_v12 = vmul.f32 %v3935_v19, %v10952_v44  ;;  %v11207_v39 = vsel %vm4348_vm2, 3.1415927, %v12717_v31 }
 0x427   : > { %v6068_v42 = vpop.eup %6067  ;;  %v4338_v61 = vadd.f32 -0.33333147, %v4337_v3  ;;  %v4703_v23 = vmul.f32 %v4702_v7, %v11166_v32  ;;  %v13163_v57 = vand.u32 2147483648, %v10574_v10  ;;  %v11219_v37 = vsel %vm4345_vm14, 2.3561945, %v12718_v17 }
 0x428   : > { %vm4724_vm4 = vcmp.lt.s32.totalorder %v13147_v5, 0  ;;  %v11222_v44 = vmul.f32 %v6068_v42, %v4743_v0  ;;  %v11224_v19 = vclamps-f32 %v4138_v11, 0.9999999  ;;  %v3911_v33 = vsel %vm3910_vm8, %v11102_v25, %v3905_v24 }
 0x429   : > { %v3867_v8 = vor.u32 %v13163_v57, %v3865_v52  ;;  %v4339_v52 = vmul.f32 %v4338_v61, %v11022_v63  ;;  %v4704_v50 = vadd.f32 0.04247222, %v4703_v23  ;;  %v11229_v49 = vand.u32 2147483647, %v11198_v43 }
 0x42a   : > { %13164 = vst [vmem:[#allocation21_spill] sm:$0xff] %v11224_v19  ;;  %vm4353_vm9 = vcmp.ne.f32.partialorder %v10882_v60, %v10882_v60  ;;  %vm4721_vm13 = vcmp.lt.f32.partialorder %v13147_v5, 0.0  ;;  %v11237_v3 = vmul.f32 %v11222_v44, %v11222_v44  ;;  %v3937_v11 = vmul.f32 %v3936_v12, %v10933_v62 }
 0x42b   : > { %13165 = vst [vmem:[#allocation18_spill] sm:$0xff] %v11229_v49  ;;  %v4340_v25 = vmul.f32 %v4339_v52, %v11014_v56  ;;  %vm4359_vm5 = vcmp.eq.s32.totalorder %v10888_v18, inf  ;;  %v4705_v63 = vmul.f32 %v4704_v50, %v11166_v32  ;;  %v11244_v61 = vsel %vm4724_vm4, 3.1415927, %v12717_v31  ;;  %v13166_v52 = vld [vmem:[#allocation32_spill] sm:$0xff]  ;;  %v13167_v49 = vld [vmem:[#allocation17_spill] sm:$0xff] }
 0x42c   : > { %v3975_v7 = vsub.f32 3.1415927, %v3867_v8  ;;  %v3912_v24 = vand.u32 2147483647, %v3911_v33  ;;  %vm4342_vm7 = vcmp.gt.f32.partialorder %v10888_v18, %v10894_v14  ;;  %vm4350_vm0 = vcmp.eq.f32.partialorder %v10882_v60, 0.0  ;;  %v13169_v18 = vld [vmem:[#allocation42_spill] sm:$0xff] }
 0x42d   : > { %vm4352_vm1 = vcmp.ne.f32.partialorder %v13137_v59, %v13137_v59  ;;  %v4748_v12 = vmul.f32 0.002785687, %v11237_v3  ;;  %v4186_v0 = vmul.f32 %v11224_v19, %v11224_v19  ;;  %v4341_v42 = vadd.f32 %v4340_v25, %v11014_v56 }
 0x42e   : > { %vm4358_vm12 = vcmp.eq.s32.totalorder %v10894_v14, inf  ;;  %v4706_v23 = vadd.f32 -0.074975304, %v4705_v63  ;;  %v11259_v57 = vsel %vm4721_vm13, 2.3561945, %v12718_v17  ;;  %vm3939_vm3 = vcmp.gt.f32.partialorder %v10839_v51, %v10836_v2  ;;  %vm4354_vm8 = vmor %vm4352_vm1, %vm4353_vm9 }
 0x42f   : > { %v11262_v8 = vand.u32 2147483647, %v11224_v19  ;;  %v4749_v33 = vadd.f32 -0.015866, %v4748_v12  ;;  %vm4768_vm10 = vcmp.lt.f32.partialorder %v13166_v52, 0.0  ;;  %vm4771_vm6 = vcmp.lt.s32.totalorder %v13166_v52, 0  ;;  %v6070_v50 = vpop.eup %6069 }
 0x430   : > { %v4367_v56 = vmin.f32 %v13159_v53, %v11169_v58  ;;  %v3938_v25 = vadd.f32 %v3937_v11, %v10933_v62  ;;  %v4343_v63 = vsub.f32 1.5707964, %v4341_v42  ;;  %v4707_v1 = vmul.f32 %v4706_v23, %v11166_v32  ;;  %v6072_v9 = vpop.eup %6071 }
 0x431   : > { %6073 = vrsqrt.f32 %v13167_v49  ;;  %v3991_v4 = vmul.f32 %v13110_v46, %v3975_v7  ;;  %v13168_v12 = vand.u32 2147483648, %v13153_v41  ;;  %v4750_v19 = vmul.f32 %v4749_v33, %v11237_v3 }
 0x432   : > { %v11277_v29 = vmul.f32 %v6070_v50, %v4367_v56  ;;  %v4344_v30 = vsel %vm4342_vm7, %v4343_v63, %v4341_v42  ;;  %v4708_v62 = vadd.f32 0.1064488, %v4707_v1  ;;  %v4221_v11 = vmul.f32 %v6072_v9, %v10789_v47 }
 0x433   : > { %v3914_v22 = vor.u32 %v13168_v12, %v3912_v24  ;;  %vm4222_vm2 = vcmp.eq.f32.partialorder %v10789_v47, inf  ;;  %v4346_v23 = vsub.f32 3.1415927, %v4344_v30  ;;  %v4751_v27 = vadd.f32 0.04247222, %v4750_v19 }
 0x434   : > { %v11286_v46 = vmul.f32 %v11277_v29, %v11277_v29  ;;  %v4225_v7 = vand.u32 2147483648, %v10789_v47  ;;  %v3940_v24 = vsub.f32 1.5707964, %v3938_v25  ;;  %v4709_v33 = vmul.f32 %v4708_v62, %v11166_v32 }
 0x435   : > { %v4223_v56 = vsel %vm4222_vm2, %v10789_v47, %v4221_v11  ;;  %vm4224_vm15 = vcmp.eq.f32.partialorder %v10789_v47, 0.0  ;;  %v4347_v9 = vsel %vm4345_vm14, %v4346_v23, %v4344_v30  ;;  %v4752_v1 = vmul.f32 %v4751_v27, %v11237_v3  ;;  %vm4360_vm14 = vmand %vm4358_vm12, %vm4359_vm5 }
 0x436   : > { %v4372_v19 = vmul.f32 0.002785687, %v11286_v46  ;;  %v11296_v42 = vsel %vm4224_vm15, %v4225_v7, %v4223_v56  ;;  %v11298_v50 = vsub.f32 1.0, %v4186_v0  ;;  %v4351_v63 = vsel %vm4350_vm0, %v11207_v39, %v4347_v9 }
 0x437   : > { %v4710_v47 = vadd.f32 -0.14207031, %v4709_v33  ;;  %v11310_v27 = vand.u32 2147483647, %v11296_v42  ;;  %v4007_v30 = vadd.f32 %v3991_v4, %v10574_v10  ;;  %v4355_v12 = vsel %vm4354_vm8, nan, %v4351_v63 }
 0x438   : > { %v4753_v39 = vadd.f32 -0.074975304, %v4752_v1  ;;  %v4373_v0 = vadd.f32 -0.015866, %v4372_v19  ;;  %v3976_v62 = vsub.f32 3.1415927, %v3914_v22  ;;  %v3941_v11 = vsel %vm3939_vm3, %v3940_v24, %v3938_v25 }
 0x439   : > { %v4361_v23 = vsel %vm4360_vm14, %v11219_v37, %v4355_v12  ;;  %v4711_v7 = vmul.f32 %v4710_v47, %v11166_v32  ;;  %v4415_v14 = vmax.f32 %v13169_v18, %v11310_v27  ;;  %v11328_v22 = vmul.f32 %v11198_v43, %v11198_v43 }
 0x43a   : > { %v4362_v33 = vand.u32 2147483647, %v4361_v23  ;;  %v4754_v10 = vmul.f32 %v4753_v39, %v11237_v3  ;;  %v4374_v4 = vmul.f32 %v4373_v0, %v11286_v46  ;;  %vm3947_vm4 = vcmp.eq.f32.partialorder %v10828_v20, 0.0 }
 0x43b   : > { %v6074_v56 = vpop.eup %6073  ;;  %vm3950_vm9 = vcmp.ne.f32.partialorder %v10828_v20, %v10828_v20  ;;  %v4712_v37 = vadd.f32 0.19993454, %v4711_v7  ;;  %v11336_v25 = vsel %vm4771_vm6, 3.1415927, %v12717_v31  ;;  %v11341_v24 = vsel %vm4768_vm10, 2.3561945, %v12718_v17 }
 0x43c   : > { %v13170_v9 = vand.u32 2147483648, %v10882_v60  ;;  %v4755_v19 = vadd.f32 0.1064488, %v4754_v10  ;;  %v4375_v63 = vadd.f32 0.04247222, %v4374_v4  ;;  %6075 = vrcp.f32 %v4415_v14 }
 0x43d   : > { %v4023_v47 = vmul.f32 0.15915494, %v4007_v30  ;;  %v3992_v12 = vmul.f32 %v13115_v48, %v3976_v62  ;;  %v3943_v39 = vsub.f32 3.1415927, %v3941_v11  ;;  %vm3949_vm5 = vcmp.ne.f32.partialorder %v13134_v34, %v13134_v34 }
 0x43e   : > { %v4364_v1 = vor.u32 %v13170_v9, %v4362_v33  ;;  %v4713_v0 = vmul.f32 %v4712_v37, %v11166_v32  ;;  %vm3956_vm7 = vcmp.eq.s32.totalorder %v10839_v51, inf  ;;  %v4756_v7 = vmul.f32 %v4755_v19, %v11237_v3  ;;  %vm11395_vm14 = vmor %vm3949_vm5, %vm3950_vm9 }
 0x43f   : > { %v4376_v43 = vmul.f32 %v4375_v63, %v11286_v46  ;;  %v4277_v33 = vmul.f32 %v6074_v56, %v13167_v49  ;;  %vm4278_vm0 = vcmp.eq.f32.partialorder %v13167_v49, inf  ;;  %vm4280_vm1 = vcmp.eq.f32.partialorder %v13167_v49, 0.0 }
 0x440   : > { %v5070_v23 = vsub.f32 3.1415927, %v4364_v1  ;;  %v4714_v10 = vadd.f32 -0.33333147, %v4713_v0  ;;  %v4281_v48 = vand.u32 2147483648, %v13167_v49  ;;  %vm3955_vm12 = vcmp.eq.s32.totalorder %v10836_v2, inf }
 0x441   : > { %v4757_v62 = vadd.f32 -0.14207031, %v4756_v7  ;;  %v4377_v4 = vadd.f32 -0.074975304, %v4376_v43  ;;  %v4279_v14 = vsel %vm4278_vm0, %v13167_v49, %v4277_v33  ;;  %v4008_v37 = vadd.f32 %v3992_v12, %v13153_v41  ;;  %v4096_v41 = vpop.permute.xlu0 %4095  ;;  %v13171_v7 = vld [vmem:[#allocation41_spill] sm:$0xff]  ;;  %vm3957_vm9 = vmand %vm3955_vm12, %vm3956_vm7 }
 0x442   : > { %v5086_v30 = vmul.f32 %v13137_v59, %v5070_v23  ;;  %v3944_v56 = vsel %vm3942_vm11, %v3943_v39, %v3941_v11  ;;  %v4715_v9 = vmul.f32 %v4714_v10, %v11166_v32  ;;  %v11363_v1 = vsel %vm4280_vm1, %v4281_v48, %v4279_v14 }
 0x443   : > { %v4758_v63 = vmul.f32 %v4757_v62, %v11237_v3  ;;  %v4378_v0 = vmul.f32 %v4377_v4, %v11286_v46  ;;  %v11369_v59 = vand.u32 2147483647, %v11363_v1  ;;  %vm4718_vm3 = vcmp.gt.f32.partialorder %v11043_v13, %v11039_v16 }
 0x444   : > { %v5102_v19 = vadd.f32 %v5086_v30, %v10882_v60  ;;  %v4716_v43 = vmul.f32 %v4715_v9, %v11143_v40  ;;  %vm4729_vm11 = vcmp.ne.f32.partialorder %v11036_v36, %v11036_v36  ;;  %vm4735_vm6 = vcmp.eq.s32.totalorder %v11043_v13, inf  ;;  %v13174_v9 = vld [vmem:[#allocation24_spill] sm:$0xff] }
 0x445   : > { %v3948_v60 = vsel %vm3947_vm4, %v11153_v26, %v3944_v56  ;;  %vm4726_vm2 = vcmp.eq.f32.partialorder %v11036_v36, 0.0  ;;  %vm4728_vm15 = vcmp.ne.f32.partialorder %v13147_v5, %v13147_v5  ;;  %v4759_v49 = vadd.f32 0.19993454, %v4758_v63 }
 0x446   : > { %v5118_v32 = vmul.f32 0.15915494, %v5102_v19  ;;  %v4379_v11 = vadd.f32 0.1064488, %v4378_v0  ;;  %v4119_v12 = vmul.f32 %v4096_v41, %v4023_v47  ;;  %v4717_v39 = vadd.f32 %v4716_v43, %v11143_v40  ;;  %v6076_v26 = vpop.eup %6075  ;;  %v13175_v19 = vld [vmem:[#allocation14_spill] sm:$0xff]  ;;  %vm4730_vm12 = vmor %vm4728_vm15, %vm4729_vm11 }
 0x447   : > { %vm4734_vm8 = vcmp.eq.s32.totalorder %v11039_v16, inf  ;;  %v4414_v23 = vmin.f32 %v13169_v18, %v11310_v27  ;;  %v4791_v33 = vmax.f32 %v13171_v7, %v11369_v59  ;;  %v4024_v10 = vmul.f32 0.15915494, %v4008_v37 }
 0x448   : > { %5680 = vmatprep.mubr.f32.mxu0 %v5118_v32  ;;  %v4739_v40 = vand.u32 2147483648, %v11036_v36  ;;  %v4760_v48 = vmul.f32 %v4759_v49, %v11237_v3  ;;  %v4380_v30 = vmul.f32 %v4379_v11, %v11286_v46  ;;  %v3952_v62 = vsel %vm11395_vm14, nan, %v3948_v60  ;;  %v4100_v60 = vpop.permute.xlu0 %4099  ;;  %vm4736_vm14 = vmand %vm4734_vm8, %vm4735_vm6 }
 0x449   : > { %v4719_v4 = vsub.f32 1.5707964, %v4717_v39  ;;  %v11404_v14 = vmul.f32 %v6076_v26, %v4414_v23  ;;  %6077 = vrcp.f32 %v4791_v33  ;;  %vm4392_vm4 = vcmp.lt.f32.partialorder %v13174_v9, 0.0 }
 0x44a   : > { %v4761_v37 = vadd.f32 -0.33333147, %v4760_v48  ;;  %v4381_v56 = vadd.f32 -0.14207031, %v4380_v30  ;;  %6079 = vrsqrt.f32 %v13175_v19  ;;  %v4139_v63 = vmul.f32 %v9727_v54, %v4119_v12 }
 0x44b   : > { %v4720_v0 = vsel %vm4718_vm3, %v4719_v4, %v4717_v39  ;;  %v4786_v43 = vand.u32 2147483648, %v11085_v6  ;;  %v11419_v41 = vmul.f32 %v11404_v14, %v11404_v14  ;;  %v3958_v32 = vsel %vm3957_vm9, %v11158_v38, %v3952_v62 }
 0x44c   : > { %v4722_v49 = vsub.f32 3.1415927, %v4720_v0  ;;  %v4762_v11 = vmul.f32 %v4761_v37, %v11237_v3  ;;  %v4382_v51 = vmul.f32 %v4381_v56, %v11286_v46  ;;  %v4120_v2 = vmul.f32 %v4100_v60, %v4024_v10 }
 0x44d   : > { %vm4765_vm5 = vcmp.gt.f32.partialorder %v11091_v15, %v13154_v45  ;;  %vm4776_vm7 = vcmp.ne.f32.partialorder %v11085_v6, %v11085_v6  ;;  %vm4395_vm0 = vcmp.lt.s32.totalorder %v13174_v9, 0  ;;  %v4419_v12 = vmul.f32 0.002785687, %v11419_v41 }
 0x44e   : > { %v4723_v39 = vsel %vm4721_vm13, %v4722_v49, %v4720_v0  ;;  %v4763_v38 = vmul.f32 %v4762_v11, %v11222_v44  ;;  %vm4782_vm1 = vcmp.eq.s32.totalorder %v11091_v15, inf  ;;  %v4383_v3 = vadd.f32 0.19993454, %v4382_v51 }
 0x44f   : > { %v11434_v23 = vclamps-f32 %v4139_v63, 0.9999999  ;;  %v3959_v33 = vand.u32 2147483647, %v3958_v32  ;;  %v4727_v26 = vsel %vm4726_vm2, %v11244_v61, %v4723_v39  ;;  %vm4773_vm13 = vcmp.eq.f32.partialorder %v11085_v6, 0.0 }
 0x450   : > { %vm4775_vm3 = vcmp.ne.f32.partialorder %v13166_v52, %v13166_v52  ;;  %v4420_v10 = vadd.f32 -0.015866, %v4419_v12  ;;  %v4731_v47 = vsel %vm4730_vm12, nan, %v4727_v26  ;;  %v4764_v61 = vadd.f32 %v4763_v38, %v11222_v44 }
 0x451   : > { %vm4781_vm2 = vcmp.eq.s32.totalorder %v13154_v45, inf  ;;  %v4384_v48 = vmul.f32 %v4383_v3, %v11286_v46  ;;  %v11458_v30 = vsel %vm4395_vm0, 3.1415927, %v12717_v31  ;;  %v11461_v62 = vmul.f32 %v9727_v54, %v4120_v2 }
 0x452   : > { %v4737_v4 = vsel %vm4736_vm14, %v11259_v57, %v4731_v47  ;;  %v11467_v16 = vsel %vm4392_vm4, 2.3561945, %v12718_v17  ;;  %v4421_v13 = vmul.f32 %v4420_v10, %v11419_v41  ;;  %v4766_v37 = vsub.f32 1.5707964, %v4764_v61  ;;  %vm4783_vm0 = vmand %vm4781_vm2, %vm4782_vm1 }
 0x453   : > { %v4738_v44 = vand.u32 2147483647, %v4737_v4  ;;  %v4385_v56 = vadd.f32 -0.33333147, %v4384_v48  ;;  %v4790_v63 = vmin.f32 %v13171_v7, %v11369_v59  ;;  %v6078_v0 = vpop.eup %6077  ;;  %v13176_v60 = vand.u32 2147483648, %v10828_v20 }
 0x454   : > { %v4422_v49 = vadd.f32 0.04247222, %v4421_v13  ;;  %vm4285_vm11 = vcmp.eq.f32.partialorder %v13175_v19, inf  ;;  %6081 = vrsqrt.f32 %v11298_v50  ;;  %v6080_v57 = vpop.eup %6079  ;;  %v4767_v51 = vsel %vm4765_vm5, %v4766_v37, %v4764_v61 }
 0x455   : > { %v3961_v32 = vor.u32 %v13176_v60, %v3959_v33  ;;  %v4740_v11 = vor.u32 %v4739_v40, %v4738_v44  ;;  %v4386_v2 = vmul.f32 %v4385_v56, %v11286_v46  ;;  %v11480_v12 = vmul.f32 %v6078_v0, %v4790_v63 }
 0x456   : > { %v4769_v39 = vsub.f32 3.1415927, %v4767_v51  ;;  %vm4400_vm6 = vcmp.ne.f32.partialorder %v11160_v21, %v11160_v21  ;;  %v4423_v38 = vmul.f32 %v4422_v49, %v11419_v41  ;;  %v4284_v3 = vmul.f32 %v6080_v57, %v13175_v19 }
 0x457   : > { %vm4287_vm15 = vcmp.eq.f32.partialorder %v13175_v19, 0.0  ;;  %v5078_v33 = vsub.f32 3.1415927, %v4740_v11  ;;  %v4387_v40 = vmul.f32 %v4386_v2, %v11277_v29  ;;  %v11490_v26 = vmul.f32 %v11480_v12, %v11480_v12 }
 0x458   : > { %6083 = vrsqrt.f32 %v11005_v28  ;;  %v4770_v46 = vsel %vm4768_vm10, %v4769_v39, %v4767_v51  ;;  %vm4397_vm8 = vcmp.eq.f32.partialorder %v11160_v21, 0.0  ;;  %vm4399_vm9 = vcmp.ne.f32.partialorder %v13174_v9, %v13174_v9  ;;  %vm4777_vm10 = vmor %vm4775_vm3, %vm4776_vm7 }
 0x459   : > { %v4424_v10 = vadd.f32 -0.074975304, %v4423_v38  ;;  %v4286_v47 = vsel %vm4285_vm11, %v13175_v19, %v4284_v3  ;;  %v4288_v61 = vand.u32 2147483648, %v13175_v19  ;;  %v5094_v48 = vmul.f32 %v13147_v5, %v5078_v33  ;;  %v13177_v3 = vld [vmem:[#allocation16_spill] sm:$0xff]  ;;  %vm4401_vm3 = vmor %vm4399_vm9, %vm4400_vm6 }
 0x45a   : > { %v4774_v4 = vsel %vm4773_vm13, %v11336_v25, %v4770_v46  ;;  %v4388_v13 = vadd.f32 %v4387_v40, %v11277_v29  ;;  %vm4405_vm5 = vcmp.eq.s32.totalorder %v13159_v53, inf  ;;  %v4795_v44 = vmul.f32 0.002785687, %v11490_v26 }
 0x45b   : > { %v3977_v37 = vsub.f32 3.1415927, %v3961_v32  ;;  %v4778_v56 = vsel %vm4777_vm10, nan, %v4774_v4  ;;  %v4425_v5 = vmul.f32 %v4424_v10, %v11419_v41  ;;  %v11522_v25 = vsel %vm4287_vm15, %v4288_v61, %v4286_v47 }
 0x45c   : > { %v5110_v63 = vadd.f32 %v5094_v48, %v11036_v36  ;;  %v4784_v29 = vsel %vm4783_vm0, %v11341_v24, %v4778_v56  ;;  %v4390_v0 = vsub.f32 1.5707964, %v4388_v13  ;;  %v4796_v60 = vadd.f32 -0.015866, %v4795_v44 }
 0x45d   : > { %v4785_v49 = vand.u32 2147483647, %v4784_v29  ;;  %vm4389_vm7 = vcmp.gt.f32.partialorder %v11169_v58, %v13159_v53  ;;  %v4426_v15 = vadd.f32 0.1064488, %v4425_v5  ;;  %v11529_v45 = vand.u32 2147483647, %v11522_v25 }
 0x45e   : > { %v5126_v32 = vmul.f32 0.15915494, %v5110_v63  ;;  %v4391_v57 = vsel %vm4389_vm7, %v4390_v0, %v4388_v13  ;;  %vm4406_vm1 = vcmp.eq.s32.totalorder %v11169_v58, inf  ;;  %v4797_v19 = vmul.f32 %v4796_v60, %v11490_v26  ;;  %v6082_v11 = vpop.eup %6081 }
 0x45f   : > { %v4787_v36 = vor.u32 %v4786_v43, %v4785_v49  ;;  %v4393_v24 = vsub.f32 3.1415927, %v4391_v57  ;;  %v4410_v51 = vand.u32 2147483648, %v11160_v21  ;;  %v4427_v2 = vmul.f32 %v4426_v15, %v11419_v41 }
 0x460   : > { %v3993_v39 = vmul.f32 %v13134_v34, %v3977_v37  ;;  %5692 = vmatprep.mubr.f32.mxu1 %v5126_v32  ;;  %v4798_v38 = vadd.f32 0.04247222, %v4797_v19  ;;  %v4838_v33 = vmax.f32 %v13177_v3, %v11529_v45  ;;  %vm4292_vm12 = vcmp.eq.f32.partialorder %v11298_v50, inf }
 0x461   : > { %v5079_v40 = vsub.f32 3.1415927, %v4787_v36  ;;  %v4394_v46 = vsel %vm4392_vm4, %v4393_v24, %v4391_v57  ;;  %v4428_v10 = vadd.f32 -0.14207031, %v4427_v2  ;;  %vm4294_vm13 = vcmp.eq.f32.partialorder %v11298_v50, 0.0  ;;  %vm4407_vm4 = vmand %vm4405_vm5, %vm4406_vm1 }
 0x462   : > { %v6084_v43 = vpop.eup %6083  ;;  %v4398_v47 = vsel %vm4397_vm8, %v11458_v30, %v4394_v46  ;;  %v4799_v34 = vmul.f32 %v4798_v38, %v11490_v26  ;;  %6085 = vrcp.f32 %v4838_v33  ;;  %v4291_v61 = vmul.f32 %v6082_v11, %v11298_v50 }
 0x463   : > { %v5095_v48 = vmul.f32 %v13166_v52, %v5079_v40  ;;  %v4402_v4 = vsel %vm4401_vm3, nan, %v4398_v47  ;;  %v4429_v30 = vmul.f32 %v4428_v10, %v11419_v41  ;;  %v4295_v13 = vand.u32 2147483648, %v11298_v50  ;;  %v13178_v47 = vld [vmem:[#allocation13_spill] sm:$0xff] }
 0x464   : > { %v4408_v44 = vsel %vm4407_vm4, %v11467_v16, %v4402_v4  ;;  %v4800_v37 = vadd.f32 -0.074975304, %v4799_v34  ;;  %v4293_v56 = vsel %vm4292_vm12, %v11298_v50, %v4291_v61  ;;  %v4228_v5 = vmul.f32 %v6084_v43, %v11005_v28 }
 0x465   : > { %v5111_v52 = vadd.f32 %v5095_v48, %v11085_v6  ;;  %v4409_v63 = vand.u32 2147483647, %v4408_v44  ;;  %v4430_v58 = vadd.f32 0.19993454, %v4429_v30  ;;  %v11570_v53 = vsel %vm4294_vm13, %v4295_v13, %v4293_v56 }
 0x466   : > { %v4187_v29 = vmul.f32 %v11434_v23, %v11434_v23  ;;  %v4009_v16 = vadd.f32 %v3993_v39, %v10828_v20  ;;  %v4801_v0 = vmul.f32 %v4800_v37, %v11490_v26  ;;  %v11577_v60 = vand.u32 2147483647, %v11570_v53 }
 0x467   : > { %v11580_v49 = vclamps-f32 %v11461_v62, 0.9999999  ;;  %v5127_v6 = vmul.f32 0.15915494, %v5111_v52  ;;  %v4411_v15 = vor.u32 %v4410_v51, %v4409_v63  ;;  %v4431_v32 = vmul.f32 %v4430_v58, %v11419_v41  ;;  %v13179_v58 = vld [vmem:[#allocation37_spill] sm:$0xff] }
 0x468   : > { %v4802_v50 = vadd.f32 0.1064488, %v4801_v0  ;;  %v4885_v57 = vmax.f32 %v11262_v8, %v11577_v60  ;;  %vm4229_vm14 = vcmp.eq.f32.partialorder %v11005_v28, inf  ;;  %v4232_v20 = vand.u32 2147483648, %v11005_v28 }
 0x469   : > { %5693 = vmatmul.mubr.f32.vlgmr.msra.gmra.mrb[0].mxu1 %v5127_v6  ;;  %v5071_v19 = vsub.f32 3.1415927, %v4411_v15  ;;  %v4432_v11 = vadd.f32 -0.33333147, %v4431_v32  ;;  %v4230_v36 = vsel %vm4229_vm14, %v11005_v28, %v4228_v5  ;;  %vm4231_vm2 = vcmp.eq.f32.partialorder %v11005_v28, 0.0 }
 0x46a   : > { %v4025_v62 = vmul.f32 0.15915494, %v4009_v16  ;;  %v4803_v24 = vmul.f32 %v4802_v50, %v11490_v26  ;;  %6087 = vrcp.f32 %v4885_v57  ;;  %v11590_v51 = vsel %vm4231_vm2, %v4232_v20, %v4230_v36 }
 0x46b   : > { %v5087_v2 = vmul.f32 %v13174_v9, %v5071_v19  ;;  %v4433_v39 = vmul.f32 %v4432_v11, %v11419_v41  ;;  %v4837_v38 = vmin.f32 %v13177_v3, %v11529_v45  ;;  %v11597_v33 = vand.u32 2147483647, %v11590_v51 }
 0x46c   : > { %v6086_v40 = vpop.eup %6085  ;;  %v11600_v46 = vsub.f32 1.0, %v11328_v22  ;;  %v11602_v28 = vsub.f32 1.0, %v4187_v29  ;;  %v11605_v10 = vand.u32 2147483647, %v11434_v23  ;;  %v4804_v43 = vadd.f32 -0.14207031, %v4803_v24  ;;  %v4104_v22 = vpop.permute.xlu0 %4103 }
 0x46d   : > { %v5103_v9 = vadd.f32 %v5087_v2, %v11160_v21  ;;  %v4434_v41 = vmul.f32 %v4433_v39, %v11404_v14  ;;  %vm4442_vm11 = vcmp.lt.s32.totalorder %v13178_v47, 0  ;;  %v11610_v34 = vmul.f32 %v6086_v40, %v4837_v38 }
 0x46e   : > { %v11614_v61 = vmul.f32 %v11580_v49, %v11580_v49  ;;  %vm4439_vm6 = vcmp.lt.f32.partialorder %v13178_v47, 0.0  ;;  %v4805_v48 = vmul.f32 %v4804_v43, %v11490_v26  ;;  %v4462_v4 = vmax.f32 %v10995_v55, %v11597_v33 }
 0x46f   : > { %v4121_v30 = vmul.f32 %v4104_v22, %v4025_v62  ;;  %v5119_v21 = vmul.f32 0.15915494, %v5103_v9  ;;  %v4435_v13 = vadd.f32 %v4434_v41, %v11404_v14  ;;  %v11623_v44 = vmul.f32 %v11610_v34, %v11610_v34  ;;  %v13180_v41 = vld [vmem:[#allocation39_spill] sm:$0xff] }
 0x470   : > { %v4443_v37 = vsel %vm4442_vm11, 3.1415927, %v12717_v31  ;;  %vm4446_vm15 = vcmp.ne.f32.partialorder %v13178_v47, %v13178_v47  ;;  %v4806_v56 = vadd.f32 0.19993454, %v4805_v48  ;;  %6089 = vrcp.f32 %v4462_v4 }
 0x471   : > { %5681 = vmatmul.mubr.f32.vlgmr.msra.gmra.mrb[0].mxu0 %v5119_v21  ;;  %v4437_v5 = vsub.f32 1.5707964, %v4435_v13  ;;  %v4451_v52 = vsel %vm4439_vm6, 2.3561945, %v12718_v17  ;;  %v4842_v63 = vmul.f32 0.002785687, %v11623_v44  ;;  %6091 = vrsqrt.f32 %v11046_v35 }
 0x472   : > { %vm4436_vm8 = vcmp.gt.f32.partialorder %v11310_v27, %v13169_v18  ;;  %vm4452_vm9 = vcmp.eq.s32.totalorder %v13169_v18, inf  ;;  %v4807_v14 = vmul.f32 %v4806_v56, %v11490_v26  ;;  %vm4818_vm10 = vcmp.lt.s32.totalorder %v13179_v58, 0 }
 0x473   : > { %v4141_v29 = vmul.f32 %v9727_v54, %v4121_v30  ;;  %v4438_v16 = vsel %vm4436_vm8, %v4437_v5, %v4435_v13  ;;  %v4843_v0 = vadd.f32 -0.015866, %v4842_v63  ;;  %v4884_v6 = vmin.f32 %v11262_v8, %v11577_v60 }
 0x474   : > { %v6088_v15 = vpop.eup %6087  ;;  %v4440_v32 = vsub.f32 3.1415927, %v4438_v16  ;;  %vm4447_vm5 = vcmp.ne.f32.partialorder %v11296_v42, %v11296_v42  ;;  %v4808_v50 = vadd.f32 -0.33333147, %v4807_v14  ;;  %vm4815_vm0 = vcmp.lt.f32.partialorder %v13179_v58, 0.0 }
 0x475   : > { %vm4453_vm7 = vcmp.eq.s32.totalorder %v11310_v27, inf  ;;  %v4819_v57 = vsel %vm4818_vm10, 3.1415927, %v12717_v31  ;;  %v4844_v20 = vmul.f32 %v4843_v0, %v11623_v44  ;;  %v11647_v54 = vmul.f32 %v6088_v15, %v4884_v6  ;;  %vm4448_vm12 = vmor %vm4446_vm15, %vm4447_vm5 }
 0x476   : > { %v4441_v19 = vsel %vm4439_vm6, %v4440_v32, %v4438_v16  ;;  %vm4444_vm1 = vcmp.eq.f32.partialorder %v11296_v42, 0.0  ;;  %v4457_v11 = vand.u32 2147483648, %v11296_v42  ;;  %v4809_v36 = vmul.f32 %v4808_v50, %v11490_v26  ;;  %vm4454_vm13 = vmand %vm4452_vm9, %vm4453_vm7  ;;  %v13181_v16 = vld [vmem:[#allocation11_spill] sm:$0xff] }
 0x477   : > { %v11654_v62 = vclamps-f32 %v4141_v29, 0.9999999  ;;  %v4445_v24 = vsel %vm4444_vm1, %v4443_v37, %v4441_v19  ;;  %v4845_v27 = vadd.f32 0.04247222, %v4844_v20  ;;  %v11661_v2 = vmul.f32 %v11647_v54, %v11647_v54 }
 0x478   : > { %v4449_v39 = vsel %vm4448_vm12, nan, %v4445_v24  ;;  %v4810_v38 = vmul.f32 %v4809_v36, %v11480_v12  ;;  %v4827_v26 = vsel %vm4815_vm0, 2.3561945, %v12718_v17  ;;  %v4461_v40 = vmin.f32 %v10995_v55, %v11597_v33 }
 0x479   : > { %v4455_v43 = vsel %vm4454_vm13, %v4451_v52, %v4449_v39  ;;  %vm4820_vm3 = vcmp.eq.f32.partialorder %v11363_v1, 0.0  ;;  %vm4822_vm4 = vcmp.ne.f32.partialorder %v13179_v58, %v13179_v58  ;;  %v4846_v9 = vmul.f32 %v4845_v27, %v11623_v44 }
 0x47a   : > { %v4889_v18 = vmul.f32 0.002785687, %v11661_v2  ;;  %6093 = vrsqrt.f32 %v13180_v41  ;;  %v6090_v22 = vpop.eup %6089  ;;  %v4456_v48 = vand.u32 2147483647, %v4455_v43  ;;  %v4811_v4 = vadd.f32 %v4810_v38, %v11480_v12 }
 0x47b   : > { %vm4812_vm14 = vcmp.gt.f32.partialorder %v11369_v59, %v13171_v7  ;;  %vm4823_vm2 = vcmp.ne.f32.partialorder %v11363_v1, %v11363_v1  ;;  %v6092_v30 = vpop.eup %6091  ;;  %v4847_v21 = vadd.f32 -0.074975304, %v4846_v9  ;;  %v11682_v37 = vmul.f32 %v6090_v22, %v4461_v40 }
 0x47c   : > { %v4890_v13 = vadd.f32 -0.015866, %v4889_v18  ;;  %vm4236_vm11 = vcmp.eq.f32.partialorder %v11046_v35, inf  ;;  %v4458_v56 = vor.u32 %v4457_v11, %v4456_v48  ;;  %v4813_v5 = vsub.f32 1.5707964, %v4811_v4  ;;  %vm4824_vm9 = vmor %vm4822_vm4, %vm4823_vm2 }
 0x47d   : > { %v4235_v52 = vmul.f32 %v6092_v30, %v11046_v35  ;;  %v4239_v63 = vand.u32 2147483648, %v11046_v35  ;;  %v4848_v12 = vmul.f32 %v4847_v21, %v11623_v44  ;;  %v11691_v29 = vmul.f32 %v11682_v37, %v11682_v37 }
 0x47e   : > { %v4891_v14 = vmul.f32 %v4890_v13, %v11661_v2  ;;  %6095 = vrsqrt.f32 %v13181_v16  ;;  %v5072_v0 = vsub.f32 3.1415927, %v4458_v56  ;;  %v4814_v6 = vsel %vm4812_vm14, %v4813_v5, %v4811_v4  ;;  %v13183_v4 = vld [vmem:[#allocation35_spill] sm:$0xff] }
 0x47f   : > { %v4237_v15 = vsel %vm4236_vm11, %v11046_v35, %v4235_v52  ;;  %vm4238_vm6 = vcmp.eq.f32.partialorder %v11046_v35, 0.0  ;;  %v4816_v32 = vsub.f32 3.1415927, %v4814_v6  ;;  %v4849_v50 = vadd.f32 0.1064488, %v4848_v12 }
 0x480   : > { %v4892_v20 = vadd.f32 0.04247222, %v4891_v14  ;;  %v11699_v19 = vsel %vm4238_vm6, %v4239_v63, %v4237_v15  ;;  %v5088_v11 = vmul.f32 %v13178_v47, %v5072_v0  ;;  %vm4829_vm15 = vcmp.eq.s32.totalorder %v11369_v59, inf }
 0x481   : > { %v4466_v36 = vmul.f32 0.002785687, %v11691_v29  ;;  %v11705_v24 = vand.u32 2147483647, %v11699_v19  ;;  %v4817_v27 = vsel %vm4815_vm0, %v4816_v32, %v4814_v6  ;;  %vm4828_vm8 = vcmp.eq.s32.totalorder %v13171_v7, inf }
 0x482   : > { %v4850_v35 = vmul.f32 %v4849_v50, %v11623_v44  ;;  %v4893_v39 = vmul.f32 %v4892_v20, %v11661_v2  ;;  %v5104_v38 = vadd.f32 %v5088_v11, %v11296_v42  ;;  %v4821_v47 = vsel %vm4820_vm3, %v4819_v57, %v4817_v27  ;;  %vm4830_vm10 = vmand %vm4828_vm8, %vm4829_vm15  ;;  %v13182_v42 = vld [vmem:[#allocation27_spill] sm:$0xff]  ;;  %v13184_v27 = vld [vmem:[#allocation21_spill] sm:$0xff] }
 0x483   : > { %v4833_v59 = vand.u32 2147483648, %v11363_v1  ;;  %v4467_v40 = vadd.f32 -0.015866, %v4466_v36  ;;  %v4825_v43 = vsel %vm4824_vm9, nan, %v4821_v47  ;;  %v4509_v22 = vmax.f32 %v13182_v42, %v11705_v24 }
 0x484   : > { %v6094_v7 = vpop.eup %6093  ;;  %v4851_v9 = vadd.f32 -0.14207031, %v4850_v35  ;;  %v4894_v18 = vadd.f32 -0.074975304, %v4893_v39  ;;  %v5120_v48 = vmul.f32 0.15915494, %v5104_v38  ;;  %v4831_v57 = vsel %vm4830_vm10, %v4827_v26, %v4825_v43 }
 0x485   : > { %vm4865_vm5 = vcmp.lt.s32.totalorder %v13183_v4, 0  ;;  %v4468_v30 = vmul.f32 %v4467_v40, %v11691_v29  ;;  %v4832_v21 = vand.u32 2147483647, %v4831_v57  ;;  %6097 = vrcp.f32 %v4509_v22  ;;  %v13185_v43 = vld [vmem:[#allocation20_spill] sm:$0xff] }
 0x486   : > { %v4852_v13 = vmul.f32 %v4851_v9, %v11623_v44  ;;  %v4895_v56 = vmul.f32 %v4894_v18, %v11661_v2  ;;  %5683 = vmatprep.mubr.f32.mxu0 %v5120_v48  ;;  %vm4862_vm0 = vcmp.lt.f32.partialorder %v13183_v4, 0.0  ;;  %v4242_v52 = vmul.f32 %v6094_v7, %v13180_v41 }
 0x487   : > { %v4469_v5 = vadd.f32 0.04247222, %v4468_v30  ;;  %vm4243_vm7 = vcmp.eq.f32.partialorder %v13180_v41, inf  ;;  %v4834_v26 = vor.u32 %v4833_v59, %v4832_v21  ;;  %v4246_v0 = vand.u32 2147483648, %v13180_v41 }
 0x488   : > { %v6096_v63 = vpop.eup %6095  ;;  %v4853_v12 = vadd.f32 0.19993454, %v4852_v13  ;;  %v4896_v14 = vadd.f32 0.1064488, %v4895_v56  ;;  %v11735_v6 = vsel %vm4865_vm5, 3.1415927, %v12717_v31  ;;  %v4244_v32 = vsel %vm4243_vm7, %v13180_v41, %v4242_v52 }
 0x489   : > { %v4470_v15 = vmul.f32 %v4469_v5, %v11691_v29  ;;  %vm4245_vm1 = vcmp.eq.f32.partialorder %v13180_v41, 0.0  ;;  %v5080_v50 = vsub.f32 3.1415927, %v4834_v26  ;;  %vm4909_vm12 = vcmp.lt.f32.partialorder %v13184_v27, 0.0 }
 0x48a   : > { %v4854_v20 = vmul.f32 %v4853_v12, %v11623_v44  ;;  %v4897_v11 = vmul.f32 %v4896_v14, %v11661_v2  ;;  %v11742_v36 = vsel %vm4245_vm1, %v4246_v0, %v4244_v32  ;;  %v4249_v38 = vmul.f32 %v6096_v63, %v13181_v16  ;;  %v13186_v32 = vld [vmem:[#allocation38_spill] sm:$0xff] }
 0x48b   : > { %v4471_v35 = vadd.f32 -0.074975304, %v4470_v15  ;;  %v11746_v39 = vand.u32 2147483647, %v11742_v36  ;;  %v5096_v47 = vmul.f32 %v13179_v58, %v5080_v50  ;;  %vm4912_vm13 = vcmp.lt.s32.totalorder %v13184_v27, 0 }
 0x48c   : > { %v4855_v59 = vadd.f32 -0.33333147, %v4854_v20  ;;  %v4898_v40 = vadd.f32 -0.14207031, %v4897_v11  ;;  %v4508_v7 = vmin.f32 %v13182_v42, %v11705_v24  ;;  %vm4250_vm3 = vcmp.eq.f32.partialorder %v13181_v16, inf }
 0x48d   : > { %v4472_v41 = vmul.f32 %v4471_v35, %v11691_v29  ;;  %v4556_v9 = vmax.f32 %v13185_v43, %v11746_v39  ;;  %v5112_v18 = vadd.f32 %v5096_v47, %v11363_v1  ;;  %v4253_v48 = vand.u32 2147483648, %v13181_v16 }
 0x48e   : > { %v4856_v22 = vmul.f32 %v4855_v59, %v11623_v44  ;;  %v4899_v58 = vmul.f32 %v4898_v40, %v11661_v2  ;;  %v4251_v30 = vsel %vm4250_vm3, %v13181_v16, %v4249_v38  ;;  %vm4252_vm4 = vcmp.eq.f32.partialorder %v13181_v16, 0.0 }
 0x48f   : > { %v4473_v57 = vadd.f32 0.1064488, %v4472_v41  ;;  %6099 = vrcp.f32 %v4556_v9  ;;  %v6098_v21 = vpop.eup %6097  ;;  %v5128_v13 = vmul.f32 0.15915494, %v5112_v18  ;;  %v11764_v52 = vsel %vm4252_vm4, %v4253_v48, %v4251_v30  ;;  %v13187_v41 = vld [vmem:[#allocation19_spill] sm:$0xff] }
 0x490   : > { %v4857_v56 = vmul.f32 %v4856_v22, %v11610_v34  ;;  %v4900_v5 = vadd.f32 0.19993454, %v4899_v58  ;;  %vm4869_vm14 = vcmp.ne.f32.partialorder %v13183_v4, %v13183_v4  ;;  %v4874_v1 = vsel %vm4862_vm0, 2.3561945, %v12718_v17 }
 0x491   : > { %v4474_v44 = vmul.f32 %v4473_v57, %v11691_v29  ;;  %v11772_v63 = vmul.f32 %v6098_v21, %v4508_v7  ;;  %v11775_v16 = vand.u32 2147483647, %v11764_v52  ;;  %5695 = vmatprep.mubr.f32.mxu1 %v5128_v13  ;;  %vm4875_vm2 = vcmp.eq.s32.totalorder %v13177_v3, inf }
 0x492   : > { %v4858_v26 = vadd.f32 %v4857_v56, %v11610_v34  ;;  %v4901_v12 = vmul.f32 %v4900_v5, %v11661_v2  ;;  %v11783_v14 = vsel %vm4912_vm13, 3.1415927, %v12717_v31  ;;  %v11788_v0 = vsel %vm4909_vm12, 2.3561945, %v12718_v17 }
 0x493   : > { %vm4870_vm11 = vcmp.ne.f32.partialorder %v11522_v25, %v11522_v25  ;;  %v4475_v15 = vadd.f32 -0.14207031, %v4474_v44  ;;  %v11794_v34 = vmul.f32 %v11772_v63, %v11772_v63  ;;  %v4603_v50 = vmax.f32 %v13186_v32, %v11775_v16 }
 0x494   : > { %vm4859_vm6 = vcmp.gt.f32.partialorder %v11529_v45, %v13177_v3  ;;  %v4860_v20 = vsub.f32 1.5707964, %v4858_v26  ;;  %vm4867_vm15 = vcmp.eq.f32.partialorder %v11522_v25, 0.0  ;;  %v4902_v11 = vadd.f32 -0.33333147, %v4901_v12 }
 0x495   : > { %vm4876_vm8 = vcmp.eq.s32.totalorder %v11529_v45, inf  ;;  %v4476_v35 = vmul.f32 %v4475_v15, %v11691_v29  ;;  %v4513_v38 = vmul.f32 0.002785687, %v11794_v34  ;;  %6101 = vrcp.f32 %v4603_v50 }
 0x496   : > { %v4861_v47 = vsel %vm4859_vm6, %v4860_v20, %v4858_v26  ;;  %v4880_v59 = vand.u32 2147483648, %v11522_v25  ;;  %v4903_v40 = vmul.f32 %v4902_v11, %v11661_v2  ;;  %vm4489_vm9 = vcmp.lt.s32.totalorder %v13187_v41, 0  ;;  %vm4877_vm3 = vmand %vm4875_vm2, %vm4876_vm8 }
 0x497   : > { %v4863_v7 = vsub.f32 3.1415927, %v4861_v47  ;;  %v4477_v9 = vadd.f32 0.19993454, %v4476_v35  ;;  %v4514_v18 = vadd.f32 -0.015866, %v4513_v38  ;;  %6103 = vrsqrt.f32 %v11600_v46 }
 0x498   : > { %v4904_v22 = vmul.f32 %v4903_v40, %v11647_v54  ;;  %vm4917_vm10 = vcmp.ne.f32.partialorder %v11570_v53, %v11570_v53  ;;  %v4927_v58 = vand.u32 2147483648, %v11570_v53  ;;  %v4555_v48 = vmin.f32 %v13185_v43, %v11746_v39 }
 0x499   : > { %v6100_v57 = vpop.eup %6099  ;;  %v4864_v2 = vsel %vm4862_vm0, %v4863_v7, %v4861_v47  ;;  %vm4906_vm5 = vcmp.gt.f32.partialorder %v11577_v60, %v11262_v8  ;;  %vm4914_vm7 = vcmp.eq.f32.partialorder %v11570_v53, 0.0  ;;  %vm4916_vm1 = vcmp.ne.f32.partialorder %v13184_v27, %v13184_v27  ;;  %vm4871_vm0 = vmor %vm4869_vm14, %vm4870_vm11 }
 0x49a   : > { %v4478_v30 = vmul.f32 %v4477_v9, %v11691_v29  ;;  %v4515_v21 = vmul.f32 %v4514_v18, %v11794_v34  ;;  %v4868_v13 = vsel %vm4867_vm15, %v11735_v6, %v4864_v2  ;;  %v4905_v56 = vadd.f32 %v4904_v22, %v11647_v54 }
 0x49b   : > { %vm4922_vm13 = vcmp.eq.s32.totalorder %v11262_v8, inf  ;;  %v11837_v5 = vsel %vm4489_vm9, 3.1415927, %v12717_v31  ;;  %v11839_v44 = vmul.f32 %v6100_v57, %v4555_v48  ;;  %v4872_v26 = vsel %vm4871_vm0, nan, %v4868_v13  ;;  %vm4918_vm0 = vmor %vm4916_vm1, %vm4917_vm10 }
 0x49c   : > { %vm4923_vm4 = vcmp.eq.s32.totalorder %v11577_v60, inf  ;;  %v4479_v6 = vadd.f32 -0.33333147, %v4478_v30  ;;  %v4516_v12 = vadd.f32 0.04247222, %v4515_v21  ;;  %v4878_v54 = vsel %vm4877_vm3, %v4874_v1, %v4872_v26 }
 0x49d   : > { %v4907_v15 = vsub.f32 1.5707964, %v4905_v56  ;;  %vm4483_vm14 = vcmp.gt.f32.partialorder %v11597_v33, %v10995_v55  ;;  %v11850_v50 = vmul.f32 %v11839_v44, %v11839_v44  ;;  %v4879_v20 = vand.u32 2147483647, %v4878_v54 }
 0x49e   : > { %v4480_v11 = vmul.f32 %v4479_v6, %v11691_v29  ;;  %vm4486_vm11 = vcmp.lt.f32.partialorder %v13187_v41, 0.0  ;;  %v4517_v45 = vmul.f32 %v4516_v12, %v11794_v34  ;;  %v4602_v3 = vmin.f32 %v13186_v32, %v11775_v16 }
 0x49f   : > { %v4908_v1 = vsel %vm4906_vm5, %v4907_v15, %v4905_v56  ;;  %vm4494_vm2 = vcmp.ne.f32.partialorder %v11590_v51, %v11590_v51  ;;  %v4560_v35 = vmul.f32 0.002785687, %v11850_v50  ;;  %vm4257_vm6 = vcmp.eq.f32.partialorder %v11600_v46, inf  ;;  %v6102_v29 = vpop.eup %6101 }
 0x4a0   : > { %vm4259_vm15 = vcmp.eq.f32.partialorder %v11600_v46, 0.0  ;;  %v4881_v38 = vor.u32 %v4880_v59, %v4879_v20  ;;  %v4910_v47 = vsub.f32 3.1415927, %v4908_v1  ;;  %v4481_v40 = vmul.f32 %v4480_v11, %v11682_v37 }
 0x4a1   : > { %vm4500_vm8 = vcmp.eq.s32.totalorder %v11597_v33, inf  ;;  %v4518_v7 = vadd.f32 -0.074975304, %v4517_v45  ;;  %vm4491_vm9 = vcmp.eq.f32.partialorder %v11590_v51, 0.0  ;;  %vm4493_vm5 = vcmp.ne.f32.partialorder %v13187_v41, %v13187_v41  ;;  %v6104_v48 = vpop.eup %6103 }
 0x4a2   : > { %v4561_v9 = vadd.f32 -0.015866, %v4560_v35  ;;  %v11870_v18 = vmul.f32 %v6102_v29, %v4602_v3  ;;  %v4260_v22 = vand.u32 2147483648, %v11600_v46  ;;  %6105 = vrsqrt.f32 %v11602_v28  ;;  %vm4495_vm10 = vmor %vm4493_vm5, %vm4494_vm2 }
 0x4a3   : > { %v5081_v59 = vsub.f32 3.1415927, %v4881_v38  ;;  %v4911_v57 = vsel %vm4909_vm12, %v4910_v47, %v4908_v1  ;;  %v4482_v2 = vadd.f32 %v4481_v40, %v11682_v37  ;;  %v4519_v30 = vmul.f32 %v4518_v7, %v11794_v34  ;;  %vm4924_vm12 = vmand %vm4922_vm13, %vm4923_vm4 }
 0x4a4   : > { %v4915_v21 = vsel %vm4914_vm7, %v11783_v14, %v4911_v57  ;;  %v4562_v13 = vmul.f32 %v4561_v9, %v11850_v50  ;;  %v11890_v56 = vmul.f32 %v11870_v18, %v11870_v18  ;;  %v4256_v37 = vmul.f32 %v6104_v48, %v11600_v46 }
 0x4a5   : > { %v5097_v26 = vmul.f32 %v13183_v4, %v5081_v59  ;;  %v4919_v6 = vsel %vm4918_vm0, nan, %v4915_v21  ;;  %v4484_v14 = vsub.f32 1.5707964, %v4482_v2  ;;  %v4520_v12 = vadd.f32 0.1064488, %v4519_v30 }
 0x4a6   : > { %v4925_v54 = vsel %vm4924_vm12, %v11788_v0, %v4919_v6  ;;  %v4563_v15 = vadd.f32 0.04247222, %v4562_v13  ;;  %v4607_v20 = vmul.f32 0.002785687, %v11890_v56  ;;  %v4258_v11 = vsel %vm4257_vm6, %v11600_v46, %v4256_v37 }
 0x4a7   : > { %v5113_v45 = vadd.f32 %v5097_v26, %v11522_v25  ;;  %v4926_v4 = vand.u32 2147483647, %v4925_v54  ;;  %v4485_v60 = vsel %vm4483_vm14, %v4484_v14, %v4482_v2  ;;  %v4521_v8 = vmul.f32 %v4520_v12, %v11794_v34 }
 0x4a8   : > { %v4487_v3 = vsub.f32 3.1415927, %v4485_v60  ;;  %v4564_v1 = vmul.f32 %v4563_v15, %v11850_v50  ;;  %v4608_v0 = vadd.f32 -0.015866, %v4607_v20  ;;  %v11911_v35 = vsel %vm4259_vm15, %v4260_v22, %v4258_v11 }
 0x4a9   : > { %v5129_v29 = vmul.f32 0.15915494, %v5113_v45  ;;  %v4928_v38 = vor.u32 %v4927_v58, %v4926_v4  ;;  %v4522_v25 = vadd.f32 -0.14207031, %v4521_v8  ;;  %v11916_v47 = vand.u32 2147483647, %v11911_v35 }
 0x4aa   : > { %v4488_v40 = vsel %vm4486_vm11, %v4487_v3, %v4485_v60  ;;  %v4498_v7 = vsel %vm4486_vm11, 2.3561945, %v12718_v17  ;;  %v4565_v9 = vadd.f32 -0.074975304, %v4564_v1  ;;  %v4609_v46 = vmul.f32 %v4608_v0, %v11890_v56  ;;  %v13189_v3 = vld [vmem:[#allocation23_spill] sm:$0xff] }
 0x4ab   : > { %5696 = vmatmul.mubr.f32.gmra.mrb[2].mxu1 %v5129_v29  ;;  %v5082_v22 = vsub.f32 3.1415927, %v4928_v38  ;;  %v4492_v58 = vsel %vm4491_vm9, %v11837_v5, %v4488_v40  ;;  %vm4499_vm7 = vcmp.eq.s32.totalorder %v10995_v55, inf  ;;  %v4523_v48 = vmul.f32 %v4522_v25, %v11794_v34  ;;  %v13188_v5 = vld [vmem:[#allocation18_spill] sm:$0xff] }
 0x4ac   : > { %v6106_v59 = vpop.eup %6105  ;;  %v4496_v57 = vsel %vm4495_vm10, nan, %v4492_v58  ;;  %vm4501_vm1 = vmand %vm4499_vm7, %vm4500_vm8  ;;  %v4566_v2 = vmul.f32 %v4565_v9, %v11850_v50  ;;  %v4610_v30 = vadd.f32 0.04247222, %v4609_v46  ;;  %v4650_v21 = vmax.f32 %v13188_v5, %v11916_v47 }
 0x4ad   : > { %v5098_v13 = vmul.f32 %v13184_v27, %v5082_v22  ;;  %v4502_v37 = vsel %vm4501_vm1, %v4498_v7, %v4496_v57  ;;  %v4504_v26 = vand.u32 2147483648, %v11590_v51  ;;  %v4524_v6 = vadd.f32 0.19993454, %v4523_v48 }
 0x4ae   : > { %v4503_v55 = vand.u32 2147483647, %v4502_v37  ;;  %v4567_v14 = vadd.f32 0.1064488, %v4566_v2  ;;  %v4611_v12 = vmul.f32 %v4610_v30, %v11890_v56  ;;  %6107 = vrcp.f32 %v4650_v21  ;;  %v13190_v30 = vld [vmem:[#allocation29_spill] sm:$0xff] }
 0x4af   : > { %v11944_v33 = vsub.f32 1.0, %v11614_v61  ;;  %v11947_v54 = vand.u32 2147483647, %v11580_v49  ;;  %v5114_v15 = vadd.f32 %v5098_v13, %v11570_v53  ;;  %v4525_v20 = vmul.f32 %v4524_v6, %v11794_v34 }
 0x4b0   : > { %v4189_v27 = vmul.f32 %v11654_v62, %v11654_v62  ;;  %v4505_v11 = vor.u32 %v4504_v26, %v4503_v55  ;;  %v4568_v45 = vmul.f32 %v4567_v14, %v11850_v50  ;;  %v4612_v4 = vadd.f32 -0.074975304, %v4611_v12 }
 0x4b1   : > { %v5130_v60 = vmul.f32 0.15915494, %v5114_v15  ;;  %v4526_v8 = vadd.f32 -0.33333147, %v4525_v20  ;;  %vm4536_vm13 = vcmp.lt.s32.totalorder %v13189_v3, 0  ;;  %v4298_v61 = vmul.f32 %v6106_v59, %v11602_v28 }
 0x4b2   : > { %v5073_v1 = vsub.f32 3.1415927, %v4505_v11  ;;  %v4569_v0 = vadd.f32 -0.14207031, %v4568_v45  ;;  %v4613_v29 = vmul.f32 %v4612_v4, %v11890_v56  ;;  %vm4299_vm3 = vcmp.eq.f32.partialorder %v11602_v28, inf }
 0x4b3   : > { %5698 = vmatprep.mubr.f32.mxu1 %v5130_v60  ;;  %v4527_v53 = vmul.f32 %v4526_v8, %v11794_v34  ;;  %vm4533_vm4 = vcmp.lt.f32.partialorder %v13189_v3, 0.0  ;;  %v4300_v38 = vsel %vm4299_vm3, %v11602_v28, %v4298_v61  ;;  %v4302_v25 = vand.u32 2147483648, %v11602_v28 }
 0x4b4   : > { %v5089_v40 = vmul.f32 %v13187_v41, %v5073_v1  ;;  %v4570_v7 = vmul.f32 %v4569_v0, %v11850_v50  ;;  %v4614_v9 = vadd.f32 0.1064488, %v4613_v29  ;;  %vm4301_vm14 = vcmp.eq.f32.partialorder %v11602_v28, 0.0 }
 0x4b5   : > { %v11965_v46 = vsub.f32 1.0, %v4189_v27  ;;  %v4528_v22 = vmul.f32 %v4527_v53, %v11772_v63  ;;  %v4537_v34 = vsel %vm4536_vm13, 3.1415927, %v12717_v31  ;;  %v11971_v58 = vsel %vm4301_vm14, %v4302_v25, %v4300_v38 }
 0x4b6   : > { %v5105_v48 = vadd.f32 %v5089_v40, %v11590_v51  ;;  %vm4540_vm11 = vcmp.ne.f32.partialorder %v13189_v3, %v13189_v3  ;;  %v4571_v41 = vadd.f32 0.19993454, %v4570_v7  ;;  %v4615_v59 = vmul.f32 %v4614_v9, %v11890_v56  ;;  %v13191_v9 = vld [vmem:[#allocation15_spill] sm:$0xff] }
 0x4b7   : > { %v11978_v28 = vand.u32 2147483647, %v11971_v58  ;;  %v4529_v57 = vadd.f32 %v4528_v22, %v11772_v63  ;;  %v4545_v2 = vsel %vm4533_vm4, 2.3561945, %v12718_v17  ;;  %vm4583_vm2 = vcmp.lt.s32.totalorder %v13190_v30, 0 }
 0x4b8   : > { %v4649_v51 = vmin.f32 %v13188_v5, %v11916_v47  ;;  %v6108_v21 = vpop.eup %6107  ;;  %v5121_v13 = vmul.f32 0.15915494, %v5105_v48  ;;  %vm4546_vm6 = vcmp.eq.s32.totalorder %v13182_v42, inf  ;;  %v4572_v37 = vmul.f32 %v4571_v41, %v11850_v50 }
 0x4b9   : > { %v4616_v26 = vadd.f32 -0.14207031, %v4615_v59  ;;  %v4531_v6 = vsub.f32 1.5707964, %v4529_v57  ;;  %vm4580_vm15 = vcmp.lt.f32.partialorder %v13190_v30, 0.0  ;;  %v4932_v55 = vmax.f32 %v11605_v10, %v11978_v28 }
 0x4ba   : > { %v11990_v63 = vmul.f32 %v6108_v21, %v4649_v51  ;;  %5684 = vmatmul.mubr.f32.gmra.mrb[2].mxu0 %v5121_v13  ;;  %vm4530_vm8 = vcmp.gt.f32.partialorder %v11705_v24, %v13182_v42  ;;  %v4573_v14 = vadd.f32 -0.33333147, %v4572_v37  ;;  %v11997_v12 = vsel %vm4583_vm2, 3.1415927, %v12717_v31 }
 0x4bb   : > { %v4617_v15 = vmul.f32 %v4616_v26, %v11890_v56  ;;  %v4532_v20 = vsel %vm4530_vm8, %v4531_v6, %v4529_v57  ;;  %vm4541_vm9 = vcmp.ne.f32.partialorder %v11699_v19, %v11699_v19  ;;  %6109 = vrcp.f32 %v4932_v55 }
 0x4bc   : > { %v12004_v27 = vmul.f32 %v11990_v63, %v11990_v63  ;;  %v4534_v11 = vsub.f32 3.1415927, %v4532_v20  ;;  %v4574_v45 = vmul.f32 %v4573_v14, %v11850_v50  ;;  %6111 = vrsqrt.f32 %v11944_v33  ;;  %vm4542_vm12 = vmor %vm4540_vm11, %vm4541_vm9 }
 0x4bd   : > { %v4618_v4 = vadd.f32 0.19993454, %v4617_v15  ;;  %vm4538_vm5 = vcmp.eq.f32.partialorder %v11699_v19, 0.0  ;;  %vm4547_vm0 = vcmp.eq.s32.totalorder %v11705_v24, inf  ;;  %v4592_v60 = vsel %vm4580_vm15, 2.3561945, %v12718_v17 }
 0x4be   : > { %v4654_v8 = vmul.f32 0.002785687, %v12004_v27  ;;  %v4535_v61 = vsel %vm4533_vm4, %v4534_v11, %v4532_v20  ;;  %v4551_v1 = vand.u32 2147483648, %v11699_v19  ;;  %v4575_v50 = vmul.f32 %v4574_v45, %v11839_v44  ;;  %vm4548_vm13 = vmand %vm4546_vm6, %vm4547_vm0 }
 0x4bf   : > { %v4619_v0 = vmul.f32 %v4618_v4, %v11890_v56  ;;  %v4539_v29 = vsel %vm4538_vm5, %v4537_v34, %v4535_v61  ;;  %vm4585_vm10 = vcmp.eq.f32.partialorder %v11742_v36, 0.0  ;;  %vm4587_vm7 = vcmp.ne.f32.partialorder %v13190_v30, %v13190_v30 }
 0x4c0   : > { %vm4588_vm1 = vcmp.ne.f32.partialorder %v11742_v36, %v11742_v36  ;;  %v4598_v53 = vand.u32 2147483648, %v11742_v36  ;;  %v4655_v38 = vadd.f32 -0.015866, %v4654_v8  ;;  %v4543_v25 = vsel %vm4542_vm12, nan, %v4539_v29 }
 0x4c1   : > { %v4576_v40 = vadd.f32 %v4575_v50, %v11839_v44  ;;  %vm4593_vm3 = vcmp.eq.s32.totalorder %v13185_v43, inf  ;;  %v4620_v7 = vadd.f32 -0.33333147, %v4619_v0  ;;  %vm4630_vm4 = vcmp.lt.s32.totalorder %v13191_v9, 0 }
 0x4c2   : > { %v4549_v22 = vsel %vm4548_vm13, %v4545_v2, %v4543_v25  ;;  %vm4577_vm14 = vcmp.gt.f32.partialorder %v11746_v39, %v13185_v43  ;;  %vm4594_vm11 = vcmp.eq.s32.totalorder %v11746_v39, inf  ;;  %v4656_v34 = vmul.f32 %v4655_v38, %v12004_v27  ;;  %vm4589_vm13 = vmor %vm4587_vm7, %vm4588_vm1 }
 0x4c3   : > { %v4550_v48 = vand.u32 2147483647, %v4549_v22  ;;  %v4578_v24 = vsub.f32 1.5707964, %v4576_v40  ;;  %v4621_v42 = vmul.f32 %v4620_v7, %v11890_v56  ;;  %vm4627_vm2 = vcmp.lt.f32.partialorder %v13191_v9, 0.0 }
 0x4c4   : > { %vm4624_vm6 = vcmp.gt.f32.partialorder %v11775_v16, %v13186_v32  ;;  %v4631_v44 = vsel %vm4630_vm4, 3.1415927, %v12717_v31  ;;  %vm4635_vm8 = vcmp.ne.f32.partialorder %v11764_v52, %v11764_v52  ;;  %v4657_v41 = vadd.f32 0.04247222, %v4656_v34 }
 0x4c5   : > { %v4552_v59 = vor.u32 %v4551_v1, %v4550_v48  ;;  %v4579_v57 = vsel %vm4577_vm14, %v4578_v24, %v4576_v40  ;;  %v4622_v2 = vmul.f32 %v4621_v42, %v11870_v18  ;;  %v4931_v51 = vmin.f32 %v11605_v10, %v11978_v28  ;;  %v6110_v21 = vpop.eup %6109 }
 0x4c6   : > { %v4581_v56 = vsub.f32 3.1415927, %v4579_v57  ;;  %vm4632_vm9 = vcmp.eq.f32.partialorder %v11764_v52, 0.0  ;;  %vm4641_vm5 = vcmp.eq.s32.totalorder %v11775_v16, inf  ;;  %v4658_v13 = vmul.f32 %v4657_v41, %v12004_v27  ;;  %v6112_v37 = vpop.eup %6111 }
 0x4c7   : > { %6113 = vrsqrt.f32 %v11965_v46  ;;  %v5074_v26 = vsub.f32 3.1415927, %v4552_v59  ;;  %v4623_v6 = vadd.f32 %v4622_v2, %v11870_v18  ;;  %v12057_v55 = vmul.f32 %v6110_v21, %v4931_v51 }
 0x4c8   : > { %vm4306_vm0 = vcmp.eq.f32.partialorder %v11944_v33, inf  ;;  %v4582_v14 = vsel %vm4580_vm15, %v4581_v56, %v4579_v57  ;;  %v4659_v15 = vadd.f32 -0.074975304, %v4658_v13  ;;  %v4305_v20 = vmul.f32 %v6112_v37, %v11944_v33  ;;  %vm4595_vm15 = vmand %vm4593_vm3, %vm4594_vm11 }
 0x4c9   : > { %vm4308_vm12 = vcmp.eq.f32.partialorder %v11944_v33, 0.0  ;;  %v5090_v11 = vmul.f32 %v13189_v3, %v5074_v26  ;;  %v4586_v45 = vsel %vm4585_vm10, %v11997_v12, %v4582_v14  ;;  %v4625_v18 = vsub.f32 1.5707964, %v4623_v6 }
 0x4ca   : > { %v12076_v4 = vmul.f32 %v12057_v55, %v12057_v55  ;;  %v4590_v8 = vsel %vm4589_vm13, nan, %v4586_v45  ;;  %v4660_v3 = vmul.f32 %v4659_v15, %v12004_v27  ;;  %v4307_v12 = vsel %vm4306_vm0, %v11944_v33, %v4305_v20 }
 0x4cb   : > { %v4309_v61 = vand.u32 2147483648, %v11944_v33  ;;  %v5106_v1 = vadd.f32 %v5090_v11, %v11699_v19  ;;  %v4596_v50 = vsel %vm4595_vm15, %v4592_v60, %v4590_v8  ;;  %v4626_v0 = vsel %vm4624_vm6, %v4625_v18, %v4623_v6 }
 0x4cc   : > { %v4936_v29 = vmul.f32 0.002785687, %v12076_v4  ;;  %v4597_v38 = vand.u32 2147483647, %v4596_v50  ;;  %v4628_v39 = vsub.f32 3.1415927, %v4626_v0  ;;  %vm4634_vm10 = vcmp.ne.f32.partialorder %v13191_v9, %v13191_v9 }
 0x4cd   : > { %v4661_v25 = vadd.f32 0.1064488, %v4660_v3  ;;  %v12092_v43 = vsel %vm4308_vm12, %v4309_v61, %v4307_v12  ;;  %v5122_v40 = vmul.f32 0.15915494, %v5106_v1  ;;  %v4639_v34 = vsel %vm4627_vm2, 2.3561945, %v12718_v17  ;;  %vm4636_vm7 = vmor %vm4634_vm10, %vm4635_vm8 }
 0x4ce   : > { %v4937_v7 = vadd.f32 -0.015866, %v4936_v29  ;;  %v12097_v19 = vand.u32 2147483647, %v12092_v43  ;;  %v4599_v60 = vor.u32 %v4598_v53, %v4597_v38  ;;  %v4629_v22 = vsel %vm4627_vm2, %v4628_v39, %v4626_v0 }
 0x4cf   : > { %v4662_v33 = vmul.f32 %v4661_v25, %v12004_v27  ;;  %5686 = vmatprep.mubr.f32.mxu0 %v5122_v40  ;;  %v4633_v48 = vsel %vm4632_vm9, %v4631_v44, %v4629_v22  ;;  %vm4640_vm1 = vcmp.eq.s32.totalorder %v13186_v32, inf  ;;  %v4645_v32 = vand.u32 2147483648, %v11764_v52 }
 0x4d0   : > { %v4938_v53 = vmul.f32 %v4937_v7, %v12076_v4  ;;  %v4979_v24 = vmax.f32 %v11947_v54, %v12097_v19  ;;  %v5075_v41 = vsub.f32 3.1415927, %v4599_v60  ;;  %v4637_v59 = vsel %vm4636_vm7, nan, %v4633_v48  ;;  %vm4642_vm3 = vmand %vm4640_vm1, %vm4641_vm5 }
 0x4d1   : > { %v6114_v42 = vpop.eup %6113  ;;  %v4663_v57 = vadd.f32 -0.14207031, %v4662_v33  ;;  %v4643_v2 = vsel %vm4642_vm3, %v4639_v34, %v4637_v59  ;;  %vm4313_vm4 = vcmp.eq.f32.partialorder %v11965_v46, inf  ;;  %v4316_v14 = vand.u32 2147483648, %v11965_v46  ;;  %v13192_v33 = vld [vmem:[#allocation43_spill] sm:$0xff] }
 0x4d2   : > { %v4939_v44 = vadd.f32 0.04247222, %v4938_v53  ;;  %6115 = vrcp.f32 %v4979_v24  ;;  %v5091_v51 = vmul.f32 %v13190_v30, %v5075_v41  ;;  %v4644_v21 = vand.u32 2147483647, %v4643_v2 }
 0x4d3   : > { %v4664_v56 = vmul.f32 %v4663_v57, %v12004_v27  ;;  %v4312_v37 = vmul.f32 %v6114_v42, %v11965_v46  ;;  %vm4315_vm14 = vcmp.eq.f32.partialorder %v11965_v46, 0.0  ;;  %v12130_v8 = vand.u32 2147483647, %v11654_v62 }
 0x4d4   : > { %v4940_v13 = vmul.f32 %v4939_v44, %v12076_v4  ;;  %v5107_v16 = vadd.f32 %v5091_v51, %v11742_v36  ;;  %v4646_v26 = vor.u32 %v4645_v32, %v4644_v21  ;;  %v4978_v29 = vmin.f32 %v11947_v54, %v12097_v19 }
 0x4d5   : > { %v4665_v6 = vadd.f32 0.19993454, %v4664_v56  ;;  %v4314_v30 = vsel %vm4313_vm4, %v11965_v46, %v4312_v37  ;;  %vm4671_vm11 = vcmp.gt.f32.partialorder %v11916_v47, %v13188_v5  ;;  %vm4677_vm2 = vcmp.lt.s32.totalorder %v13192_v33, 0 }
 0x4d6   : > { %v4941_v15 = vadd.f32 -0.074975304, %v4940_v13  ;;  %v5123_v20 = vmul.f32 0.15915494, %v5107_v16  ;;  %v5076_v11 = vsub.f32 3.1415927, %v4646_v26  ;;  %v12127_v18 = vsel %vm4315_vm14, %v4316_v14, %v4314_v30 }
 0x4d7   : > { %v4666_v45 = vmul.f32 %v4665_v6, %v12004_v27  ;;  %v12134_v3 = vand.u32 2147483647, %v12127_v18  ;;  %vm4674_vm6 = vcmp.lt.f32.partialorder %v13192_v33, 0.0  ;;  %vm4682_vm8 = vcmp.ne.f32.partialorder %v11911_v35, %v11911_v35 }
 0x4d8   : > { %v4942_v36 = vmul.f32 %v4941_v15, %v12076_v4  ;;  %5687 = vmatmul.mubr.f32.gmra.mrb[4].mxu0 %v5123_v20  ;;  %v5092_v12 = vmul.f32 %v13191_v9, %v5076_v11  ;;  %v4678_v41 = vsel %vm4677_vm2, 3.1415927, %v12717_v31  ;;  %vm4688_vm9 = vcmp.eq.s32.totalorder %v11916_v47, inf }
 0x4d9   : > { %v4667_v61 = vadd.f32 -0.33333147, %v4666_v45  ;;  %v5026_v46 = vmax.f32 %v12130_v8, %v12134_v3  ;;  %v5025_v57 = vmin.f32 %v12130_v8, %v12134_v3  ;;  %vm4679_vm5 = vcmp.eq.f32.partialorder %v11911_v35, 0.0 }
 0x4da   : > { %v4943_v1 = vadd.f32 0.1064488, %v4942_v36  ;;  %v5108_v50 = vadd.f32 %v5092_v12, %v11764_v52  ;;  %vm4681_vm0 = vcmp.ne.f32.partialorder %v13192_v33, %v13192_v33  ;;  %vm4687_vm13 = vcmp.eq.s32.totalorder %v13188_v5, inf }
 0x4db   : > { %v4668_v0 = vmul.f32 %v4667_v61, %v12004_v27  ;;  %6117 = vrcp.f32 %v5026_v46  ;;  %vm4683_vm12 = vmor %vm4681_vm0, %vm4682_vm8  ;;  %v4686_v37 = vsel %vm4674_vm6, 2.3561945, %v12718_v17  ;;  %v4692_v15 = vand.u32 2147483648, %v11911_v35 }
 0x4dc   : > { %v6116_v38 = vpop.eup %6115  ;;  %v4944_v39 = vmul.f32 %v4943_v1, %v12076_v4  ;;  %v5124_v25 = vmul.f32 0.15915494, %v5108_v50  ;;  %vm4689_vm15 = vmand %vm4687_vm13, %vm4688_vm9  ;;  %vm4953_vm10 = vcmp.gt.f32.partialorder %v11978_v28, %v11605_v10  ;;  %vm4959_vm7 = vcmp.lt.s32.totalorder %v11434_v23, 0 }
 0x4dd   : > { %v4669_v40 = vmul.f32 %v4668_v0, %v11990_v63  ;;  %v12145_v9 = vmul.f32 %v6116_v38, %v4978_v29  ;;  %vm4956_vm1 = vcmp.lt.f32.partialorder %v11434_v23, 0.0  ;;  %vm4964_vm3 = vcmp.ne.f32.partialorder %v11971_v58, %v11971_v58 }
 0x4de   : > { %v4945_v7 = vadd.f32 -0.14207031, %v4944_v39  ;;  %5689 = vmatprep.mubr.f32.mxu0 %v5124_v25  ;;  %v4960_v25 = vsel %vm4959_vm7, 3.1415927, %v12717_v31  ;;  %vm4963_vm4 = vcmp.ne.f32.partialorder %v11434_v23, %v11434_v23  ;;  %vm4970_vm14 = vcmp.eq.s32.totalorder %v11978_v28, inf }
 0x4df   : > { %v4670_v60 = vadd.f32 %v4669_v40, %v11990_v63  ;;  %v12150_v52 = vmul.f32 %v12145_v9, %v12145_v9  ;;  %vm4965_vm2 = vmor %vm4963_vm4, %vm4964_vm3  ;;  %vm5000_vm9 = vcmp.gt.f32.partialorder %v12097_v19, %v11947_v54  ;;  %vm5011_vm0 = vcmp.ne.f32.partialorder %v12092_v43, %v12092_v43 }
 0x4e0   : > { %v4946_v27 = vmul.f32 %v4945_v7, %v12076_v4  ;;  %vm5017_vm13 = vcmp.eq.s32.totalorder %v12097_v19, inf  ;;  %vm5047_vm4 = vcmp.gt.f32.partialorder %v12134_v3, %v12130_v8 }
 0x4e1   : > { %v4672_v22 = vsub.f32 1.5707964, %v4670_v60  ;;  %v4983_v34 = vmul.f32 0.002785687, %v12150_v52 }
 0x4e2   : > { %v4947_v48 = vadd.f32 0.19993454, %v4946_v27 }
 0x4e3   : > { %v4673_v53 = vsel %vm4671_vm11, %v4672_v22, %v4670_v60  ;;  %v4984_v24 = vadd.f32 -0.015866, %v4983_v34  ;;  %vm4961_vm11 = vcmp.eq.f32.partialorder %v11971_v58, 0.0  ;;  %v4968_v34 = vsel %vm4956_vm1, 2.3561945, %v12718_v17 }
 0x4e4   : > { %v4675_v63 = vsub.f32 3.1415927, %v4673_v53  ;;  %v4948_v42 = vmul.f32 %v4947_v48, %v12076_v4 }
 0x4e5   : > { %v4985_v59 = vmul.f32 %v4984_v24, %v12150_v52  ;;  %v6118_v2 = vpop.eup %6117  ;;  %v4974_v24 = vand.u32 2147483648, %v11971_v58 }
 0x4e6   : > { %v4676_v44 = vsel %vm4674_vm6, %v4675_v63, %v4673_v53  ;;  %v4949_v51 = vadd.f32 -0.33333147, %v4948_v42  ;;  %v12172_v56 = vmul.f32 %v6118_v2, %v5025_v57  ;;  %vm4969_vm6 = vcmp.eq.s32.totalorder %v11605_v10, inf }
 0x4e7   : > { %v4680_v21 = vsel %vm4679_vm5, %v4678_v41, %v4676_v44  ;;  %v4986_v32 = vadd.f32 0.04247222, %v4985_v59  ;;  %vm4971_vm8 = vmand %vm4969_vm6, %vm4970_vm14  ;;  %vm5006_vm5 = vcmp.lt.s32.totalorder %v11580_v49, 0  ;;  %vm5053_vm14 = vcmp.lt.s32.totalorder %v11654_v62, 0 }
 0x4e8   : > { %v4684_v13 = vsel %vm4683_vm12, nan, %v4680_v21  ;;  %v4950_v16 = vmul.f32 %v4949_v51, %v12076_v4  ;;  %v12183_v14 = vmul.f32 %v12172_v56, %v12172_v56  ;;  %vm5003_vm12 = vcmp.lt.f32.partialorder %v11580_v49, 0.0 }
 0x4e9   : > { %v4690_v26 = vsel %vm4689_vm15, %v4686_v37, %v4684_v13  ;;  %v4987_v6 = vmul.f32 %v4986_v32, %v12150_v52  ;;  %vm5008_vm15 = vcmp.eq.f32.partialorder %v12092_v43, 0.0  ;;  %vm5057_vm6 = vcmp.ne.f32.partialorder %v11654_v62, %v11654_v62 }
 0x4ea   : > { %v4691_v5 = vand.u32 2147483647, %v4690_v26  ;;  %v4951_v30 = vmul.f32 %v4950_v16, %v12057_v55  ;;  %v5030_v11 = vmul.f32 0.002785687, %v12183_v14 }
 0x4eb   : > { %v4988_v20 = vadd.f32 -0.074975304, %v4987_v6 }
 0x4ec   : > { %v4693_v45 = vor.u32 %v4692_v15, %v4691_v5  ;;  %v4952_v47 = vadd.f32 %v4951_v30, %v12057_v55  ;;  %v5031_v36 = vadd.f32 -0.015866, %v5030_v11  ;;  %v5007_v11 = vsel %vm5006_vm5, 3.1415927, %v12717_v31 }
 0x4ed   : > { %v4989_v4 = vmul.f32 %v4988_v20, %v12150_v52 }
 0x4ee   : > { %v5077_v12 = vsub.f32 3.1415927, %v4693_v45  ;;  %v4954_v61 = vsub.f32 1.5707964, %v4952_v47  ;;  %v5032_v46 = vmul.f32 %v5031_v36, %v12183_v14  ;;  %v5015_v36 = vsel %vm5003_vm12, 2.3561945, %v12718_v17 }
 0x4ef   : > { %v4990_v1 = vadd.f32 0.1064488, %v4989_v4 }
 0x4f0   : > { %v5093_v50 = vmul.f32 %v13192_v33, %v5077_v12  ;;  %v4955_v0 = vsel %vm4953_vm10, %v4954_v61, %v4952_v47  ;;  %v5033_v38 = vadd.f32 0.04247222, %v5032_v46  ;;  %vm5010_vm10 = vcmp.ne.f32.partialorder %v11580_v49, %v11580_v49 }
 0x4f1   : > { %v4957_v29 = vsub.f32 3.1415927, %v4955_v0  ;;  %v4991_v55 = vmul.f32 %v4990_v1, %v12150_v52  ;;  %vm5012_vm7 = vmor %vm5010_vm10, %vm5011_vm0  ;;  %v5021_v61 = vand.u32 2147483648, %v12092_v43  ;;  %vm5063_vm0 = vcmp.eq.s32.totalorder %v12130_v8, inf  ;;  %v5159_v8 = vld [vmem:[#allocation2 + $0x48] sm:$0xff] }
 0x4f2   : > { %v5109_v39 = vadd.f32 %v5093_v50, %v11911_v35  ;;  %v5034_v60 = vmul.f32 %v5033_v38, %v12183_v14 }
 0x4f3   : > { %v4958_v40 = vsel %vm4956_vm1, %v4957_v29, %v4955_v0  ;;  %v4992_v7 = vadd.f32 -0.14207031, %v4991_v55  ;;  %vm5016_vm1 = vcmp.eq.s32.totalorder %v11947_v54, inf  ;;  %v5054_v55 = vsel %vm5053_vm14, 3.1415927, %v12717_v31 }
 0x4f4   : > { %v5125_v27 = vmul.f32 0.15915494, %v5109_v39  ;;  %v4962_v22 = vsel %vm4961_vm11, %v4960_v25, %v4958_v40  ;;  %v5035_v33 = vadd.f32 -0.074975304, %v5034_v60  ;;  %vm5018_vm3 = vmand %vm5016_vm1, %vm5017_vm13  ;;  %vm5058_vm11 = vcmp.ne.f32.partialorder %v12127_v18, %v12127_v18 }
 0x4f5   : > { %v4966_v35 = vsel %vm4965_vm2, nan, %v4962_v22  ;;  %v4993_v28 = vmul.f32 %v4992_v7, %v12150_v52  ;;  %vm5050_vm2 = vcmp.lt.f32.partialorder %v11654_v62, 0.0  ;;  %vm5059_vm5 = vmor %vm5057_vm6, %vm5058_vm11 }
 0x4f6   : > { %5690 = vmatmul.mubr.f32.gmra.mrb[6].mxu0 %v5125_v27  ;;  %v4972_v48 = vsel %vm4971_vm8, %v4968_v34, %v4966_v35  ;;  %v5036_v42 = vmul.f32 %v5035_v33, %v12183_v14  ;;  %vm5064_vm8 = vcmp.eq.s32.totalorder %v12134_v3, inf  ;;  %v5062_v40 = vsel %vm5050_vm2, 2.3561945, %v12718_v17 }
 0x4f7   : > { %v4973_v53 = vand.u32 2147483647, %v4972_v48  ;;  %v4994_v63 = vadd.f32 0.19993454, %v4993_v28 }
 0x4f8   : > { %v5037_v59 = vadd.f32 0.1064488, %v5036_v42 }
 0x4f9   : > { %v4975_v41 = vor.u32 %v4974_v24, %v4973_v53  ;;  %v4995_v10 = vmul.f32 %v4994_v63, %v12150_v52  ;;  %v5151_v53 = vld [vmem:[#allocation2 + $0x8] sm:$0xff]  ;;  %v5150_v24 = vld [vmem:[#allocation2] sm:$0xff] }
 0x4fa   : > { %v5038_v44 = vmul.f32 %v5037_v59, %v12183_v14 }
 0x4fb   : > { %v5083_v57 = vsub.f32 3.1415927, %v4975_v41  ;;  %v4996_v2 = vadd.f32 -0.33333147, %v4995_v10 }
 0x4fc   : > { %v5039_v32 = vadd.f32 -0.14207031, %v5038_v44 }
 0x4fd   : > { %v5099_v51 = vmul.f32 %v11434_v23, %v5083_v57  ;;  %v4997_v21 = vmul.f32 %v4996_v2, %v12150_v52 }
 0x4fe   : > { %v5040_v16 = vmul.f32 %v5039_v32, %v12183_v14 }
 0x4ff   : > { %v5115_v13 = vadd.f32 %v5099_v51, %v11971_v58  ;;  %v4998_v37 = vmul.f32 %v4997_v21, %v12145_v9  ;;  %v5153_v51 = vld [vmem:[#allocation2 + $0x18] sm:$0xff]  ;;  %v5152_v21 = vld [vmem:[#allocation2 + $0x10] sm:$0xff] }
 0x500   : > { %v5041_v5 = vadd.f32 0.19993454, %v5040_v16 }
 0x501   : > { %v5131_v26 = vmul.f32 0.15915494, %v5115_v13  ;;  %v4999_v6 = vadd.f32 %v4998_v37, %v12145_v9 }
 0x502   : > { %v5042_v30 = vmul.f32 %v5041_v5, %v12183_v14 }
 0x503   : > { %5699 = vmatmul.mubr.f32.gmra.mrb[4].mxu1 %v5131_v26  ;;  %v5001_v15 = vsub.f32 1.5707964, %v4999_v6  ;;  %v5155_v26 = vld [vmem:[#allocation2 + $0x28] sm:$0xff] }
 0x504   : > { %v5043_v52 = vadd.f32 -0.33333147, %v5042_v30 }
 0x505   : > { %v5002_v23 = vsel %vm5000_vm9, %v5001_v15, %v4999_v6  ;;  %vm5055_vm9 = vcmp.eq.f32.partialorder %v12127_v18, 0.0  ;;  %v5154_v6 = vld [vmem:[#allocation2 + $0x20] sm:$0xff] }
 0x506   : > { %v5004_v58 = vsub.f32 3.1415927, %v5002_v23  ;;  %v5044_v9 = vmul.f32 %v5043_v52, %v12183_v14  ;;  %v5157_v52 = vld [vmem:[#allocation2 + $0x38] sm:$0xff] }
 0x508   : > { %v5005_v20 = vsel %vm5003_vm12, %v5004_v58, %v5002_v23  ;;  %v5045_v47 = vmul.f32 %v5044_v9, %v12172_v56  ;;  %vm5065_vm12 = vmand %vm5063_vm0, %vm5064_vm8  ;;  %v5156_v58 = vld [vmem:[#allocation2 + $0x30] sm:$0xff] }
 0x509   : > { %v5009_v45 = vsel %vm5008_vm15, %v5007_v11, %v5005_v20 }
 0x50a   : > { %v5013_v4 = vsel %vm5012_vm7, nan, %v5009_v45  ;;  %v5046_v14 = vadd.f32 %v5045_v47, %v12172_v56  ;;  %v5163_v47 = vld [vmem:[#allocation2 + $0x68] sm:$0xff] }
 0x50b   : > { %v5019_v19 = vsel %vm5018_vm3, %v5015_v36, %v5013_v4  ;;  %v5162_v4 = vld [vmem:[#allocation2 + $0x60] sm:$0xff] }
 0x50c   : > { %v5020_v12 = vand.u32 2147483647, %v5019_v19  ;;  %v5048_v1 = vsub.f32 1.5707964, %v5046_v14 }
 0x50e   : > { %v5022_v46 = vor.u32 %v5021_v61, %v5020_v12  ;;  %v5049_v50 = vsel %vm5047_vm4, %v5048_v1, %v5046_v14  ;;  %v5165_v61 = vld [vmem:[#allocation2 + $0x78] sm:$0xff]  ;;  %v5164_v1 = vld [vmem:[#allocation2 + $0x70] sm:$0xff] }
 0x50f   : > { %v5051_v0 = vsub.f32 3.1415927, %v5049_v50 }
 0x510   : > { %v5084_v54 = vsub.f32 3.1415927, %v5022_v46 }
 0x511   : > { %v5052_v29 = vsel %vm5050_vm2, %v5051_v0, %v5049_v50 }
 0x512   : > { %v5100_v56 = vmul.f32 %v11580_v49, %v5084_v54  ;;  %v5056_v38 = vsel %vm5055_vm9, %v5054_v55, %v5052_v29  ;;  %v5068_v49 = vand.u32 2147483648, %v12127_v18 }
 0x513   : > { %v5060_v25 = vsel %vm5059_vm5, nan, %v5056_v38 }
 0x514   : > { %v5116_v39 = vadd.f32 %v5100_v56, %v12092_v43  ;;  %v5066_v7 = vsel %vm5065_vm12, %v5062_v40, %v5060_v25  ;;  %v5158_v43 = vld [vmem:[#allocation2 + $0x40] sm:$0xff] }
 0x515   : > { %v5067_v3 = vand.u32 2147483647, %v5066_v7 }
 0x516   : > { %v5132_v60 = vmul.f32 0.15915494, %v5116_v39 }
 0x517   : > { %v5069_v27 = vor.u32 %v5068_v49, %v5067_v3 }
 0x518   : > { %5701 = vmatprep.mubr.f32.mxu1 %v5132_v60 }
 0x519   : > { %v5085_v31 = vsub.f32 3.1415927, %v5069_v27 }
 0x51b   : > { %v5101_v22 = vmul.f32 %v11654_v62, %v5085_v31  ;;  %v5161_v62 = vld [vmem:[#allocation2 + $0x58] sm:$0xff] }
 0x51d   : > { %v5117_v35 = vadd.f32 %v5101_v22, %v12127_v18  ;;  %v5160_v18 = vld [vmem:[#allocation2 + $0x50] sm:$0xff] }
 0x51f   : > { %v5133_v34 = vmul.f32 0.15915494, %v5117_v35 }
 0x521   : > { %5702 = vmatmul.mubr.f32.gmra.mrb[6].mxu1 %v5133_v34 }
 0x53c   : > { %v5694_v28 = vpop.f32.mrb[0].mxu1 }
 0x53d   : > { %v5336_v33 = vadd.f32 %v5694_v28, %v5159_v8  ;;  %v5288_v17 = vpop.f32.mrb[1].mxu1 }
 0x53e   : > { %v5335_v48 = vadd.f32 %v5288_v17, %v5158_v43 }
 0x53f   : > { %5352 = vst [vmem:[#allocation2 + $0x48] sm:$0xff] %v5336_v33 }
 0x540   : > { %5351 = vst [vmem:[#allocation2 + $0x40] sm:$0xff] %v5335_v48 }
 0x544   : > { %v5682_v63 = vpop.f32.mrb[0].mxu0 }
 0x545   : > { %v5328_v42 = vadd.f32 %v5682_v63, %v5151_v53  ;;  %v5248_v41 = vpop.f32.mrb[1].mxu0 }
 0x546   : > { %v5327_v10 = vadd.f32 %v5248_v41, %v5150_v24  ;;  %v5372_v3 = vld [vmem:[#allocation2 + $0x48] sm:$0xff] (!%p5609_p2) }
 0x547   : > { %5344 = vst [vmem:[#allocation2 + $0x8] sm:$0xff] %v5328_v42  ;;  %v5371_v60 = vld [vmem:[#allocation2 + $0x40] sm:$0xff] (!%p5609_p2)  ;;  %5388 = vst [vmem:[%s6374_s7 + $0x48] sm:$0xff] (!%p5609_p2), %v5372_v3 }
 0x548   : > { %5343 = vst [vmem:[#allocation2] sm:$0xff] %v5327_v10  ;;  %5387 = vst [vmem:[%s6374_s7 + $0x40] sm:$0xff] (!%p5609_p2), %v5371_v60 }
 0x54e   : > { %v5364_v29 = vld [vmem:[#allocation2 + $0x8] sm:$0xff] (!%p5609_p2) }
 0x54f   : > { %v5363_v56 = vld [vmem:[#allocation2] sm:$0xff] (!%p5609_p2)  ;;  %5380 = vst [vmem:[%s6374_s7 + $0x8] sm:$0xff] (!%p5609_p2), %v5364_v29 }
 0x550   : > { %5379 = vst [vmem:[%s6374_s7] sm:$0xff] (!%p5609_p2), %v5363_v56 }
 0x57e   : > { %v5697_v59 = vpop.f32.mrb[2].mxu1 }
 0x57f   : > { %v5338_v57 = vadd.f32 %v5697_v59, %v5161_v62  ;;  %v5298_v2 = vpop.f32.mrb[3].mxu1 }
 0x580   : > { %v5337_v44 = vadd.f32 %v5298_v2, %v5160_v18 }
 0x581   : > { %5354 = vst [vmem:[#allocation2 + $0x58] sm:$0xff] %v5338_v57 }
 0x582   : > { %5353 = vst [vmem:[#allocation2 + $0x50] sm:$0xff] %v5337_v44 }
 0x588   : > { %v5374_v27 = vld [vmem:[#allocation2 + $0x58] sm:$0xff] (!%p5609_p2) }
 0x589   : > { %v5373_v49 = vld [vmem:[#allocation2 + $0x50] sm:$0xff] (!%p5609_p2)  ;;  %5390 = vst [vmem:[%s6374_s7 + $0x58] sm:$0xff] (!%p5609_p2), %v5374_v27 }
 0x58a   : > { %5389 = vst [vmem:[%s6374_s7 + $0x50] sm:$0xff] (!%p5609_p2), %v5373_v49 }
 0x58d   : > { %v5685_v32 = vpop.f32.mrb[2].mxu0 }
 0x58e   : > { %v5330_v13 = vadd.f32 %v5685_v32, %v5153_v51  ;;  %v5258_v37 = vpop.f32.mrb[3].mxu0 }
 0x58f   : > { %v5329_v16 = vadd.f32 %v5258_v37, %v5152_v21 }
 0x590   : > { %5346 = vst [vmem:[#allocation2 + $0x18] sm:$0xff] %v5330_v13 }
 0x591   : > { %5345 = vst [vmem:[#allocation2 + $0x10] sm:$0xff] %v5329_v16 }
 0x597   : > { %v5366_v38 = vld [vmem:[#allocation2 + $0x18] sm:$0xff] (!%p5609_p2) }
 0x598   : > { %v5365_v55 = vld [vmem:[#allocation2 + $0x10] sm:$0xff] (!%p5609_p2)  ;;  %5382 = vst [vmem:[%s6374_s7 + $0x18] sm:$0xff] (!%p5609_p2), %v5366_v38 }
 0x599   : > { %5381 = vst [vmem:[%s6374_s7 + $0x10] sm:$0xff] (!%p5609_p2), %v5365_v55 }
 0x5ab   : > { %v5688_v5 = vpop.f32.mrb[4].mxu0 }
 0x5ac   : > { %v5332_v15 = vadd.f32 %v5688_v5, %v5155_v26  ;;  %v5268_v30 = vpop.f32.mrb[5].mxu0 }
 0x5ad   : > { %v5331_v23 = vadd.f32 %v5268_v30, %v5154_v6 }
 0x5ae   : > { %5348 = vst [vmem:[#allocation2 + $0x28] sm:$0xff] %v5332_v15 }
 0x5af   : > { %5347 = vst [vmem:[#allocation2 + $0x20] sm:$0xff] %v5331_v23 }
 0x5b5   : > { %v5368_v25 = vld [vmem:[#allocation2 + $0x28] sm:$0xff] (!%p5609_p2) }
 0x5b6   : > { %v5367_v39 = vld [vmem:[#allocation2 + $0x20] sm:$0xff] (!%p5609_p2)  ;;  %5384 = vst [vmem:[%s6374_s7 + $0x28] sm:$0xff] (!%p5609_p2), %v5368_v25 }
 0x5b7   : > { %5383 = vst [vmem:[%s6374_s7 + $0x20] sm:$0xff] (!%p5609_p2), %v5367_v39 }
 0x5c9   : > { %v5691_v9 = vpop.f32.mrb[6].mxu0 }
 0x5ca   : > { %v5334_v20 = vadd.f32 %v5691_v9, %v5157_v52  ;;  %v5278_v11 = vpop.f32.mrb[7].mxu0 }
 0x5cb   : > { %v5333_v45 = vadd.f32 %v5278_v11, %v5156_v58 }
 0x5cc   : > { %5350 = vst [vmem:[#allocation2 + $0x38] sm:$0xff] %v5334_v20 }
 0x5cd   : > { %5349 = vst [vmem:[#allocation2 + $0x30] sm:$0xff] %v5333_v45 }
 0x5d3   : > { %v5370_v7 = vld [vmem:[#allocation2 + $0x38] sm:$0xff] (!%p5609_p2) }
 0x5d4   : > { %v5369_v40 = vld [vmem:[#allocation2 + $0x30] sm:$0xff] (!%p5609_p2)  ;;  %5386 = vst [vmem:[%s6374_s7 + $0x38] sm:$0xff] (!%p5609_p2), %v5370_v7 }
 0x5d5   : > { %5385 = vst [vmem:[%s6374_s7 + $0x30] sm:$0xff] (!%p5609_p2), %v5369_v40 }
 0x5d6   : > { %v5700_v36 = vpop.f32.mrb[4].mxu1 }
 0x5d7   : > { %v5340_v19 = vadd.f32 %v5700_v36, %v5163_v47  ;;  %v5308_v14 = vpop.f32.mrb[5].mxu1 }
 0x5d8   : > { %v5339_v12 = vadd.f32 %v5308_v14, %v5162_v4 }
 0x5d9   : > { %5356 = vst [vmem:[#allocation2 + $0x68] sm:$0xff] %v5340_v19 }
 0x5da   : > { %5355 = vst [vmem:[#allocation2 + $0x60] sm:$0xff] %v5339_v12 }
 0x5e0   : > { %v5376_v22 = vld [vmem:[#allocation2 + $0x68] sm:$0xff] (!%p5609_p2) }
 0x5e1   : > { %v5375_v31 = vld [vmem:[#allocation2 + $0x60] sm:$0xff] (!%p5609_p2)  ;;  %5392 = vst [vmem:[%s6374_s7 + $0x68] sm:$0xff] (!%p5609_p2), %v5376_v22 }
 0x5e2   : > { %5391 = vst [vmem:[%s6374_s7 + $0x60] sm:$0xff] (!%p5609_p2), %v5375_v31 }
 0x5f2   : > { %5362 = sbr.rel (%p5609_p2) target bundleno = 1537 (0x601), region = 48 }
 0x5f4   : > { %v5703_v46 = vpop.f32.mrb[6].mxu1 }
 0x5f5   : > { %v5342_v50 = vadd.f32 %v5703_v46, %v5165_v61  ;;  %v5318_v54 = vpop.f32.mrb[7].mxu1 }
 0x5f6   : > { %v5341_v0 = vadd.f32 %v5318_v54, %v5164_v1 }
 0x5f7   : > { %5358 = vst [vmem:[#allocation2 + $0x78] sm:$0xff] %v5342_v50 }
 0x5f8   : > { %5357 = vst [vmem:[#allocation2 + $0x70] sm:$0xff] %v5341_v0 }
 0x5fe   : > { %v5378_v34 = vld [vmem:[#allocation2 + $0x78] sm:$0xff] }
 0x5ff   : > { %v5377_v35 = vld [vmem:[#allocation2 + $0x70] sm:$0xff]  ;;  %5394 = vst [vmem:[%s6374_s7 + $0x78] sm:$0xff] %v5378_v34 }
 0x600   : > { %5393 = vst [vmem:[%s6374_s7 + $0x70] sm:$0xff] %v5377_v35 }
 0x601 PF: > { %s5615_s0 = sshll.u32 %s6219_s22, 11  ;;  %s5409_s28 = sshll.u32 %s6374_s7, 4  ;;  %s12283_s28 = int_to_ptr.vmem [resolvable:$true] %s5409_s28 }
 0x602   : > { %s12280_s24 = scalar_lea.hbm %s12344_s5, %s5615_s0  ;;  %s13193_s29 = sand.u32 1, %s6207_s19  }
 0x603   : > { %s12287_s9 = scalar_lea.sflag [#allocation4], %s13193_s29  ;;  %s6137_s10 = scalar_lea.vmem %s12283_s28, 2048 }
 0x604   : > { %p6138_p4 = scmp.ne.s32.totalorder %s12283_s28, %s6137_s10  ;;  %s6240_s22 = smov [#allocation3]  }
 0x605   : > { %s6141_s12 = sshll.u32 %s6240_s22, 4  ;;  %s6142_s12 = int_to_ptr.vmem [resolvable:$false] %s6141_s12 }
 0x606   : > { %p6139_p5 = pnand %p6138_p4, %p6322_p3  ;;  %s6143_s14 = scalar_lea.vmem %s6142_s12, 4096 }
 0x607   : > { %p6144_p7 = scmp.lt.s32.totalorder %s12283_s28, %s6142_s12  ;;  %p6145_p8 = scmp.lt.s32.totalorder %s6143_s14, %s6137_s10 }
 0x608   : > { %p6140_p6 = pneg %p6139_p5 }
 0x609   : > { %p6146_p10 = por %p6145_p8, %p6144_p7 }
 0x60b   : > { %p6147_p11 = pnand %p6146_p10, %p6140_p6 }
 0x60d   : > { %6150 = shalt.err (!%p6147_p11)
}
 0x60e   : > { %s6151_s15 = scalar_lea.hbm %s12280_s24, 2048  ;;  %s6155_s8 = scalar_lea.hbm %s12344_s5, 4096 }
 0x60f   : > { %p6152_p12 = scmp.ne.s32.totalorder %s12280_s24, %s6151_s15  ;;  %p6156_p1 = scmp.lt.u32.totalorder %s12280_s24, %s12344_s5 }
 0x610   : > { %p6157_p2 = scmp.lt.u32.totalorder %s6155_s8, %s6151_s15  ;;  %p6159_p5 = scmp.lt.u32.totalorder %s6151_s15, %s12280_s24 }
 0x611   : > { %p6153_p13 = pnand %p6152_p12, %p6322_p3 }
 0x612   : > { %p6158_p4 = por %p6157_p2, %p6156_p1 }
 0x613   : > { %p6154_p0 = pneg %p6153_p13 }
 0x614   : > { %p6160_p6 = por %p6159_p5, %p6158_p4 }
 0x616   : > { %p6161_p7 = pnand %p6160_p6, %p6154_p0 }
 0x618   : > { %6164 = shalt.err (!%p6161_p7)
}
 0x619   : > { %s6241_s17 = smov 128   ;;  %s6242_s13 = smov 8  }
 0x61a   : > { %5752 = dma.vmem_to_hbm [thread:$0]  (%p6322_p3), %s12283_s28, 2048, %s12280_s24, %s12287_s9, %s6241_s17, %s6241_s17, %s6242_s13  }
 0x61b PF: > { %p5758_p8 = scmp.ge.s32.totalorder %s6231_s25, 2  ;;  %s5424_s7 = sand.u32 1, %s6203_s18  }
 0x61c   : > { %s5425_s0 = scalar_lea.sflag [#allocation4], %s5424_s7 }
 0x61d   : > { %p5755_p10 = pnand %p5758_p8, %p6332_p9 }
 0x61f   : > { %6198 = dma.done.wait (!%p5755_p10), %s5425_s0, 2048  }
 0x620   : > { %6200 = vsyncadd (!%p5755_p10), %s5425_s0, 4294965248  ;;  %s18_s25 = sadd.s32 1, %s6231_s25   ;;  %s13194_s21 = sld [smem:[#allocation10_spill]] }
 0x621   : > { %p15_p11 = scmp.ge.s32.totalorder %s18_s25, 6   ;;  %s13195_s23 = sld [smem:[#allocation6_spill]] }
 0x622   : > { %s13196_s22 = sld [smem:[#allocation7_spill]]  ;;  %s13197_s30 = sld [smem:[#allocation8_spill]] }
 0x623   : > { %s13198_s24 = sld [smem:[#allocation9_spill]]  ;;  %s13199_s18 = smov %s6207_s19 }
 0x624   : > { %s13200_s19 = smov %s6211_s20  ;;  %17 = sbr.rel (!%p15_p11) target bundleno = 7 (0x7), region = 95 }
 0x626   : > { %s13201_s20 = smov %s13194_s21 }
 0x627   : > { %s13202_s21 = smov %s13195_s23 }
 0x628   : > { %s13203_s23 = smov %s13197_s30 }
 0x62b   :  { %5430 = vsyncpa [#allocation4], 1 }
 0x62c   :  { %5432 = vsyncpa [#allocation4 + $0x1], 1 }

</bundles_post_ra>
